<compile_context>
chip_gen: v5e
topology: v5e:2x2
jax: 0.10.0
libtpu: 0.0.40
codegen_flags: <defaults>
</compile_context>

<pallas_src>
import functools

import jax
import jax.numpy as jnp
from jax.experimental import pallas as pl
from jax.experimental.pallas import tpu as pltpu

HIDDEN_SIZE = 50
INPUT_SIZE = 10
NUM_LAYERS = 2
OUTPUT_SIZE = 1
GATE_PAD = 128  # each LSTM gate gets its own 128-lane tile


def _prep_gate_weight(w, in_pad):
    """PyTorch (4H, in_dim) gate-stacked weight -> (in_pad, 4*GATE_PAD) padded/transposed."""
    four_h, in_dim = w.shape
    h = four_h // 4
    out = jnp.zeros((in_pad, 4 * GATE_PAD), jnp.float32)
    for g in range(4):
        out = out.at[:in_dim, g * GATE_PAD:g * GATE_PAD + h].set(
            w[g * h:(g + 1) * h, :].T.astype(jnp.float32))
    return out


def _prep_gate_bias(b):
    """(4H,) gate-stacked bias -> (1, 4*GATE_PAD) padded."""
    h = b.shape[0] // 4
    out = jnp.zeros((1, 4 * GATE_PAD), jnp.float32)
    for g in range(4):
        out = out.at[0, g * GATE_PAD:g * GATE_PAD + h].set(
            b[g * h:(g + 1) * h].astype(jnp.float32))
    return out


def _lstm_kernel(x_ref, wih0_ref, whh0_ref, b0_ref, w1_ref, b1_ref,
                 wfc_ref, bfc_ref, out_ref, *, T, BP):
    """Whole 2-layer LSTM forward in one kernel invocation.

    x_ref:   (T*BP, I)        time-major, batch padded to BP (multiple of 8)
    wih0:    (I, 4*GP)        layer-0 input weights, gate g at cols [g*GP, g*GP+H)
    whh0:    (GP, 4*GP)       layer-0 recurrent weights (rows >= H are zero)
    w1:      (2*GP, 4*GP)     fused [W_ih_l1; W_hh_l1] (lane-tile aligned rows)
    b0/b1:   (1, 4*GP)        fused b_ih + b_hh, gate-padded
    wfc:     (1, GP)          fc weight row (cols >= H zero), bfc: (1, 1)
    out_ref: (BP, OUTPUT_SIZE)
    """
    GP = GATE_PAD

    # Prologue: hoist the layer-0 input projection out of the recurrence
    # (one (T*BP, I) @ (I, 4*GP) MXU pass; biases fused in here once).
    x_proj = (jnp.dot(x_ref[...], wih0_ref[...],
                      preferred_element_type=jnp.float32)
              + b0_ref[...])                            # (T*BP, 4*GP)

    whh0 = whh0_ref[...]
    w1 = w1_ref[...]
    b1 = b1_ref[...]

    zeros = jnp.zeros((BP, GP), jnp.float32)
    h0, c0, h1, c1 = zeros, zeros, zeros, zeros

    def gate_act(gates, c):
        # Gate slices are 128-lane aligned -> pure vreg views (no XLU shuffles).
        i_g = jax.nn.sigmoid(gates[:, 0 * GP:1 * GP])
        f_g = jax.nn.sigmoid(gates[:, 1 * GP:2 * GP])
        g_g = jnp.tanh(gates[:, 2 * GP:3 * GP])
        o_g = jax.nn.sigmoid(gates[:, 3 * GP:4 * GP])
        c_new = f_g * c + i_g * g_g
        h_new = o_g * jnp.tanh(c_new)
        return h_new, c_new

    for t in range(T):  # static unroll: T is tiny and known at trace time
        # Layer 0: only the recurrent matmul remains on the serial path.
        gates0 = (x_proj[t * BP:(t + 1) * BP, :]
                  + jnp.dot(h0, whh0, preferred_element_type=jnp.float32))
        h0, c0 = gate_act(gates0, c0)

        # Layer 1: single fused matmul over [h0 | h1] (lane-aligned concat).
        inp1 = jnp.concatenate([h0, h1], axis=-1)       # (BP, 2*GP)
        gates1 = (jnp.dot(inp1, w1, preferred_element_type=jnp.float32)
                  + b1)
        h1, c1 = gate_act(gates1, c1)

    # Final fc: OUTPUT_SIZE == 1, so use VPU multiply + lane reduction instead
    # of an N=1 MXU pass. Padded lanes of h1 / wfc are zero, so the sum is exact.
    out_ref[...] = (jnp.sum(h1 * wfc_ref[...], axis=-1, keepdims=True)
                    + bfc_ref[...])


@jax.jit
def lstm_model_forward(x, params):
    """x: (B, T, INPUT_SIZE) float32 -> (B, OUTPUT_SIZE) float32."""
    B, T, I = x.shape
    H = HIDDEN_SIZE
    GP = GATE_PAD
    BP = max(8, ((B + 7) // 8) * 8)   # pad batch to sublane multiple

    # ---- weight prep (done once per call in the jitted wrapper) ----
    wih0 = _prep_gate_weight(params["w_ih_l0"], I)                    # (I, 4GP)
    whh0 = _prep_gate_weight(params["w_hh_l0"], GP)                   # (GP, 4GP)
    b0 = _prep_gate_bias(params["b_ih_l0"] + params["b_hh_l0"])       # (1, 4GP)
    w1 = jnp.concatenate(
        [_prep_gate_weight(params["w_ih_l1"], GP),
         _prep_gate_weight(params["w_hh_l1"], GP)], axis=0)           # (2GP, 4GP)
    b1 = _prep_gate_bias(params["b_ih_l1"] + params["b_hh_l1"])       # (1, 4GP)
    wfc = jnp.zeros((1, GP), jnp.float32).at[0, :H].set(
        params["w_fc"][0].astype(jnp.float32))                        # (1, GP)
    bfc = params["b_fc"].reshape(1, 1).astype(jnp.float32)            # (1, 1)

    # ---- input prep: time-major, batch-padded, flattened for the prologue ----
    x_tm = jnp.transpose(x.astype(jnp.float32), (1, 0, 2))            # (T, B, I)
    x_tm = jnp.pad(x_tm, ((0, 0), (0, BP - B), (0, 0)))               # (T, BP, I)
    x_flat = x_tm.reshape(T * BP, I)                                  # (T*BP, I)

    kernel = functools.partial(_lstm_kernel, T=T, BP=BP)

    full = lambda a: pl.BlockSpec(a.shape, lambda i: (0,) * a.ndim)

    grid_spec = pltpu.PrefetchScalarGridSpec(
        num_scalar_prefetch=0,
        grid=(1,),  # single step: whole recurrence lives inside the kernel
        in_specs=[full(x_flat), full(wih0), full(whh0), full(b0),
                  full(w1), full(b1), full(wfc), full(bfc)],
        out_specs=pl.BlockSpec((BP, OUTPUT_SIZE), lambda i: (0, 0)),
    )

    out = pl.pallas_call(
        kernel,
        out_shape=jax.ShapeDtypeStruct((BP, OUTPUT_SIZE), jnp.float32),
        grid_spec=grid_spec,
        compiler_params=pltpu.CompilerParams(
            dimension_semantics=("arbitrary",)),
    )(x_flat, wih0, whh0, b0, w1, b1, wfc, bfc)
    return out[:B]


def init_params(key):
    """Deterministic init mimicking PyTorch's uniform(-1/sqrt(H), 1/sqrt(H))."""
    H, I, O = HIDDEN_SIZE, INPUT_SIZE, OUTPUT_SIZE
    k = 1.0 / jnp.sqrt(jnp.float32(H))
    names_shapes = [
        ("w_ih_l0", (4 * H, I)), ("w_hh_l0", (4 * H, H)),
        ("b_ih_l0", (4 * H,)), ("b_hh_l0", (4 * H,)),
        ("w_ih_l1", (4 * H, H)), ("w_hh_l1", (4 * H, H)),
        ("b_ih_l1", (4 * H,)), ("b_hh_l1", (4 * H,)),
        ("w_fc", (O, H)), ("b_fc", (O,)),
    ]
    params = {}
    keys = jax.random.split(key, len(names_shapes))
    for (name, shape), kk in zip(names_shapes, keys):
        params[name] = jax.random.uniform(
            kk, shape, dtype=jnp.float32, minval=-k, maxval=k)
    return params


def reference_forward(x, params):
    """Pure-JAX reference matching PyTorch nn.LSTM semantics (for verification)."""
    B, T, _ = x.shape
    H = HIDDEN_SIZE

    def cell(inp, h, c, wih, whh, bih, bhh):
        gates = inp @ wih.T + h @ whh.T + bih + bhh
        i_g = jax.nn.sigmoid(gates[:, 0 * H:1 * H])
        f_g = jax.nn.sigmoid(gates[:, 1 * H:2 * H])
        g_g = jnp.tanh(gates[:, 2 * H:3 * H])
        o_g = jax.nn.sigmoid(gates[:, 3 * H:4 * H])
        c_new = f_g * c + i_g * g_g
        h_new = o_g * jnp.tanh(c_new)
        return h_new, c_new

    h0 = jnp.zeros((B, H), jnp.float32)
    c0 = jnp.zeros((B, H), jnp.float32)
    h1 = jnp.zeros((B, H), jnp.float32)
    c1 = jnp.zeros((B, H), jnp.float32)
    for t in range(T):
        h0, c0 = cell(x[:, t, :], h0, c0, params["w_ih_l0"], params["w_hh_l0"],
                      params["b_ih_l0"], params["b_hh_l0"])
        h1, c1 = cell(h0, h1, c1, params["w_ih_l1"], params["w_hh_l1"],
                      params["b_ih_l1"], params["b_hh_l1"])
    return h1 @ params["w_fc"].T + params["b_fc"]


if __name__ == "__main__":
    key = jax.random.PRNGKey(0)
    k_x, k_p = jax.random.split(key)

    B, T = 2, 8
    x = jax.random.normal(k_x, (B, T, INPUT_SIZE), dtype=jnp.float32)
    params = init_params(k_p)

    out = lstm_model_forward(x, params)
    out = jax.block_until_ready(out)

    ref = reference_forward(x, params)
    assert out.shape == (B, OUTPUT_SIZE)
    assert jnp.allclose(out, ref, atol=1e-4, rtol=1e-4), (out, ref)

    print("KERNEL_OK")
</pallas_src>

<mosaic_0001>
module attributes {stable_mosaic.version = 11 : i64} {
  func.func @_lstm_kernel(%arg0: i32, %arg1: memref<64x10xf32, #tpu.memory_space<vmem>>, %arg2: memref<10x512xf32, #tpu.memory_space<vmem>>, %arg3: memref<128x512xf32, #tpu.memory_space<vmem>>, %arg4: memref<1x512xf32, #tpu.memory_space<vmem>>, %arg5: memref<256x512xf32, #tpu.memory_space<vmem>>, %arg6: memref<1x512xf32, #tpu.memory_space<vmem>>, %arg7: memref<1x128xf32, #tpu.memory_space<vmem>>, %arg8: memref<1x1xf32, #tpu.memory_space<vmem>>, %arg9: memref<8x1xf32, #tpu.memory_space<vmem>>) attributes {dimension_semantics = [#tpu.dimension_semantics<arbitrary>], iteration_bounds = array<i64: 1>, scalar_prefetch = 0 : i64, scratch_operands = 0 : i64, tpu.core_type = #tpu.core_type<tc>, window_params = [{pipeline_mode = #tpu.pipeline_mode<synchronous>, transform_indices = @transform_0, window_bounds = array<i64: 64, 10>}, {pipeline_mode = #tpu.pipeline_mode<synchronous>, transform_indices = @transform_1, window_bounds = array<i64: 10, 512>}, {pipeline_mode = #tpu.pipeline_mode<synchronous>, transform_indices = @transform_2, window_bounds = array<i64: 128, 512>}, {pipeline_mode = #tpu.pipeline_mode<synchronous>, transform_indices = @transform_3, window_bounds = array<i64: 1, 512>}, {pipeline_mode = #tpu.pipeline_mode<synchronous>, transform_indices = @transform_4, window_bounds = array<i64: 256, 512>}, {pipeline_mode = #tpu.pipeline_mode<synchronous>, transform_indices = @transform_5, window_bounds = array<i64: 1, 512>}, {pipeline_mode = #tpu.pipeline_mode<synchronous>, transform_indices = @transform_6, window_bounds = array<i64: 1, 128>}, {pipeline_mode = #tpu.pipeline_mode<synchronous>, transform_indices = @transform_7, window_bounds = array<i64: 1, 1>}, {pipeline_mode = #tpu.pipeline_mode<synchronous>, transform_indices = @transform_8, window_bounds = array<i64: 8, 1>}]} {
    %c0 = arith.constant 0 : index
    %c0_0 = arith.constant 0 : index
    %0 = vector.load %arg1[%c0, %c0_0] : memref<64x10xf32, #tpu.memory_space<vmem>>, vector<64x10xf32>
    %c0_1 = arith.constant 0 : index
    %c0_2 = arith.constant 0 : index
    %1 = vector.load %arg2[%c0_1, %c0_2] : memref<10x512xf32, #tpu.memory_space<vmem>>, vector<10x512xf32>
    %cst = arith.constant dense<0.000000e+00> : vector<64x512xf32>
    %2 = tpu.matmul %0, %1, %cst {dimension_numbers = #tpu.dot_dimension_numbers<[1], [0], [0], [1], [0, 0, 1, 1], [], []>} : vector<64x10xf32>, vector<10x512xf32>, vector<64x512xf32> -> vector<64x512xf32>
    %c0_3 = arith.constant 0 : index
    %c0_4 = arith.constant 0 : index
    %3 = vector.load %arg4[%c0_3, %c0_4] : memref<1x512xf32, #tpu.memory_space<vmem>>, vector<1x512xf32>
    %4 = vector.broadcast %3 : vector<1x512xf32> to vector<64x512xf32>
    %5 = arith.addf %2, %4 : vector<64x512xf32>
    %c0_5 = arith.constant 0 : index
    %c0_6 = arith.constant 0 : index
    %6 = vector.load %arg3[%c0_5, %c0_6] : memref<128x512xf32, #tpu.memory_space<vmem>>, vector<128x512xf32>
    %c0_7 = arith.constant 0 : index
    %c0_8 = arith.constant 0 : index
    %7 = vector.load %arg5[%c0_7, %c0_8] : memref<256x512xf32, #tpu.memory_space<vmem>>, vector<256x512xf32>
    %c0_9 = arith.constant 0 : index
    %c0_10 = arith.constant 0 : index
    %8 = vector.load %arg6[%c0_9, %c0_10] : memref<1x512xf32, #tpu.memory_space<vmem>>, vector<1x512xf32>
    %cst_11 = arith.constant 0.000000e+00 : f32
    %9 = vector.broadcast %cst_11 : f32 to vector<8x128xf32>
    %10 = vector.extract_strided_slice %5 {offsets = [0, 0], sizes = [8, 512], strides = [1, 1]} : vector<64x512xf32> to vector<8x512xf32>
    %cst_12 = arith.constant dense<0.000000e+00> : vector<8x512xf32>
    %11 = tpu.matmul %9, %6, %cst_12 {dimension_numbers = #tpu.dot_dimension_numbers<[1], [0], [0], [1], [0, 0, 1, 1], [], []>} : vector<8x128xf32>, vector<128x512xf32>, vector<8x512xf32> -> vector<8x512xf32>
    %12 = arith.addf %10, %11 : vector<8x512xf32>
    %13 = vector.extract_strided_slice %12 {offsets = [0, 0], sizes = [8, 128], strides = [1, 1]} : vector<8x512xf32> to vector<8x128xf32>
    %14 = arith.negf %13 : vector<8x128xf32>
    %15 = math.exp %14 : vector<8x128xf32>
    %cst_13 = arith.constant 1.000000e+00 : f32
    %16 = vector.broadcast %cst_13 : f32 to vector<8x128xf32>
    %17 = arith.addf %16, %15 : vector<8x128xf32>
    %18 = arith.divf %16, %17 : vector<8x128xf32>
    %19 = vector.extract_strided_slice %12 {offsets = [0, 128], sizes = [8, 128], strides = [1, 1]} : vector<8x512xf32> to vector<8x128xf32>
    %20 = arith.negf %19 : vector<8x128xf32>
    %21 = math.exp %20 : vector<8x128xf32>
    %cst_14 = arith.constant 1.000000e+00 : f32
    %22 = vector.broadcast %cst_14 : f32 to vector<8x128xf32>
    %23 = arith.addf %22, %21 : vector<8x128xf32>
    %24 = arith.divf %22, %23 : vector<8x128xf32>
    %25 = vector.extract_strided_slice %12 {offsets = [0, 256], sizes = [8, 128], strides = [1, 1]} : vector<8x512xf32> to vector<8x128xf32>
    %26 = math.tanh %25 : vector<8x128xf32>
    %27 = vector.extract_strided_slice %12 {offsets = [0, 384], sizes = [8, 128], strides = [1, 1]} : vector<8x512xf32> to vector<8x128xf32>
    %28 = arith.negf %27 : vector<8x128xf32>
    %29 = math.exp %28 : vector<8x128xf32>
    %cst_15 = arith.constant 1.000000e+00 : f32
    %30 = vector.broadcast %cst_15 : f32 to vector<8x128xf32>
    %31 = arith.addf %30, %29 : vector<8x128xf32>
    %32 = arith.divf %30, %31 : vector<8x128xf32>
    %33 = arith.mulf %24, %9 : vector<8x128xf32>
    %34 = arith.mulf %18, %26 : vector<8x128xf32>
    %35 = arith.addf %33, %34 : vector<8x128xf32>
    %36 = math.tanh %35 : vector<8x128xf32>
    %37 = arith.mulf %32, %36 : vector<8x128xf32>
    %38 = tpu.concatenate %37, %9 in 1 : vector<8x128xf32>, vector<8x128xf32> -> vector<8x256xf32>
    %cst_16 = arith.constant dense<0.000000e+00> : vector<8x512xf32>
    %39 = tpu.matmul %38, %7, %cst_16 {dimension_numbers = #tpu.dot_dimension_numbers<[1], [0], [0], [1], [0, 0, 1, 1], [], []>} : vector<8x256xf32>, vector<256x512xf32>, vector<8x512xf32> -> vector<8x512xf32>
    %40 = vector.broadcast %8 : vector<1x512xf32> to vector<8x512xf32>
    %41 = arith.addf %39, %40 : vector<8x512xf32>
    %42 = vector.extract_strided_slice %41 {offsets = [0, 0], sizes = [8, 128], strides = [1, 1]} : vector<8x512xf32> to vector<8x128xf32>
    %43 = arith.negf %42 : vector<8x128xf32>
    %44 = math.exp %43 : vector<8x128xf32>
    %cst_17 = arith.constant 1.000000e+00 : f32
    %45 = vector.broadcast %cst_17 : f32 to vector<8x128xf32>
    %46 = arith.addf %45, %44 : vector<8x128xf32>
    %47 = arith.divf %45, %46 : vector<8x128xf32>
    %48 = vector.extract_strided_slice %41 {offsets = [0, 128], sizes = [8, 128], strides = [1, 1]} : vector<8x512xf32> to vector<8x128xf32>
    %49 = arith.negf %48 : vector<8x128xf32>
    %50 = math.exp %49 : vector<8x128xf32>
    %cst_18 = arith.constant 1.000000e+00 : f32
    %51 = vector.broadcast %cst_18 : f32 to vector<8x128xf32>
    %52 = arith.addf %51, %50 : vector<8x128xf32>
    %53 = arith.divf %51, %52 : vector<8x128xf32>
    %54 = vector.extract_strided_slice %41 {offsets = [0, 256], sizes = [8, 128], strides = [1, 1]} : vector<8x512xf32> to vector<8x128xf32>
    %55 = math.tanh %54 : vector<8x128xf32>
    %56 = vector.extract_strided_slice %41 {offsets = [0, 384], sizes = [8, 128], strides = [1, 1]} : vector<8x512xf32> to vector<8x128xf32>
    %57 = arith.negf %56 : vector<8x128xf32>
    %58 = math.exp %57 : vector<8x128xf32>
    %cst_19 = arith.constant 1.000000e+00 : f32
    %59 = vector.broadcast %cst_19 : f32 to vector<8x128xf32>
    %60 = arith.addf %59, %58 : vector<8x128xf32>
    %61 = arith.divf %59, %60 : vector<8x128xf32>
    %62 = arith.mulf %53, %9 : vector<8x128xf32>
    %63 = arith.mulf %47, %55 : vector<8x128xf32>
    %64 = arith.addf %62, %63 : vector<8x128xf32>
    %65 = math.tanh %64 : vector<8x128xf32>
    %66 = arith.mulf %61, %65 : vector<8x128xf32>
    %67 = vector.extract_strided_slice %5 {offsets = [8, 0], sizes = [8, 512], strides = [1, 1]} : vector<64x512xf32> to vector<8x512xf32>
    %cst_20 = arith.constant dense<0.000000e+00> : vector<8x512xf32>
    %68 = tpu.matmul %37, %6, %cst_20 {dimension_numbers = #tpu.dot_dimension_numbers<[1], [0], [0], [1], [0, 0, 1, 1], [], []>} : vector<8x128xf32>, vector<128x512xf32>, vector<8x512xf32> -> vector<8x512xf32>
    %69 = arith.addf %67, %68 : vector<8x512xf32>
    %70 = vector.extract_strided_slice %69 {offsets = [0, 0], sizes = [8, 128], strides = [1, 1]} : vector<8x512xf32> to vector<8x128xf32>
    %71 = arith.negf %70 : vector<8x128xf32>
    %72 = math.exp %71 : vector<8x128xf32>
    %cst_21 = arith.constant 1.000000e+00 : f32
    %73 = vector.broadcast %cst_21 : f32 to vector<8x128xf32>
    %74 = arith.addf %73, %72 : vector<8x128xf32>
    %75 = arith.divf %73, %74 : vector<8x128xf32>
    %76 = vector.extract_strided_slice %69 {offsets = [0, 128], sizes = [8, 128], strides = [1, 1]} : vector<8x512xf32> to vector<8x128xf32>
    %77 = arith.negf %76 : vector<8x128xf32>
    %78 = math.exp %77 : vector<8x128xf32>
    %cst_22 = arith.constant 1.000000e+00 : f32
    %79 = vector.broadcast %cst_22 : f32 to vector<8x128xf32>
    %80 = arith.addf %79, %78 : vector<8x128xf32>
    %81 = arith.divf %79, %80 : vector<8x128xf32>
    %82 = vector.extract_strided_slice %69 {offsets = [0, 256], sizes = [8, 128], strides = [1, 1]} : vector<8x512xf32> to vector<8x128xf32>
    %83 = math.tanh %82 : vector<8x128xf32>
    %84 = vector.extract_strided_slice %69 {offsets = [0, 384], sizes = [8, 128], strides = [1, 1]} : vector<8x512xf32> to vector<8x128xf32>
    %85 = arith.negf %84 : vector<8x128xf32>
    %86 = math.exp %85 : vector<8x128xf32>
    %cst_23 = arith.constant 1.000000e+00 : f32
    %87 = vector.broadcast %cst_23 : f32 to vector<8x128xf32>
    %88 = arith.addf %87, %86 : vector<8x128xf32>
    %89 = arith.divf %87, %88 : vector<8x128xf32>
    %90 = arith.mulf %81, %35 : vector<8x128xf32>
    %91 = arith.mulf %75, %83 : vector<8x128xf32>
    %92 = arith.addf %90, %91 : vector<8x128xf32>
    %93 = math.tanh %92 : vector<8x128xf32>
    %94 = arith.mulf %89, %93 : vector<8x128xf32>
    %95 = tpu.concatenate %94, %66 in 1 : vector<8x128xf32>, vector<8x128xf32> -> vector<8x256xf32>
    %cst_24 = arith.constant dense<0.000000e+00> : vector<8x512xf32>
    %96 = tpu.matmul %95, %7, %cst_24 {dimension_numbers = #tpu.dot_dimension_numbers<[1], [0], [0], [1], [0, 0, 1, 1], [], []>} : vector<8x256xf32>, vector<256x512xf32>, vector<8x512xf32> -> vector<8x512xf32>
    %97 = vector.broadcast %8 : vector<1x512xf32> to vector<8x512xf32>
    %98 = arith.addf %96, %97 : vector<8x512xf32>
    %99 = vector.extract_strided_slice %98 {offsets = [0, 0], sizes = [8, 128], strides = [1, 1]} : vector<8x512xf32> to vector<8x128xf32>
    %100 = arith.negf %99 : vector<8x128xf32>
    %101 = math.exp %100 : vector<8x128xf32>
    %cst_25 = arith.constant 1.000000e+00 : f32
    %102 = vector.broadcast %cst_25 : f32 to vector<8x128xf32>
    %103 = arith.addf %102, %101 : vector<8x128xf32>
    %104 = arith.divf %102, %103 : vector<8x128xf32>
    %105 = vector.extract_strided_slice %98 {offsets = [0, 128], sizes = [8, 128], strides = [1, 1]} : vector<8x512xf32> to vector<8x128xf32>
    %106 = arith.negf %105 : vector<8x128xf32>
    %107 = math.exp %106 : vector<8x128xf32>
    %cst_26 = arith.constant 1.000000e+00 : f32
    %108 = vector.broadcast %cst_26 : f32 to vector<8x128xf32>
    %109 = arith.addf %108, %107 : vector<8x128xf32>
    %110 = arith.divf %108, %109 : vector<8x128xf32>
    %111 = vector.extract_strided_slice %98 {offsets = [0, 256], sizes = [8, 128], strides = [1, 1]} : vector<8x512xf32> to vector<8x128xf32>
    %112 = math.tanh %111 : vector<8x128xf32>
    %113 = vector.extract_strided_slice %98 {offsets = [0, 384], sizes = [8, 128], strides = [1, 1]} : vector<8x512xf32> to vector<8x128xf32>
    %114 = arith.negf %113 : vector<8x128xf32>
    %115 = math.exp %114 : vector<8x128xf32>
    %cst_27 = arith.constant 1.000000e+00 : f32
    %116 = vector.broadcast %cst_27 : f32 to vector<8x128xf32>
    %117 = arith.addf %116, %115 : vector<8x128xf32>
    %118 = arith.divf %116, %117 : vector<8x128xf32>
    %119 = arith.mulf %110, %64 : vector<8x128xf32>
    %120 = arith.mulf %104, %112 : vector<8x128xf32>
    %121 = arith.addf %119, %120 : vector<8x128xf32>
    %122 = math.tanh %121 : vector<8x128xf32>
    %123 = arith.mulf %118, %122 : vector<8x128xf32>
    %124 = vector.extract_strided_slice %5 {offsets = [16, 0], sizes = [8, 512], strides = [1, 1]} : vector<64x512xf32> to vector<8x512xf32>
    %cst_28 = arith.constant dense<0.000000e+00> : vector<8x512xf32>
    %125 = tpu.matmul %94, %6, %cst_28 {dimension_numbers = #tpu.dot_dimension_numbers<[1], [0], [0], [1], [0, 0, 1, 1], [], []>} : vector<8x128xf32>, vector<128x512xf32>, vector<8x512xf32> -> vector<8x512xf32>
    %126 = arith.addf %124, %125 : vector<8x512xf32>
    %127 = vector.extract_strided_slice %126 {offsets = [0, 0], sizes = [8, 128], strides = [1, 1]} : vector<8x512xf32> to vector<8x128xf32>
    %128 = arith.negf %127 : vector<8x128xf32>
    %129 = math.exp %128 : vector<8x128xf32>
    %cst_29 = arith.constant 1.000000e+00 : f32
    %130 = vector.broadcast %cst_29 : f32 to vector<8x128xf32>
    %131 = arith.addf %130, %129 : vector<8x128xf32>
    %132 = arith.divf %130, %131 : vector<8x128xf32>
    %133 = vector.extract_strided_slice %126 {offsets = [0, 128], sizes = [8, 128], strides = [1, 1]} : vector<8x512xf32> to vector<8x128xf32>
    %134 = arith.negf %133 : vector<8x128xf32>
    %135 = math.exp %134 : vector<8x128xf32>
    %cst_30 = arith.constant 1.000000e+00 : f32
    %136 = vector.broadcast %cst_30 : f32 to vector<8x128xf32>
    %137 = arith.addf %136, %135 : vector<8x128xf32>
    %138 = arith.divf %136, %137 : vector<8x128xf32>
    %139 = vector.extract_strided_slice %126 {offsets = [0, 256], sizes = [8, 128], strides = [1, 1]} : vector<8x512xf32> to vector<8x128xf32>
    %140 = math.tanh %139 : vector<8x128xf32>
    %141 = vector.extract_strided_slice %126 {offsets = [0, 384], sizes = [8, 128], strides = [1, 1]} : vector<8x512xf32> to vector<8x128xf32>
    %142 = arith.negf %141 : vector<8x128xf32>
    %143 = math.exp %142 : vector<8x128xf32>
    %cst_31 = arith.constant 1.000000e+00 : f32
    %144 = vector.broadcast %cst_31 : f32 to vector<8x128xf32>
    %145 = arith.addf %144, %143 : vector<8x128xf32>
    %146 = arith.divf %144, %145 : vector<8x128xf32>
    %147 = arith.mulf %138, %92 : vector<8x128xf32>
    %148 = arith.mulf %132, %140 : vector<8x128xf32>
    %149 = arith.addf %147, %148 : vector<8x128xf32>
    %150 = math.tanh %149 : vector<8x128xf32>
    %151 = arith.mulf %146, %150 : vector<8x128xf32>
    %152 = tpu.concatenate %151, %123 in 1 : vector<8x128xf32>, vector<8x128xf32> -> vector<8x256xf32>
    %cst_32 = arith.constant dense<0.000000e+00> : vector<8x512xf32>
    %153 = tpu.matmul %152, %7, %cst_32 {dimension_numbers = #tpu.dot_dimension_numbers<[1], [0], [0], [1], [0, 0, 1, 1], [], []>} : vector<8x256xf32>, vector<256x512xf32>, vector<8x512xf32> -> vector<8x512xf32>
    %154 = vector.broadcast %8 : vector<1x512xf32> to vector<8x512xf32>
    %155 = arith.addf %153, %154 : vector<8x512xf32>
    %156 = vector.extract_strided_slice %155 {offsets = [0, 0], sizes = [8, 128], strides = [1, 1]} : vector<8x512xf32> to vector<8x128xf32>
    %157 = arith.negf %156 : vector<8x128xf32>
    %158 = math.exp %157 : vector<8x128xf32>
    %cst_33 = arith.constant 1.000000e+00 : f32
    %159 = vector.broadcast %cst_33 : f32 to vector<8x128xf32>
    %160 = arith.addf %159, %158 : vector<8x128xf32>
    %161 = arith.divf %159, %160 : vector<8x128xf32>
    %162 = vector.extract_strided_slice %155 {offsets = [0, 128], sizes = [8, 128], strides = [1, 1]} : vector<8x512xf32> to vector<8x128xf32>
    %163 = arith.negf %162 : vector<8x128xf32>
    %164 = math.exp %163 : vector<8x128xf32>
    %cst_34 = arith.constant 1.000000e+00 : f32
    %165 = vector.broadcast %cst_34 : f32 to vector<8x128xf32>
    %166 = arith.addf %165, %164 : vector<8x128xf32>
    %167 = arith.divf %165, %166 : vector<8x128xf32>
    %168 = vector.extract_strided_slice %155 {offsets = [0, 256], sizes = [8, 128], strides = [1, 1]} : vector<8x512xf32> to vector<8x128xf32>
    %169 = math.tanh %168 : vector<8x128xf32>
    %170 = vector.extract_strided_slice %155 {offsets = [0, 384], sizes = [8, 128], strides = [1, 1]} : vector<8x512xf32> to vector<8x128xf32>
    %171 = arith.negf %170 : vector<8x128xf32>
    %172 = math.exp %171 : vector<8x128xf32>
    %cst_35 = arith.constant 1.000000e+00 : f32
    %173 = vector.broadcast %cst_35 : f32 to vector<8x128xf32>
    %174 = arith.addf %173, %172 : vector<8x128xf32>
    %175 = arith.divf %173, %174 : vector<8x128xf32>
    %176 = arith.mulf %167, %121 : vector<8x128xf32>
    %177 = arith.mulf %161, %169 : vector<8x128xf32>
    %178 = arith.addf %176, %177 : vector<8x128xf32>
    %179 = math.tanh %178 : vector<8x128xf32>
    %180 = arith.mulf %175, %179 : vector<8x128xf32>
    %181 = vector.extract_strided_slice %5 {offsets = [24, 0], sizes = [8, 512], strides = [1, 1]} : vector<64x512xf32> to vector<8x512xf32>
    %cst_36 = arith.constant dense<0.000000e+00> : vector<8x512xf32>
    %182 = tpu.matmul %151, %6, %cst_36 {dimension_numbers = #tpu.dot_dimension_numbers<[1], [0], [0], [1], [0, 0, 1, 1], [], []>} : vector<8x128xf32>, vector<128x512xf32>, vector<8x512xf32> -> vector<8x512xf32>
    %183 = arith.addf %181, %182 : vector<8x512xf32>
    %184 = vector.extract_strided_slice %183 {offsets = [0, 0], sizes = [8, 128], strides = [1, 1]} : vector<8x512xf32> to vector<8x128xf32>
    %185 = arith.negf %184 : vector<8x128xf32>
    %186 = math.exp %185 : vector<8x128xf32>
    %cst_37 = arith.constant 1.000000e+00 : f32
    %187 = vector.broadcast %cst_37 : f32 to vector<8x128xf32>
    %188 = arith.addf %187, %186 : vector<8x128xf32>
    %189 = arith.divf %187, %188 : vector<8x128xf32>
    %190 = vector.extract_strided_slice %183 {offsets = [0, 128], sizes = [8, 128], strides = [1, 1]} : vector<8x512xf32> to vector<8x128xf32>
    %191 = arith.negf %190 : vector<8x128xf32>
    %192 = math.exp %191 : vector<8x128xf32>
    %cst_38 = arith.constant 1.000000e+00 : f32
    %193 = vector.broadcast %cst_38 : f32 to vector<8x128xf32>
    %194 = arith.addf %193, %192 : vector<8x128xf32>
    %195 = arith.divf %193, %194 : vector<8x128xf32>
    %196 = vector.extract_strided_slice %183 {offsets = [0, 256], sizes = [8, 128], strides = [1, 1]} : vector<8x512xf32> to vector<8x128xf32>
    %197 = math.tanh %196 : vector<8x128xf32>
    %198 = vector.extract_strided_slice %183 {offsets = [0, 384], sizes = [8, 128], strides = [1, 1]} : vector<8x512xf32> to vector<8x128xf32>
    %199 = arith.negf %198 : vector<8x128xf32>
    %200 = math.exp %199 : vector<8x128xf32>
    %cst_39 = arith.constant 1.000000e+00 : f32
    %201 = vector.broadcast %cst_39 : f32 to vector<8x128xf32>
    %202 = arith.addf %201, %200 : vector<8x128xf32>
    %203 = arith.divf %201, %202 : vector<8x128xf32>
    %204 = arith.mulf %195, %149 : vector<8x128xf32>
    %205 = arith.mulf %189, %197 : vector<8x128xf32>
    %206 = arith.addf %204, %205 : vector<8x128xf32>
    %207 = math.tanh %206 : vector<8x128xf32>
    %208 = arith.mulf %203, %207 : vector<8x128xf32>
    %209 = tpu.concatenate %208, %180 in 1 : vector<8x128xf32>, vector<8x128xf32> -> vector<8x256xf32>
    %cst_40 = arith.constant dense<0.000000e+00> : vector<8x512xf32>
    %210 = tpu.matmul %209, %7, %cst_40 {dimension_numbers = #tpu.dot_dimension_numbers<[1], [0], [0], [1], [0, 0, 1, 1], [], []>} : vector<8x256xf32>, vector<256x512xf32>, vector<8x512xf32> -> vector<8x512xf32>
    %211 = vector.broadcast %8 : vector<1x512xf32> to vector<8x512xf32>
    %212 = arith.addf %210, %211 : vector<8x512xf32>
    %213 = vector.extract_strided_slice %212 {offsets = [0, 0], sizes = [8, 128], strides = [1, 1]} : vector<8x512xf32> to vector<8x128xf32>
    %214 = arith.negf %213 : vector<8x128xf32>
    %215 = math.exp %214 : vector<8x128xf32>
    %cst_41 = arith.constant 1.000000e+00 : f32
    %216 = vector.broadcast %cst_41 : f32 to vector<8x128xf32>
    %217 = arith.addf %216, %215 : vector<8x128xf32>
    %218 = arith.divf %216, %217 : vector<8x128xf32>
    %219 = vector.extract_strided_slice %212 {offsets = [0, 128], sizes = [8, 128], strides = [1, 1]} : vector<8x512xf32> to vector<8x128xf32>
    %220 = arith.negf %219 : vector<8x128xf32>
    %221 = math.exp %220 : vector<8x128xf32>
    %cst_42 = arith.constant 1.000000e+00 : f32
    %222 = vector.broadcast %cst_42 : f32 to vector<8x128xf32>
    %223 = arith.addf %222, %221 : vector<8x128xf32>
    %224 = arith.divf %222, %223 : vector<8x128xf32>
    %225 = vector.extract_strided_slice %212 {offsets = [0, 256], sizes = [8, 128], strides = [1, 1]} : vector<8x512xf32> to vector<8x128xf32>
    %226 = math.tanh %225 : vector<8x128xf32>
    %227 = vector.extract_strided_slice %212 {offsets = [0, 384], sizes = [8, 128], strides = [1, 1]} : vector<8x512xf32> to vector<8x128xf32>
    %228 = arith.negf %227 : vector<8x128xf32>
    %229 = math.exp %228 : vector<8x128xf32>
    %cst_43 = arith.constant 1.000000e+00 : f32
    %230 = vector.broadcast %cst_43 : f32 to vector<8x128xf32>
    %231 = arith.addf %230, %229 : vector<8x128xf32>
    %232 = arith.divf %230, %231 : vector<8x128xf32>
    %233 = arith.mulf %224, %178 : vector<8x128xf32>
    %234 = arith.mulf %218, %226 : vector<8x128xf32>
    %235 = arith.addf %233, %234 : vector<8x128xf32>
    %236 = math.tanh %235 : vector<8x128xf32>
    %237 = arith.mulf %232, %236 : vector<8x128xf32>
    %238 = vector.extract_strided_slice %5 {offsets = [32, 0], sizes = [8, 512], strides = [1, 1]} : vector<64x512xf32> to vector<8x512xf32>
    %cst_44 = arith.constant dense<0.000000e+00> : vector<8x512xf32>
    %239 = tpu.matmul %208, %6, %cst_44 {dimension_numbers = #tpu.dot_dimension_numbers<[1], [0], [0], [1], [0, 0, 1, 1], [], []>} : vector<8x128xf32>, vector<128x512xf32>, vector<8x512xf32> -> vector<8x512xf32>
    %240 = arith.addf %238, %239 : vector<8x512xf32>
    %241 = vector.extract_strided_slice %240 {offsets = [0, 0], sizes = [8, 128], strides = [1, 1]} : vector<8x512xf32> to vector<8x128xf32>
    %242 = arith.negf %241 : vector<8x128xf32>
    %243 = math.exp %242 : vector<8x128xf32>
    %cst_45 = arith.constant 1.000000e+00 : f32
    %244 = vector.broadcast %cst_45 : f32 to vector<8x128xf32>
    %245 = arith.addf %244, %243 : vector<8x128xf32>
    %246 = arith.divf %244, %245 : vector<8x128xf32>
    %247 = vector.extract_strided_slice %240 {offsets = [0, 128], sizes = [8, 128], strides = [1, 1]} : vector<8x512xf32> to vector<8x128xf32>
    %248 = arith.negf %247 : vector<8x128xf32>
    %249 = math.exp %248 : vector<8x128xf32>
    %cst_46 = arith.constant 1.000000e+00 : f32
    %250 = vector.broadcast %cst_46 : f32 to vector<8x128xf32>
    %251 = arith.addf %250, %249 : vector<8x128xf32>
    %252 = arith.divf %250, %251 : vector<8x128xf32>
    %253 = vector.extract_strided_slice %240 {offsets = [0, 256], sizes = [8, 128], strides = [1, 1]} : vector<8x512xf32> to vector<8x128xf32>
    %254 = math.tanh %253 : vector<8x128xf32>
    %255 = vector.extract_strided_slice %240 {offsets = [0, 384], sizes = [8, 128], strides = [1, 1]} : vector<8x512xf32> to vector<8x128xf32>
    %256 = arith.negf %255 : vector<8x128xf32>
    %257 = math.exp %256 : vector<8x128xf32>
    %cst_47 = arith.constant 1.000000e+00 : f32
    %258 = vector.broadcast %cst_47 : f32 to vector<8x128xf32>
    %259 = arith.addf %258, %257 : vector<8x128xf32>
    %260 = arith.divf %258, %259 : vector<8x128xf32>
    %261 = arith.mulf %252, %206 : vector<8x128xf32>
    %262 = arith.mulf %246, %254 : vector<8x128xf32>
    %263 = arith.addf %261, %262 : vector<8x128xf32>
    %264 = math.tanh %263 : vector<8x128xf32>
    %265 = arith.mulf %260, %264 : vector<8x128xf32>
    %266 = tpu.concatenate %265, %237 in 1 : vector<8x128xf32>, vector<8x128xf32> -> vector<8x256xf32>
    %cst_48 = arith.constant dense<0.000000e+00> : vector<8x512xf32>
    %267 = tpu.matmul %266, %7, %cst_48 {dimension_numbers = #tpu.dot_dimension_numbers<[1], [0], [0], [1], [0, 0, 1, 1], [], []>} : vector<8x256xf32>, vector<256x512xf32>, vector<8x512xf32> -> vector<8x512xf32>
    %268 = vector.broadcast %8 : vector<1x512xf32> to vector<8x512xf32>
    %269 = arith.addf %267, %268 : vector<8x512xf32>
    %270 = vector.extract_strided_slice %269 {offsets = [0, 0], sizes = [8, 128], strides = [1, 1]} : vector<8x512xf32> to vector<8x128xf32>
    %271 = arith.negf %270 : vector<8x128xf32>
    %272 = math.exp %271 : vector<8x128xf32>
    %cst_49 = arith.constant 1.000000e+00 : f32
    %273 = vector.broadcast %cst_49 : f32 to vector<8x128xf32>
    %274 = arith.addf %273, %272 : vector<8x128xf32>
    %275 = arith.divf %273, %274 : vector<8x128xf32>
    %276 = vector.extract_strided_slice %269 {offsets = [0, 128], sizes = [8, 128], strides = [1, 1]} : vector<8x512xf32> to vector<8x128xf32>
    %277 = arith.negf %276 : vector<8x128xf32>
    %278 = math.exp %277 : vector<8x128xf32>
    %cst_50 = arith.constant 1.000000e+00 : f32
    %279 = vector.broadcast %cst_50 : f32 to vector<8x128xf32>
    %280 = arith.addf %279, %278 : vector<8x128xf32>
    %281 = arith.divf %279, %280 : vector<8x128xf32>
    %282 = vector.extract_strided_slice %269 {offsets = [0, 256], sizes = [8, 128], strides = [1, 1]} : vector<8x512xf32> to vector<8x128xf32>
    %283 = math.tanh %282 : vector<8x128xf32>
    %284 = vector.extract_strided_slice %269 {offsets = [0, 384], sizes = [8, 128], strides = [1, 1]} : vector<8x512xf32> to vector<8x128xf32>
    %285 = arith.negf %284 : vector<8x128xf32>
    %286 = math.exp %285 : vector<8x128xf32>
    %cst_51 = arith.constant 1.000000e+00 : f32
    %287 = vector.broadcast %cst_51 : f32 to vector<8x128xf32>
    %288 = arith.addf %287, %286 : vector<8x128xf32>
    %289 = arith.divf %287, %288 : vector<8x128xf32>
    %290 = arith.mulf %281, %235 : vector<8x128xf32>
    %291 = arith.mulf %275, %283 : vector<8x128xf32>
    %292 = arith.addf %290, %291 : vector<8x128xf32>
    %293 = math.tanh %292 : vector<8x128xf32>
    %294 = arith.mulf %289, %293 : vector<8x128xf32>
    %295 = vector.extract_strided_slice %5 {offsets = [40, 0], sizes = [8, 512], strides = [1, 1]} : vector<64x512xf32> to vector<8x512xf32>
    %cst_52 = arith.constant dense<0.000000e+00> : vector<8x512xf32>
    %296 = tpu.matmul %265, %6, %cst_52 {dimension_numbers = #tpu.dot_dimension_numbers<[1], [0], [0], [1], [0, 0, 1, 1], [], []>} : vector<8x128xf32>, vector<128x512xf32>, vector<8x512xf32> -> vector<8x512xf32>
    %297 = arith.addf %295, %296 : vector<8x512xf32>
    %298 = vector.extract_strided_slice %297 {offsets = [0, 0], sizes = [8, 128], strides = [1, 1]} : vector<8x512xf32> to vector<8x128xf32>
    %299 = arith.negf %298 : vector<8x128xf32>
    %300 = math.exp %299 : vector<8x128xf32>
    %cst_53 = arith.constant 1.000000e+00 : f32
    %301 = vector.broadcast %cst_53 : f32 to vector<8x128xf32>
    %302 = arith.addf %301, %300 : vector<8x128xf32>
    %303 = arith.divf %301, %302 : vector<8x128xf32>
    %304 = vector.extract_strided_slice %297 {offsets = [0, 128], sizes = [8, 128], strides = [1, 1]} : vector<8x512xf32> to vector<8x128xf32>
    %305 = arith.negf %304 : vector<8x128xf32>
    %306 = math.exp %305 : vector<8x128xf32>
    %cst_54 = arith.constant 1.000000e+00 : f32
    %307 = vector.broadcast %cst_54 : f32 to vector<8x128xf32>
    %308 = arith.addf %307, %306 : vector<8x128xf32>
    %309 = arith.divf %307, %308 : vector<8x128xf32>
    %310 = vector.extract_strided_slice %297 {offsets = [0, 256], sizes = [8, 128], strides = [1, 1]} : vector<8x512xf32> to vector<8x128xf32>
    %311 = math.tanh %310 : vector<8x128xf32>
    %312 = vector.extract_strided_slice %297 {offsets = [0, 384], sizes = [8, 128], strides = [1, 1]} : vector<8x512xf32> to vector<8x128xf32>
    %313 = arith.negf %312 : vector<8x128xf32>
    %314 = math.exp %313 : vector<8x128xf32>
    %cst_55 = arith.constant 1.000000e+00 : f32
    %315 = vector.broadcast %cst_55 : f32 to vector<8x128xf32>
    %316 = arith.addf %315, %314 : vector<8x128xf32>
    %317 = arith.divf %315, %316 : vector<8x128xf32>
    %318 = arith.mulf %309, %263 : vector<8x128xf32>
    %319 = arith.mulf %303, %311 : vector<8x128xf32>
    %320 = arith.addf %318, %319 : vector<8x128xf32>
    %321 = math.tanh %320 : vector<8x128xf32>
    %322 = arith.mulf %317, %321 : vector<8x128xf32>
    %323 = tpu.concatenate %322, %294 in 1 : vector<8x128xf32>, vector<8x128xf32> -> vector<8x256xf32>
    %cst_56 = arith.constant dense<0.000000e+00> : vector<8x512xf32>
    %324 = tpu.matmul %323, %7, %cst_56 {dimension_numbers = #tpu.dot_dimension_numbers<[1], [0], [0], [1], [0, 0, 1, 1], [], []>} : vector<8x256xf32>, vector<256x512xf32>, vector<8x512xf32> -> vector<8x512xf32>
    %325 = vector.broadcast %8 : vector<1x512xf32> to vector<8x512xf32>
    %326 = arith.addf %324, %325 : vector<8x512xf32>
    %327 = vector.extract_strided_slice %326 {offsets = [0, 0], sizes = [8, 128], strides = [1, 1]} : vector<8x512xf32> to vector<8x128xf32>
    %328 = arith.negf %327 : vector<8x128xf32>
    %329 = math.exp %328 : vector<8x128xf32>
    %cst_57 = arith.constant 1.000000e+00 : f32
    %330 = vector.broadcast %cst_57 : f32 to vector<8x128xf32>
    %331 = arith.addf %330, %329 : vector<8x128xf32>
    %332 = arith.divf %330, %331 : vector<8x128xf32>
    %333 = vector.extract_strided_slice %326 {offsets = [0, 128], sizes = [8, 128], strides = [1, 1]} : vector<8x512xf32> to vector<8x128xf32>
    %334 = arith.negf %333 : vector<8x128xf32>
    %335 = math.exp %334 : vector<8x128xf32>
    %cst_58 = arith.constant 1.000000e+00 : f32
    %336 = vector.broadcast %cst_58 : f32 to vector<8x128xf32>
    %337 = arith.addf %336, %335 : vector<8x128xf32>
    %338 = arith.divf %336, %337 : vector<8x128xf32>
    %339 = vector.extract_strided_slice %326 {offsets = [0, 256], sizes = [8, 128], strides = [1, 1]} : vector<8x512xf32> to vector<8x128xf32>
    %340 = math.tanh %339 : vector<8x128xf32>
    %341 = vector.extract_strided_slice %326 {offsets = [0, 384], sizes = [8, 128], strides = [1, 1]} : vector<8x512xf32> to vector<8x128xf32>
    %342 = arith.negf %341 : vector<8x128xf32>
    %343 = math.exp %342 : vector<8x128xf32>
    %cst_59 = arith.constant 1.000000e+00 : f32
    %344 = vector.broadcast %cst_59 : f32 to vector<8x128xf32>
    %345 = arith.addf %344, %343 : vector<8x128xf32>
    %346 = arith.divf %344, %345 : vector<8x128xf32>
    %347 = arith.mulf %338, %292 : vector<8x128xf32>
    %348 = arith.mulf %332, %340 : vector<8x128xf32>
    %349 = arith.addf %347, %348 : vector<8x128xf32>
    %350 = math.tanh %349 : vector<8x128xf32>
    %351 = arith.mulf %346, %350 : vector<8x128xf32>
    %352 = vector.extract_strided_slice %5 {offsets = [48, 0], sizes = [8, 512], strides = [1, 1]} : vector<64x512xf32> to vector<8x512xf32>
    %cst_60 = arith.constant dense<0.000000e+00> : vector<8x512xf32>
    %353 = tpu.matmul %322, %6, %cst_60 {dimension_numbers = #tpu.dot_dimension_numbers<[1], [0], [0], [1], [0, 0, 1, 1], [], []>} : vector<8x128xf32>, vector<128x512xf32>, vector<8x512xf32> -> vector<8x512xf32>
    %354 = arith.addf %352, %353 : vector<8x512xf32>
    %355 = vector.extract_strided_slice %354 {offsets = [0, 0], sizes = [8, 128], strides = [1, 1]} : vector<8x512xf32> to vector<8x128xf32>
    %356 = arith.negf %355 : vector<8x128xf32>
    %357 = math.exp %356 : vector<8x128xf32>
    %cst_61 = arith.constant 1.000000e+00 : f32
    %358 = vector.broadcast %cst_61 : f32 to vector<8x128xf32>
    %359 = arith.addf %358, %357 : vector<8x128xf32>
    %360 = arith.divf %358, %359 : vector<8x128xf32>
    %361 = vector.extract_strided_slice %354 {offsets = [0, 128], sizes = [8, 128], strides = [1, 1]} : vector<8x512xf32> to vector<8x128xf32>
    %362 = arith.negf %361 : vector<8x128xf32>
    %363 = math.exp %362 : vector<8x128xf32>
    %cst_62 = arith.constant 1.000000e+00 : f32
    %364 = vector.broadcast %cst_62 : f32 to vector<8x128xf32>
    %365 = arith.addf %364, %363 : vector<8x128xf32>
    %366 = arith.divf %364, %365 : vector<8x128xf32>
    %367 = vector.extract_strided_slice %354 {offsets = [0, 256], sizes = [8, 128], strides = [1, 1]} : vector<8x512xf32> to vector<8x128xf32>
    %368 = math.tanh %367 : vector<8x128xf32>
    %369 = vector.extract_strided_slice %354 {offsets = [0, 384], sizes = [8, 128], strides = [1, 1]} : vector<8x512xf32> to vector<8x128xf32>
    %370 = arith.negf %369 : vector<8x128xf32>
    %371 = math.exp %370 : vector<8x128xf32>
    %cst_63 = arith.constant 1.000000e+00 : f32
    %372 = vector.broadcast %cst_63 : f32 to vector<8x128xf32>
    %373 = arith.addf %372, %371 : vector<8x128xf32>
    %374 = arith.divf %372, %373 : vector<8x128xf32>
    %375 = arith.mulf %366, %320 : vector<8x128xf32>
    %376 = arith.mulf %360, %368 : vector<8x128xf32>
    %377 = arith.addf %375, %376 : vector<8x128xf32>
    %378 = math.tanh %377 : vector<8x128xf32>
    %379 = arith.mulf %374, %378 : vector<8x128xf32>
    %380 = tpu.concatenate %379, %351 in 1 : vector<8x128xf32>, vector<8x128xf32> -> vector<8x256xf32>
    %cst_64 = arith.constant dense<0.000000e+00> : vector<8x512xf32>
    %381 = tpu.matmul %380, %7, %cst_64 {dimension_numbers = #tpu.dot_dimension_numbers<[1], [0], [0], [1], [0, 0, 1, 1], [], []>} : vector<8x256xf32>, vector<256x512xf32>, vector<8x512xf32> -> vector<8x512xf32>
    %382 = vector.broadcast %8 : vector<1x512xf32> to vector<8x512xf32>
    %383 = arith.addf %381, %382 : vector<8x512xf32>
    %384 = vector.extract_strided_slice %383 {offsets = [0, 0], sizes = [8, 128], strides = [1, 1]} : vector<8x512xf32> to vector<8x128xf32>
    %385 = arith.negf %384 : vector<8x128xf32>
    %386 = math.exp %385 : vector<8x128xf32>
    %cst_65 = arith.constant 1.000000e+00 : f32
    %387 = vector.broadcast %cst_65 : f32 to vector<8x128xf32>
    %388 = arith.addf %387, %386 : vector<8x128xf32>
    %389 = arith.divf %387, %388 : vector<8x128xf32>
    %390 = vector.extract_strided_slice %383 {offsets = [0, 128], sizes = [8, 128], strides = [1, 1]} : vector<8x512xf32> to vector<8x128xf32>
    %391 = arith.negf %390 : vector<8x128xf32>
    %392 = math.exp %391 : vector<8x128xf32>
    %cst_66 = arith.constant 1.000000e+00 : f32
    %393 = vector.broadcast %cst_66 : f32 to vector<8x128xf32>
    %394 = arith.addf %393, %392 : vector<8x128xf32>
    %395 = arith.divf %393, %394 : vector<8x128xf32>
    %396 = vector.extract_strided_slice %383 {offsets = [0, 256], sizes = [8, 128], strides = [1, 1]} : vector<8x512xf32> to vector<8x128xf32>
    %397 = math.tanh %396 : vector<8x128xf32>
    %398 = vector.extract_strided_slice %383 {offsets = [0, 384], sizes = [8, 128], strides = [1, 1]} : vector<8x512xf32> to vector<8x128xf32>
    %399 = arith.negf %398 : vector<8x128xf32>
    %400 = math.exp %399 : vector<8x128xf32>
    %cst_67 = arith.constant 1.000000e+00 : f32
    %401 = vector.broadcast %cst_67 : f32 to vector<8x128xf32>
    %402 = arith.addf %401, %400 : vector<8x128xf32>
    %403 = arith.divf %401, %402 : vector<8x128xf32>
    %404 = arith.mulf %395, %349 : vector<8x128xf32>
    %405 = arith.mulf %389, %397 : vector<8x128xf32>
    %406 = arith.addf %404, %405 : vector<8x128xf32>
    %407 = math.tanh %406 : vector<8x128xf32>
    %408 = arith.mulf %403, %407 : vector<8x128xf32>
    %409 = vector.extract_strided_slice %5 {offsets = [56, 0], sizes = [8, 512], strides = [1, 1]} : vector<64x512xf32> to vector<8x512xf32>
    %cst_68 = arith.constant dense<0.000000e+00> : vector<8x512xf32>
    %410 = tpu.matmul %379, %6, %cst_68 {dimension_numbers = #tpu.dot_dimension_numbers<[1], [0], [0], [1], [0, 0, 1, 1], [], []>} : vector<8x128xf32>, vector<128x512xf32>, vector<8x512xf32> -> vector<8x512xf32>
    %411 = arith.addf %409, %410 : vector<8x512xf32>
    %412 = vector.extract_strided_slice %411 {offsets = [0, 0], sizes = [8, 128], strides = [1, 1]} : vector<8x512xf32> to vector<8x128xf32>
    %413 = arith.negf %412 : vector<8x128xf32>
    %414 = math.exp %413 : vector<8x128xf32>
    %cst_69 = arith.constant 1.000000e+00 : f32
    %415 = vector.broadcast %cst_69 : f32 to vector<8x128xf32>
    %416 = arith.addf %415, %414 : vector<8x128xf32>
    %417 = arith.divf %415, %416 : vector<8x128xf32>
    %418 = vector.extract_strided_slice %411 {offsets = [0, 128], sizes = [8, 128], strides = [1, 1]} : vector<8x512xf32> to vector<8x128xf32>
    %419 = arith.negf %418 : vector<8x128xf32>
    %420 = math.exp %419 : vector<8x128xf32>
    %cst_70 = arith.constant 1.000000e+00 : f32
    %421 = vector.broadcast %cst_70 : f32 to vector<8x128xf32>
    %422 = arith.addf %421, %420 : vector<8x128xf32>
    %423 = arith.divf %421, %422 : vector<8x128xf32>
    %424 = vector.extract_strided_slice %411 {offsets = [0, 256], sizes = [8, 128], strides = [1, 1]} : vector<8x512xf32> to vector<8x128xf32>
    %425 = math.tanh %424 : vector<8x128xf32>
    %426 = vector.extract_strided_slice %411 {offsets = [0, 384], sizes = [8, 128], strides = [1, 1]} : vector<8x512xf32> to vector<8x128xf32>
    %427 = arith.negf %426 : vector<8x128xf32>
    %428 = math.exp %427 : vector<8x128xf32>
    %cst_71 = arith.constant 1.000000e+00 : f32
    %429 = vector.broadcast %cst_71 : f32 to vector<8x128xf32>
    %430 = arith.addf %429, %428 : vector<8x128xf32>
    %431 = arith.divf %429, %430 : vector<8x128xf32>
    %432 = arith.mulf %423, %377 : vector<8x128xf32>
    %433 = arith.mulf %417, %425 : vector<8x128xf32>
    %434 = arith.addf %432, %433 : vector<8x128xf32>
    %435 = math.tanh %434 : vector<8x128xf32>
    %436 = arith.mulf %431, %435 : vector<8x128xf32>
    %437 = tpu.concatenate %436, %408 in 1 : vector<8x128xf32>, vector<8x128xf32> -> vector<8x256xf32>
    %cst_72 = arith.constant dense<0.000000e+00> : vector<8x512xf32>
    %438 = tpu.matmul %437, %7, %cst_72 {dimension_numbers = #tpu.dot_dimension_numbers<[1], [0], [0], [1], [0, 0, 1, 1], [], []>} : vector<8x256xf32>, vector<256x512xf32>, vector<8x512xf32> -> vector<8x512xf32>
    %439 = vector.broadcast %8 : vector<1x512xf32> to vector<8x512xf32>
    %440 = arith.addf %438, %439 : vector<8x512xf32>
    %441 = vector.extract_strided_slice %440 {offsets = [0, 0], sizes = [8, 128], strides = [1, 1]} : vector<8x512xf32> to vector<8x128xf32>
    %442 = arith.negf %441 : vector<8x128xf32>
    %443 = math.exp %442 : vector<8x128xf32>
    %cst_73 = arith.constant 1.000000e+00 : f32
    %444 = vector.broadcast %cst_73 : f32 to vector<8x128xf32>
    %445 = arith.addf %444, %443 : vector<8x128xf32>
    %446 = arith.divf %444, %445 : vector<8x128xf32>
    %447 = vector.extract_strided_slice %440 {offsets = [0, 128], sizes = [8, 128], strides = [1, 1]} : vector<8x512xf32> to vector<8x128xf32>
    %448 = arith.negf %447 : vector<8x128xf32>
    %449 = math.exp %448 : vector<8x128xf32>
    %cst_74 = arith.constant 1.000000e+00 : f32
    %450 = vector.broadcast %cst_74 : f32 to vector<8x128xf32>
    %451 = arith.addf %450, %449 : vector<8x128xf32>
    %452 = arith.divf %450, %451 : vector<8x128xf32>
    %453 = vector.extract_strided_slice %440 {offsets = [0, 256], sizes = [8, 128], strides = [1, 1]} : vector<8x512xf32> to vector<8x128xf32>
    %454 = math.tanh %453 : vector<8x128xf32>
    %455 = vector.extract_strided_slice %440 {offsets = [0, 384], sizes = [8, 128], strides = [1, 1]} : vector<8x512xf32> to vector<8x128xf32>
    %456 = arith.negf %455 : vector<8x128xf32>
    %457 = math.exp %456 : vector<8x128xf32>
    %cst_75 = arith.constant 1.000000e+00 : f32
    %458 = vector.broadcast %cst_75 : f32 to vector<8x128xf32>
    %459 = arith.addf %458, %457 : vector<8x128xf32>
    %460 = arith.divf %458, %459 : vector<8x128xf32>
    %461 = arith.mulf %452, %406 : vector<8x128xf32>
    %462 = arith.mulf %446, %454 : vector<8x128xf32>
    %463 = arith.addf %461, %462 : vector<8x128xf32>
    %464 = math.tanh %463 : vector<8x128xf32>
    %465 = arith.mulf %460, %464 : vector<8x128xf32>
    %c0_76 = arith.constant 0 : index
    %c0_77 = arith.constant 0 : index
    %466 = vector.load %arg7[%c0_76, %c0_77] : memref<1x128xf32, #tpu.memory_space<vmem>>, vector<1x128xf32>
    %467 = vector.broadcast %466 : vector<1x128xf32> to vector<8x128xf32>
    %468 = arith.mulf %465, %467 : vector<8x128xf32>
    %cst_78 = arith.constant dense<0.000000e+00> : vector<8xf32>
    %469 = vector.multi_reduction <add>, %468, %cst_78 [1] : vector<8x128xf32> to vector<8xf32>
    %470 = vector.shape_cast %469 : vector<8xf32> to vector<8x1xf32>
    %c0_79 = arith.constant 0 : index
    %c0_80 = arith.constant 0 : index
    %471 = vector.load %arg8[%c0_79, %c0_80] : memref<1x1xf32, #tpu.memory_space<vmem>>, vector<1x1xf32>
    %472 = vector.broadcast %471 : vector<1x1xf32> to vector<8x1xf32>
    %473 = arith.addf %470, %472 : vector<8x1xf32>
    %c0_81 = arith.constant 0 : index
    %c0_82 = arith.constant 0 : index
    %474 = vector.load %arg9[%c0_81, %c0_82] : memref<8x1xf32, #tpu.memory_space<vmem>>, vector<8x1xf32>
    tpu.vector_store %arg9[%c0_81, %c0_82], %473 {strides = array<i32>} : memref<8x1xf32, #tpu.memory_space<vmem>>, vector<8x1xf32>,
    return
  }
  func.func @transform_0(%arg0: i32) -> (i32, i32) {
    %c0_i32 = arith.constant 0 : i32
    %c0_i32_0 = arith.constant 0 : i32
    %c0_i32_1 = arith.constant 0 : i32
    return %c0_i32, %c0_i32_0 : i32, i32
  }
  func.func @transform_1(%arg0: i32) -> (i32, i32) {
    %c0_i32 = arith.constant 0 : i32
    %c0_i32_0 = arith.constant 0 : i32
    %c0_i32_1 = arith.constant 0 : i32
    return %c0_i32, %c0_i32_0 : i32, i32
  }
  func.func @transform_2(%arg0: i32) -> (i32, i32) {
    %c0_i32 = arith.constant 0 : i32
    %c0_i32_0 = arith.constant 0 : i32
    %c0_i32_1 = arith.constant 0 : i32
    return %c0_i32, %c0_i32_0 : i32, i32
  }
  func.func @transform_3(%arg0: i32) -> (i32, i32) {
    %c0_i32 = arith.constant 0 : i32
    %c0_i32_0 = arith.constant 0 : i32
    %c0_i32_1 = arith.constant 0 : i32
    return %c0_i32, %c0_i32_0 : i32, i32
  }
  func.func @transform_4(%arg0: i32) -> (i32, i32) {
    %c0_i32 = arith.constant 0 : i32
    %c0_i32_0 = arith.constant 0 : i32
    %c0_i32_1 = arith.constant 0 : i32
    return %c0_i32, %c0_i32_0 : i32, i32
  }
  func.func @transform_5(%arg0: i32) -> (i32, i32) {
    %c0_i32 = arith.constant 0 : i32
    %c0_i32_0 = arith.constant 0 : i32
    %c0_i32_1 = arith.constant 0 : i32
    return %c0_i32, %c0_i32_0 : i32, i32
  }
  func.func @transform_6(%arg0: i32) -> (i32, i32) {
    %c0_i32 = arith.constant 0 : i32
    %c0_i32_0 = arith.constant 0 : i32
    %c0_i32_1 = arith.constant 0 : i32
    return %c0_i32, %c0_i32_0 : i32, i32
  }
  func.func @transform_7(%arg0: i32) -> (i32, i32) {
    %c0_i32 = arith.constant 0 : i32
    %c0_i32_0 = arith.constant 0 : i32
    %c0_i32_1 = arith.constant 0 : i32
    return %c0_i32, %c0_i32_0 : i32, i32
  }
  func.func @transform_8(%arg0: i32) -> (i32, i32) {
    %c0_i32 = arith.constant 0 : i32
    %c0_i32_0 = arith.constant 0 : i32
    %c0_i32_1 = arith.constant 0 : i32
    return %c0_i32, %c0_i32_0 : i32, i32
  }
}

</mosaic_0001>

<bundles_post_ra>
// kernel: lstm_model_forward.1
= control target key start
LH: loop header
LB: loop body
LE: loop exit
PB: predicated region body
PF: predicated region fallthrough
CT: control target
= control target key end

     0   :  { %vm82_vm0 = vcmask 1041408   ;;  %vm57_vm1 = vcmask 80896   ;;  %s10496_s1 = inlined_call_operand.vmem [shape: f32[10,512], index: 1, kind: input, shape index: {}]   ;;  %s10497_s0 = inlined_call_operand.vmem [shape: f32[64,10], index: 0, kind: input, shape index: {}]   ;;  %s10498_s2 = inlined_call_operand.vmem [shape: f32[128,512], index: 2, kind: input, shape index: {}]   ;;  %s10499_s4 = inlined_call_operand.vmem [shape: f32[256,512], index: 4, kind: input, shape index: {}]   ;;  %s10500_s3 = inlined_call_operand.vmem [shape: f32[1,512], index: 3, kind: input, shape index: {}]   ;;  %s10501_s5 = inlined_call_operand.vmem [shape: f32[1,512], index: 5, kind: input, shape index: {}]   ;;  %s10502_s6 = inlined_call_operand.vmem [shape: f32[1,128], index: 6, kind: input, shape index: {}]   ;;  %s10503_s7 = inlined_call_operand.<no memory space> [shape: f32[1,1], index: 7, kind: input, shape index: {}]   ;;  %s10504_s8 = inlined_call_operand.vmem [shape: f32[8,1], index: 8, kind: output, shape index: {}]  }
   0x1   :  { %v43_v0 = vld [vmem:[%s10496_s1 + $0x20] sm:$0x3]  ;;  %v44_v1 = vld [vmem:[%s10496_s1 + $0x28] sm:$0x3]  ;;  %v45_v2 = vld [vmem:[%s10496_s1 + $0x30] sm:$0x3] }
   0x2   :  { %3439 = vmatpush.msk.msra.mxu0 %vm82_vm0, %v43_v0  ;;  %3448 = vmatpush.msk.msra.mxu1 %vm82_vm0, %v44_v1  ;;  %v46_v3 = vld [vmem:[%s10496_s1 + $0x38] sm:$0x3]  ;;  %v39_v4 = vld [vmem:[%s10496_s1] sm:$0xff]  ;;  %v40_v5 = vld [vmem:[%s10496_s1 + $0x8] sm:$0xff] }
   0x3   :  { %3457 = vmatpush.msk.msra.mxu2 %vm82_vm0, %v45_v2  ;;  %3466 = vmatpush.msk.msra.mxu3 %vm82_vm0, %v46_v3  ;;  %v41_v6 = vld [vmem:[%s10496_s1 + $0x10] sm:$0xff]  ;;  %v42_v7 = vld [vmem:[%s10496_s1 + $0x18] sm:$0xff]  ;;  %v31_v8 = vld [vmem:[%s10497_s0] sm:$0xff] }
   0x4   :  { %110 = vmatpush.msra.mxu0 %v39_v4  ;;  %151 = vmatpush.msra.mxu1 %v40_v5  ;;  %v319_v9 = vld [vmem:[%s10498_s2 + $0x1e0] sm:$0xff]  ;;  %v4469_v10 = vld [vmem:[%s10498_s2 + $0x1e8] sm:$0xff]  ;;  %v4476_v11 = vld [vmem:[%s10498_s2 + $0x1f8] sm:$0xff] }
   0x5   :  { %192 = vmatpush.msra.mxu2 %v41_v6  ;;  %233 = vmatpush.msra.mxu3 %v42_v7  ;;  %v315_v12 = vld [vmem:[%s10498_s2 + $0x1c0] sm:$0xff]  ;;  %v4486_v13 = vld [vmem:[%s10498_s2 + $0x1c8] sm:$0xff]  ;;  %v4492_v14 = vld [vmem:[%s10498_s2 + $0x1d8] sm:$0xff] }
   0x6   :  { %3440 = vmatmul.msk.f32.vlgmr.msra.gmra.mxu0 %vm57_vm1, %v31_v8  ;;  %3449 = vmatmul.msk.f32.vlgmr.msra.gmra.mxu1 %vm57_vm1, %v31_v8  ;;  %v321_v15 = vld [vmem:[%s10498_s2 + $0x1f0] sm:$0xff]  ;;  %v311_v16 = vld [vmem:[%s10498_s2 + $0x1a0] sm:$0xff]  ;;  %v4504_v17 = vld [vmem:[%s10498_s2 + $0x1a8] sm:$0xff] }
   0x7   :  { %3458 = vmatmul.msk.f32.vlgmr.msra.gmra.mxu2 %vm57_vm1, %v31_v8  ;;  %3467 = vmatmul.msk.f32.vlgmr.msra.gmra.mxu3 %vm57_vm1, %v31_v8  ;;  %v317_v18 = vld [vmem:[%s10498_s2 + $0x1d0] sm:$0xff]  ;;  %v4513_v19 = vld [vmem:[%s10498_s2 + $0x1b8] sm:$0xff]  ;;  %v32_v20 = vld [vmem:[%s10497_s0 + $0x8] sm:$0xff] }
   0x8   :  { %452 = vmatpush.msrb.mxu0 %v319_v9  ;;  %472 = vmatpush.msrb.mxu1 %v4469_v10  ;;  %v313_v21 = vld [vmem:[%s10498_s2 + $0x1b0] sm:$0xff]  ;;  %v307_v22 = vld [vmem:[%s10498_s2 + $0x180] sm:$0xff]  ;;  %v4529_v23 = vld [vmem:[%s10498_s2 + $0x188] sm:$0xff] }
   0x9   :  { %512 = vmatpush.msrb.mxu3 %v4476_v11  ;;  %492 = vmatpush.msrb.mxu2 %v321_v15  ;;  %v4537_v24 = vld [vmem:[%s10498_s2 + $0x198] sm:$0xff]  ;;  %v309_v25 = vld [vmem:[%s10498_s2 + $0x190] sm:$0xff]  ;;  %v303_v26 = vld [vmem:[%s10498_s2 + $0x160] sm:$0xff] }
   0xa   :  { %453 = vmatpush.msrb.mxu0 %v315_v12  ;;  %473 = vmatpush.msrb.mxu1 %v4486_v13  ;;  %v4550_v27 = vld [vmem:[%s10498_s2 + $0x168] sm:$0xff]  ;;  %v4556_v28 = vld [vmem:[%s10498_s2 + $0x178] sm:$0xff]  ;;  %v305_v29 = vld [vmem:[%s10498_s2 + $0x170] sm:$0xff] }
   0xb   :  { %513 = vmatpush.msrb.mxu3 %v4492_v14  ;;  %493 = vmatpush.msrb.mxu2 %v317_v18  ;;  %v299_v30 = vld [vmem:[%s10498_s2 + $0x140] sm:$0xff]  ;;  %v4568_v31 = vld [vmem:[%s10498_s2 + $0x148] sm:$0xff]  ;;  %v4574_v32 = vld [vmem:[%s10498_s2 + $0x158] sm:$0xff] }
   0xc   :  { %454 = vmatpush.msrb.mxu0 %v311_v16  ;;  %474 = vmatpush.msrb.mxu1 %v4504_v17  ;;  %v301_v33 = vld [vmem:[%s10498_s2 + $0x150] sm:$0xff]  ;;  %v295_v35 = vld [vmem:[%s10498_s2 + $0x120] sm:$0xff]  ;;  %v4590_v36 = vld [vmem:[%s10498_s2 + $0x128] sm:$0xff] }
   0xd   :  { %514 = vmatpush.msrb.mxu3 %v4513_v19  ;;  %494 = vmatpush.msrb.mxu2 %v313_v21  ;;  %v33_v34 = vld [vmem:[%s10497_s0 + $0x10] sm:$0xff]  ;;  %v4598_v37 = vld [vmem:[%s10498_s2 + $0x138] sm:$0xff]  ;;  %v291_v39 = vld [vmem:[%s10498_s2 + $0x100] sm:$0xff] }
   0xe   :  { %3441 = vmatmul.msk.f32.gmra.mxu0 %vm57_vm1, %v32_v20  ;;  %3450 = vmatmul.msk.f32.gmra.mxu1 %vm57_vm1, %v32_v20  ;;  %v297_v38 = vld [vmem:[%s10498_s2 + $0x130] sm:$0xff]  ;;  %v4611_v40 = vld [vmem:[%s10498_s2 + $0x108] sm:$0xff]  ;;  %v4617_v41 = vld [vmem:[%s10498_s2 + $0x118] sm:$0xff] }
   0xf   :  { %3459 = vmatmul.msk.f32.gmra.mxu2 %vm57_vm1, %v32_v20  ;;  %3468 = vmatmul.msk.f32.gmra.mxu3 %vm57_vm1, %v32_v20  ;;  %v293_v42 = vld [vmem:[%s10498_s2 + $0x110] sm:$0xff]  ;;  %v287_v43 = vld [vmem:[%s10498_s2 + $0xe0] sm:$0xff]  ;;  %v4629_v44 = vld [vmem:[%s10498_s2 + $0xe8] sm:$0xff] }
  0x10   :  { %455 = vmatpush.msrb.mxu0 %v307_v22  ;;  %475 = vmatpush.msrb.mxu1 %v4529_v23  ;;  %v4635_v45 = vld [vmem:[%s10498_s2 + $0xf8] sm:$0xff]  ;;  %v289_v46 = vld [vmem:[%s10498_s2 + $0xf0] sm:$0xff]  ;;  %v283_v48 = vld [vmem:[%s10498_s2 + $0xc0] sm:$0xff]  ;;  %v10505_v22 = vmov 0.0  }
  0x11   :  { %515 = vmatpush.msrb.mxu3 %v4537_v24  ;;  %495 = vmatpush.msrb.mxu2 %v309_v25  ;;  %v34_v47 = vld [vmem:[%s10497_s0 + $0x18] sm:$0xff]  ;;  %v4651_v49 = vld [vmem:[%s10498_s2 + $0xc8] sm:$0xff]  ;;  %v285_v51 = vld [vmem:[%s10498_s2 + $0xd0] sm:$0xff] }
  0x12   :  { %456 = vmatpush.msrb.mxu0 %v303_v26  ;;  %476 = vmatpush.msrb.mxu1 %v4550_v27  ;;  %v4659_v50 = vld [vmem:[%s10498_s2 + $0xd8] sm:$0xff]  ;;  %v279_v52 = vld [vmem:[%s10498_s2 + $0xa0] sm:$0xff]  ;;  %v4672_v53 = vld [vmem:[%s10498_s2 + $0xa8] sm:$0xff] }
  0x13   :  { %516 = vmatpush.msrb.mxu3 %v4556_v28  ;;  %496 = vmatpush.msrb.mxu2 %v305_v29  ;;  %v4678_v54 = vld [vmem:[%s10498_s2 + $0xb8] sm:$0xff]  ;;  %v281_v55 = vld [vmem:[%s10498_s2 + $0xb0] sm:$0xff]  ;;  %v275_v56 = vld [vmem:[%s10498_s2 + $0x80] sm:$0xff] }
  0x14   :  { %457 = vmatpush.msrb.mxu0 %v299_v30  ;;  %477 = vmatpush.msrb.mxu1 %v4568_v31  ;;  %v4690_v57 = vld [vmem:[%s10498_s2 + $0x88] sm:$0xff]  ;;  %v4696_v58 = vld [vmem:[%s10498_s2 + $0x98] sm:$0xff]  ;;  %v277_v59 = vld [vmem:[%s10498_s2 + $0x90] sm:$0xff] }
  0x15   :  { %517 = vmatpush.msrb.mxu3 %v4574_v32  ;;  %497 = vmatpush.msrb.mxu2 %v301_v33  ;;  %v35_v60 = vld [vmem:[%s10497_s0 + $0x20] sm:$0xff]  ;;  %v4712_v62 = vld [vmem:[%s10498_s2 + $0x68] sm:$0xff]  ;;  %v4720_v63 = vld [vmem:[%s10498_s2 + $0x78] sm:$0xff] }
  0x16   :  { %3442 = vmatmul.msk.f32.gmra.mxu0 %vm57_vm1, %v33_v34  ;;  %3451 = vmatmul.msk.f32.gmra.mxu1 %vm57_vm1, %v33_v34  ;;  %v271_v61 = vld [vmem:[%s10498_s2 + $0x60] sm:$0xff]  ;;  %v273_v0 = vld [vmem:[%s10498_s2 + $0x70] sm:$0xff]  ;;  %v4733_v2 = vld [vmem:[%s10498_s2 + $0x48] sm:$0xff] }
  0x17   :  { %3460 = vmatmul.msk.f32.gmra.mxu2 %vm57_vm1, %v33_v34  ;;  %3469 = vmatmul.msk.f32.gmra.mxu3 %vm57_vm1, %v33_v34  ;;  %v267_v1 = vld [vmem:[%s10498_s2 + $0x40] sm:$0xff]  ;;  %v4739_v3 = vld [vmem:[%s10498_s2 + $0x58] sm:$0xff]  ;;  %v269_v4 = vld [vmem:[%s10498_s2 + $0x50] sm:$0xff] }
  0x18   :  { %458 = vmatpush.msrb.mxu0 %v295_v35  ;;  %478 = vmatpush.msrb.mxu1 %v4590_v36  ;;  %v263_v5 = vld [vmem:[%s10498_s2 + $0x20] sm:$0xff]  ;;  %v4751_v6 = vld [vmem:[%s10498_s2 + $0x28] sm:$0xff]  ;;  %v265_v7 = vld [vmem:[%s10498_s2 + $0x30] sm:$0xff] }
  0x19   :  { %518 = vmatpush.msrb.mxu3 %v4598_v37  ;;  %498 = vmatpush.msrb.mxu2 %v297_v38  ;;  %v4760_v8 = vld [vmem:[%s10498_s2 + $0x38] sm:$0xff]  ;;  %v36_v9 = vld [vmem:[%s10497_s0 + $0x28] sm:$0xff]  ;;  %v259_v12 = vld [vmem:[%s10498_s2] sm:$0xff] }
  0x1a   :  { %459 = vmatpush.msrb.mxu0 %v291_v39  ;;  %479 = vmatpush.msrb.mxu1 %v4611_v40  ;;  %v4773_v15 = vld [vmem:[%s10498_s2 + $0x8] sm:$0xff]  ;;  %v261_v16 = vld [vmem:[%s10498_s2 + $0x10] sm:$0xff]  ;;  %v4784_v18 = vld [vmem:[%s10498_s2 + $0x18] sm:$0xff] }
  0x1b   :  { %519 = vmatpush.msrb.mxu3 %v4617_v41  ;;  %499 = vmatpush.msrb.mxu2 %v293_v42  ;;  %v37_v20 = vld [vmem:[%s10497_s0 + $0x30] sm:$0xff]  ;;  %v38_v21 = vld [vmem:[%s10497_s0 + $0x38] sm:$0xff]  ;;  %v4811_v25 = vld [vmem:[%s10499_s4 + $0x3e0] sm:$0xff] }
  0x1c   :  { %460 = vmatpush.msrb.mxu0 %v287_v43  ;;  %480 = vmatpush.msrb.mxu1 %v4629_v44  ;;  %v4816_v26 = vld [vmem:[%s10499_s4 + $0x3e8] sm:$0xff]  ;;  %v4823_v29 = vld [vmem:[%s10499_s4 + $0x3c0] sm:$0xff] }
  0x1d   :  { %520 = vmatpush.msrb.mxu3 %v4635_v45  ;;  %500 = vmatpush.msrb.mxu2 %v289_v46  ;;  %v4828_v30 = vld [vmem:[%s10499_s4 + $0x3c8] sm:$0xff]  ;;  %v4833_v33 = vld [vmem:[%s10499_s4 + $0x3a0] sm:$0xff] }
  0x1e   :  { %3443 = vmatmul.msk.f32.gmra.mxu0 %vm57_vm1, %v34_v47  ;;  %3452 = vmatmul.msk.f32.gmra.mxu1 %vm57_vm1, %v34_v47  ;;  %v4840_v34 = vld [vmem:[%s10499_s4 + $0x3a8] sm:$0xff]  ;;  %v4845_v35 = vld [vmem:[%s10499_s4 + $0x380] sm:$0xff] }
  0x1f   :  { %3461 = vmatmul.msk.f32.gmra.mxu2 %vm57_vm1, %v34_v47  ;;  %3470 = vmatmul.msk.f32.gmra.mxu3 %vm57_vm1, %v34_v47  ;;  %v4850_v38 = vld [vmem:[%s10499_s4 + $0x388] sm:$0xff]  ;;  %v4859_v39 = vld [vmem:[%s10499_s4 + $0x360] sm:$0xff] }
  0x20   :  { %461 = vmatpush.msrb.mxu0 %v283_v48  ;;  %481 = vmatpush.msrb.mxu1 %v4651_v49  ;;  %v4864_v42 = vld [vmem:[%s10499_s4 + $0x368] sm:$0xff]  ;;  %v4871_v43 = vld [vmem:[%s10499_s4 + $0x340] sm:$0xff] }
  0x21   :  { %521 = vmatpush.msrb.mxu3 %v4659_v50  ;;  %501 = vmatpush.msrb.mxu2 %v285_v51  ;;  %v4876_v46 = vld [vmem:[%s10499_s4 + $0x348] sm:$0xff]  ;;  %v4881_v47 = vld [vmem:[%s10499_s4 + $0x320] sm:$0xff] }
  0x22   :  { %462 = vmatpush.msrb.mxu0 %v279_v52  ;;  %482 = vmatpush.msrb.mxu1 %v4672_v53  ;;  %v4888_v48 = vld [vmem:[%s10499_s4 + $0x328] sm:$0xff]  ;;  %v4893_v51 = vld [vmem:[%s10499_s4 + $0x300] sm:$0xff] }
  0x23   :  { %522 = vmatpush.msrb.mxu3 %v4678_v54  ;;  %502 = vmatpush.msrb.mxu2 %v281_v55  ;;  %v4898_v52 = vld [vmem:[%s10499_s4 + $0x308] sm:$0xff]  ;;  %v4907_v55 = vld [vmem:[%s10499_s4 + $0x2e0] sm:$0xff] }
  0x24   :  { %463 = vmatpush.msrb.mxu0 %v275_v56  ;;  %483 = vmatpush.msrb.mxu1 %v4690_v57  ;;  %v4912_v56 = vld [vmem:[%s10499_s4 + $0x2e8] sm:$0xff] }
  0x25   :  { %523 = vmatpush.msrb.mxu3 %v4696_v58  ;;  %503 = vmatpush.msrb.mxu2 %v277_v59 }
  0x26   :  { %3444 = vmatmul.msk.f32.gmra.mxu0 %vm57_vm1, %v35_v60  ;;  %3453 = vmatmul.msk.f32.gmra.mxu1 %vm57_vm1, %v35_v60 }
  0x27   :  { %3462 = vmatmul.msk.f32.gmra.mxu2 %vm57_vm1, %v35_v60  ;;  %3471 = vmatmul.msk.f32.gmra.mxu3 %vm57_vm1, %v35_v60 }
  0x28   :  { %464 = vmatpush.msrb.mxu0 %v271_v61  ;;  %484 = vmatpush.msrb.mxu1 %v4712_v62  ;;  %v4923_v61 = vld [vmem:[%s10499_s4 + $0x2c0] sm:$0xff] }
  0x29   :  { %524 = vmatpush.msrb.mxu3 %v4720_v63  ;;  %504 = vmatpush.msrb.mxu2 %v273_v0  ;;  %v4928_v0 = vld [vmem:[%s10499_s4 + $0x2c8] sm:$0xff] }
  0x2a   :  { %465 = vmatpush.msrb.mxu0 %v267_v1  ;;  %485 = vmatpush.msrb.mxu1 %v4733_v2  ;;  %10996 = vst [vmem:[#allocation3_spill] sm:$0xff] %v4928_v0  ;;  %v4933_v1 = vld [vmem:[%s10499_s4 + $0x2a0] sm:$0xff] }
  0x2b   :  { %525 = vmatpush.msrb.mxu3 %v4739_v3  ;;  %505 = vmatpush.msrb.mxu2 %v269_v4  ;;  %10997 = vst [vmem:[#allocation4_spill] sm:$0xff] %v4933_v1  ;;  %v4940_v4 = vld [vmem:[%s10499_s4 + $0x2a8] sm:$0xff] }
  0x2c   :  { %466 = vmatpush.msrb.mxu0 %v263_v5  ;;  %486 = vmatpush.msrb.mxu1 %v4751_v6  ;;  %10998 = vst [vmem:[#allocation5_spill] sm:$0xff] %v4940_v4  ;;  %v4945_v5 = vld [vmem:[%s10499_s4 + $0x280] sm:$0xff] }
  0x2d   :  { %506 = vmatpush.msrb.mxu2 %v265_v7  ;;  %526 = vmatpush.msrb.mxu3 %v4760_v8  ;;  %10999 = vst [vmem:[#allocation6_spill] sm:$0xff] %v4945_v5  ;;  %v4950_v7 = vld [vmem:[%s10499_s4 + $0x288] sm:$0xff] }
  0x2e   :  { %3445 = vmatmul.msk.f32.gmra.mxu0 %vm57_vm1, %v36_v9  ;;  %3454 = vmatmul.msk.f32.gmra.mxu1 %vm57_vm1, %v36_v9  ;;  %11000 = vst [vmem:[#allocation7_spill] sm:$0xff] %v4950_v7 }
  0x2f   :  { %3463 = vmatmul.msk.f32.gmra.mxu2 %vm57_vm1, %v36_v9  ;;  %3472 = vmatmul.msk.f32.gmra.mxu3 %vm57_vm1, %v36_v9 }
  0x30   :  { %467 = vmatpush.msrb.mxu0 %v259_v12  ;;  %487 = vmatpush.msrb.mxu1 %v4773_v15 }
  0x31   :  { %507 = vmatpush.msrb.mxu2 %v261_v16  ;;  %527 = vmatpush.msrb.mxu3 %v4784_v18  ;;  %v4963_v16 = vld [vmem:[%s10499_s4 + $0x260] sm:$0xff] }
  0x32   :  { %628 = vmatpush.msra.mxu1 %v4811_v25  ;;  %11001 = vst [vmem:[#allocation8_spill] sm:$0xff] %v4963_v16 }
  0x33   :  { %668 = vmatpush.msra.mxu3 %v4816_v26 }
  0x34   :  { %629 = vmatpush.msra.mxu1 %v4823_v29 }
  0x35   :  { %669 = vmatpush.msra.mxu3 %v4828_v30 }
  0x36   :  { %3446 = vmatmul.msk.f32.gmra.mxu0 %vm57_vm1, %v37_v20  ;;  %3455 = vmatmul.msk.f32.gmra.mxu1 %vm57_vm1, %v37_v20 }
  0x37   :  { %3464 = vmatmul.msk.f32.gmra.mxu2 %vm57_vm1, %v37_v20  ;;  %3473 = vmatmul.msk.f32.gmra.mxu3 %vm57_vm1, %v37_v20  ;;  %v4968_v20 = vld [vmem:[%s10499_s4 + $0x268] sm:$0xff] }
  0x38   :  { %630 = vmatpush.msra.mxu1 %v4833_v33  ;;  %670 = vmatpush.msra.mxu3 %v4840_v34  ;;  %11002 = vst [vmem:[#allocation9_spill] sm:$0xff] %v4968_v20 }
  0x3a   :  { %631 = vmatpush.msra.mxu1 %v4845_v35  ;;  %671 = vmatpush.msra.mxu3 %v4850_v38 }
  0x3c   :  { %632 = vmatpush.msra.mxu1 %v4859_v39  ;;  %672 = vmatpush.msra.mxu3 %v4864_v42 }
  0x3e   :  { %3447 = vmatmul.msk.f32.gmra.mxu0 %vm57_vm1, %v38_v21  ;;  %3456 = vmatmul.msk.f32.gmra.mxu1 %vm57_vm1, %v38_v21 }
  0x3f   :  { %3465 = vmatmul.msk.f32.gmra.mxu2 %vm57_vm1, %v38_v21  ;;  %3474 = vmatmul.msk.f32.gmra.mxu3 %vm57_vm1, %v38_v21 }
  0x40   :  { %633 = vmatpush.msra.mxu1 %v4871_v43  ;;  %673 = vmatpush.msra.mxu3 %v4876_v46 }
  0x42   :  { %634 = vmatpush.msra.mxu1 %v4881_v47  ;;  %674 = vmatpush.msra.mxu3 %v4888_v48 }
  0x44   :  { %635 = vmatpush.msra.mxu1 %v4893_v51  ;;  %675 = vmatpush.msra.mxu3 %v4898_v52 }
  0x46   :  { %468 = vmatmul.f32.vlgmr.msrb.gmra.mxu0 %v10505_v22  ;;  %488 = vmatmul.f32.vlgmr.msrb.gmra.mxu1 %v10505_v22 }
  0x47   :  { %508 = vmatmul.f32.vlgmr.msrb.gmra.mxu2 %v10505_v22  ;;  %528 = vmatmul.f32.vlgmr.msrb.gmra.mxu3 %v10505_v22 }
  0x48   :  { %636 = vmatpush.msra.mxu1 %v4907_v55  ;;  %676 = vmatpush.msra.mxu3 %v4912_v56 }
  0x4a   :  { %637 = vmatpush.msra.mxu1 %v4923_v61  ;;  %677 = vmatpush.msra.mxu3 %v4928_v0  ;;  %v5451_v0 = vld [vmem:[%s10499_s4 + $0x1d0] sm:$0xff] }
  0x4c   :  { %638 = vmatpush.msra.mxu1 %v4933_v1  ;;  %678 = vmatpush.msra.mxu3 %v4940_v4 }
  0x4e   :  { %639 = vmatpush.msra.mxu1 %v4945_v5  ;;  %679 = vmatpush.msra.mxu3 %v4950_v7  ;;  %v4979_v7 = vld [vmem:[%s10499_s4 + $0x240] sm:$0xff]  ;;  %v4984_v5 = vld [vmem:[%s10499_s4 + $0x248] sm:$0xff] }
  0x4f   :  { %11005 = vst [vmem:[#allocation12_spill] sm:$0xff] %v4979_v7 }
  0x50   :  { %640 = vmatpush.msra.mxu1 %v4963_v16  ;;  %680 = vmatpush.msra.mxu3 %v4968_v20  ;;  %11006 = vst [vmem:[#allocation13_spill] sm:$0xff] %v4984_v5  ;;  %v5001_v20 = vld [vmem:[%s10499_s4 + $0x200] sm:$0xff]  ;;  %v5006_v16 = vld [vmem:[%s10499_s4 + $0x208] sm:$0xff] }
  0x51   :  { %11009 = vst [vmem:[#allocation16_spill] sm:$0xff] %v5001_v20 }
  0x52   :  { %641 = vmatpush.msra.mxu1 %v4979_v7  ;;  %681 = vmatpush.msra.mxu3 %v4984_v5  ;;  %11010 = vst [vmem:[#allocation17_spill] sm:$0xff] %v5006_v16  ;;  %v5015_v5 = vld [vmem:[%s10499_s4 + $0x1e0] sm:$0xff]  ;;  %v5020_v7 = vld [vmem:[%s10499_s4 + $0x1e8] sm:$0xff] }
  0x53   :  { %11011 = vst [vmem:[#allocation18_spill] sm:$0xff] %v5015_v5  ;;  %608 = vmatpush.msra.mxu0 %v5015_v5  ;;  %648 = vmatpush.msra.mxu2 %v5020_v7  ;;  %v5074_v5 = vld [vmem:[%s10499_s4 + $0x1a8] sm:$0xff] }
  0x54   :  { %11012 = vst [vmem:[#allocation19_spill] sm:$0xff] %v5020_v7  ;;  %v5069_v7 = vld [vmem:[%s10499_s4 + $0x1a0] sm:$0xff] }
  0x55   :  { %11023 = vst [vmem:[#allocation30_spill] sm:$0xff] %v5069_v7 }
  0x56   :  { %11024 = vst [vmem:[#allocation31_spill] sm:$0xff] %v5074_v5 }
  0x83   :  { %v4914_v59 = vpop.f32.mrf.mxu0  ;;  %v4916_v60 = vpop.f32.mrf.mxu1 }
  0x8a   :  { %v4956_v9 = vpop.f32.mrf.mxu2  ;;  %v4958_v12 = vpop.f32.mrf.mxu3 }
  0x8b   :  { %v4970_v21 = vpop.f32.mrf.mxu0  ;;  %v4972_v22 = vpop.f32.mrf.mxu1 }
  0x8c   :  { %11003 = vst [vmem:[#allocation10_spill] sm:$0xff] %v4970_v21  ;;  %v4989_v21 = vld [vmem:[%s10499_s4 + $0x220] sm:$0xff] }
  0x8d   :  { %11004 = vst [vmem:[#allocation11_spill] sm:$0xff] %v4972_v22  ;;  %v4996_v22 = vld [vmem:[%s10499_s4 + $0x228] sm:$0xff]  ;;  %642 = vmatpush.msra.mxu1 %v4989_v21 }
  0x8e   :  { %11007 = vst [vmem:[#allocation14_spill] sm:$0xff] %v4989_v21  ;;  %682 = vmatpush.msra.mxu3 %v4996_v22  ;;  %v5025_v21 = vld [vmem:[%s10499_s4 + $0x3f0] sm:$0xff] }
  0x8f   :  { %11008 = vst [vmem:[#allocation15_spill] sm:$0xff] %v4996_v22  ;;  %643 = vmatpush.msra.mxu1 %v5001_v20 }
  0x90   :  { %683 = vmatpush.msra.mxu3 %v5006_v16  ;;  %11013 = vst [vmem:[#allocation20_spill] sm:$0xff] %v5025_v21  ;;  %v5036_v16 = vld [vmem:[%s10499_s4 + $0x3f8] sm:$0xff] }
  0x91   :  { %11016 = vst [vmem:[#allocation23_spill] sm:$0xff] %v5036_v16  ;;  %708 = vmatpush.msrb.mxu1 %v5025_v21  ;;  %v5108_v21 = vld [vmem:[%s10499_s4 + $0x398] sm:$0xff] }
  0x92   :  { %v5027_v22 = vpop.f32.mrf.mxu2  ;;  %v5029_v20 = vpop.f32.mrf.mxu3  ;;  %748 = vmatpush.msrb.mxu3 %v5036_v16  ;;  %v5091_v16 = vld [vmem:[%s10499_s4 + $0x180] sm:$0xff]  ;;  %11030 = vst [vmem:[#allocation37_spill] sm:$0xff] %v5108_v21 }
  0x93   :  { %11014 = vst [vmem:[#allocation21_spill] sm:$0xff] %v5027_v22  ;;  %v5038_v4 = vpop.f32.mrf.mxu0  ;;  %v5040_v1 = vpop.f32.mrf.mxu1  ;;  %v5047_v22 = vld [vmem:[%s10499_s4 + $0x1c0] sm:$0xff] }
  0x94   :  { %11015 = vst [vmem:[#allocation22_spill] sm:$0xff] %v5029_v20  ;;  %v5052_v20 = vld [vmem:[%s10499_s4 + $0x1c8] sm:$0xff]  ;;  %609 = vmatpush.msra.mxu0 %v5047_v22 }
  0x95   :  { %11017 = vst [vmem:[#allocation24_spill] sm:$0xff] %v5038_v4  ;;  %v5057_v4 = vld [vmem:[%s10499_s4 + $0x3d0] sm:$0xff]  ;;  %649 = vmatpush.msra.mxu2 %v5052_v20 }
  0x96   :  { %11018 = vst [vmem:[#allocation25_spill] sm:$0xff] %v5040_v1  ;;  %v5064_v1 = vld [vmem:[%s10499_s4 + $0x3d8] sm:$0xff]  ;;  %709 = vmatpush.msrb.mxu1 %v5057_v4  ;;  %610 = vmatpush.msra.mxu0 %v5069_v7  ;;  %v5124_v7 = vld [vmem:[%s10499_s4 + $0x168] sm:$0xff] }
  0x97   :  { %11019 = vst [vmem:[#allocation26_spill] sm:$0xff] %v5047_v22  ;;  %749 = vmatpush.msrb.mxu3 %v5064_v1  ;;  %v5086_v22 = vld [vmem:[%s10499_s4 + $0x3b8] sm:$0xff]  ;;  %650 = vmatpush.msra.mxu2 %v5074_v5  ;;  %v5119_v5 = vld [vmem:[%s10499_s4 + $0x160] sm:$0xff] }
  0x98   :  { %11020 = vst [vmem:[#allocation27_spill] sm:$0xff] %v5052_v20  ;;  %v5081_v20 = vld [vmem:[%s10499_s4 + $0x3b0] sm:$0xff]  ;;  %611 = vmatpush.msra.mxu0 %v5091_v16 }
  0x99   :  { %11021 = vst [vmem:[#allocation28_spill] sm:$0xff] %v5057_v4  ;;  %v5103_v4 = vld [vmem:[%s10499_s4 + $0x390] sm:$0xff]  ;;  %710 = vmatpush.msrb.mxu1 %v5081_v20  ;;  %750 = vmatpush.msrb.mxu3 %v5086_v22 }
  0x9a   :  { %11022 = vst [vmem:[#allocation29_spill] sm:$0xff] %v5064_v1  ;;  %v5098_v1 = vld [vmem:[%s10499_s4 + $0x188] sm:$0xff]  ;;  %612 = vmatpush.msra.mxu0 %v5119_v5 }
  0x9b   :  { %11025 = vst [vmem:[#allocation32_spill] sm:$0xff] %v5081_v20  ;;  %651 = vmatpush.msra.mxu2 %v5098_v1  ;;  %711 = vmatpush.msrb.mxu1 %v5103_v4  ;;  %v5144_v20 = vpop.f32.mrf.mxu1 }
  0x9c   :  { %11026 = vst [vmem:[#allocation33_spill] sm:$0xff] %v5086_v22  ;;  %751 = vmatpush.msrb.mxu3 %v5108_v21  ;;  %v5140_v21 = vld [vmem:[%s10499_s4 + $0x378] sm:$0xff]  ;;  %v5142_v22 = vpop.f32.mrf.mxu0 }
  0x9d   :  { %11027 = vst [vmem:[#allocation34_spill] sm:$0xff] %v5091_v16  ;;  %v5129_v16 = vld [vmem:[%s10499_s4 + $0x370] sm:$0xff]  ;;  %652 = vmatpush.msra.mxu2 %v5124_v7 }
  0x9e   :  { %11028 = vst [vmem:[#allocation35_spill] sm:$0xff] %v5098_v1  ;;  %v5131_v1 = vpop.f32.mrf.mxu2  ;;  %712 = vmatpush.msrb.mxu1 %v5129_v16  ;;  %752 = vmatpush.msrb.mxu3 %v5140_v21 }
  0x9f   :  { %11029 = vst [vmem:[#allocation36_spill] sm:$0xff] %v5103_v4  ;;  %v5133_v4 = vpop.f32.mrf.mxu3 }
  0xa0   :  { %11031 = vst [vmem:[#allocation38_spill] sm:$0xff] %v5119_v5  ;;  %v5178_v5 = vld [vmem:[%s10499_s4 + $0x128] sm:$0xff] }
  0xa1   :  { %11032 = vst [vmem:[#allocation39_spill] sm:$0xff] %v5124_v7  ;;  %v5173_v7 = vld [vmem:[%s10499_s4 + $0x120] sm:$0xff] }
  0xa2   :  { %11033 = vst [vmem:[#allocation40_spill] sm:$0xff] %v5129_v16  ;;  %v5212_v16 = vld [vmem:[%s10499_s4 + $0x318] sm:$0xff] }
  0xa3   :  { %11034 = vst [vmem:[#allocation41_spill] sm:$0xff] %v5131_v1  ;;  %v5151_v1 = vld [vmem:[%s10499_s4 + $0x140] sm:$0xff] }
  0xa4   :  { %11035 = vst [vmem:[#allocation42_spill] sm:$0xff] %v5133_v4  ;;  %v5156_v4 = vld [vmem:[%s10499_s4 + $0x148] sm:$0xff]  ;;  %613 = vmatpush.msra.mxu0 %v5151_v1 }
  0xa5   :  { %11036 = vst [vmem:[#allocation43_spill] sm:$0xff] %v5140_v21  ;;  %653 = vmatpush.msra.mxu2 %v5156_v4  ;;  %v5195_v21 = vld [vmem:[%s10499_s4 + $0x100] sm:$0xff] }
  0xa6   :  { %11037 = vst [vmem:[#allocation44_spill] sm:$0xff] %v5142_v22  ;;  %v5161_v22 = vld [vmem:[%s10499_s4 + $0x350] sm:$0xff]  ;;  %614 = vmatpush.msra.mxu0 %v5173_v7 }
  0xa7   :  { %11038 = vst [vmem:[#allocation45_spill] sm:$0xff] %v5144_v20  ;;  %v5168_v20 = vld [vmem:[%s10499_s4 + $0x358] sm:$0xff]  ;;  %713 = vmatpush.msrb.mxu1 %v5161_v22  ;;  %654 = vmatpush.msra.mxu2 %v5178_v5 }
  0xa8   :  { %11039 = vst [vmem:[#allocation46_spill] sm:$0xff] %v5151_v1  ;;  %753 = vmatpush.msrb.mxu3 %v5168_v20  ;;  %v5190_v1 = vld [vmem:[%s10499_s4 + $0x338] sm:$0xff]  ;;  %615 = vmatpush.msra.mxu0 %v5195_v21 }
  0xa9   :  { %11040 = vst [vmem:[#allocation47_spill] sm:$0xff] %v5156_v4  ;;  %v5185_v4 = vld [vmem:[%s10499_s4 + $0x330] sm:$0xff] }
  0xaa   :  { %11041 = vst [vmem:[#allocation48_spill] sm:$0xff] %v5161_v22  ;;  %v5207_v22 = vld [vmem:[%s10499_s4 + $0x310] sm:$0xff]  ;;  %714 = vmatpush.msrb.mxu1 %v5185_v4  ;;  %754 = vmatpush.msrb.mxu3 %v5190_v1 }
  0xab   :  { %11042 = vst [vmem:[#allocation49_spill] sm:$0xff] %v5168_v20  ;;  %v5202_v20 = vld [vmem:[%s10499_s4 + $0x108] sm:$0xff] }
  0xac   :  { %11043 = vst [vmem:[#allocation50_spill] sm:$0xff] %v5173_v7  ;;  %655 = vmatpush.msra.mxu2 %v5202_v20  ;;  %715 = vmatpush.msrb.mxu1 %v5207_v22  ;;  %v5228_v7 = vld [vmem:[%s10499_s4 + $0xe8] sm:$0xff] }
  0xad   :  { %11044 = vst [vmem:[#allocation51_spill] sm:$0xff] %v5178_v5  ;;  %755 = vmatpush.msrb.mxu3 %v5212_v16  ;;  %v5223_v5 = vld [vmem:[%s10499_s4 + $0xe0] sm:$0xff] }
  0xae   :  { %11045 = vst [vmem:[#allocation52_spill] sm:$0xff] %v5185_v4  ;;  %616 = vmatpush.msra.mxu0 %v5223_v5  ;;  %656 = vmatpush.msra.mxu2 %v5228_v7  ;;  %v5248_v4 = vpop.f32.mrf.mxu1 }
  0xaf   :  { %11046 = vst [vmem:[#allocation53_spill] sm:$0xff] %v5190_v1  ;;  %v5246_v1 = vpop.f32.mrf.mxu0 }
  0xb0   :  { %11047 = vst [vmem:[#allocation54_spill] sm:$0xff] %v5195_v21  ;;  %v5233_v21 = vld [vmem:[%s10499_s4 + $0x2f0] sm:$0xff] }
  0xb1   :  { %11048 = vst [vmem:[#allocation55_spill] sm:$0xff] %v5202_v20  ;;  %v5235_v20 = vpop.f32.mrf.mxu2  ;;  %716 = vmatpush.msrb.mxu1 %v5233_v21 }
  0xb2   :  { %11049 = vst [vmem:[#allocation56_spill] sm:$0xff] %v5207_v22  ;;  %v5237_v22 = vpop.f32.mrf.mxu3 }
  0xb3   :  { %11050 = vst [vmem:[#allocation57_spill] sm:$0xff] %v5212_v16  ;;  %v5244_v16 = vld [vmem:[%s10499_s4 + $0x2f8] sm:$0xff] }
  0xb4   :  { %11051 = vst [vmem:[#allocation58_spill] sm:$0xff] %v5223_v5  ;;  %756 = vmatpush.msrb.mxu3 %v5244_v16  ;;  %v5296_v5 = vld [vmem:[%s10499_s4 + $0x2b8] sm:$0xff] }
  0xb5   :  { %11052 = vst [vmem:[#allocation59_spill] sm:$0xff] %v5228_v7  ;;  %v5279_v7 = vld [vmem:[%s10499_s4 + $0xa0] sm:$0xff] }
  0xb6   :  { %11053 = vst [vmem:[#allocation60_spill] sm:$0xff] %v5233_v21 }
  0xb7   :  { %11054 = vst [vmem:[#allocation61_spill] sm:$0xff] %v5235_v20  ;;  %v5255_v20 = vld [vmem:[%s10499_s4 + $0xc0] sm:$0xff] }
  0xb8   :  { %11055 = vst [vmem:[#allocation62_spill] sm:$0xff] %v5237_v22  ;;  %v5260_v22 = vld [vmem:[%s10499_s4 + $0xc8] sm:$0xff]  ;;  %617 = vmatpush.msra.mxu0 %v5255_v20 }
  0xb9   :  { %11056 = vst [vmem:[#allocation63_spill] sm:$0xff] %v5244_v16  ;;  %657 = vmatpush.msra.mxu2 %v5260_v22  ;;  %v5352_v16 = vld [vmem:[%s10499_s4 + $0x278] sm:$0xff]  ;;  %v5354_v21 = vpop.f32.mrf.mxu2 }
  0xba   :  { %11057 = vst [vmem:[#allocation64_spill] sm:$0xff] %v5246_v1  ;;  %v5265_v1 = vld [vmem:[%s10499_s4 + $0x2d0] sm:$0xff]  ;;  %618 = vmatpush.msra.mxu0 %v5279_v7 }
  0xbb   :  { %11058 = vst [vmem:[#allocation65_spill] sm:$0xff] %v5248_v4  ;;  %v5272_v4 = vld [vmem:[%s10499_s4 + $0x2d8] sm:$0xff]  ;;  %717 = vmatpush.msrb.mxu1 %v5265_v1 }
  0xbc   :  { %11059 = vst [vmem:[#allocation66_spill] sm:$0xff] %v5255_v20  ;;  %757 = vmatpush.msrb.mxu3 %v5272_v4  ;;  %v5284_v20 = vld [vmem:[%s10499_s4 + $0xa8] sm:$0xff] }
  0xbd   :  { %11060 = vst [vmem:[#allocation67_spill] sm:$0xff] %v5260_v22  ;;  %v5289_v22 = vld [vmem:[%s10499_s4 + $0x2b0] sm:$0xff]  ;;  %658 = vmatpush.msra.mxu2 %v5284_v20 }
  0xbe   :  { %11061 = vst [vmem:[#allocation68_spill] sm:$0xff] %v5265_v1  ;;  %718 = vmatpush.msrb.mxu1 %v5289_v22  ;;  %758 = vmatpush.msrb.mxu3 %v5296_v5  ;;  %v5329_v1 = vld [vmem:[%s10499_s4 + $0x60] sm:$0xff] }
  0xbf   :  { %11062 = vst [vmem:[#allocation69_spill] sm:$0xff] %v5272_v4  ;;  %v5303_v4 = vld [vmem:[%s10499_s4 + $0x80] sm:$0xff] }
  0xc0   :  { %11063 = vst [vmem:[#allocation70_spill] sm:$0xff] %v5279_v7  ;;  %v5308_v7 = vld [vmem:[%s10499_s4 + $0x88] sm:$0xff]  ;;  %619 = vmatpush.msra.mxu0 %v5303_v4 }
  0xc1   :  { %11064 = vst [vmem:[#allocation71_spill] sm:$0xff] %v5284_v20  ;;  %v5313_v20 = vld [vmem:[%s10499_s4 + $0x290] sm:$0xff]  ;;  %659 = vmatpush.msra.mxu2 %v5308_v7 }
  0xc2   :  { %11065 = vst [vmem:[#allocation72_spill] sm:$0xff] %v5289_v22  ;;  %719 = vmatpush.msrb.mxu1 %v5313_v20  ;;  %v5324_v22 = vpop.f32.mrf.mxu3  ;;  %620 = vmatpush.msra.mxu0 %v5329_v1 }
  0xc3   :  { %11066 = vst [vmem:[#allocation73_spill] sm:$0xff] %v5296_v5  ;;  %v5320_v5 = vld [vmem:[%s10499_s4 + $0x298] sm:$0xff] }
  0xc4   :  { %11067 = vst [vmem:[#allocation74_spill] sm:$0xff] %v5303_v4  ;;  %759 = vmatpush.msrb.mxu3 %v5320_v5  ;;  %v5339_v4 = vld [vmem:[%s10499_s4 + $0x270] sm:$0xff] }
  0xc5   :  { %11068 = vst [vmem:[#allocation75_spill] sm:$0xff] %v5308_v7  ;;  %v5334_v7 = vld [vmem:[%s10499_s4 + $0x68] sm:$0xff]  ;;  %720 = vmatpush.msrb.mxu1 %v5339_v4 }
  0xc6   :  { %11069 = vst [vmem:[#allocation76_spill] sm:$0xff] %v5313_v20  ;;  %v11075_v20 = vmov 0.0   ;;  %660 = vmatpush.msra.mxu2 %v5334_v7  ;;  %760 = vmatpush.msrb.mxu3 %v5352_v16 }
  0xc7   :  { %11070 = vst [vmem:[#allocation77_spill] sm:$0xff] %v5320_v5  ;;  %644 = vmatmul.f32.vlgmr.msra.gmra.mxu1 %v11075_v20  ;;  %684 = vmatmul.f32.vlgmr.msra.gmra.mxu3 %v11075_v20  ;;  %v5345_v5 = vpop.f32.mrf.mxu1 }
  0xc8   :  { %11071 = vst [vmem:[#allocation78_spill] sm:$0xff] %v5324_v22  ;;  %v5343_v22 = vpop.f32.mrf.mxu0 }
  0xc9   :  { %11072 = vst [vmem:[#allocation79_spill] sm:$0xff] %v5329_v1  ;;  %v5385_v1 = vld [vmem:[%s10499_s4 + $0x20] sm:$0xff] }
  0xca   :  { %11073 = vst [vmem:[#allocation80_spill] sm:$0xff] %v5334_v7  ;;  %v5371_v7 = vld [vmem:[%s10499_s4 + $0x250] sm:$0xff] }
  0xcb   :  { %11074 = vst [vmem:[#allocation81_spill] sm:$0xff] %v5339_v4  ;;  %721 = vmatpush.msrb.mxu1 %v5371_v7  ;;  %v5438_v4 = vpop.f32.mrf.mxu3 }
  0xcc   :  { %11076 = vst [vmem:[#allocation82_spill] sm:$0xff] %v5343_v22  ;;  %v5361_v22 = vld [vmem:[%s10499_s4 + $0x40] sm:$0xff] }
  0xcd   :  { %11077 = vst [vmem:[#allocation83_spill] sm:$0xff] %v5345_v5  ;;  %v5366_v5 = vld [vmem:[%s10499_s4 + $0x48] sm:$0xff]  ;;  %621 = vmatpush.msra.mxu0 %v5361_v22 }
  0xce   :  { %11078 = vst [vmem:[#allocation84_spill] sm:$0xff] %v5352_v16  ;;  %661 = vmatpush.msra.mxu2 %v5366_v5  ;;  %v5436_v16 = vld [vmem:[%s10499_s4 + $0x1f8] sm:$0xff] }
  0xcf   :  { %11079 = vst [vmem:[#allocation85_spill] sm:$0xff] %v5354_v21  ;;  %v5378_v21 = vld [vmem:[%s10499_s4 + $0x258] sm:$0xff]  ;;  %622 = vmatpush.msra.mxu0 %v5385_v1 }
  0xd0   :  { %11080 = vst [vmem:[#allocation86_spill] sm:$0xff] %v5361_v22  ;;  %761 = vmatpush.msrb.mxu3 %v5378_v21  ;;  %v5390_v22 = vld [vmem:[%s10499_s4 + $0x28] sm:$0xff] }
  0xd1   :  { %11081 = vst [vmem:[#allocation87_spill] sm:$0xff] %v5366_v5  ;;  %v5395_v5 = vld [vmem:[%s10499_s4 + $0x230] sm:$0xff]  ;;  %662 = vmatpush.msra.mxu2 %v5390_v22 }
  0xd2   :  { %11082 = vst [vmem:[#allocation88_spill] sm:$0xff] %v5371_v7  ;;  %722 = vmatpush.msrb.mxu1 %v5395_v5  ;;  %v5409_v7 = vld [vmem:[%s10499_s4] sm:$0xff] }
  0xd3   :  { %11083 = vst [vmem:[#allocation89_spill] sm:$0xff] %v5378_v21  ;;  %v5402_v21 = vld [vmem:[%s10499_s4 + $0x238] sm:$0xff]  ;;  %623 = vmatpush.msra.mxu0 %v5409_v7 }
  0xd4   :  { %11084 = vst [vmem:[#allocation90_spill] sm:$0xff] %v5385_v1  ;;  %762 = vmatpush.msrb.mxu3 %v5402_v21  ;;  %v5414_v1 = vld [vmem:[%s10499_s4 + $0x8] sm:$0xff] }
  0xd5   :  { %11085 = vst [vmem:[#allocation91_spill] sm:$0xff] %v5390_v22  ;;  %v5419_v22 = vld [vmem:[%s10499_s4 + $0x210] sm:$0xff]  ;;  %663 = vmatpush.msra.mxu2 %v5414_v1 }
  0xd6   :  { %11086 = vst [vmem:[#allocation92_spill] sm:$0xff] %v5395_v5  ;;  %v5431_v5 = vld [vmem:[%s10499_s4 + $0x1f0] sm:$0xff]  ;;  %723 = vmatpush.msrb.mxu1 %v5419_v22 }
  0xd7   :  { %11087 = vst [vmem:[#allocation93_spill] sm:$0xff] %v5402_v21  ;;  %v5426_v21 = vld [vmem:[%s10499_s4 + $0x218] sm:$0xff]  ;;  %688 = vmatpush.msrb.mxu0 %v5431_v5  ;;  %728 = vmatpush.msrb.mxu2 %v5436_v16 }
  0xd8   :  { %11088 = vst [vmem:[#allocation94_spill] sm:$0xff] %v5409_v7  ;;  %763 = vmatpush.msrb.mxu3 %v5426_v21  ;;  %v5444_v7 = vpop.f32.mrf.mxu1  ;;  %851 = vmatpush.msra.mxu1 %v4469_v10  ;;  %v5481_v10 = vld [vmem:[%s10499_s4 + $0x190] sm:$0xff] }
  0xd9   :  { %11089 = vst [vmem:[#allocation95_spill] sm:$0xff] %v5414_v1  ;;  %v5442_v1 = vpop.f32.mrf.mxu0  ;;  %689 = vmatpush.msrb.mxu0 %v5451_v0  ;;  %724 = vmatmul.f32.vlgmr.msrb.gmra.mxu1 %v11075_v20 }
  0xda   :  { %11090 = vst [vmem:[#allocation96_spill] sm:$0xff] %v5436_v16  ;;  %891 = vmatpush.msra.mxu3 %v4476_v11  ;;  %v5472_v16 = vpop.f32.mrf.mxu2  ;;  %852 = vmatpush.msra.mxu1 %v4486_v13  ;;  %v5486_v11 = vld [vmem:[%s10499_s4 + $0x198] sm:$0xff]  ;;  %v5495_v13 = vld [vmem:[%s10499_s4 + $0x170] sm:$0xff] }
  0xdb   :  { %11091 = vst [vmem:[#allocation97_spill] sm:$0xff] %v5438_v4  ;;  %v5456_v4 = vld [vmem:[%s10499_s4 + $0x1d8] sm:$0xff]  ;;  %764 = vmatmul.f32.vlgmr.msrb.gmra.mxu3 %v11075_v20 }
  0xdc   :  { %11092 = vst [vmem:[#allocation98_spill] sm:$0xff] %v5442_v1  ;;  %729 = vmatpush.msrb.mxu2 %v5456_v4  ;;  %v5465_v1 = vld [vmem:[%s10499_s4 + $0x1b0] sm:$0xff]  ;;  %892 = vmatpush.msra.mxu3 %v4492_v14  ;;  %v5500_v14 = vld [vmem:[%s10499_s4 + $0x178] sm:$0xff] }
  0xdd   :  { %11093 = vst [vmem:[#allocation99_spill] sm:$0xff] %v5444_v7  ;;  %v5470_v7 = vld [vmem:[%s10499_s4 + $0x1b8] sm:$0xff]  ;;  %690 = vmatpush.msrb.mxu0 %v5465_v1  ;;  %853 = vmatpush.msra.mxu1 %v4504_v17  ;;  %v5509_v17 = vld [vmem:[%s10500_s3] sm:$0xf] }
  0xde   :  { %11094 = vst [vmem:[#allocation100_spill] sm:$0xff] %v5472_v16  ;;  %730 = vmatpush.msrb.mxu2 %v5470_v7  ;;  %893 = vmatpush.msra.mxu3 %v4513_v19  ;;  %v5502_v16 = vpop.f32.mrf.mxu3  ;;  %v5672_v20 = vld [vmem:[%s10499_s4 + $0x38] sm:$0xff] }
  0xdf   :  { %11095 = vst [vmem:[#allocation101_spill] sm:$0xff] %v5486_v11  ;;  %691 = vmatpush.msrb.mxu0 %v5481_v10  ;;  %854 = vmatpush.msra.mxu1 %v4529_v23  ;;  %v5525_v23 = vld [vmem:[%s10499_s4 + $0x158] sm:$0xff] }
  0xe0   :  { %731 = vmatpush.msrb.mxu2 %v5486_v11  ;;  %11096 = vst [vmem:[#allocation102_spill] sm:$0xff] %v5502_v16  ;;  %894 = vmatpush.msra.mxu3 %v4537_v24  ;;  %v5513_v11 = vpop.f32.mrf.mxu1  ;;  %v5520_v16 = vld [vmem:[%s10499_s4 + $0x150] sm:$0xff] }
  0xe1   :  { %v5511_v19 = vpop.f32.mrf.mxu0  ;;  %11098 = vst [vmem:[#allocation104_spill] sm:$0xff] %v5513_v11  ;;  %692 = vmatpush.msrb.mxu0 %v5495_v13  ;;  %855 = vmatpush.msra.mxu1 %v4550_v27  ;;  %v5534_v24 = vld [vmem:[%s10499_s4 + $0x130] sm:$0xff]  ;;  %v5542_v11 = vperm.slane %v5509_v17, 0  ;;  %v5545_v27 = vperm.slane %v5509_v17, 1 }
  0xe2   :  { %11097 = vst [vmem:[#allocation103_spill] sm:$0xff] %v5511_v19  ;;  %732 = vmatpush.msrb.mxu2 %v5500_v14  ;;  %895 = vmatpush.msra.mxu3 %v4556_v28  ;;  %v5539_v19 = vld [vmem:[%s10499_s4 + $0x138] sm:$0xff]  ;;  %v5554_v28 = vld [vmem:[%s10499_s4 + $0x110] sm:$0xff] }
  0xe3   :  { %11099 = vst [vmem:[#allocation105_spill] sm:$0xff] %v5520_v16  ;;  %693 = vmatpush.msrb.mxu0 %v5520_v16  ;;  %856 = vmatpush.msra.mxu1 %v4568_v31  ;;  %v5561_v16 = vpop.f32.mrf.mxu2  ;;  %v5570_v31 = vld [vmem:[%s10499_s4 + $0xf0] sm:$0xff] }
  0xe4   :  { %11100 = vst [vmem:[#allocation106_spill] sm:$0xff] %v5525_v23  ;;  %733 = vmatpush.msrb.mxu2 %v5525_v23  ;;  %896 = vmatpush.msra.mxu3 %v4574_v32  ;;  %v5559_v23 = vld [vmem:[%s10499_s4 + $0x118] sm:$0xff] }
  0xe5   :  { %11101 = vst [vmem:[#allocation107_spill] sm:$0xff] %v5539_v19  ;;  %694 = vmatpush.msrb.mxu0 %v5534_v24  ;;  %857 = vmatpush.msra.mxu1 %v4590_v36  ;;  %v5575_v32 = vld [vmem:[%s10499_s4 + $0xf8] sm:$0xff]  ;;  %v154_v36 = vadd.f32 %v4916_v60, %v5545_v27 }
  0xe6   :  { %11102 = vst [vmem:[#allocation108_spill] sm:$0xff] %v5542_v11  ;;  %734 = vmatpush.msrb.mxu2 %v5539_v19  ;;  %897 = vmatpush.msra.mxu3 %v4598_v37  ;;  %v5581_v37 = vpop.f32.mrf.mxu3  ;;  %v5590_v19 = vld [vmem:[%s10499_s4 + $0xd0] sm:$0xff] }
  0xe7   :  { %11103 = vst [vmem:[#allocation109_spill] sm:$0xff] %v5545_v27  ;;  %695 = vmatpush.msrb.mxu0 %v5554_v28  ;;  %858 = vmatpush.msra.mxu1 %v4611_v40 }
  0xe8   :  { %11104 = vst [vmem:[#allocation110_spill] sm:$0xff] %v5554_v28  ;;  %735 = vmatpush.msrb.mxu2 %v5559_v23  ;;  %898 = vmatpush.msra.mxu3 %v4617_v41  ;;  %v489_v28 = vpop.f32.mrf.mxu1  ;;  %v5600_v41 = vperm.slane %v5509_v17, 3 }
  0xe9   :  { %11105 = vst [vmem:[#allocation111_spill] sm:$0xff] %v5559_v23  ;;  %v469_v23 = vpop.f32.mrf.mxu0  ;;  %696 = vmatpush.msrb.mxu0 %v5570_v31  ;;  %v533_v40 = vadd.f32 %v489_v28, %v154_v36  ;;  %859 = vmatpush.msra.mxu1 %v4629_v44  ;;  %v5626_v28 = vld [vmem:[%s10499_s4 + $0x98] sm:$0xff] }
  0xea   :  { %11106 = vst [vmem:[#allocation112_spill] sm:$0xff] %v5561_v16  ;;  %v113_v16 = vadd.f32 %v4914_v59, %v5542_v11  ;;  %736 = vmatpush.msrb.mxu2 %v5575_v32  ;;  %v5595_v59 = vld [vmem:[%s10499_s4 + $0xd8] sm:$0xff]  ;;  %899 = vmatpush.msra.mxu3 %v4635_v45  ;;  %v5621_v45 = vld [vmem:[%s10499_s4 + $0x90] sm:$0xff] }
  0xeb   :  { %11107 = vst [vmem:[#allocation113_spill] sm:$0xff] %v5581_v37  ;;  %697 = vmatpush.msrb.mxu0 %v5590_v19  ;;  %v5607_v37 = vld [vmem:[%s10499_s4 + $0xb0] sm:$0xff]  ;;  %860 = vmatpush.msra.mxu1 %v4651_v49  ;;  %v236_v49 = vadd.f32 %v4958_v12, %v5600_v41  ;;  %v5642_v36 = vld [vmem:[%s10499_s4 + $0x78] sm:$0xff] }
  0xec   :  { %v532_v60 = vadd.f32 %v469_v23, %v113_v16  ;;  %11108 = vst [vmem:[#allocation114_spill] sm:$0xff] %v5600_v41  ;;  %737 = vmatpush.msrb.mxu2 %v5595_v59  ;;  %v5612_v16 = vld [vmem:[%s10499_s4 + $0xb8] sm:$0xff]  ;;  %v3476_v23 = vmul.f32 -1.442695, %v533_v40  ;;  %900 = vmatpush.msra.mxu3 %v4659_v50  ;;  %v5637_v50 = vld [vmem:[%s10499_s4 + $0x70] sm:$0xff] }
  0xed   :  { %698 = vmatpush.msrb.mxu0 %v5607_v37  ;;  %861 = vmatpush.msra.mxu1 %v4672_v53  ;;  %v5644_v53 = vpop.f32.mrf.mxu2  ;;  %v5658_v40 = vld [vmem:[%s10499_s4 + $0x58] sm:$0xff] }
  0xee   :  { %v3475_v44 = vmul.f32 -1.442695, %v532_v60  ;;  %738 = vmatpush.msrb.mxu2 %v5612_v16  ;;  %901 = vmatpush.msra.mxu3 %v4678_v54  ;;  %11109 = vst [vmem:[#allocation115_spill] sm:$0xff] %v5644_v53  ;;  %v529_v54 = vpop.f32.mrf.mxu3  ;;  %v5653_v60 = vld [vmem:[%s10499_s4 + $0x50] sm:$0xff] }
  0xef   :  { %699 = vmatpush.msrb.mxu0 %v5621_v45  ;;  %862 = vmatpush.msra.mxu1 %v4690_v57  ;;  %v535_v12 = vadd.f32 %v529_v54, %v236_v49  ;;  %v11149_v53 = vld [vmem:[#allocation69_spill] sm:$0xff] }
  0xf0   :  { %3526 = vpow2.f32 %v3475_v44  ;;  %739 = vmatpush.msrb.mxu2 %v5626_v28  ;;  %902 = vmatpush.msra.mxu3 %v4696_v58  ;;  %v5667_v58 = vld [vmem:[%s10499_s4 + $0x30] sm:$0xff] }
  0xf1   :  { %3528 = vpow2.f32 %v3476_v23  ;;  %700 = vmatpush.msrb.mxu0 %v5637_v50  ;;  %v3477_v57 = vmul.f32 -1.442695, %v535_v12  ;;  %863 = vmatpush.msra.mxu1 %v4712_v62  ;;  %v5681_v62 = vld [vmem:[%s10499_s4 + $0x10] sm:$0xff] }
  0xf2   :  { %740 = vmatpush.msrb.mxu2 %v5642_v36  ;;  %903 = vmatpush.msra.mxu3 %v4720_v63  ;;  %v5686_v63 = vld [vmem:[%s10499_s4 + $0x18] sm:$0xff] }
  0xf3   :  { %701 = vmatpush.msrb.mxu0 %v5653_v60  ;;  %3530 = vpow2.f32 %v3477_v57  ;;  %864 = vmatpush.msra.mxu1 %v4733_v2  ;;  %v5693_v2 = vperm.slane %v5509_v17, 2 }
  0xf4   :  { %741 = vmatpush.msrb.mxu2 %v5658_v40  ;;  %904 = vmatpush.msra.mxu3 %v4739_v3 }
  0xf5   :  { %702 = vmatpush.msrb.mxu0 %v5667_v58  ;;  %865 = vmatpush.msra.mxu1 %v4751_v6  ;;  %v509_v3 = vpop.f32.mrf.mxu2  ;;  %v195_v6 = vadd.f32 %v4956_v9, %v5693_v2 }
  0xf6   :  { %v3527_v44 = vpop.eup %3526  ;;  %742 = vmatpush.msrb.mxu2 %v5672_v20  ;;  %905 = vmatpush.msra.mxu3 %v4760_v8 }
  0xf7   :  { %v3529_v23 = vpop.eup %3528  ;;  %v539_v49 = vadd.f32 1.0, %v3527_v44  ;;  %703 = vmatpush.msrb.mxu0 %v5681_v62  ;;  %866 = vmatpush.msra.mxu1 %v4773_v15  ;;  %v534_v57 = vadd.f32 %v509_v3, %v195_v6 }
  0xf8   :  { %v5688_v54 = vadd.f32 1.0, %v3529_v23  ;;  %743 = vmatpush.msrb.mxu2 %v5686_v63  ;;  %906 = vmatpush.msra.mxu3 %v4784_v18 }
  0xf9   :  { %3532 = vrcp.f32 %v539_v49  ;;  %998 = vmatpush.msrb.mxu1 %v4811_v25  ;;  %v3531_v17 = vpop.eup %3530  ;;  %v549_v23 = vand.u32 2147483647, %v539_v49  ;;  %vm545_vm4 = vweird.f32 %v539_v49 }
  0xfa   :  { %3534 = vrcp.f32 %v5688_v54  ;;  %1038 = vmatpush.msrb.mxu3 %v4816_v26  ;;  %v5706_v8 = vadd.f32 1.0, %v3531_v17  ;;  %vm564_vm5 = vweird.f32 %v5688_v54 }
  0xfb   :  { %999 = vmatpush.msrb.mxu1 %v4823_v29  ;;  %v551_v29 = vand.u32 2147483648, %v539_v49  ;;  %vm550_vm7 = vcmp.eq.f32.partialorder %v549_v23, 8.507059e+37 }
  0xfc   :  { %1039 = vmatpush.msrb.mxu3 %v4828_v30  ;;  %3536 = vrcp.f32 %v5706_v8  ;;  %v570_v30 = vand.u32 2147483648, %v5688_v54  ;;  %vm584_vm11 = vweird.f32 %v5706_v8 }
  0xfd   :  { %1000 = vmatpush.msrb.mxu1 %v4833_v33  ;;  %3538 = vtanh.f32 %v534_v57 }
  0xfe   :  { %1040 = vmatpush.msrb.mxu3 %v4840_v34  ;;  %v568_v34 = vand.u32 2147483647, %v5688_v54  ;;  %v571_v6 = vor.u32 1.1754944e-38, %v570_v30  ;;  %v11115_v30 = vld [vmem:[#allocation8_spill] sm:$0xff] }
  0xff   :  { %v3533_v12 = vpop.eup %3532  ;;  %1001 = vmatpush.msrb.mxu1 %v4845_v35 }
 0x100   :  { %v3535_v15 = vpop.eup %3534  ;;  %v541_v44 = vmul.f32 %v3533_v12, %v539_v49  ;;  %1041 = vmatpush.msrb.mxu3 %v4850_v38  ;;  %vm546_vm2 = vweird.f32 %v3533_v12  ;;  %v552_v38 = vor.u32 1.1754944e-38, %v551_v29  ;;  %vm569_vm9 = vcmp.eq.f32.partialorder %v568_v34, 8.507059e+37  ;;  %v11114_v29 = vld [vmem:[#allocation7_spill] sm:$0xff] }
 0x101   :  { %v560_v18 = vmul.f32 %v3535_v15, %v5688_v54  ;;  %1002 = vmatpush.msrb.mxu1 %v4859_v39  ;;  %vm565_vm3 = vweird.f32 %v3535_v15  ;;  %vm547_vm6 = vmor %vm545_vm4, %vm546_vm2 }
 0x102   :  { %v542_v25 = vsub.f32 1.0, %v541_v44  ;;  %1042 = vmatpush.msrb.mxu3 %v4864_v42  ;;  %v3537_v3 = vpop.eup %3536  ;;  %vm566_vm8 = vmor %vm564_vm5, %vm565_vm3 }
 0x103   :  { %v561_v26 = vsub.f32 1.0, %v560_v18  ;;  %1003 = vmatpush.msrb.mxu1 %v4871_v43  ;;  %v580_v39 = vmul.f32 %v3537_v3, %v5706_v8  ;;  %v3539_v49 = vpop.eup %3538  ;;  %vm585_vm10 = vweird.f32 %v3537_v3 }
 0x104   :  { %v543_v9 = vmul.f32 %v3533_v12, %v542_v25  ;;  %1043 = vmatpush.msrb.mxu3 %v4876_v46  ;;  %v11111_v25 = vld [vmem:[#allocation4_spill] sm:$0xff]  ;;  %vm586_vm12 = vmor %vm584_vm11, %vm585_vm10 }
 0x105   :  { %v562_v33 = vmul.f32 %v3535_v15, %v561_v26  ;;  %1004 = vmatpush.msrb.mxu1 %v4881_v47  ;;  %v581_v46 = vsub.f32 1.0, %v580_v39  ;;  %v11113_v26 = vld [vmem:[#allocation6_spill] sm:$0xff] }
 0x106   :  { %v544_v35 = vadd.f32 %v3533_v12, %v543_v9  ;;  %1044 = vmatpush.msrb.mxu3 %v4888_v48  ;;  %v11116_v9 = vld [vmem:[#allocation9_spill] sm:$0xff]  ;;  %v11119_v39 = vld [vmem:[#allocation14_spill] sm:$0xff] }
 0x107   :  { %v563_v17 = vadd.f32 %v3535_v15, %v562_v33  ;;  %1005 = vmatpush.msrb.mxu1 %v4893_v51  ;;  %v590_v51 = vand.u32 2147483648, %v5706_v8 }
 0x108   :  { %v548_v42 = vsel %vm547_vm6, %v3533_v12, %v544_v35  ;;  %1045 = vmatpush.msrb.mxu3 %v4898_v52  ;;  %v582_v12 = vmul.f32 %v3537_v3, %v581_v46  ;;  %v588_v52 = vand.u32 2147483647, %v5706_v8  ;;  %v11117_v8 = vld [vmem:[#allocation12_spill] sm:$0xff]  ;;  %v11118_v35 = vld [vmem:[#allocation13_spill] sm:$0xff] }
 0x109   :  { %v553_v43 = vsel %vm550_vm7, %v552_v38, %v548_v42  ;;  %v567_v57 = vsel %vm566_vm8, %v3535_v15, %v563_v17  ;;  %1006 = vmatpush.msrb.mxu1 %v4907_v55  ;;  %v11110_v15 = vld [vmem:[#allocation3_spill] sm:$0xff]  ;;  %v11112_v55 = vld [vmem:[#allocation5_spill] sm:$0xff] }
 0x10a   :  { %v572_v54 = vsel %vm569_vm9, %v571_v6, %v567_v57  ;;  %v595_v44 = vmul.f32 %v3539_v49, %v553_v43  ;;  %1046 = vmatpush.msrb.mxu3 %v4912_v56  ;;  %v583_v48 = vadd.f32 %v3537_v3, %v582_v12  ;;  %vm589_vm13 = vcmp.eq.f32.partialorder %v588_v52, 8.507059e+37  ;;  %v5761_v38 = vld [vmem:[%s10498_s2 + $0x1f0] sm:$0xff]  ;;  %v5768_v17 = vld [vmem:[%s10498_s2 + $0x1c0] sm:$0xff] }
 0x10b   :  { %v594_v18 = vmul.f32 0.0, %v572_v54  ;;  %1007 = vmatpush.msrb.mxu1 %v4923_v61  ;;  %v591_v61 = vor.u32 1.1754944e-38, %v590_v51  ;;  %v5775_v6 = vld [vmem:[%s10498_s2 + $0x1d0] sm:$0xff]  ;;  %v11120_v42 = vld [vmem:[#allocation15_spill] sm:$0xff] }
 0x10c   :  { %1047 = vmatpush.msrb.mxu3 %v11110_v15  ;;  %v587_v56 = vsel %vm586_vm12, %v3537_v3, %v583_v48  ;;  %v5754_v3 = vld [vmem:[%s10498_s2 + $0x1e0] sm:$0xff]  ;;  %v11121_v43 = vld [vmem:[#allocation16_spill] sm:$0xff]  ;;  %v11122_v46 = vld [vmem:[#allocation17_spill] sm:$0xff] }
 0x10d   :  { %v5731_v47 = vadd.f32 %v595_v44, %v594_v18  ;;  %1008 = vmatpush.msrb.mxu1 %v11111_v25  ;;  %v592_v33 = vsel %vm589_vm13, %v591_v61, %v587_v56  ;;  %v5782_v49 = vld [vmem:[%s10498_s2 + $0x1a0] sm:$0xff]  ;;  %v5789_v57 = vld [vmem:[%s10498_s2 + $0x1b0] sm:$0xff] }
 0x10e   :  { %1048 = vmatpush.msrb.mxu3 %v11112_v55  ;;  %v5796_v54 = vld [vmem:[%s10498_s2 + $0x180] sm:$0xff]  ;;  %v11123_v44 = vld [vmem:[#allocation20_spill] sm:$0xff]  ;;  %v11126_v55 = vld [vmem:[#allocation29_spill] sm:$0xff] }
 0x10f   :  { %3540 = vtanh.f32 %v5731_v47  ;;  %1009 = vmatpush.msrb.mxu1 %v11113_v26  ;;  %v5803_v18 = vld [vmem:[%s10498_s2 + $0x190] sm:$0xff]  ;;  %v5811_v12 = vld [vmem:[%s10498_s2 + $0x160] sm:$0xff] }
 0x110   :  { %1049 = vmatpush.msrb.mxu3 %v11114_v29  ;;  %v5817_v48 = vld [vmem:[%s10498_s2 + $0x170] sm:$0xff]  ;;  %v11124_v15 = vld [vmem:[#allocation23_spill] sm:$0xff] }
 0x111   :  { %1010 = vmatpush.msrb.mxu1 %v11115_v30  ;;  %v5824_v51 = vld [vmem:[%s10498_s2 + $0x140] sm:$0xff]  ;;  %v11125_v52 = vld [vmem:[#allocation28_spill] sm:$0xff]  ;;  %v11128_v61 = vld [vmem:[#allocation33_spill] sm:$0xff] }
 0x112   :  { %1050 = vmatpush.msrb.mxu3 %v11116_v9  ;;  %v5831_v25 = vld [vmem:[%s10498_s2 + $0x150] sm:$0xff]  ;;  %v5838_v56 = vld [vmem:[%s10498_s2 + $0x120] sm:$0xff] }
 0x113   :  { %1011 = vmatpush.msrb.mxu1 %v11117_v8  ;;  %v11127_v26 = vld [vmem:[#allocation32_spill] sm:$0xff]  ;;  %v5852_v30 = vld [vmem:[%s10498_s2 + $0x100] sm:$0xff] }
 0x114   :  { %1051 = vmatpush.msrb.mxu3 %v11118_v35  ;;  %v5845_v29 = vld [vmem:[%s10498_s2 + $0x130] sm:$0xff]  ;;  %v5866_v8 = vld [vmem:[%s10498_s2 + $0xe0] sm:$0xff] }
 0x115   :  { %v3541_v23 = vpop.eup %3540  ;;  %1012 = vmatpush.msrb.mxu1 %v11119_v39  ;;  %v11129_v9 = vld [vmem:[#allocation36_spill] sm:$0xff] }
 0x116   :  { %v5745_v34 = vmul.f32 %v3541_v23, %v592_v33  ;;  %1052 = vmatpush.msrb.mxu3 %v11120_v42  ;;  %v5859_v23 = vld [vmem:[%s10498_s2 + $0x110] sm:$0xff]  ;;  %v11132_v42 = vld [vmem:[#allocation43_spill] sm:$0xff] }
 0x117   :  { %1013 = vmatpush.msrb.mxu1 %v11121_v43  ;;  %v11130_v33 = vld [vmem:[#allocation37_spill] sm:$0xff]  ;;  %v11131_v35 = vld [vmem:[#allocation40_spill] sm:$0xff]  ;;  %v5880_v43 = vld [vmem:[%s10498_s2 + $0xc0] sm:$0xff] }
 0x118   :  { %624 = vmatmul.f32.vlgmr.msra.gmra.mxu0 %v5745_v34  ;;  %664 = vmatmul.f32.vlgmr.msra.gmra.mxu2 %v5745_v34  ;;  %v5873_v39 = vld [vmem:[%s10498_s2 + $0xf0] sm:$0xff] }
 0x119   :  { %831 = vmatpush.msra.mxu0 %v5754_v3  ;;  %867 = vmatmul.f32.vlgmr.msra.gmra.mxu1 %v5745_v34 }
 0x11a   :  { %871 = vmatpush.msra.mxu2 %v5761_v38  ;;  %907 = vmatmul.f32.vlgmr.msra.gmra.mxu3 %v5745_v34 }
 0x11b   :  { %832 = vmatpush.msra.mxu0 %v5768_v17  ;;  %1053 = vmatpush.msrb.mxu3 %v11122_v46  ;;  %v11133_v46 = vld [vmem:[#allocation48_spill] sm:$0xff] }
 0x11c   :  { %872 = vmatpush.msra.mxu2 %v5775_v6  ;;  %1078 = vmatpush.msra.mxu1 %v11123_v44  ;;  %v5887_v44 = vld [vmem:[%s10498_s2 + $0xd0] sm:$0xff] }
 0x11d   :  { %833 = vmatpush.msra.mxu0 %v5782_v49  ;;  %1118 = vmatpush.msra.mxu3 %v11124_v15  ;;  %v11134_v15 = vld [vmem:[#allocation49_spill] sm:$0xff] }
 0x11e   :  { %873 = vmatpush.msra.mxu2 %v5789_v57  ;;  %1079 = vmatpush.msra.mxu1 %v11125_v52  ;;  %v5894_v52 = vld [vmem:[%s10498_s2 + $0xa0] sm:$0xff] }
 0x11f   :  { %834 = vmatpush.msra.mxu0 %v5796_v54  ;;  %1119 = vmatpush.msra.mxu3 %v11126_v55  ;;  %v11135_v55 = vld [vmem:[#allocation52_spill] sm:$0xff] }
 0x120   :  { %874 = vmatpush.msra.mxu2 %v5803_v18  ;;  %704 = vmatmul.f32.vlgmr.msrb.gmra.mxu0 %v5745_v34 }
 0x121   :  { %744 = vmatmul.f32.vlgmr.msrb.gmra.mxu2 %v5745_v34  ;;  %835 = vmatpush.msra.mxu0 %v5811_v12 }
 0x122   :  { %875 = vmatpush.msra.mxu2 %v5817_v48  ;;  %1080 = vmatpush.msra.mxu1 %v11127_v26  ;;  %v5901_v26 = vld [vmem:[%s10498_s2 + $0xb0] sm:$0xff] }
 0x123   :  { %836 = vmatpush.msra.mxu0 %v5824_v51  ;;  %1120 = vmatpush.msra.mxu3 %v11128_v61  ;;  %11136 = vst [vmem:[#allocation3_spill] sm:$0xff] %v5901_v26  ;;  %v11137_v61 = vld [vmem:[#allocation53_spill] sm:$0xff] }
 0x124   :  { %876 = vmatpush.msra.mxu2 %v5831_v25  ;;  %1081 = vmatpush.msra.mxu1 %v11129_v9  ;;  %v5908_v9 = vld [vmem:[%s10498_s2 + $0x80] sm:$0xff] }
 0x125   :  { %837 = vmatpush.msra.mxu0 %v5838_v56  ;;  %1121 = vmatpush.msra.mxu3 %v11130_v33  ;;  %11138 = vst [vmem:[#allocation4_spill] sm:$0xff] %v5908_v9  ;;  %v11139_v33 = vld [vmem:[#allocation56_spill] sm:$0xff] }
 0x126   :  { %877 = vmatpush.msra.mxu2 %v5845_v29  ;;  %1082 = vmatpush.msra.mxu1 %v11131_v35  ;;  %v5915_v35 = vld [vmem:[%s10498_s2 + $0x90] sm:$0xff] }
 0x127   :  { %838 = vmatpush.msra.mxu0 %v5852_v30  ;;  %1122 = vmatpush.msra.mxu3 %v11132_v42  ;;  %11140 = vst [vmem:[#allocation5_spill] sm:$0xff] %v5915_v35  ;;  %v11141_v42 = vld [vmem:[#allocation57_spill] sm:$0xff] }
 0x128   :  { %878 = vmatpush.msra.mxu2 %v5859_v23  ;;  %1083 = vmatpush.msra.mxu1 %v11133_v46  ;;  %v5922_v46 = vld [vmem:[%s10498_s2 + $0x60] sm:$0xff] }
 0x129   :  { %839 = vmatpush.msra.mxu0 %v5866_v8  ;;  %1123 = vmatpush.msra.mxu3 %v11134_v15  ;;  %11142 = vst [vmem:[#allocation6_spill] sm:$0xff] %v5922_v46  ;;  %v11143_v15 = vld [vmem:[#allocation60_spill] sm:$0xff] }
 0x12a   :  { %879 = vmatpush.msra.mxu2 %v5873_v39  ;;  %1084 = vmatpush.msra.mxu1 %v11135_v55  ;;  %v5929_v55 = vld [vmem:[%s10498_s2 + $0x70] sm:$0xff] }
 0x12b   :  { %840 = vmatpush.msra.mxu0 %v5880_v43  ;;  %1124 = vmatpush.msra.mxu3 %v11137_v61  ;;  %11144 = vst [vmem:[#allocation7_spill] sm:$0xff] %v5929_v55  ;;  %v11145_v61 = vld [vmem:[#allocation63_spill] sm:$0xff] }
 0x12c   :  { %880 = vmatpush.msra.mxu2 %v5887_v44  ;;  %1085 = vmatpush.msra.mxu1 %v11139_v33  ;;  %v5936_v33 = vld [vmem:[%s10498_s2 + $0x40] sm:$0xff] }
 0x12d   :  { %841 = vmatpush.msra.mxu0 %v5894_v52  ;;  %1125 = vmatpush.msra.mxu3 %v11141_v42  ;;  %11146 = vst [vmem:[#allocation8_spill] sm:$0xff] %v5936_v33  ;;  %v11147_v42 = vld [vmem:[#allocation68_spill] sm:$0xff] }
 0x12e   :  { %881 = vmatpush.msra.mxu2 %v5901_v26  ;;  %1086 = vmatpush.msra.mxu1 %v11143_v15  ;;  %v5943_v15 = vld [vmem:[%s10498_s2 + $0x50] sm:$0xff]  ;;  %v11166_v26 = vld [vmem:[#allocation31_spill] sm:$0xff] }
 0x12f   :  { %842 = vmatpush.msra.mxu0 %v5908_v9  ;;  %1126 = vmatpush.msra.mxu3 %v11145_v61  ;;  %11148 = vst [vmem:[#allocation9_spill] sm:$0xff] %v5943_v15  ;;  %v5950_v61 = vld [vmem:[%s10498_s2 + $0x20] sm:$0xff] }
 0x130   :  { %882 = vmatpush.msra.mxu2 %v5915_v35  ;;  %1087 = vmatpush.msra.mxu1 %v11147_v42  ;;  %11150 = vst [vmem:[#allocation12_spill] sm:$0xff] %v5950_v61  ;;  %v5957_v42 = vld [vmem:[%s10498_s2 + $0x30] sm:$0xff]  ;;  %v11164_v9 = vld [vmem:[#allocation30_spill] sm:$0xff] }
 0x131   :  { %843 = vmatpush.msra.mxu0 %v5922_v46  ;;  %1127 = vmatpush.msra.mxu3 %v11149_v53  ;;  %11152 = vst [vmem:[#allocation13_spill] sm:$0xff] %v5957_v42  ;;  %v5964_v53 = vld [vmem:[%s10498_s2] sm:$0xff]  ;;  %v11163_v35 = vld [vmem:[#allocation84_spill] sm:$0xff] }
 0x132   :  { %883 = vmatpush.msra.mxu2 %v5929_v55  ;;  %v11151_v55 = vld [vmem:[#allocation72_spill] sm:$0xff]  ;;  %11154 = vst [vmem:[#allocation14_spill] sm:$0xff] %v5964_v53  ;;  %v11162_v46 = vld [vmem:[#allocation27_spill] sm:$0xff] }
 0x133   :  { %844 = vmatpush.msra.mxu0 %v5936_v33  ;;  %1088 = vmatpush.msra.mxu1 %v11151_v55  ;;  %v11153_v33 = vld [vmem:[#allocation73_spill] sm:$0xff] }
 0x134   :  { %884 = vmatpush.msra.mxu2 %v5943_v15  ;;  %1128 = vmatpush.msra.mxu3 %v11153_v33  ;;  %v11155_v15 = vld [vmem:[#allocation76_spill] sm:$0xff]  ;;  %v11157_v33 = vld [vmem:[#allocation18_spill] sm:$0xff] }
 0x135   :  { %845 = vmatpush.msra.mxu0 %v5950_v61  ;;  %1089 = vmatpush.msra.mxu1 %v11155_v15  ;;  %v5971_v55 = vld [vmem:[%s10498_s2 + $0x10] sm:$0xff] }
 0x136   :  { %885 = vmatpush.msra.mxu2 %v5957_v42  ;;  %11156 = vst [vmem:[#allocation15_spill] sm:$0xff] %v5971_v55  ;;  %v11158_v42 = vld [vmem:[#allocation19_spill] sm:$0xff]  ;;  %v11159_v61 = vld [vmem:[#allocation77_spill] sm:$0xff] }
 0x137   :  { %846 = vmatpush.msra.mxu0 %v5964_v53  ;;  %1129 = vmatpush.msra.mxu3 %v11159_v61  ;;  %v11160_v53 = vld [vmem:[#allocation26_spill] sm:$0xff]  ;;  %v11161_v15 = vld [vmem:[#allocation81_spill] sm:$0xff]  ;;  %v11170_v61 = vld [vmem:[#allocation35_spill] sm:$0xff] }
 0x138   :  { %886 = vmatpush.msra.mxu2 %v5971_v55  ;;  %847 = vmatmul.f32.vlgmr.msra.gmra.mxu0 %v5745_v34  ;;  %v11165_v55 = vld [vmem:[#allocation88_spill] sm:$0xff] }
 0x139   :  { %887 = vmatmul.f32.vlgmr.msra.gmra.mxu2 %v5745_v34  ;;  %978 = vmatpush.msrb.mxu0 %v11157_v33  ;;  %v11167_v34 = vld [vmem:[#allocation89_spill] sm:$0xff]  ;;  %v11168_v33 = vld [vmem:[#allocation34_spill] sm:$0xff] }
 0x13a   :  { %1018 = vmatpush.msrb.mxu2 %v11158_v42  ;;  %1090 = vmatpush.msra.mxu1 %v11161_v15  ;;  %v11169_v42 = vld [vmem:[#allocation92_spill] sm:$0xff]  ;;  %v11172_v15 = vld [vmem:[#allocation38_spill] sm:$0xff] }
 0x13b   :  { %979 = vmatpush.msrb.mxu0 %v11160_v53  ;;  %1130 = vmatpush.msra.mxu3 %v11163_v35  ;;  %v11171_v53 = vld [vmem:[#allocation93_spill] sm:$0xff]  ;;  %v11173_v35 = vld [vmem:[#allocation39_spill] sm:$0xff] }
 0x13c   :  { %1019 = vmatpush.msrb.mxu2 %v11162_v46  ;;  %1091 = vmatpush.msra.mxu1 %v11165_v55  ;;  %v11176_v46 = vld [vmem:[#allocation50_spill] sm:$0xff]  ;;  %v11177_v55 = vld [vmem:[#allocation51_spill] sm:$0xff] }
 0x13d   :  { %980 = vmatpush.msrb.mxu0 %v11164_v9  ;;  %1131 = vmatpush.msra.mxu3 %v11167_v34  ;;  %v11174_v9 = vld [vmem:[#allocation46_spill] sm:$0xff] }
 0x13e   :  { %1020 = vmatpush.msrb.mxu2 %v11166_v26  ;;  %1092 = vmatpush.msra.mxu1 %v11169_v42  ;;  %v11175_v26 = vld [vmem:[#allocation47_spill] sm:$0xff]  ;;  %v11178_v34 = vld [vmem:[#allocation54_spill] sm:$0xff] }
 0x13f   :  { %981 = vmatpush.msrb.mxu0 %v11168_v33  ;;  %1132 = vmatpush.msra.mxu3 %v11171_v53  ;;  %v11179_v33 = vld [vmem:[#allocation55_spill] sm:$0xff]  ;;  %v11180_v42 = vld [vmem:[#allocation58_spill] sm:$0xff] }
 0x140   :  { %1021 = vmatpush.msrb.mxu2 %v11170_v61  ;;  %1093 = vmatpush.msra.mxu1 %v5419_v22  ;;  %v11181_v61 = vld [vmem:[#allocation59_spill] sm:$0xff]  ;;  %v11182_v22 = vld [vmem:[#allocation66_spill] sm:$0xff] }
 0x141   :  { %982 = vmatpush.msrb.mxu0 %v11172_v15  ;;  %1133 = vmatpush.msra.mxu3 %v5426_v21  ;;  %v11183_v53 = vld [vmem:[#allocation67_spill] sm:$0xff]  ;;  %v11184_v21 = vld [vmem:[#allocation70_spill] sm:$0xff] }
 0x142   :  { %1022 = vmatpush.msrb.mxu2 %v11173_v35  ;;  %v11185_v15 = vld [vmem:[#allocation71_spill] sm:$0xff]  ;;  %v11186_v35 = vld [vmem:[#allocation74_spill] sm:$0xff] }
 0x143   :  { %983 = vmatpush.msrb.mxu0 %v11174_v9  ;;  %v11187_v9 = vld [vmem:[#allocation75_spill] sm:$0xff] }
 0x144   :  { %1023 = vmatpush.msrb.mxu2 %v11175_v26  ;;  %v11188_v26 = vld [vmem:[#allocation79_spill] sm:$0xff] }
 0x145   :  { %984 = vmatpush.msrb.mxu0 %v11176_v46  ;;  %v11189_v46 = vld [vmem:[#allocation80_spill] sm:$0xff] }
 0x146   :  { %1024 = vmatpush.msrb.mxu2 %v11177_v55  ;;  %v11190_v55 = vld [vmem:[#allocation86_spill] sm:$0xff] }
 0x147   :  { %985 = vmatpush.msrb.mxu0 %v11178_v34  ;;  %v11191_v34 = vld [vmem:[#allocation87_spill] sm:$0xff] }
 0x148   :  { %1025 = vmatpush.msrb.mxu2 %v11179_v33  ;;  %v11192_v33 = vld [vmem:[#allocation90_spill] sm:$0xff] }
 0x149   :  { %986 = vmatpush.msrb.mxu0 %v11180_v42  ;;  %v11193_v42 = vld [vmem:[#allocation91_spill] sm:$0xff] }
 0x14a   :  { %1026 = vmatpush.msrb.mxu2 %v11181_v61  ;;  %v11194_v61 = vld [vmem:[#allocation94_spill] sm:$0xff] }
 0x14b   :  { %987 = vmatpush.msrb.mxu0 %v11182_v22  ;;  %v11195_v22 = vld [vmem:[#allocation95_spill] sm:$0xff] }
 0x14c   :  { %1027 = vmatpush.msrb.mxu2 %v11183_v53  ;;  %v11196_v53 = vld [vmem:[#allocation96_spill] sm:$0xff] }
 0x14d   :  { %988 = vmatpush.msrb.mxu0 %v11184_v21  ;;  %v11197_v21 = vld [vmem:[#allocation101_spill] sm:$0xff] }
 0x14e   :  { %1028 = vmatpush.msrb.mxu2 %v11185_v15  ;;  %v11198_v15 = vld [vmem:[#allocation105_spill] sm:$0xff] }
 0x14f   :  { %989 = vmatpush.msrb.mxu0 %v11186_v35 }
 0x150   :  { %1029 = vmatpush.msrb.mxu2 %v11187_v9 }
 0x151   :  { %990 = vmatpush.msrb.mxu0 %v11188_v26 }
 0x152   :  { %1030 = vmatpush.msrb.mxu2 %v11189_v46 }
 0x153   :  { %991 = vmatpush.msrb.mxu0 %v11190_v55 }
 0x154   :  { %1031 = vmatpush.msrb.mxu2 %v11191_v34 }
 0x155   :  { %992 = vmatpush.msrb.mxu0 %v11192_v33 }
 0x156   :  { %1032 = vmatpush.msrb.mxu2 %v11193_v42  ;;  %v11207_v42 = vld [vmem:[#allocation22_spill] sm:$0xff] }
 0x157   :  { %993 = vmatpush.msrb.mxu0 %v11194_v61  ;;  %v239_v61 = vadd.f32 %v11207_v42, %v5600_v41 }
 0x158   :  { %1033 = vmatpush.msrb.mxu2 %v11195_v22 }
 0x159   :  { %1058 = vmatpush.msra.mxu0 %v5431_v5  ;;  %v11199_v5 = vld [vmem:[#allocation106_spill] sm:$0xff] }
 0x15a   :  { %1098 = vmatpush.msra.mxu2 %v11196_v53 }
 0x15b   :  { %1059 = vmatpush.msra.mxu0 %v5451_v0  ;;  %v11200_v0 = vld [vmem:[#allocation107_spill] sm:$0xff] }
 0x15c   :  { %1099 = vmatpush.msra.mxu2 %v5456_v4  ;;  %v11201_v4 = vld [vmem:[#allocation110_spill] sm:$0xff] }
 0x15d   :  { %1060 = vmatpush.msra.mxu0 %v5465_v1  ;;  %v11202_v1 = vld [vmem:[#allocation111_spill] sm:$0xff] }
 0x15e   :  { %1100 = vmatpush.msra.mxu2 %v5470_v7  ;;  %v645_v7 = vpop.f32.mrf.mxu1 }
 0x15f   :  { %1061 = vmatpush.msra.mxu0 %v5481_v10  ;;  %v451_v10 = vld [vmem:[%s10501_s5] sm:$0xf] }
 0x160   :  { %1101 = vmatpush.msra.mxu2 %v11197_v21  ;;  %v6065_v53 = vperm.slane %v451_v10, 2 }
 0x161   :  { %1062 = vmatpush.msra.mxu0 %v5495_v13 }
 0x162   :  { %1102 = vmatpush.msra.mxu2 %v5500_v14  ;;  %v6052_v14 = vperm.slane %v451_v10, 0  ;;  %11208 = vst [vmem:[#allocation23_spill] sm:$0xff] %v6065_v53 }
 0x163   :  { %1063 = vmatpush.msra.mxu0 %v11198_v15 }
 0x164   :  { %1103 = vmatpush.msra.mxu2 %v11199_v5  ;;  %11203 = vst [vmem:[#allocation16_spill] sm:$0xff] %v6052_v14 }
 0x165   :  { %1064 = vmatpush.msra.mxu0 %v5534_v24 }
 0x166   :  { %1104 = vmatpush.msra.mxu2 %v11200_v0  ;;  %v725_v13 = vpop.f32.mrf.mxu1 }
 0x167   :  { %1065 = vmatpush.msra.mxu0 %v11201_v4 }
 0x168   :  { %1105 = vmatpush.msra.mxu2 %v11202_v1 }
 0x169   :  { %1066 = vmatpush.msra.mxu0 %v5570_v31 }
 0x16a   :  { %1106 = vmatpush.msra.mxu2 %v5575_v32 }
 0x16b   :  { %1067 = vmatpush.msra.mxu0 %v5590_v19  ;;  %v685_v19 = vpop.f32.mrf.mxu3 }
 0x16c   :  { %1107 = vmatpush.msra.mxu2 %v5595_v59 }
 0x16d   :  { %1068 = vmatpush.msra.mxu0 %v5607_v37  ;;  %v6055_v37 = vperm.slane %v451_v10, 1 }
 0x16e   :  { %1108 = vmatpush.msra.mxu2 %v5612_v16 }
 0x16f   :  { %1069 = vmatpush.msra.mxu0 %v5621_v45  ;;  %11204 = vst [vmem:[#allocation17_spill] sm:$0xff] %v6055_v37 }
 0x170   :  { %1109 = vmatpush.msra.mxu2 %v5626_v28 }
 0x171   :  { %1070 = vmatpush.msra.mxu0 %v5637_v50  ;;  %v11205_v50 = vld [vmem:[#allocation11_spill] sm:$0xff] }
 0x172   :  { %1110 = vmatpush.msra.mxu2 %v5642_v36  ;;  %v157_v36 = vadd.f32 %v11205_v50, %v5545_v27 }
 0x173   :  { %1071 = vmatpush.msra.mxu0 %v5653_v60  ;;  %v765_v60 = vpop.f32.mrf.mxu3 }
 0x174   :  { %1111 = vmatpush.msra.mxu2 %v5658_v40 }
 0x175   :  { %1072 = vmatpush.msra.mxu0 %v5667_v58 }
 0x176   :  { %1112 = vmatpush.msra.mxu2 %v5672_v20 }
 0x177   :  { %1073 = vmatpush.msra.mxu0 %v5681_v62 }
 0x178   :  { %1113 = vmatpush.msra.mxu2 %v5686_v63  ;;  %v6060_v63 = vperm.slane %v451_v10, 3 }
 0x17a   :  { %11206 = vst [vmem:[#allocation20_spill] sm:$0xff] %v6060_v63 }
 0x195   :  { %v625_v24 = vpop.f32.mrf.mxu0 }
 0x196   :  { %v626_v31 = vadd.f32 %v625_v24, %v6052_v14  ;;  %v868_v45 = vpop.f32.mrf.mxu1 }
 0x197   :  { %v912_v58 = vadd.f32 %v868_v45, %v157_v36 }
 0x198   :  { %v646_v32 = vadd.f32 %v645_v7, %v626_v31 }
 0x199   :  { %v3482_v9 = vmul.f32 -1.442695, %v912_v58 }
 0x19a   :  { %v3478_v59 = vmul.f32 -1.442695, %v646_v32 }
 0x19b   :  { %v665_v16 = vpop.f32.mrf.mxu2 }
 0x19c   :  { %3542 = vpow2.f32 %v3478_v59  ;;  %v666_v28 = vadd.f32 %v665_v16, %v6055_v37 }
 0x19d   :  { %v908_v34 = vpop.f32.mrf.mxu3  ;;  %v705_v21 = vpop.f32.mrf.mxu0 }
 0x19e   :  { %v686_v40 = vadd.f32 %v685_v19, %v666_v28  ;;  %v914_v0 = vadd.f32 %v908_v34, %v239_v61  ;;  %v706_v7 = vadd.f32 %v705_v21, %v6065_v53  ;;  %v11209_v28 = vld [vmem:[#allocation10_spill] sm:$0xff] }
 0x19f   :  { %v116_v50 = vadd.f32 %v11209_v28, %v5542_v11 }
 0x1a0   :  { %v3479_v20 = vmul.f32 -1.442695, %v686_v40  ;;  %v3483_v24 = vmul.f32 -1.442695, %v914_v0  ;;  %v726_v16 = vadd.f32 %v725_v13, %v706_v7 }
 0x1a2   :  { %v3543_v62 = vpop.eup %3542  ;;  %3544 = vpow2.f32 %v3479_v20 }
 0x1a3   :  { %v771_v35 = vadd.f32 1.0, %v3543_v62 }
 0x1a4   :  { %v745_v26 = vpop.f32.mrf.mxu2 }
 0x1a5   :  { %3546 = vrcp.f32 %v771_v35  ;;  %v746_v46 = vadd.f32 %v745_v26, %v6060_v63  ;;  %v783_v36 = vand.u32 2147483648, %v771_v35  ;;  %vm777_vm15 = vweird.f32 %v771_v35 }
 0x1a6   :  { %3548 = vpow2.f32 %v3482_v9  ;;  %v781_v58 = vand.u32 2147483647, %v771_v35 }
 0x1a7   :  { %v766_v33 = vadd.f32 %v765_v60, %v746_v46 }
 0x1a8   :  { %v3545_v55 = vpop.eup %3544  ;;  %vm782_vm3 = vcmp.eq.f32.partialorder %v781_v58, 8.507059e+37 }
 0x1a9   :  { %v790_v22 = vadd.f32 1.0, %v3545_v55  ;;  %v3480_v15 = vmul.f32 -1.442695, %v766_v33  ;;  %v784_v33 = vor.u32 1.1754944e-38, %v783_v36 }
 0x1ab   :  { %v3547_v5 = vpop.eup %3546  ;;  %3550 = vrcp.f32 %v790_v22  ;;  %v802_v20 = vand.u32 2147483648, %v790_v22  ;;  %v800_v13 = vand.u32 2147483647, %v790_v22  ;;  %vm796_vm2 = vweird.f32 %v790_v22 }
 0x1ac   :  { %v773_v4 = vmul.f32 %v3547_v5, %v771_v35  ;;  %v3549_v1 = vpop.eup %3548  ;;  %3552 = vpow2.f32 %v3480_v15  ;;  %vm778_vm14 = vweird.f32 %v3547_v5 }
 0x1ad   :  { %v6068_v31 = vadd.f32 1.0, %v3549_v1  ;;  %3554 = vpow2.f32 %v3483_v24  ;;  %vm6073_vm0 = vmor %vm777_vm15, %vm778_vm14  ;;  %v803_v21 = vor.u32 1.1754944e-38, %v802_v20  ;;  %vm801_vm5 = vcmp.eq.f32.partialorder %v800_v13, 8.507059e+37 }
 0x1ae   :  { %v774_v19 = vsub.f32 1.0, %v773_v4 }
 0x1af   :  { %3556 = vrcp.f32 %v6068_v31  ;;  %vm943_vm11 = vweird.f32 %v6068_v31 }
 0x1b0   :  { %v775_v32 = vmul.f32 %v3547_v5, %v774_v19  ;;  %3558 = vtanh.f32 %v726_v16 }
 0x1b1   :  { %v3551_v59 = vpop.eup %3550 }
 0x1b2   :  { %v792_v45 = vmul.f32 %v3551_v59, %v790_v22  ;;  %v776_v10 = vadd.f32 %v3547_v5, %v775_v32  ;;  %v3553_v60 = vpop.eup %3552  ;;  %vm797_vm1 = vweird.f32 %v3551_v59 }
 0x1b3   :  { %v810_v9 = vadd.f32 1.0, %v3553_v60  ;;  %v3555_v61 = vpop.eup %3554  ;;  %vm798_vm4 = vmor %vm796_vm2, %vm797_vm1 }
 0x1b4   :  { %v793_v40 = vsub.f32 1.0, %v792_v45  ;;  %v780_v55 = vsel %vm6073_vm0, %v3547_v5, %v776_v10  ;;  %v6081_v32 = vadd.f32 1.0, %v3555_v61 }
 0x1b5   :  { %v848_v26 = vpop.f32.mrf.mxu0  ;;  %3560 = vrcp.f32 %v810_v9  ;;  %v785_v15 = vsel %vm782_vm3, %v784_v33, %v780_v55  ;;  %v6079_v0 = vpop.eup %3556  ;;  %vm816_vm7 = vweird.f32 %v810_v9 }
 0x1b6   :  { %v794_v46 = vmul.f32 %v3551_v59, %v793_v40  ;;  %v911_v34 = vadd.f32 %v848_v26, %v116_v50  ;;  %v3559_v1 = vpop.eup %3558  ;;  %v939_v22 = vmul.f32 %v6079_v0, %v6068_v31  ;;  %v822_v50 = vand.u32 2147483648, %v810_v9 }
 0x1b7   :  { %v827_v19 = vmul.f32 %v3559_v1, %v785_v15  ;;  %v820_v40 = vand.u32 2147483647, %v810_v9  ;;  %vm944_vm10 = vweird.f32 %v6079_v0  ;;  %vm963_vm3 = vweird.f32 %v6081_v32 }
 0x1b8   :  { %v795_v35 = vadd.f32 %v3551_v59, %v794_v46  ;;  %v3481_v42 = vmul.f32 -1.442695, %v911_v34  ;;  %v940_v36 = vsub.f32 1.0, %v939_v22  ;;  %v823_v20 = vor.u32 1.1754944e-38, %v822_v50  ;;  %v11212_v34 = vld [vmem:[#allocation21_spill] sm:$0xff]  ;;  %vm6117_vm12 = vmor %vm943_vm11, %vm944_vm10 }
 0x1b9   :  { %vm821_vm9 = vcmp.eq.f32.partialorder %v820_v40, 8.507059e+37  ;;  %v198_v33 = vadd.f32 %v11212_v34, %v5693_v2  ;;  %v969_v22 = vand.u32 2147483648, %v6081_v32 }
 0x1ba   :  { %v799_v4 = vsel %vm798_vm4, %v3551_v59, %v795_v35  ;;  %3562 = vpow2.f32 %v3481_v42  ;;  %v941_v13 = vmul.f32 %v6079_v0, %v940_v36 }
 0x1bb   :  { %v804_v7 = vsel %vm801_vm5, %v803_v21, %v799_v4  ;;  %v3561_v24 = vpop.eup %3560  ;;  %v949_v4 = vand.u32 2147483648, %v6068_v31 }
 0x1bc   :  { %v826_v5 = vmul.f32 0.0, %v804_v7  ;;  %v812_v45 = vmul.f32 %v3561_v24, %v810_v9  ;;  %vm817_vm6 = vweird.f32 %v3561_v24  ;;  %v888_v26 = vpop.f32.mrf.mxu2  ;;  %v942_v15 = vadd.f32 %v6079_v0, %v941_v13  ;;  %v6106_v7 = vld [vmem:[%s10498_s2 + $0x1e8] sm:$0xff] }
 0x1bd   :  { %vm818_vm8 = vmor %vm816_vm7, %vm817_vm6  ;;  %v913_v21 = vadd.f32 %v888_v26, %v198_v33  ;;  %v6154_v26 = vld [vmem:[%s10498_s2 + $0x188] sm:$0xff] }
 0x1be   :  { %v6085_v16 = vadd.f32 %v827_v19, %v826_v5  ;;  %v813_v28 = vsub.f32 1.0, %v812_v45  ;;  %v6112_v5 = vld [vmem:[%s10498_s2 + $0x1f8] sm:$0xff]  ;;  %v946_v36 = vsel %vm6117_vm12, %v6079_v0, %v942_v15  ;;  %v6180_v15 = vld [vmem:[%s10498_s2 + $0x148] sm:$0xff] }
 0x1c0   :  { %v3563_v10 = vpop.eup %3562  ;;  %3564 = vtanh.f32 %v6085_v16  ;;  %v814_v60 = vmul.f32 %v3561_v24, %v813_v28  ;;  %v6131_v28 = vld [vmem:[%s10498_s2 + $0x1d8] sm:$0xff] }
 0x1c1   :  { %3566 = vrcp.f32 %v6081_v32  ;;  %v6089_v59 = vadd.f32 1.0, %v3563_v10  ;;  %v6125_v10 = vld [vmem:[%s10498_s2 + $0x1c8] sm:$0xff] }
 0x1c2   :  { %v815_v58 = vadd.f32 %v3561_v24, %v814_v60  ;;  %v950_v60 = vor.u32 1.1754944e-38, %v949_v4  ;;  %v6186_v4 = vld [vmem:[%s10498_s2 + $0x158] sm:$0xff] }
 0x1c3   :  { %3568 = vrcp.f32 %v6089_v59  ;;  %v930_v45 = vand.u32 2147483648, %v6089_v59  ;;  %v928_v50 = vand.u32 2147483647, %v6089_v59  ;;  %vm924_vm14 = vweird.f32 %v6089_v59 }
 0x1c4   :  { %v819_v46 = vsel %vm818_vm8, %v3561_v24, %v815_v58  ;;  %v947_v24 = vand.u32 2147483647, %v6068_v31  ;;  %3570 = vtanh.f32 %v913_v21  ;;  %v6141_v58 = vld [vmem:[%s10498_s2 + $0x1a8] sm:$0xff] }
 0x1c5   :  { %v824_v35 = vsel %vm821_vm9, %v823_v20, %v819_v46  ;;  %v6147_v20 = vld [vmem:[%s10498_s2 + $0x1b8] sm:$0xff]  ;;  %v931_v0 = vor.u32 1.1754944e-38, %v930_v45  ;;  %vm929_vm1 = vcmp.eq.f32.partialorder %v928_v50, 8.507059e+37  ;;  %v6167_v21 = vld [vmem:[%s10498_s2 + $0x168] sm:$0xff]  ;;  %v967_v45 = vand.u32 2147483647, %v6081_v32 }
 0x1c6   :  { %v3565_v62 = vpop.eup %3564  ;;  %vm948_vm15 = vcmp.eq.f32.partialorder %v947_v24, 8.507059e+37  ;;  %v6160_v46 = vld [vmem:[%s10498_s2 + $0x198] sm:$0xff] }
 0x1c7   :  { %v6093_v55 = vpop.eup %3566  ;;  %v830_v42 = vmul.f32 %v3565_v62, %v824_v35  ;;  %v951_v13 = vsel %vm948_vm15, %v950_v60, %v946_v36  ;;  %v6202_v24 = vld [vmem:[%s10498_s2 + $0x138] sm:$0xff]  ;;  %vm968_vm5 = vcmp.eq.f32.partialorder %v967_v45, 8.507059e+37  ;;  %v6431_v45 = vld [vmem:[%s10499_s4 + $0x328] sm:$0xff] }
 0x1c8   :  { %v959_v1 = vmul.f32 %v6093_v55, %v6081_v32  ;;  %vm964_vm2 = vweird.f32 %v6093_v55  ;;  %v6218_v50 = vld [vmem:[%s10498_s2 + $0x118] sm:$0xff]  ;;  %v6225_v32 = vld [vmem:[%s10498_s2 + $0xe8] sm:$0xff]  ;;  %11228 = vst [vmem:[#allocation52_spill] sm:$0xff] %v6431_v45 }
 0x1c9   :  { %v3569_v61 = vpop.eup %3568  ;;  %1014 = vmatmul.f32.vlgmr.msrb.gmra.mxu1 %v830_v42  ;;  %1054 = vmatmul.f32.vlgmr.msrb.gmra.mxu3 %v830_v42  ;;  %vm965_vm4 = vmor %vm963_vm3, %vm964_vm2  ;;  %v6231_v60 = vld [vmem:[%s10498_s2 + $0xf8] sm:$0xff] }
 0x1ca   :  { %v920_v9 = vmul.f32 %v3569_v61, %v6089_v59  ;;  %1221 = vmatpush.msrb.mxu1 %v6106_v7  ;;  %1261 = vmatpush.msrb.mxu3 %v6112_v5  ;;  %vm925_vm13 = vweird.f32 %v3569_v61  ;;  %v960_v40 = vsub.f32 1.0, %v959_v1  ;;  %v3571_v59 = vpop.eup %3570 }
 0x1cb   :  { %vm926_vm0 = vmor %vm924_vm14, %vm925_vm13 }
 0x1cc   :  { %v921_v19 = vsub.f32 1.0, %v920_v9  ;;  %1222 = vmatpush.msrb.mxu1 %v6125_v10  ;;  %1262 = vmatpush.msrb.mxu3 %v6131_v28  ;;  %v961_v33 = vmul.f32 %v6093_v55, %v960_v40  ;;  %v6173_v9 = vld [vmem:[%s10498_s2 + $0x178] sm:$0xff]  ;;  %v970_v40 = vor.u32 1.1754944e-38, %v969_v22 }
 0x1cd   :  { %v11227_v22 = vld [vmem:[#allocation5_spill] sm:$0xff] }
 0x1ce   :  { %v922_v31 = vmul.f32 %v3569_v61, %v921_v19  ;;  %1223 = vmatpush.msrb.mxu1 %v6141_v58  ;;  %1263 = vmatpush.msrb.mxu3 %v6147_v20  ;;  %v962_v19 = vadd.f32 %v6093_v55, %v961_v33  ;;  %v6257_v33 = vld [vmem:[%s10498_s2 + $0xb8] sm:$0xff] }
 0x1d0   :  { %v923_v62 = vadd.f32 %v3569_v61, %v922_v31  ;;  %1224 = vmatpush.msrb.mxu1 %v6154_v26  ;;  %1264 = vmatpush.msrb.mxu3 %v6160_v46  ;;  %v6212_v31 = vld [vmem:[%s10498_s2 + $0x108] sm:$0xff]  ;;  %v966_v36 = vsel %vm965_vm4, %v6093_v55, %v962_v19  ;;  %v6285_v19 = vld [vmem:[%s10498_s2 + $0x78] sm:$0xff] }
 0x1d1   :  { %1094 = vmatmul.f32.vlgmr.msra.gmra.mxu1 %v830_v42  ;;  %1134 = vmatmul.f32.vlgmr.msra.gmra.mxu3 %v830_v42  ;;  %v973_v42 = vmul.f32 %v951_v13, %v5731_v47  ;;  %v6196_v47 = vld [vmem:[%s10498_s2 + $0x128] sm:$0xff]  ;;  %v971_v13 = vsel %vm968_vm5, %v970_v40, %v966_v36  ;;  %v11229_v36 = vld [vmem:[#allocation6_spill] sm:$0xff] }
 0x1d2   :  { %v927_v34 = vsel %vm926_vm0, %v3569_v61, %v923_v62  ;;  %1225 = vmatpush.msrb.mxu1 %v6167_v21  ;;  %1265 = vmatpush.msrb.mxu3 %v6173_v9  ;;  %v6237_v55 = vld [vmem:[%s10498_s2 + $0xc8] sm:$0xff]  ;;  %v6243_v62 = vld [vmem:[%s10498_s2 + $0xd8] sm:$0xff]  ;;  %v6438_v40 = vld [vmem:[%s10499_s4 + $0x300] sm:$0xff] }
 0x1d3   :  { %v932_v35 = vsel %vm929_vm1, %v931_v0, %v927_v34  ;;  %11230 = vst [vmem:[#allocation53_spill] sm:$0xff] %v6438_v40 }
 0x1d4   :  { %v974_v61 = vmul.f32 %v3571_v59, %v932_v35  ;;  %1226 = vmatpush.msrb.mxu1 %v6180_v15  ;;  %1266 = vmatpush.msrb.mxu3 %v6186_v4  ;;  %v6251_v59 = vld [vmem:[%s10498_s2 + $0xa8] sm:$0xff] }
 0x1d5   :  { %v6263_v35 = vld [vmem:[%s10498_s2 + $0x88] sm:$0xff] }
 0x1d6   :  { %v6189_v1 = vadd.f32 %v974_v61, %v973_v42  ;;  %1227 = vmatpush.msrb.mxu1 %v6196_v47  ;;  %1267 = vmatpush.msrb.mxu3 %v6202_v24  ;;  %v6269_v42 = vld [vmem:[%s10498_s2 + $0x98] sm:$0xff]  ;;  %v6279_v61 = vld [vmem:[%s10498_s2 + $0x68] sm:$0xff] }
 0x1d8   :  { %3572 = vtanh.f32 %v6189_v1  ;;  %1228 = vmatpush.msrb.mxu1 %v6212_v31  ;;  %1268 = vmatpush.msrb.mxu3 %v6218_v50 }
 0x1da   :  { %1229 = vmatpush.msrb.mxu1 %v6225_v32  ;;  %1269 = vmatpush.msrb.mxu3 %v6231_v60 }
 0x1dc   :  { %1230 = vmatpush.msrb.mxu1 %v6237_v55  ;;  %1270 = vmatpush.msrb.mxu3 %v6243_v62 }
 0x1de   :  { %v3573_v0 = vpop.eup %3572  ;;  %1231 = vmatpush.msrb.mxu1 %v6251_v59  ;;  %1271 = vmatpush.msrb.mxu3 %v6257_v33 }
 0x1df   :  { %v6246_v34 = vmul.f32 %v3573_v0, %v971_v13  ;;  %v11231_v0 = vld [vmem:[#allocation7_spill] sm:$0xff] }
 0x1e0   :  { %1232 = vmatpush.msrb.mxu1 %v6263_v35  ;;  %1272 = vmatpush.msrb.mxu3 %v6269_v42  ;;  %v6445_v13 = vld [vmem:[%s10499_s4 + $0x308] sm:$0xff] }
 0x1e1   :  { %994 = vmatmul.f32.vlgmr.msrb.gmra.mxu0 %v6246_v34  ;;  %1034 = vmatmul.f32.vlgmr.msrb.gmra.mxu2 %v6246_v34  ;;  %11232 = vst [vmem:[#allocation56_spill] sm:$0xff] %v6445_v13 }
 0x1e2   :  { %1201 = vmatpush.msrb.mxu0 %v5754_v3  ;;  %1241 = vmatpush.msrb.mxu2 %v5761_v38  ;;  %v6293_v3 = vld [vmem:[%s10498_s2 + $0x48] sm:$0xff]  ;;  %v6299_v38 = vld [vmem:[%s10498_s2 + $0x58] sm:$0xff] }
 0x1e3   :  { %1233 = vmatpush.msrb.mxu1 %v6279_v61  ;;  %1273 = vmatpush.msrb.mxu3 %v6285_v19 }
 0x1e4   :  { %1202 = vmatpush.msrb.mxu0 %v5768_v17  ;;  %1242 = vmatpush.msrb.mxu2 %v5775_v6  ;;  %v6307_v17 = vld [vmem:[%s10498_s2 + $0x28] sm:$0xff]  ;;  %v6313_v6 = vld [vmem:[%s10498_s2 + $0x38] sm:$0xff] }
 0x1e5   :  { %1234 = vmatpush.msrb.mxu1 %v6293_v3  ;;  %1274 = vmatpush.msrb.mxu3 %v6299_v38 }
 0x1e6   :  { %1203 = vmatpush.msrb.mxu0 %v5782_v49  ;;  %1243 = vmatpush.msrb.mxu2 %v5789_v57  ;;  %v6321_v49 = vld [vmem:[%s10498_s2 + $0x8] sm:$0xff]  ;;  %v6327_v57 = vld [vmem:[%s10498_s2 + $0x18] sm:$0xff] }
 0x1e7   :  { %1235 = vmatpush.msrb.mxu1 %v6307_v17  ;;  %1275 = vmatpush.msrb.mxu3 %v6313_v6 }
 0x1e8   :  { %1204 = vmatpush.msrb.mxu0 %v5796_v54  ;;  %1244 = vmatpush.msrb.mxu2 %v5803_v18  ;;  %v6340_v54 = vld [vmem:[%s10499_s4 + $0x3e0] sm:$0xff]  ;;  %v6347_v18 = vld [vmem:[%s10499_s4 + $0x3e8] sm:$0xff] }
 0x1e9   :  { %1236 = vmatpush.msrb.mxu1 %v6321_v49  ;;  %1276 = vmatpush.msrb.mxu3 %v6327_v57 }
 0x1ea   :  { %1074 = vmatmul.f32.vlgmr.msra.gmra.mxu0 %v6246_v34  ;;  %1114 = vmatmul.f32.vlgmr.msra.gmra.mxu2 %v6246_v34 }
 0x1eb   :  { %1205 = vmatpush.msrb.mxu0 %v5811_v12  ;;  %1237 = vmatmul.f32.vlgmr.msrb.gmra.mxu1 %v6246_v34  ;;  %v6354_v12 = vld [vmem:[%s10499_s4 + $0x3c0] sm:$0xff] }
 0x1ec   :  { %1245 = vmatpush.msrb.mxu2 %v5817_v48  ;;  %1277 = vmatmul.f32.vlgmr.msrb.gmra.mxu3 %v6246_v34  ;;  %v6361_v48 = vld [vmem:[%s10499_s4 + $0x3c8] sm:$0xff] }
 0x1ed   :  { %1206 = vmatpush.msrb.mxu0 %v5824_v51  ;;  %1368 = vmatpush.msra.mxu1 %v6340_v54  ;;  %11215 = vst [vmem:[#allocation28_spill] sm:$0xff] %v6361_v48  ;;  %v6368_v51 = vld [vmem:[%s10499_s4 + $0x3a0] sm:$0xff] }
 0x1ee   :  { %1246 = vmatpush.msrb.mxu2 %v5831_v25  ;;  %1408 = vmatpush.msra.mxu3 %v6347_v18  ;;  %11216 = vst [vmem:[#allocation29_spill] sm:$0xff] %v6368_v51  ;;  %v6375_v25 = vld [vmem:[%s10499_s4 + $0x3a8] sm:$0xff] }
 0x1ef   :  { %1207 = vmatpush.msrb.mxu0 %v5838_v56  ;;  %1369 = vmatpush.msra.mxu1 %v6354_v12  ;;  %11217 = vst [vmem:[#allocation32_spill] sm:$0xff] %v6375_v25  ;;  %v6382_v56 = vld [vmem:[%s10499_s4 + $0x380] sm:$0xff] }
 0x1f0   :  { %1247 = vmatpush.msrb.mxu2 %v5845_v29  ;;  %1409 = vmatpush.msra.mxu3 %v6361_v48  ;;  %11218 = vst [vmem:[#allocation33_spill] sm:$0xff] %v6382_v56  ;;  %v6389_v29 = vld [vmem:[%s10499_s4 + $0x388] sm:$0xff] }
 0x1f1   :  { %1208 = vmatpush.msrb.mxu0 %v5852_v30  ;;  %1370 = vmatpush.msra.mxu1 %v6368_v51  ;;  %11219 = vst [vmem:[#allocation36_spill] sm:$0xff] %v6389_v29  ;;  %v6396_v30 = vld [vmem:[%s10499_s4 + $0x360] sm:$0xff] }
 0x1f2   :  { %1248 = vmatpush.msrb.mxu2 %v5859_v23  ;;  %1410 = vmatpush.msra.mxu3 %v6375_v25  ;;  %11220 = vst [vmem:[#allocation37_spill] sm:$0xff] %v6396_v30  ;;  %v6403_v23 = vld [vmem:[%s10499_s4 + $0x368] sm:$0xff] }
 0x1f3   :  { %1209 = vmatpush.msrb.mxu0 %v5866_v8  ;;  %1371 = vmatpush.msra.mxu1 %v6382_v56  ;;  %11221 = vst [vmem:[#allocation40_spill] sm:$0xff] %v6403_v23  ;;  %v6410_v8 = vld [vmem:[%s10499_s4 + $0x340] sm:$0xff] }
 0x1f4   :  { %1249 = vmatpush.msrb.mxu2 %v5873_v39  ;;  %1411 = vmatpush.msra.mxu3 %v6389_v29  ;;  %11222 = vst [vmem:[#allocation43_spill] sm:$0xff] %v6410_v8  ;;  %v11223_v39 = vld [vmem:[#allocation3_spill] sm:$0xff] }
 0x1f5   :  { %1210 = vmatpush.msrb.mxu0 %v5880_v43  ;;  %1372 = vmatpush.msra.mxu1 %v6396_v30  ;;  %v6417_v43 = vld [vmem:[%s10499_s4 + $0x348] sm:$0xff] }
 0x1f6   :  { %1250 = vmatpush.msrb.mxu2 %v5887_v44  ;;  %1412 = vmatpush.msra.mxu3 %v6403_v23  ;;  %11224 = vst [vmem:[#allocation48_spill] sm:$0xff] %v6417_v43  ;;  %v11225_v44 = vld [vmem:[#allocation4_spill] sm:$0xff] }
 0x1f7   :  { %1211 = vmatpush.msrb.mxu0 %v5894_v52  ;;  %1373 = vmatpush.msra.mxu1 %v6410_v8  ;;  %v6424_v52 = vld [vmem:[%s10499_s4 + $0x320] sm:$0xff]  ;;  %v11351_v8 = vld [vmem:[#allocation25_spill] sm:$0xff] }
 0x1f8   :  { %1251 = vmatpush.msrb.mxu2 %v11223_v39  ;;  %1413 = vmatpush.msra.mxu3 %v6417_v43  ;;  %11226 = vst [vmem:[#allocation49_spill] sm:$0xff] %v6424_v52  ;;  %v11233_v39 = vld [vmem:[#allocation8_spill] sm:$0xff]  ;;  %v160_v23 = vadd.f32 %v11351_v8, %v5545_v27  ;;  %v11352_v8 = vld [vmem:[#allocation42_spill] sm:$0xff] }
 0x1f9   :  { %1212 = vmatpush.msrb.mxu0 %v11225_v44  ;;  %1374 = vmatpush.msra.mxu1 %v6424_v52  ;;  %v6452_v44 = vld [vmem:[%s10499_s4 + $0x2e0] sm:$0xff] }
 0x1fa   :  { %1252 = vmatpush.msrb.mxu2 %v11227_v22  ;;  %1414 = vmatpush.msra.mxu3 %v6431_v45  ;;  %11234 = vst [vmem:[#allocation57_spill] sm:$0xff] %v6452_v44  ;;  %v11235_v22 = vld [vmem:[#allocation9_spill] sm:$0xff] }
 0x1fb   :  { %1213 = vmatpush.msrb.mxu0 %v11229_v36  ;;  %1375 = vmatpush.msra.mxu1 %v6438_v40  ;;  %v6459_v36 = vld [vmem:[%s10499_s4 + $0x2e8] sm:$0xff] }
 0x1fc   :  { %1253 = vmatpush.msrb.mxu2 %v11231_v0  ;;  %1415 = vmatpush.msra.mxu3 %v6445_v13  ;;  %11236 = vst [vmem:[#allocation60_spill] sm:$0xff] %v6459_v36  ;;  %v11237_v0 = vld [vmem:[#allocation12_spill] sm:$0xff]  ;;  %v11239_v13 = vld [vmem:[#allocation13_spill] sm:$0xff] }
 0x1fd   :  { %1214 = vmatpush.msrb.mxu0 %v11233_v39  ;;  %1376 = vmatpush.msra.mxu1 %v6452_v44  ;;  %v6466_v39 = vld [vmem:[%s10499_s4 + $0x2c0] sm:$0xff] }
 0x1fe   :  { %1254 = vmatpush.msrb.mxu2 %v11235_v22  ;;  %1416 = vmatpush.msra.mxu3 %v6459_v36  ;;  %11238 = vst [vmem:[#allocation63_spill] sm:$0xff] %v6466_v39  ;;  %v6473_v22 = vld [vmem:[%s10499_s4 + $0x2c8] sm:$0xff]  ;;  %v11241_v44 = vld [vmem:[#allocation14_spill] sm:$0xff] }
 0x1ff   :  { %1215 = vmatpush.msrb.mxu0 %v11237_v0  ;;  %1377 = vmatpush.msra.mxu1 %v6466_v39  ;;  %11240 = vst [vmem:[#allocation68_spill] sm:$0xff] %v6473_v22  ;;  %v6480_v0 = vld [vmem:[%s10499_s4 + $0x2a0] sm:$0xff] }
 0x200   :  { %1255 = vmatpush.msrb.mxu2 %v11239_v13  ;;  %1417 = vmatpush.msra.mxu3 %v6473_v22  ;;  %11242 = vst [vmem:[#allocation69_spill] sm:$0xff] %v6480_v0  ;;  %v11243_v36 = vld [vmem:[#allocation15_spill] sm:$0xff] }
 0x201   :  { %1216 = vmatpush.msrb.mxu0 %v11241_v44  ;;  %1378 = vmatpush.msra.mxu1 %v6480_v0  ;;  %v6489_v13 = vld [vmem:[%s10499_s4 + $0x2a8] sm:$0xff]  ;;  %v6495_v44 = vld [vmem:[%s10499_s4 + $0x280] sm:$0xff] }
 0x202   :  { %1256 = vmatpush.msrb.mxu2 %v11243_v36  ;;  %1217 = vmatmul.f32.vlgmr.msrb.gmra.mxu0 %v6246_v34  ;;  %11244 = vst [vmem:[#allocation72_spill] sm:$0xff] %v6489_v13  ;;  %v6501_v36 = vld [vmem:[%s10499_s4 + $0x1e0] sm:$0xff] }
 0x203   :  { %1257 = vmatmul.f32.vlgmr.msrb.gmra.mxu2 %v6246_v34  ;;  %1418 = vmatpush.msra.mxu3 %v6489_v13  ;;  %11245 = vst [vmem:[#allocation73_spill] sm:$0xff] %v6495_v44  ;;  %v6507_v34 = vld [vmem:[%s10499_s4 + $0x288] sm:$0xff] }
 0x204   :  { %1379 = vmatpush.msra.mxu1 %v6495_v44  ;;  %11246 = vst [vmem:[#allocation76_spill] sm:$0xff] %v6501_v36  ;;  %1348 = vmatpush.msra.mxu0 %v6501_v36  ;;  %v6513_v13 = vld [vmem:[%s10499_s4 + $0x1e8] sm:$0xff]  ;;  %v6519_v44 = vld [vmem:[%s10499_s4 + $0x260] sm:$0xff] }
 0x205   :  { %11247 = vst [vmem:[#allocation18_spill] sm:$0xff] %v6507_v34  ;;  %1419 = vmatpush.msra.mxu3 %v6507_v34  ;;  %1388 = vmatpush.msra.mxu2 %v6513_v13  ;;  %v6525_v36 = vld [vmem:[%s10499_s4 + $0x1c0] sm:$0xff]  ;;  %v6531_v34 = vld [vmem:[%s10499_s4 + $0x268] sm:$0xff] }
 0x206   :  { %11248 = vst [vmem:[#allocation19_spill] sm:$0xff] %v6513_v13  ;;  %1380 = vmatpush.msra.mxu1 %v6519_v44  ;;  %1349 = vmatpush.msra.mxu0 %v6525_v36  ;;  %v6537_v13 = vld [vmem:[%s10499_s4 + $0x1c8] sm:$0xff] }
 0x207   :  { %11249 = vst [vmem:[#allocation77_spill] sm:$0xff] %v6519_v44  ;;  %1420 = vmatpush.msra.mxu3 %v6531_v34  ;;  %1389 = vmatpush.msra.mxu2 %v6537_v13  ;;  %v6543_v44 = vld [vmem:[%s10499_s4 + $0x240] sm:$0xff] }
 0x208   :  { %11250 = vst [vmem:[#allocation26_spill] sm:$0xff] %v6525_v36  ;;  %1381 = vmatpush.msra.mxu1 %v6543_v44  ;;  %v6549_v36 = vld [vmem:[%s10499_s4 + $0x1a0] sm:$0xff] }
 0x209   :  { %11251 = vst [vmem:[#allocation81_spill] sm:$0xff] %v6531_v34  ;;  %1350 = vmatpush.msra.mxu0 %v6549_v36  ;;  %v6555_v34 = vld [vmem:[%s10499_s4 + $0x248] sm:$0xff] }
 0x20a   :  { %11252 = vst [vmem:[#allocation27_spill] sm:$0xff] %v6537_v13  ;;  %1421 = vmatpush.msra.mxu3 %v6555_v34  ;;  %v6561_v13 = vld [vmem:[%s10499_s4 + $0x1a8] sm:$0xff] }
 0x20b   :  { %11253 = vst [vmem:[#allocation84_spill] sm:$0xff] %v6543_v44  ;;  %1390 = vmatpush.msra.mxu2 %v6561_v13  ;;  %v6567_v44 = vld [vmem:[%s10499_s4 + $0x220] sm:$0xff] }
 0x20c   :  { %11254 = vst [vmem:[#allocation30_spill] sm:$0xff] %v6549_v36  ;;  %1382 = vmatpush.msra.mxu1 %v6567_v44  ;;  %v6573_v36 = vld [vmem:[%s10499_s4 + $0x180] sm:$0xff] }
 0x20d   :  { %11255 = vst [vmem:[#allocation88_spill] sm:$0xff] %v6555_v34  ;;  %1351 = vmatpush.msra.mxu0 %v6573_v36  ;;  %v6579_v34 = vld [vmem:[%s10499_s4 + $0x228] sm:$0xff] }
 0x20e   :  { %11256 = vst [vmem:[#allocation31_spill] sm:$0xff] %v6561_v13  ;;  %1422 = vmatpush.msra.mxu3 %v6579_v34  ;;  %v6585_v13 = vld [vmem:[%s10499_s4 + $0x188] sm:$0xff] }
 0x20f   :  { %11257 = vst [vmem:[#allocation89_spill] sm:$0xff] %v6567_v44  ;;  %1391 = vmatpush.msra.mxu2 %v6585_v13  ;;  %v6591_v44 = vld [vmem:[%s10499_s4 + $0x200] sm:$0xff] }
 0x210   :  { %11258 = vst [vmem:[#allocation34_spill] sm:$0xff] %v6573_v36  ;;  %1383 = vmatpush.msra.mxu1 %v6591_v44  ;;  %v6597_v36 = vld [vmem:[%s10499_s4 + $0x160] sm:$0xff] }
 0x211   :  { %11259 = vst [vmem:[#allocation92_spill] sm:$0xff] %v6579_v34  ;;  %1352 = vmatpush.msra.mxu0 %v6597_v36  ;;  %v6603_v34 = vld [vmem:[%s10499_s4 + $0x208] sm:$0xff] }
 0x212   :  { %11260 = vst [vmem:[#allocation35_spill] sm:$0xff] %v6585_v13  ;;  %1423 = vmatpush.msra.mxu3 %v6603_v34  ;;  %v6609_v13 = vld [vmem:[%s10499_s4 + $0x168] sm:$0xff] }
 0x213   :  { %11261 = vst [vmem:[#allocation93_spill] sm:$0xff] %v6591_v44  ;;  %1392 = vmatpush.msra.mxu2 %v6609_v13  ;;  %v6615_v44 = vld [vmem:[%s10499_s4 + $0x3f0] sm:$0xff] }
 0x214   :  { %11262 = vst [vmem:[#allocation38_spill] sm:$0xff] %v6597_v36  ;;  %1448 = vmatpush.msrb.mxu1 %v6615_v44  ;;  %v6621_v36 = vld [vmem:[%s10499_s4 + $0x3f8] sm:$0xff] }
 0x215   :  { %11263 = vst [vmem:[#allocation39_spill] sm:$0xff] %v6603_v34  ;;  %1488 = vmatpush.msrb.mxu3 %v6621_v36  ;;  %v6627_v34 = vld [vmem:[%s10499_s4 + $0x140] sm:$0xff] }
 0x216   :  { %11264 = vst [vmem:[#allocation46_spill] sm:$0xff] %v6609_v13  ;;  %1353 = vmatpush.msra.mxu0 %v6627_v34  ;;  %v6633_v13 = vld [vmem:[%s10499_s4 + $0x148] sm:$0xff] }
 0x217   :  { %11265 = vst [vmem:[#allocation47_spill] sm:$0xff] %v6615_v44  ;;  %1393 = vmatpush.msra.mxu2 %v6633_v13  ;;  %v6639_v44 = vld [vmem:[%s10499_s4 + $0x3d0] sm:$0xff] }
 0x218   :  { %11266 = vst [vmem:[#allocation50_spill] sm:$0xff] %v6621_v36  ;;  %1449 = vmatpush.msrb.mxu1 %v6639_v44  ;;  %v6645_v36 = vld [vmem:[%s10499_s4 + $0x3d8] sm:$0xff] }
 0x219   :  { %11267 = vst [vmem:[#allocation51_spill] sm:$0xff] %v6627_v34  ;;  %1489 = vmatpush.msrb.mxu3 %v6645_v36  ;;  %v6651_v34 = vld [vmem:[%s10499_s4 + $0x120] sm:$0xff] }
 0x21a   :  { %11268 = vst [vmem:[#allocation54_spill] sm:$0xff] %v6633_v13  ;;  %1354 = vmatpush.msra.mxu0 %v6651_v34  ;;  %v6657_v13 = vld [vmem:[%s10499_s4 + $0x128] sm:$0xff] }
 0x21b   :  { %11269 = vst [vmem:[#allocation55_spill] sm:$0xff] %v6639_v44  ;;  %1394 = vmatpush.msra.mxu2 %v6657_v13  ;;  %v6663_v44 = vld [vmem:[%s10499_s4 + $0x3b0] sm:$0xff] }
 0x21c   :  { %11270 = vst [vmem:[#allocation58_spill] sm:$0xff] %v6645_v36  ;;  %1450 = vmatpush.msrb.mxu1 %v6663_v44  ;;  %v6669_v36 = vld [vmem:[%s10499_s4 + $0x3b8] sm:$0xff] }
 0x21d   :  { %11271 = vst [vmem:[#allocation59_spill] sm:$0xff] %v6651_v34  ;;  %1490 = vmatpush.msrb.mxu3 %v6669_v36  ;;  %v6675_v34 = vld [vmem:[%s10499_s4 + $0x100] sm:$0xff] }
 0x21e   :  { %11272 = vst [vmem:[#allocation66_spill] sm:$0xff] %v6657_v13  ;;  %1355 = vmatpush.msra.mxu0 %v6675_v34  ;;  %v6681_v13 = vld [vmem:[%s10499_s4 + $0x108] sm:$0xff] }
 0x21f   :  { %11273 = vst [vmem:[#allocation67_spill] sm:$0xff] %v6663_v44  ;;  %1395 = vmatpush.msra.mxu2 %v6681_v13  ;;  %v6687_v44 = vld [vmem:[%s10499_s4 + $0x390] sm:$0xff] }
 0x220   :  { %11274 = vst [vmem:[#allocation70_spill] sm:$0xff] %v6669_v36  ;;  %1451 = vmatpush.msrb.mxu1 %v6687_v44  ;;  %v6693_v36 = vld [vmem:[%s10499_s4 + $0x398] sm:$0xff] }
 0x221   :  { %11275 = vst [vmem:[#allocation71_spill] sm:$0xff] %v6675_v34  ;;  %1491 = vmatpush.msrb.mxu3 %v6693_v36  ;;  %v6699_v34 = vld [vmem:[%s10499_s4 + $0xe0] sm:$0xff] }
 0x222   :  { %11276 = vst [vmem:[#allocation74_spill] sm:$0xff] %v6681_v13  ;;  %1356 = vmatpush.msra.mxu0 %v6699_v34  ;;  %v6705_v13 = vld [vmem:[%s10499_s4 + $0xe8] sm:$0xff] }
 0x223   :  { %11277 = vst [vmem:[#allocation75_spill] sm:$0xff] %v6687_v44  ;;  %1396 = vmatpush.msra.mxu2 %v6705_v13  ;;  %v6711_v44 = vld [vmem:[%s10499_s4 + $0x370] sm:$0xff] }
 0x224   :  { %11278 = vst [vmem:[#allocation79_spill] sm:$0xff] %v6693_v36  ;;  %1452 = vmatpush.msrb.mxu1 %v6711_v44  ;;  %v6717_v36 = vld [vmem:[%s10499_s4 + $0x378] sm:$0xff] }
 0x225   :  { %11279 = vst [vmem:[#allocation80_spill] sm:$0xff] %v6699_v34  ;;  %1492 = vmatpush.msrb.mxu3 %v6717_v36  ;;  %v6723_v34 = vld [vmem:[%s10499_s4 + $0xc0] sm:$0xff] }
 0x226   :  { %11280 = vst [vmem:[#allocation86_spill] sm:$0xff] %v6705_v13  ;;  %1357 = vmatpush.msra.mxu0 %v6723_v34  ;;  %v6729_v13 = vld [vmem:[%s10499_s4 + $0xc8] sm:$0xff] }
 0x227   :  { %11281 = vst [vmem:[#allocation87_spill] sm:$0xff] %v6711_v44  ;;  %1397 = vmatpush.msra.mxu2 %v6729_v13  ;;  %v6735_v44 = vld [vmem:[%s10499_s4 + $0x350] sm:$0xff] }
 0x228   :  { %11282 = vst [vmem:[#allocation90_spill] sm:$0xff] %v6717_v36  ;;  %1453 = vmatpush.msrb.mxu1 %v6735_v44  ;;  %v6741_v36 = vld [vmem:[%s10499_s4 + $0x358] sm:$0xff] }
 0x229   :  { %11283 = vst [vmem:[#allocation91_spill] sm:$0xff] %v6723_v34  ;;  %1493 = vmatpush.msrb.mxu3 %v6741_v36  ;;  %v6747_v34 = vld [vmem:[%s10499_s4 + $0xa0] sm:$0xff] }
 0x22a   :  { %11284 = vst [vmem:[#allocation94_spill] sm:$0xff] %v6729_v13  ;;  %1358 = vmatpush.msra.mxu0 %v6747_v34  ;;  %v6753_v13 = vld [vmem:[%s10499_s4 + $0xa8] sm:$0xff] }
 0x22b   :  { %11285 = vst [vmem:[#allocation95_spill] sm:$0xff] %v6735_v44  ;;  %1398 = vmatpush.msra.mxu2 %v6753_v13  ;;  %v6759_v44 = vld [vmem:[%s10499_s4 + $0x330] sm:$0xff] }
 0x22c   :  { %11286 = vst [vmem:[#allocation96_spill] sm:$0xff] %v6741_v36  ;;  %1454 = vmatpush.msrb.mxu1 %v6759_v44  ;;  %v6765_v36 = vld [vmem:[%s10499_s4 + $0x338] sm:$0xff] }
 0x22d   :  { %11287 = vst [vmem:[#allocation101_spill] sm:$0xff] %v6747_v34  ;;  %1494 = vmatpush.msrb.mxu3 %v6765_v36  ;;  %v6771_v34 = vld [vmem:[%s10499_s4 + $0x80] sm:$0xff] }
 0x22e   :  { %11288 = vst [vmem:[#allocation105_spill] sm:$0xff] %v6753_v13  ;;  %1359 = vmatpush.msra.mxu0 %v6771_v34  ;;  %v6777_v13 = vld [vmem:[%s10499_s4 + $0x88] sm:$0xff] }
 0x22f   :  { %11289 = vst [vmem:[#allocation106_spill] sm:$0xff] %v6759_v44  ;;  %1399 = vmatpush.msra.mxu2 %v6777_v13  ;;  %v6783_v44 = vld [vmem:[%s10499_s4 + $0x310] sm:$0xff] }
 0x230   :  { %11290 = vst [vmem:[#allocation107_spill] sm:$0xff] %v6765_v36  ;;  %1455 = vmatpush.msrb.mxu1 %v6783_v44  ;;  %v6789_v36 = vld [vmem:[%s10499_s4 + $0x318] sm:$0xff] }
 0x231   :  { %11291 = vst [vmem:[#allocation110_spill] sm:$0xff] %v6771_v34  ;;  %1495 = vmatpush.msrb.mxu3 %v6789_v36  ;;  %v6795_v34 = vld [vmem:[%s10499_s4 + $0x60] sm:$0xff] }
 0x232   :  { %11292 = vst [vmem:[#allocation111_spill] sm:$0xff] %v6777_v13  ;;  %1360 = vmatpush.msra.mxu0 %v6795_v34  ;;  %v6801_v13 = vld [vmem:[%s10499_s4 + $0x68] sm:$0xff] }
 0x233   :  { %11293 = vst [vmem:[#allocation11_spill] sm:$0xff] %v6783_v44  ;;  %1400 = vmatpush.msra.mxu2 %v6801_v13  ;;  %v6807_v44 = vld [vmem:[%s10499_s4 + $0x2f0] sm:$0xff] }
 0x234   :  { %11294 = vst [vmem:[#allocation22_spill] sm:$0xff] %v6789_v36  ;;  %1456 = vmatpush.msrb.mxu1 %v6807_v44  ;;  %v6813_v36 = vld [vmem:[%s10499_s4 + $0x2f8] sm:$0xff] }
 0x235   :  { %11295 = vst [vmem:[#allocation10_spill] sm:$0xff] %v6795_v34  ;;  %1496 = vmatpush.msrb.mxu3 %v6813_v36  ;;  %v6819_v34 = vld [vmem:[%s10499_s4 + $0x40] sm:$0xff] }
 0x236   :  { %11296 = vst [vmem:[#allocation21_spill] sm:$0xff] %v6801_v13  ;;  %1361 = vmatpush.msra.mxu0 %v6819_v34  ;;  %v6825_v13 = vld [vmem:[%s10499_s4 + $0x48] sm:$0xff] }
 0x237   :  { %11297 = vst [vmem:[#allocation3_spill] sm:$0xff] %v6807_v44  ;;  %1401 = vmatpush.msra.mxu2 %v6825_v13  ;;  %v6831_v44 = vld [vmem:[%s10499_s4 + $0x2d0] sm:$0xff] }
 0x238   :  { %11298 = vst [vmem:[#allocation4_spill] sm:$0xff] %v6813_v36  ;;  %1457 = vmatpush.msrb.mxu1 %v6831_v44  ;;  %v6837_v36 = vld [vmem:[%s10499_s4 + $0x2d8] sm:$0xff] }
 0x239   :  { %11299 = vst [vmem:[#allocation5_spill] sm:$0xff] %v6819_v34  ;;  %1497 = vmatpush.msrb.mxu3 %v6837_v36  ;;  %v6843_v34 = vld [vmem:[%s10499_s4 + $0x20] sm:$0xff] }
 0x23a   :  { %11300 = vst [vmem:[#allocation6_spill] sm:$0xff] %v6825_v13  ;;  %1362 = vmatpush.msra.mxu0 %v6843_v34  ;;  %v6849_v13 = vld [vmem:[%s10499_s4 + $0x28] sm:$0xff] }
 0x23b   :  { %11301 = vst [vmem:[#allocation7_spill] sm:$0xff] %v6831_v44  ;;  %1402 = vmatpush.msra.mxu2 %v6849_v13  ;;  %v6855_v44 = vld [vmem:[%s10499_s4 + $0x2b0] sm:$0xff] }
 0x23c   :  { %11302 = vst [vmem:[#allocation8_spill] sm:$0xff] %v6837_v36  ;;  %1458 = vmatpush.msrb.mxu1 %v6855_v44  ;;  %v6861_v36 = vld [vmem:[%s10499_s4 + $0x2b8] sm:$0xff] }
 0x23d   :  { %11303 = vst [vmem:[#allocation9_spill] sm:$0xff] %v6843_v34  ;;  %1498 = vmatpush.msrb.mxu3 %v6861_v36  ;;  %v6867_v34 = vld [vmem:[%s10499_s4] sm:$0xff] }
 0x23e   :  { %11304 = vst [vmem:[#allocation12_spill] sm:$0xff] %v6849_v13  ;;  %1363 = vmatpush.msra.mxu0 %v6867_v34  ;;  %v6873_v13 = vld [vmem:[%s10499_s4 + $0x8] sm:$0xff] }
 0x23f   :  { %11305 = vst [vmem:[#allocation13_spill] sm:$0xff] %v6855_v44  ;;  %1403 = vmatpush.msra.mxu2 %v6873_v13  ;;  %v6879_v44 = vld [vmem:[%s10499_s4 + $0x290] sm:$0xff] }
 0x240   :  { %11306 = vst [vmem:[#allocation14_spill] sm:$0xff] %v6861_v36  ;;  %1459 = vmatpush.msrb.mxu1 %v6879_v44  ;;  %v6885_v36 = vld [vmem:[%s10499_s4 + $0x298] sm:$0xff] }
 0x241   :  { %11307 = vst [vmem:[#allocation15_spill] sm:$0xff] %v6867_v34  ;;  %1499 = vmatpush.msrb.mxu3 %v6885_v36  ;;  %v6891_v34 = vld [vmem:[%s10499_s4 + $0x1f0] sm:$0xff] }
 0x242   :  { %11308 = vst [vmem:[#allocation116_spill] sm:$0xff] %v6873_v13  ;;  %1428 = vmatpush.msrb.mxu0 %v6891_v34  ;;  %v6897_v13 = vld [vmem:[%s10499_s4 + $0x1f8] sm:$0xff] }
 0x243   :  { %11309 = vst [vmem:[#allocation117_spill] sm:$0xff] %v6879_v44  ;;  %1468 = vmatpush.msrb.mxu2 %v6897_v13  ;;  %v6903_v44 = vld [vmem:[%s10499_s4 + $0x270] sm:$0xff] }
 0x244   :  { %11310 = vst [vmem:[#allocation118_spill] sm:$0xff] %v6885_v36  ;;  %1460 = vmatpush.msrb.mxu1 %v6903_v44  ;;  %v6909_v36 = vld [vmem:[%s10499_s4 + $0x278] sm:$0xff] }
 0x245   :  { %11311 = vst [vmem:[#allocation119_spill] sm:$0xff] %v6891_v34  ;;  %1500 = vmatpush.msrb.mxu3 %v6909_v36  ;;  %v6915_v34 = vld [vmem:[%s10499_s4 + $0x1d0] sm:$0xff] }
 0x246   :  { %11312 = vst [vmem:[#allocation120_spill] sm:$0xff] %v6897_v13  ;;  %1429 = vmatpush.msrb.mxu0 %v6915_v34  ;;  %v6921_v13 = vld [vmem:[%s10499_s4 + $0x1d8] sm:$0xff] }
 0x247   :  { %11313 = vst [vmem:[#allocation121_spill] sm:$0xff] %v6903_v44  ;;  %1469 = vmatpush.msrb.mxu2 %v6921_v13  ;;  %v6927_v44 = vld [vmem:[%s10499_s4 + $0x250] sm:$0xff] }
 0x248   :  { %11314 = vst [vmem:[#allocation122_spill] sm:$0xff] %v6909_v36  ;;  %1461 = vmatpush.msrb.mxu1 %v6927_v44  ;;  %v6933_v36 = vld [vmem:[%s10499_s4 + $0x258] sm:$0xff] }
 0x249   :  { %11315 = vst [vmem:[#allocation123_spill] sm:$0xff] %v6915_v34  ;;  %1501 = vmatpush.msrb.mxu3 %v6933_v36  ;;  %v6939_v34 = vld [vmem:[%s10499_s4 + $0x1b0] sm:$0xff] }
 0x24a   :  { %11316 = vst [vmem:[#allocation124_spill] sm:$0xff] %v6921_v13  ;;  %1430 = vmatpush.msrb.mxu0 %v6939_v34  ;;  %v6945_v13 = vld [vmem:[%s10499_s4 + $0x1b8] sm:$0xff] }
 0x24b   :  { %11317 = vst [vmem:[#allocation125_spill] sm:$0xff] %v6927_v44  ;;  %1470 = vmatpush.msrb.mxu2 %v6945_v13  ;;  %v6951_v44 = vld [vmem:[%s10499_s4 + $0x230] sm:$0xff] }
 0x24c   :  { %11318 = vst [vmem:[#allocation126_spill] sm:$0xff] %v6933_v36  ;;  %1462 = vmatpush.msrb.mxu1 %v6951_v44  ;;  %v6957_v36 = vld [vmem:[%s10499_s4 + $0x238] sm:$0xff]  ;;  %v1055_v39 = vpop.f32.mrf.mxu3 }
 0x24d   :  { %11319 = vst [vmem:[#allocation127_spill] sm:$0xff] %v6939_v34  ;;  %1502 = vmatpush.msrb.mxu3 %v6957_v36  ;;  %v6963_v34 = vld [vmem:[%s10499_s4 + $0x190] sm:$0xff] }
 0x24e   :  { %11320 = vst [vmem:[#allocation128_spill] sm:$0xff] %v6945_v13  ;;  %1431 = vmatpush.msrb.mxu0 %v6963_v34  ;;  %v6969_v13 = vld [vmem:[%s10499_s4 + $0x198] sm:$0xff] }
 0x24f   :  { %11321 = vst [vmem:[#allocation129_spill] sm:$0xff] %v6951_v44  ;;  %1471 = vmatpush.msrb.mxu2 %v6969_v13  ;;  %v6975_v44 = vld [vmem:[%s10499_s4 + $0x210] sm:$0xff] }
 0x250   :  { %11322 = vst [vmem:[#allocation130_spill] sm:$0xff] %v6957_v36  ;;  %1463 = vmatpush.msrb.mxu1 %v6975_v44  ;;  %v6981_v36 = vld [vmem:[%s10499_s4 + $0x218] sm:$0xff] }
 0x251   :  { %11323 = vst [vmem:[#allocation131_spill] sm:$0xff] %v6963_v34  ;;  %1503 = vmatpush.msrb.mxu3 %v6981_v36  ;;  %v6987_v34 = vld [vmem:[%s10499_s4 + $0x170] sm:$0xff] }
 0x252   :  { %11324 = vst [vmem:[#allocation132_spill] sm:$0xff] %v6969_v13  ;;  %1432 = vmatpush.msrb.mxu0 %v6987_v34  ;;  %v6993_v13 = vld [vmem:[%s10499_s4 + $0x178] sm:$0xff] }
 0x253   :  { %11325 = vst [vmem:[#allocation133_spill] sm:$0xff] %v6975_v44  ;;  %1472 = vmatpush.msrb.mxu2 %v6993_v13  ;;  %v6999_v44 = vld [vmem:[%s10499_s4 + $0x150] sm:$0xff] }
 0x254   :  { %11326 = vst [vmem:[#allocation134_spill] sm:$0xff] %v6981_v36  ;;  %1433 = vmatpush.msrb.mxu0 %v6999_v44  ;;  %v7005_v36 = vld [vmem:[%s10499_s4 + $0x158] sm:$0xff]  ;;  %v1135_v56 = vpop.f32.mrf.mxu3 }
 0x255   :  { %11327 = vst [vmem:[#allocation135_spill] sm:$0xff] %v6987_v34  ;;  %1473 = vmatpush.msrb.mxu2 %v7005_v36  ;;  %v7011_v34 = vld [vmem:[%s10499_s4 + $0x130] sm:$0xff] }
 0x256   :  { %11328 = vst [vmem:[#allocation136_spill] sm:$0xff] %v6993_v13  ;;  %1434 = vmatpush.msrb.mxu0 %v7011_v34  ;;  %v7017_v13 = vld [vmem:[%s10499_s4 + $0x138] sm:$0xff] }
 0x257   :  { %11329 = vst [vmem:[#allocation137_spill] sm:$0xff] %v6999_v44  ;;  %1474 = vmatpush.msrb.mxu2 %v7017_v13  ;;  %v7023_v44 = vld [vmem:[%s10499_s4 + $0x110] sm:$0xff] }
 0x258   :  { %11330 = vst [vmem:[#allocation138_spill] sm:$0xff] %v7005_v36  ;;  %1435 = vmatpush.msrb.mxu0 %v7023_v44  ;;  %v7029_v36 = vld [vmem:[%s10499_s4 + $0x118] sm:$0xff] }
 0x259   :  { %11331 = vst [vmem:[#allocation139_spill] sm:$0xff] %v7011_v34  ;;  %1475 = vmatpush.msrb.mxu2 %v7029_v36  ;;  %v7035_v34 = vld [vmem:[%s10499_s4 + $0xf0] sm:$0xff] }
 0x25a   :  { %11332 = vst [vmem:[#allocation140_spill] sm:$0xff] %v7017_v13  ;;  %1436 = vmatpush.msrb.mxu0 %v7035_v34  ;;  %v7041_v13 = vld [vmem:[%s10499_s4 + $0xf8] sm:$0xff] }
 0x25b   :  { %11333 = vst [vmem:[#allocation141_spill] sm:$0xff] %v7023_v44  ;;  %1476 = vmatpush.msrb.mxu2 %v7041_v13  ;;  %v7047_v44 = vld [vmem:[%s10499_s4 + $0xd0] sm:$0xff] }
 0x25c   :  { %11334 = vst [vmem:[#allocation142_spill] sm:$0xff] %v7029_v36  ;;  %1437 = vmatpush.msrb.mxu0 %v7047_v44  ;;  %v7053_v36 = vld [vmem:[%s10499_s4 + $0xd8] sm:$0xff] }
 0x25d   :  { %11335 = vst [vmem:[#allocation143_spill] sm:$0xff] %v7035_v34  ;;  %1477 = vmatpush.msrb.mxu2 %v7053_v36  ;;  %v7059_v34 = vld [vmem:[%s10499_s4 + $0xb0] sm:$0xff] }
 0x25e   :  { %11336 = vst [vmem:[#allocation144_spill] sm:$0xff] %v7041_v13  ;;  %1438 = vmatpush.msrb.mxu0 %v7059_v34  ;;  %v7065_v13 = vld [vmem:[%s10499_s4 + $0xb8] sm:$0xff]  ;;  %v995_v0 = vpop.f32.mrf.mxu0 }
 0x25f   :  { %11337 = vst [vmem:[#allocation145_spill] sm:$0xff] %v7047_v44  ;;  %1478 = vmatpush.msrb.mxu2 %v7065_v13  ;;  %v7071_v44 = vld [vmem:[%s10499_s4 + $0x90] sm:$0xff]  ;;  %v996_v22 = vadd.f32 %v995_v0, %v6052_v14 }
 0x260   :  { %11338 = vst [vmem:[#allocation146_spill] sm:$0xff] %v7053_v36  ;;  %1439 = vmatpush.msrb.mxu0 %v7071_v44  ;;  %v7077_v36 = vld [vmem:[%s10499_s4 + $0x98] sm:$0xff] }
 0x261   :  { %11339 = vst [vmem:[#allocation147_spill] sm:$0xff] %v7059_v34  ;;  %1479 = vmatpush.msrb.mxu2 %v7077_v36  ;;  %v7083_v34 = vld [vmem:[%s10499_s4 + $0x70] sm:$0xff] }
 0x262   :  { %11340 = vst [vmem:[#allocation148_spill] sm:$0xff] %v7065_v13  ;;  %1440 = vmatpush.msrb.mxu0 %v7083_v34  ;;  %v7089_v13 = vld [vmem:[%s10499_s4 + $0x78] sm:$0xff] }
 0x263   :  { %11341 = vst [vmem:[#allocation149_spill] sm:$0xff] %v7071_v44  ;;  %1480 = vmatpush.msrb.mxu2 %v7089_v13  ;;  %v7095_v44 = vld [vmem:[%s10499_s4 + $0x50] sm:$0xff] }
 0x264   :  { %11342 = vst [vmem:[#allocation150_spill] sm:$0xff] %v7077_v36  ;;  %1441 = vmatpush.msrb.mxu0 %v7095_v44  ;;  %v7101_v36 = vld [vmem:[%s10499_s4 + $0x58] sm:$0xff]  ;;  %v1035_v52 = vpop.f32.mrf.mxu2 }
 0x265   :  { %11343 = vst [vmem:[#allocation151_spill] sm:$0xff] %v7083_v34  ;;  %1481 = vmatpush.msrb.mxu2 %v7101_v36  ;;  %v7107_v34 = vld [vmem:[%s10499_s4 + $0x30] sm:$0xff]  ;;  %v1036_v43 = vadd.f32 %v1035_v52, %v6055_v37 }
 0x266   :  { %11344 = vst [vmem:[#allocation152_spill] sm:$0xff] %v7089_v13  ;;  %1442 = vmatpush.msrb.mxu0 %v7107_v34  ;;  %v7113_v13 = vld [vmem:[%s10499_s4 + $0x38] sm:$0xff] }
 0x267   :  { %11345 = vst [vmem:[#allocation153_spill] sm:$0xff] %v7095_v44  ;;  %1482 = vmatpush.msrb.mxu2 %v7113_v13  ;;  %v7119_v44 = vld [vmem:[%s10499_s4 + $0x10] sm:$0xff] }
 0x268   :  { %11346 = vst [vmem:[#allocation154_spill] sm:$0xff] %v7101_v36  ;;  %1443 = vmatpush.msrb.mxu0 %v7119_v44  ;;  %v7125_v36 = vld [vmem:[%s10499_s4 + $0x18] sm:$0xff] }
 0x269   :  { %11347 = vst [vmem:[#allocation155_spill] sm:$0xff] %v7107_v34  ;;  %1483 = vmatpush.msrb.mxu2 %v7125_v36  ;;  %v1015_v34 = vpop.f32.mrf.mxu1 }
 0x26a   :  { %11348 = vst [vmem:[#allocation156_spill] sm:$0xff] %v7113_v13  ;;  %v1016_v40 = vadd.f32 %v1015_v34, %v996_v22 }
 0x26b   :  { %11349 = vst [vmem:[#allocation157_spill] sm:$0xff] %v7119_v44  ;;  %v1056_v44 = vadd.f32 %v1055_v39, %v1036_v43  ;;  %v242_v39 = vadd.f32 %v11352_v8, %v5600_v41 }
 0x26c   :  { %11350 = vst [vmem:[#allocation158_spill] sm:$0xff] %v7125_v36  ;;  %v3484_v45 = vmul.f32 -1.442695, %v1016_v40 }
 0x26d   :  { %v3485_v29 = vmul.f32 -1.442695, %v1056_v44  ;;  %v1115_v0 = vpop.f32.mrf.mxu2 }
 0x26e   :  { %3574 = vpow2.f32 %v3484_v45  ;;  %v1116_v40 = vadd.f32 %v1115_v0, %v6060_v63  ;;  %v1075_v45 = vpop.f32.mrf.mxu0 }
 0x26f   :  { %3576 = vpow2.f32 %v3485_v29  ;;  %v1278_v43 = vpop.f32.mrf.mxu3  ;;  %v1076_v29 = vadd.f32 %v1075_v45, %v6065_v53 }
 0x270   :  { %v1136_v34 = vadd.f32 %v1135_v56, %v1116_v40 }
 0x271   :  { %v1095_v13 = vpop.f32.mrf.mxu1 }
 0x272   :  { %v3486_v44 = vmul.f32 -1.442695, %v1136_v34  ;;  %v1096_v0 = vadd.f32 %v1095_v13, %v1076_v29 }
 0x274   :  { %v3575_v25 = vpop.eup %3574 }
 0x275   :  { %v1141_v51 = vadd.f32 1.0, %v3575_v25  ;;  %v3577_v22 = vpop.eup %3576 }
 0x276   :  { %v1160_v52 = vadd.f32 1.0, %v3577_v22 }
 0x277   :  { %3578 = vrcp.f32 %v1141_v51  ;;  %v1153_v34 = vand.u32 2147483648, %v1141_v51  ;;  %vm1147_vm7 = vweird.f32 %v1141_v51  ;;  %v1151_v45 = vand.u32 2147483647, %v1141_v51 }
 0x278   :  { %v1172_v13 = vand.u32 2147483648, %v1160_v52  ;;  %v1170_v29 = vand.u32 2147483647, %v1160_v52  ;;  %vm1166_vm10 = vweird.f32 %v1160_v52 }
 0x279   :  { %v1238_v30 = vpop.f32.mrf.mxu1  ;;  %vm1152_vm11 = vcmp.eq.f32.partialorder %v1151_v45, 8.507059e+37 }
 0x27a   :  { %v1282_v36 = vadd.f32 %v1238_v30, %v160_v23  ;;  %v1284_v30 = vadd.f32 %v1278_v43, %v242_v39  ;;  %v11353_v43 = vld [vmem:[#allocation24_spill] sm:$0xff]  ;;  %vm1171_vm13 = vcmp.eq.f32.partialorder %v1170_v29, 8.507059e+37 }
 0x27b   :  { %v119_v39 = vadd.f32 %v11353_v43, %v5542_v11 }
 0x27c   :  { %v3488_v14 = vmul.f32 -1.442695, %v1282_v36  ;;  %v3489_v37 = vmul.f32 -1.442695, %v1284_v30 }
 0x27d   :  { %v3579_v27 = vpop.eup %3578 }
 0x27e   :  { %3580 = vpow2.f32 %v3488_v14  ;;  %v1143_v25 = vmul.f32 %v3579_v27, %v1141_v51  ;;  %vm1148_vm6 = vweird.f32 %v3579_v27  ;;  %v1154_v51 = vor.u32 1.1754944e-38, %v1153_v34 }
 0x27f   :  { %3582 = vrcp.f32 %v1160_v52  ;;  %vm7140_vm8 = vmor %vm1147_vm7, %vm1148_vm6  ;;  %v1218_v30 = vpop.f32.mrf.mxu0 }
 0x280   :  { %3584 = vpow2.f32 %v3486_v44  ;;  %v1144_v23 = vsub.f32 1.0, %v1143_v25 }
 0x281   :  { %3586 = vtanh.f32 %v1096_v0  ;;  %v1173_v0 = vor.u32 1.1754944e-38, %v1172_v13 }
 0x282   :  { %v1145_v63 = vmul.f32 %v3579_v27, %v1144_v23  ;;  %3588 = vpow2.f32 %v3489_v37  ;;  %v1281_v37 = vadd.f32 %v1218_v30, %v119_v39 }
 0x284   :  { %v3581_v36 = vpop.eup %3580  ;;  %v1146_v22 = vadd.f32 %v3579_v27, %v1145_v63 }
 0x285   :  { %v3583_v56 = vpop.eup %3582  ;;  %v7136_v48 = vadd.f32 1.0, %v3581_v36 }
 0x286   :  { %v3585_v40 = vpop.eup %3584  ;;  %v1162_v14 = vmul.f32 %v3583_v56, %v1160_v52  ;;  %vm1167_vm9 = vweird.f32 %v3583_v56  ;;  %v1150_v25 = vsel %vm7140_vm8, %v3579_v27, %v1146_v22 }
 0x287   :  { %v1180_v8 = vadd.f32 1.0, %v3585_v40  ;;  %v3587_v36 = vpop.eup %3586  ;;  %vm1168_vm12 = vmor %vm1166_vm10, %vm1167_vm9  ;;  %v1155_v40 = vsel %vm1152_vm11, %v1154_v51, %v1150_v25  ;;  %vm1313_vm3 = vweird.f32 %v7136_v48 }
 0x288   :  { %v1163_v41 = vsub.f32 1.0, %v1162_v14  ;;  %v3487_v14 = vmul.f32 -1.442695, %v1281_v37  ;;  %v3589_v43 = vpop.eup %3588  ;;  %v1197_v34 = vmul.f32 %v3587_v36, %v1155_v40 }
 0x289   :  { %3590 = vrcp.f32 %v1180_v8  ;;  %v7154_v44 = vadd.f32 1.0, %v3589_v43  ;;  %v1192_v29 = vand.u32 2147483648, %v1180_v8  ;;  %vm1186_vm15 = vweird.f32 %v1180_v8 }
 0x28a   :  { %v1164_v63 = vmul.f32 %v3583_v56, %v1163_v41  ;;  %3592 = vrcp.f32 %v7136_v48 }
 0x28b   :  { %3594 = vpow2.f32 %v3487_v14  ;;  %v11356_v14 = vld [vmem:[#allocation41_spill] sm:$0xff]  ;;  %vm1333_vm11 = vweird.f32 %v7154_v44 }
 0x28c   :  { %v1165_v23 = vadd.f32 %v3583_v56, %v1164_v63  ;;  %v1190_v63 = vand.u32 2147483647, %v1180_v8  ;;  %v201_v43 = vadd.f32 %v11356_v14, %v5693_v2  ;;  %v11365_v14 = vld [vmem:[#allocation40_spill] sm:$0xff] }
 0x28e   :  { %v1169_v11 = vsel %vm1168_vm12, %v3583_v56, %v1165_v23  ;;  %vm1191_vm1 = vcmp.eq.f32.partialorder %v1190_v63, 8.507059e+37 }
 0x28f   :  { %v3591_v41 = vpop.eup %3590  ;;  %v1174_v53 = vsel %vm1171_vm13, %v1173_v0, %v1169_v11  ;;  %v1258_v0 = vpop.f32.mrf.mxu2 }
 0x290   :  { %v7147_v27 = vpop.eup %3592  ;;  %v1196_v22 = vmul.f32 %v1174_v53, %v6085_v16  ;;  %v1182_v39 = vmul.f32 %v3591_v41, %v1180_v8  ;;  %vm1187_vm14 = vweird.f32 %v3591_v41  ;;  %v1193_v16 = vor.u32 1.1754944e-38, %v1192_v29 }
 0x291   :  { %v1309_v13 = vmul.f32 %v7147_v27, %v7136_v48  ;;  %v3595_v11 = vpop.eup %3594  ;;  %vm1188_vm0 = vmor %vm1186_vm15, %vm1187_vm14  ;;  %v1283_v8 = vadd.f32 %v1258_v0, %v201_v43  ;;  %vm1314_vm2 = vweird.f32 %v7147_v27  ;;  %v11364_v0 = vld [vmem:[#allocation37_spill] sm:$0xff]  ;;  %v7361_v43 = vld [vmem:[%s10498_s2 + $0xa0] sm:$0xff] }
 0x292   :  { %v7150_v52 = vadd.f32 %v1197_v34, %v1196_v22  ;;  %v1183_v45 = vsub.f32 1.0, %v1182_v39  ;;  %v1288_v25 = vadd.f32 1.0, %v3595_v11  ;;  %vm7174_vm4 = vmor %vm1313_vm3, %vm1314_vm2 }
 0x293   :  { %v1310_v53 = vsub.f32 1.0, %v1309_v13 }
 0x294   :  { %3596 = vtanh.f32 %v7150_v52  ;;  %v1184_v56 = vmul.f32 %v3591_v41, %v1183_v45  ;;  %v1319_v45 = vand.u32 2147483648, %v7136_v48  ;;  %v1300_v29 = vand.u32 2147483648, %v1288_v25 }
 0x295   :  { %3598 = vrcp.f32 %v7154_v44  ;;  %v1311_v36 = vmul.f32 %v7147_v27, %v1310_v53  ;;  %vm1294_vm6 = vweird.f32 %v1288_v25 }
 0x296   :  { %v1185_v30 = vadd.f32 %v3591_v41, %v1184_v56  ;;  %3600 = vrcp.f32 %v1288_v25  ;;  %v1320_v63 = vor.u32 1.1754944e-38, %v1319_v45  ;;  %v7382_v45 = vld [vmem:[%s10498_s2 + $0x90] sm:$0xff] }
 0x297   :  { %v1312_v39 = vadd.f32 %v7147_v27, %v1311_v36  ;;  %3602 = vtanh.f32 %v1283_v8  ;;  %v7347_v36 = vld [vmem:[%s10498_s2 + $0xc0] sm:$0xff]  ;;  %v11367_v8 = vld [vmem:[#allocation48_spill] sm:$0xff] }
 0x298   :  { %v1189_v51 = vsel %vm1188_vm0, %v3591_v41, %v1185_v30 }
 0x299   :  { %v1194_v23 = vsel %vm1191_vm1, %v1193_v16, %v1189_v51  ;;  %v11362_v51 = vld [vmem:[#allocation33_spill] sm:$0xff] }
 0x29a   :  { %v3597_v37 = vpop.eup %3596 }
 0x29b   :  { %v1200_v40 = vmul.f32 %v3597_v37, %v1194_v23  ;;  %v7161_v22 = vpop.eup %3598  ;;  %v7340_v37 = vld [vmem:[%s10498_s2 + $0xf0] sm:$0xff] }
 0x29c   :  { %v3601_v34 = vpop.eup %3600  ;;  %v1329_v13 = vmul.f32 %v7161_v22, %v7154_v44  ;;  %vm1334_vm10 = vweird.f32 %v7161_v22  ;;  %v11363_v23 = vld [vmem:[#allocation36_spill] sm:$0xff] }
 0x29d   :  { %1384 = vmatmul.f32.vlgmr.msra.gmra.mxu1 %v1200_v40  ;;  %1424 = vmatmul.f32.vlgmr.msra.gmra.mxu3 %v1200_v40  ;;  %v1290_v41 = vmul.f32 %v3601_v34, %v1288_v25  ;;  %vm1295_vm5 = vweird.f32 %v3601_v34  ;;  %vm1335_vm12 = vmor %vm1333_vm11, %vm1334_vm10 }
 0x29e   :  { %1591 = vmatpush.msra.mxu1 %v6106_v7  ;;  %1631 = vmatpush.msra.mxu3 %v6112_v5  ;;  %v1317_v7 = vand.u32 2147483647, %v7136_v48  ;;  %v1330_v30 = vsub.f32 1.0, %v1329_v13  ;;  %vm1296_vm8 = vmor %vm1294_vm6, %vm1295_vm5  ;;  %v11369_v13 = vld [vmem:[#allocation52_spill] sm:$0xff] }
 0x29f   :  { %v1291_v56 = vsub.f32 1.0, %v1290_v41  ;;  %v7375_v41 = vld [vmem:[%s10498_s2 + $0x80] sm:$0xff]  ;;  %v7396_v5 = vld [vmem:[%s10498_s2 + $0x70] sm:$0xff] }
 0x2a0   :  { %1592 = vmatpush.msra.mxu1 %v6125_v10  ;;  %1632 = vmatpush.msra.mxu3 %v6131_v28  ;;  %v1298_v10 = vand.u32 2147483647, %v1288_v25  ;;  %v1316_v28 = vsel %vm7174_vm4, %v7147_v27, %v1312_v39  ;;  %vm1318_vm7 = vcmp.eq.f32.partialorder %v1317_v7, 8.507059e+37  ;;  %v3603_v27 = vpop.eup %3602  ;;  %v1331_v16 = vmul.f32 %v7161_v22, %v1330_v30  ;;  %v11368_v39 = vld [vmem:[#allocation49_spill] sm:$0xff]  ;;  %v7417_v30 = vld [vmem:[%s10498_s2 + $0x20] sm:$0xff] }
 0x2a1   :  { %v1292_v11 = vmul.f32 %v3601_v34, %v1291_v56  ;;  %v7389_v56 = vld [vmem:[%s10498_s2 + $0x60] sm:$0xff]  ;;  %v11370_v7 = vld [vmem:[#allocation53_spill] sm:$0xff] }
 0x2a2   :  { %1593 = vmatpush.msra.mxu1 %v6141_v58  ;;  %1633 = vmatpush.msra.mxu3 %v6147_v20  ;;  %v1301_v58 = vor.u32 1.1754944e-38, %v1300_v29  ;;  %v1321_v20 = vsel %vm1318_vm7, %v1320_v63, %v1316_v28  ;;  %vm1299_vm9 = vcmp.eq.f32.partialorder %v1298_v10, 8.507059e+37  ;;  %v11371_v29 = vld [vmem:[#allocation56_spill] sm:$0xff]  ;;  %v11372_v10 = vld [vmem:[#allocation57_spill] sm:$0xff] }
 0x2a3   :  { %v1293_v48 = vadd.f32 %v3601_v34, %v1292_v11  ;;  %v7403_v11 = vld [vmem:[%s10498_s2 + $0x40] sm:$0xff]  ;;  %v7410_v28 = vld [vmem:[%s10498_s2 + $0x50] sm:$0xff] }
 0x2a4   :  { %1594 = vmatpush.msra.mxu1 %v6154_v26  ;;  %1634 = vmatpush.msra.mxu3 %v6160_v46  ;;  %v1343_v46 = vmul.f32 %v1321_v20, %v6189_v1  ;;  %v11373_v63 = vld [vmem:[#allocation60_spill] sm:$0xff] }
 0x2a5   :  { %1464 = vmatmul.f32.vlgmr.msrb.gmra.mxu1 %v1200_v40  ;;  %1504 = vmatmul.f32.vlgmr.msrb.gmra.mxu3 %v1200_v40  ;;  %v1297_v53 = vsel %vm1296_vm8, %v3601_v34, %v1293_v48  ;;  %v7354_v40 = vld [vmem:[%s10498_s2 + $0xd0] sm:$0xff]  ;;  %v11374_v48 = vld [vmem:[#allocation63_spill] sm:$0xff] }
 0x2a6   :  { %1595 = vmatpush.msra.mxu1 %v6167_v21  ;;  %1635 = vmatpush.msra.mxu3 %v6173_v9  ;;  %v1302_v26 = vsel %vm1299_vm9, %v1301_v58, %v1297_v53  ;;  %v1332_v9 = vadd.f32 %v7161_v22, %v1331_v16  ;;  %v7368_v34 = vld [vmem:[%s10498_s2 + $0xb0] sm:$0xff]  ;;  %v7431_v53 = vld [vmem:[%s10498_s2] sm:$0xff] }
 0x2a7   :  { %v1344_v25 = vmul.f32 %v3603_v27, %v1302_v26  ;;  %v7424_v58 = vld [vmem:[%s10498_s2 + $0x30] sm:$0xff] }
 0x2a8   :  { %1596 = vmatpush.msra.mxu1 %v6180_v15  ;;  %1636 = vmatpush.msra.mxu3 %v6186_v4  ;;  %v1339_v15 = vand.u32 2147483648, %v7154_v44  ;;  %v1337_v4 = vand.u32 2147483647, %v7154_v44  ;;  %v1336_v1 = vsel %vm1335_vm12, %v7161_v22, %v1332_v9  ;;  %v7333_v44 = vld [vmem:[%s10498_s2 + $0xe0] sm:$0xff]  ;;  %v11375_v20 = vld [vmem:[#allocation68_spill] sm:$0xff]  ;;  %v11376_v27 = vld [vmem:[#allocation69_spill] sm:$0xff] }
 0x2a9   :  { %v7193_v21 = vadd.f32 %v1344_v25, %v1343_v46  ;;  %v11366_v22 = vld [vmem:[#allocation43_spill] sm:$0xff]  ;;  %v7438_v16 = vld [vmem:[%s10498_s2 + $0x10] sm:$0xff]  ;;  %v11380_v9 = vld [vmem:[#allocation18_spill] sm:$0xff] }
 0x2aa   :  { %1597 = vmatpush.msra.mxu1 %v6196_v47  ;;  %1637 = vmatpush.msra.mxu3 %v6202_v24  ;;  %v1340_v47 = vor.u32 1.1754944e-38, %v1339_v15  ;;  %vm1338_vm13 = vcmp.eq.f32.partialorder %v1337_v4, 8.507059e+37  ;;  %v11377_v26 = vld [vmem:[#allocation72_spill] sm:$0xff]  ;;  %v11378_v46 = vld [vmem:[#allocation73_spill] sm:$0xff]  ;;  %v11381_v15 = vld [vmem:[#allocation19_spill] sm:$0xff] }
 0x2ab   :  { %3604 = vtanh.f32 %v7193_v21  ;;  %v11379_v25 = vld [vmem:[#allocation76_spill] sm:$0xff]  ;;  %v11382_v4 = vld [vmem:[#allocation77_spill] sm:$0xff] }
 0x2ac   :  { %1598 = vmatpush.msra.mxu1 %v6212_v31  ;;  %1638 = vmatpush.msra.mxu3 %v6218_v50  ;;  %v1341_v31 = vsel %vm1338_vm13, %v1340_v47, %v1336_v1  ;;  %v11383_v1 = vld [vmem:[#allocation26_spill] sm:$0xff]  ;;  %v11384_v47 = vld [vmem:[#allocation81_spill] sm:$0xff] }
 0x2ae   :  { %1599 = vmatpush.msra.mxu1 %v6225_v32  ;;  %1639 = vmatpush.msra.mxu3 %v6231_v60  ;;  %v7219_v32 = vld [vmem:[%s10498_s2 + $0x1e0] sm:$0xff]  ;;  %v7225_v60 = vld [vmem:[%s10498_s2 + $0x1f0] sm:$0xff] }
 0x2b0   :  { %1600 = vmatpush.msra.mxu1 %v6237_v55  ;;  %1640 = vmatpush.msra.mxu3 %v6243_v62  ;;  %v7233_v55 = vld [vmem:[%s10498_s2 + $0x1c0] sm:$0xff]  ;;  %v7239_v62 = vld [vmem:[%s10498_s2 + $0x1d0] sm:$0xff] }
 0x2b1   :  { %v3605_v24 = vpop.eup %3604 }
 0x2b2   :  { %1601 = vmatpush.msra.mxu1 %v6251_v59  ;;  %1641 = vmatpush.msra.mxu3 %v6257_v33  ;;  %v7210_v50 = vmul.f32 %v3605_v24, %v1341_v31  ;;  %v7247_v59 = vld [vmem:[%s10498_s2 + $0x1a0] sm:$0xff]  ;;  %v7253_v33 = vld [vmem:[%s10498_s2 + $0x1b0] sm:$0xff] }
 0x2b3   :  { %v11385_v24 = vld [vmem:[#allocation27_spill] sm:$0xff]  ;;  %v11386_v31 = vld [vmem:[#allocation84_spill] sm:$0xff] }
 0x2b4   :  { %1602 = vmatpush.msra.mxu1 %v6263_v35  ;;  %1642 = vmatpush.msra.mxu3 %v6269_v42  ;;  %v7261_v35 = vld [vmem:[%s10498_s2 + $0x180] sm:$0xff]  ;;  %v7267_v42 = vld [vmem:[%s10498_s2 + $0x190] sm:$0xff] }
 0x2b5   :  { %1364 = vmatmul.f32.vlgmr.msra.gmra.mxu0 %v7210_v50  ;;  %1404 = vmatmul.f32.vlgmr.msra.gmra.mxu2 %v7210_v50 }
 0x2b6   :  { %1571 = vmatpush.msra.mxu0 %v7219_v32  ;;  %1611 = vmatpush.msra.mxu2 %v7225_v60 }
 0x2b7   :  { %1603 = vmatpush.msra.mxu1 %v6279_v61  ;;  %1643 = vmatpush.msra.mxu3 %v6285_v19  ;;  %v7277_v61 = vld [vmem:[%s10498_s2 + $0x160] sm:$0xff]  ;;  %v7284_v19 = vld [vmem:[%s10498_s2 + $0x170] sm:$0xff] }
 0x2b8   :  { %1572 = vmatpush.msra.mxu0 %v7233_v55  ;;  %1612 = vmatpush.msra.mxu2 %v7239_v62 }
 0x2b9   :  { %1604 = vmatpush.msra.mxu1 %v6293_v3  ;;  %1644 = vmatpush.msra.mxu3 %v6299_v38  ;;  %v7291_v3 = vld [vmem:[%s10498_s2 + $0x140] sm:$0xff]  ;;  %v7298_v38 = vld [vmem:[%s10498_s2 + $0x150] sm:$0xff] }
 0x2ba   :  { %1573 = vmatpush.msra.mxu0 %v7247_v59  ;;  %1613 = vmatpush.msra.mxu2 %v7253_v33 }
 0x2bb   :  { %1605 = vmatpush.msra.mxu1 %v6307_v17  ;;  %1645 = vmatpush.msra.mxu3 %v6313_v6  ;;  %v7305_v17 = vld [vmem:[%s10498_s2 + $0x120] sm:$0xff]  ;;  %v7312_v6 = vld [vmem:[%s10498_s2 + $0x130] sm:$0xff] }
 0x2bc   :  { %1574 = vmatpush.msra.mxu0 %v7261_v35  ;;  %1614 = vmatpush.msra.mxu2 %v7267_v42 }
 0x2bd   :  { %1606 = vmatpush.msra.mxu1 %v6321_v49  ;;  %1646 = vmatpush.msra.mxu3 %v6327_v57  ;;  %v11359_v49 = vld [vmem:[#allocation28_spill] sm:$0xff]  ;;  %v7319_v57 = vld [vmem:[%s10498_s2 + $0x100] sm:$0xff] }
 0x2be   :  { %1444 = vmatmul.f32.vlgmr.msrb.gmra.mxu0 %v7210_v50  ;;  %1484 = vmatmul.f32.vlgmr.msrb.gmra.mxu2 %v7210_v50 }
 0x2bf   :  { %1575 = vmatpush.msra.mxu0 %v7277_v61  ;;  %1607 = vmatmul.f32.vlgmr.msra.gmra.mxu1 %v7210_v50 }
 0x2c0   :  { %1615 = vmatpush.msra.mxu2 %v7284_v19  ;;  %1647 = vmatmul.f32.vlgmr.msra.gmra.mxu3 %v7210_v50 }
 0x2c1   :  { %1576 = vmatpush.msra.mxu0 %v7291_v3  ;;  %1738 = vmatpush.msrb.mxu1 %v6340_v54  ;;  %v11360_v54 = vld [vmem:[#allocation29_spill] sm:$0xff] }
 0x2c2   :  { %1616 = vmatpush.msra.mxu2 %v7298_v38  ;;  %1778 = vmatpush.msrb.mxu3 %v6347_v18  ;;  %v7326_v18 = vld [vmem:[%s10498_s2 + $0x110] sm:$0xff] }
 0x2c3   :  { %1577 = vmatpush.msra.mxu0 %v7305_v17  ;;  %1739 = vmatpush.msrb.mxu1 %v6354_v12  ;;  %v11361_v12 = vld [vmem:[#allocation32_spill] sm:$0xff] }
 0x2c4   :  { %1617 = vmatpush.msra.mxu2 %v7312_v6  ;;  %1779 = vmatpush.msrb.mxu3 %v11359_v49  ;;  %v11388_v49 = vld [vmem:[#allocation88_spill] sm:$0xff] }
 0x2c5   :  { %1578 = vmatpush.msra.mxu0 %v7319_v57  ;;  %1740 = vmatpush.msrb.mxu1 %v11360_v54  ;;  %v11389_v54 = vld [vmem:[#allocation31_spill] sm:$0xff] }
 0x2c6   :  { %1618 = vmatpush.msra.mxu2 %v7326_v18  ;;  %1780 = vmatpush.msrb.mxu3 %v11361_v12  ;;  %v11390_v12 = vld [vmem:[#allocation89_spill] sm:$0xff] }
 0x2c7   :  { %1579 = vmatpush.msra.mxu0 %v7333_v44  ;;  %1741 = vmatpush.msrb.mxu1 %v11362_v51  ;;  %v11391_v51 = vld [vmem:[#allocation34_spill] sm:$0xff] }
 0x2c8   :  { %1619 = vmatpush.msra.mxu2 %v7340_v37  ;;  %1781 = vmatpush.msrb.mxu3 %v11363_v23  ;;  %v11392_v23 = vld [vmem:[#allocation92_spill] sm:$0xff] }
 0x2c9   :  { %1580 = vmatpush.msra.mxu0 %v7347_v36  ;;  %1742 = vmatpush.msrb.mxu1 %v11364_v0  ;;  %v11393_v0 = vld [vmem:[#allocation35_spill] sm:$0xff] }
 0x2ca   :  { %1620 = vmatpush.msra.mxu2 %v7354_v40  ;;  %1782 = vmatpush.msrb.mxu3 %v11365_v14  ;;  %v11394_v14 = vld [vmem:[#allocation93_spill] sm:$0xff] }
 0x2cb   :  { %1581 = vmatpush.msra.mxu0 %v7361_v43  ;;  %1743 = vmatpush.msrb.mxu1 %v11366_v22  ;;  %v11395_v22 = vld [vmem:[#allocation38_spill] sm:$0xff] }
 0x2cc   :  { %1621 = vmatpush.msra.mxu2 %v7368_v34  ;;  %1783 = vmatpush.msrb.mxu3 %v11367_v8  ;;  %v11396_v8 = vld [vmem:[#allocation39_spill] sm:$0xff] }
 0x2cd   :  { %1582 = vmatpush.msra.mxu0 %v7375_v41  ;;  %1744 = vmatpush.msrb.mxu1 %v11368_v39  ;;  %v11397_v39 = vld [vmem:[#allocation46_spill] sm:$0xff] }
 0x2ce   :  { %1622 = vmatpush.msra.mxu2 %v7382_v45  ;;  %1784 = vmatpush.msrb.mxu3 %v11369_v13  ;;  %v11398_v13 = vld [vmem:[#allocation47_spill] sm:$0xff] }
 0x2cf   :  { %1583 = vmatpush.msra.mxu0 %v7389_v56  ;;  %1745 = vmatpush.msrb.mxu1 %v11370_v7  ;;  %v11399_v7 = vld [vmem:[#allocation50_spill] sm:$0xff] }
 0x2d0   :  { %1623 = vmatpush.msra.mxu2 %v7396_v5  ;;  %1785 = vmatpush.msrb.mxu3 %v11371_v29  ;;  %v11400_v29 = vld [vmem:[#allocation51_spill] sm:$0xff] }
 0x2d1   :  { %1584 = vmatpush.msra.mxu0 %v7403_v11  ;;  %1746 = vmatpush.msrb.mxu1 %v11372_v10  ;;  %v11401_v10 = vld [vmem:[#allocation54_spill] sm:$0xff] }
 0x2d2   :  { %1624 = vmatpush.msra.mxu2 %v7410_v28  ;;  %1786 = vmatpush.msrb.mxu3 %v11373_v63  ;;  %v11402_v63 = vld [vmem:[#allocation55_spill] sm:$0xff] }
 0x2d3   :  { %1585 = vmatpush.msra.mxu0 %v7417_v30  ;;  %1747 = vmatpush.msrb.mxu1 %v11374_v48  ;;  %v11403_v48 = vld [vmem:[#allocation58_spill] sm:$0xff] }
 0x2d4   :  { %1625 = vmatpush.msra.mxu2 %v7424_v58  ;;  %1787 = vmatpush.msrb.mxu3 %v11375_v20  ;;  %v11404_v20 = vld [vmem:[#allocation59_spill] sm:$0xff] }
 0x2d5   :  { %1586 = vmatpush.msra.mxu0 %v7431_v53  ;;  %1748 = vmatpush.msrb.mxu1 %v11376_v27  ;;  %v11405_v27 = vld [vmem:[#allocation66_spill] sm:$0xff] }
 0x2d6   :  { %1626 = vmatpush.msra.mxu2 %v7438_v16  ;;  %1587 = vmatmul.f32.vlgmr.msra.gmra.mxu0 %v7210_v50 }
 0x2d7   :  { %1627 = vmatmul.f32.vlgmr.msra.gmra.mxu2 %v7210_v50  ;;  %1788 = vmatpush.msrb.mxu3 %v11377_v26  ;;  %v11387_v50 = vld [vmem:[#allocation30_spill] sm:$0xff]  ;;  %v11406_v26 = vld [vmem:[#allocation67_spill] sm:$0xff] }
 0x2d8   :  { %1749 = vmatpush.msrb.mxu1 %v11378_v46  ;;  %1718 = vmatpush.msrb.mxu0 %v11379_v25  ;;  %v11407_v46 = vld [vmem:[#allocation70_spill] sm:$0xff]  ;;  %v11408_v25 = vld [vmem:[#allocation71_spill] sm:$0xff] }
 0x2d9   :  { %1789 = vmatpush.msrb.mxu3 %v11380_v9  ;;  %1758 = vmatpush.msrb.mxu2 %v11381_v15  ;;  %v11409_v9 = vld [vmem:[#allocation74_spill] sm:$0xff]  ;;  %v11410_v15 = vld [vmem:[#allocation75_spill] sm:$0xff] }
 0x2da   :  { %1750 = vmatpush.msrb.mxu1 %v11382_v4  ;;  %1719 = vmatpush.msrb.mxu0 %v11383_v1  ;;  %v11411_v4 = vld [vmem:[#allocation79_spill] sm:$0xff]  ;;  %v11412_v1 = vld [vmem:[#allocation80_spill] sm:$0xff] }
 0x2db   :  { %1790 = vmatpush.msrb.mxu3 %v11384_v47  ;;  %1759 = vmatpush.msrb.mxu2 %v11385_v24  ;;  %v11413_v47 = vld [vmem:[#allocation86_spill] sm:$0xff]  ;;  %v11414_v24 = vld [vmem:[#allocation87_spill] sm:$0xff] }
 0x2dc   :  { %1751 = vmatpush.msrb.mxu1 %v11386_v31  ;;  %1720 = vmatpush.msrb.mxu0 %v11387_v50  ;;  %v11415_v31 = vld [vmem:[#allocation90_spill] sm:$0xff]  ;;  %v11416_v50 = vld [vmem:[#allocation91_spill] sm:$0xff] }
 0x2dd   :  { %1791 = vmatpush.msrb.mxu3 %v11388_v49  ;;  %1760 = vmatpush.msrb.mxu2 %v11389_v54  ;;  %v11417_v49 = vld [vmem:[#allocation94_spill] sm:$0xff]  ;;  %v11418_v54 = vld [vmem:[#allocation95_spill] sm:$0xff] }
 0x2de   :  { %1752 = vmatpush.msrb.mxu1 %v11390_v12  ;;  %1721 = vmatpush.msrb.mxu0 %v11391_v51  ;;  %v11419_v12 = vld [vmem:[#allocation96_spill] sm:$0xff]  ;;  %v11420_v51 = vld [vmem:[#allocation101_spill] sm:$0xff] }
 0x2df   :  { %1792 = vmatpush.msrb.mxu3 %v11392_v23  ;;  %1761 = vmatpush.msrb.mxu2 %v11393_v0  ;;  %v11421_v23 = vld [vmem:[#allocation105_spill] sm:$0xff]  ;;  %v11422_v0 = vld [vmem:[#allocation106_spill] sm:$0xff] }
 0x2e0   :  { %1753 = vmatpush.msrb.mxu1 %v11394_v14  ;;  %1722 = vmatpush.msrb.mxu0 %v11395_v22  ;;  %v11423_v14 = vld [vmem:[#allocation107_spill] sm:$0xff]  ;;  %v11424_v22 = vld [vmem:[#allocation110_spill] sm:$0xff] }
 0x2e1   :  { %1793 = vmatpush.msrb.mxu3 %v11396_v8  ;;  %1762 = vmatpush.msrb.mxu2 %v11397_v39  ;;  %v11425_v8 = vld [vmem:[#allocation111_spill] sm:$0xff] }
 0x2e2   :  { %1818 = vmatpush.msra.mxu1 %v11398_v13  ;;  %1723 = vmatpush.msrb.mxu0 %v11400_v29  ;;  %v11426_v39 = vld [vmem:[#allocation11_spill] sm:$0xff]  ;;  %v11427_v13 = vld [vmem:[#allocation22_spill] sm:$0xff]  ;;  %v11429_v29 = vld [vmem:[#allocation21_spill] sm:$0xff] }
 0x2e3   :  { %1858 = vmatpush.msra.mxu3 %v11399_v7  ;;  %1763 = vmatpush.msrb.mxu2 %v11401_v10  ;;  %v11428_v7 = vld [vmem:[#allocation10_spill] sm:$0xff]  ;;  %v11430_v10 = vld [vmem:[#allocation3_spill] sm:$0xff] }
 0x2e4   :  { %1819 = vmatpush.msra.mxu1 %v11402_v63  ;;  %1724 = vmatpush.msrb.mxu0 %v11404_v20  ;;  %v11431_v63 = vld [vmem:[#allocation4_spill] sm:$0xff]  ;;  %v11433_v20 = vld [vmem:[#allocation6_spill] sm:$0xff] }
 0x2e5   :  { %1859 = vmatpush.msra.mxu3 %v11403_v48  ;;  %1764 = vmatpush.msrb.mxu2 %v11405_v27  ;;  %v11432_v48 = vld [vmem:[#allocation5_spill] sm:$0xff]  ;;  %v11434_v27 = vld [vmem:[#allocation7_spill] sm:$0xff] }
 0x2e6   :  { %1820 = vmatpush.msra.mxu1 %v11406_v26  ;;  %1725 = vmatpush.msrb.mxu0 %v11408_v25  ;;  %v11435_v26 = vld [vmem:[#allocation8_spill] sm:$0xff] }
 0x2e7   :  { %1860 = vmatpush.msra.mxu3 %v11407_v46  ;;  %1765 = vmatpush.msrb.mxu2 %v11409_v9  ;;  %v11436_v46 = vld [vmem:[#allocation9_spill] sm:$0xff]  ;;  %v11437_v25 = vld [vmem:[#allocation12_spill] sm:$0xff] }
 0x2e8   :  { %1821 = vmatpush.msra.mxu1 %v11410_v15  ;;  %1726 = vmatpush.msrb.mxu0 %v11412_v1  ;;  %v11438_v9 = vld [vmem:[#allocation13_spill] sm:$0xff]  ;;  %v11439_v15 = vld [vmem:[#allocation14_spill] sm:$0xff]  ;;  %v11441_v1 = vld [vmem:[#allocation116_spill] sm:$0xff] }
 0x2e9   :  { %1861 = vmatpush.msra.mxu3 %v11411_v4  ;;  %1766 = vmatpush.msrb.mxu2 %v11413_v47  ;;  %v11440_v4 = vld [vmem:[#allocation15_spill] sm:$0xff]  ;;  %v11442_v47 = vld [vmem:[#allocation117_spill] sm:$0xff] }
 0x2ea   :  { %1822 = vmatpush.msra.mxu1 %v11414_v24  ;;  %1727 = vmatpush.msrb.mxu0 %v11416_v50  ;;  %v11443_v24 = vld [vmem:[#allocation118_spill] sm:$0xff]  ;;  %v11445_v50 = vld [vmem:[#allocation120_spill] sm:$0xff] }
 0x2eb   :  { %1862 = vmatpush.msra.mxu3 %v11415_v31  ;;  %1767 = vmatpush.msrb.mxu2 %v11417_v49  ;;  %v11444_v31 = vld [vmem:[#allocation119_spill] sm:$0xff]  ;;  %v11446_v49 = vld [vmem:[#allocation121_spill] sm:$0xff] }
 0x2ec   :  { %1823 = vmatpush.msra.mxu1 %v11418_v54  ;;  %1728 = vmatpush.msrb.mxu0 %v11420_v51  ;;  %v11447_v54 = vld [vmem:[#allocation122_spill] sm:$0xff]  ;;  %v11449_v51 = vld [vmem:[#allocation124_spill] sm:$0xff] }
 0x2ed   :  { %1863 = vmatpush.msra.mxu3 %v11419_v12  ;;  %1768 = vmatpush.msrb.mxu2 %v11421_v23  ;;  %v11448_v12 = vld [vmem:[#allocation123_spill] sm:$0xff]  ;;  %v11450_v23 = vld [vmem:[#allocation125_spill] sm:$0xff] }
 0x2ee   :  { %1824 = vmatpush.msra.mxu1 %v11422_v0  ;;  %1729 = vmatpush.msrb.mxu0 %v11424_v22  ;;  %v11451_v0 = vld [vmem:[#allocation126_spill] sm:$0xff]  ;;  %v11453_v22 = vld [vmem:[#allocation128_spill] sm:$0xff] }
 0x2ef   :  { %1864 = vmatpush.msra.mxu3 %v11423_v14  ;;  %1769 = vmatpush.msrb.mxu2 %v11425_v8  ;;  %v11452_v14 = vld [vmem:[#allocation127_spill] sm:$0xff]  ;;  %v11454_v8 = vld [vmem:[#allocation129_spill] sm:$0xff] }
 0x2f0   :  { %1825 = vmatpush.msra.mxu1 %v11426_v39  ;;  %1730 = vmatpush.msrb.mxu0 %v11428_v7  ;;  %v11455_v39 = vld [vmem:[#allocation130_spill] sm:$0xff]  ;;  %v11457_v7 = vld [vmem:[#allocation132_spill] sm:$0xff] }
 0x2f1   :  { %1865 = vmatpush.msra.mxu3 %v11427_v13  ;;  %1770 = vmatpush.msrb.mxu2 %v11429_v29  ;;  %v11456_v13 = vld [vmem:[#allocation131_spill] sm:$0xff]  ;;  %v11458_v29 = vld [vmem:[#allocation133_spill] sm:$0xff] }
 0x2f2   :  { %1826 = vmatpush.msra.mxu1 %v11430_v10  ;;  %1731 = vmatpush.msrb.mxu0 %v11432_v48  ;;  %v11459_v10 = vld [vmem:[#allocation134_spill] sm:$0xff]  ;;  %v11461_v48 = vld [vmem:[#allocation136_spill] sm:$0xff] }
 0x2f3   :  { %1866 = vmatpush.msra.mxu3 %v11431_v63  ;;  %1771 = vmatpush.msrb.mxu2 %v11433_v20  ;;  %v11460_v63 = vld [vmem:[#allocation135_spill] sm:$0xff]  ;;  %v11462_v20 = vld [vmem:[#allocation137_spill] sm:$0xff] }
 0x2f4   :  { %1827 = vmatpush.msra.mxu1 %v11434_v27  ;;  %1732 = vmatpush.msrb.mxu0 %v11436_v46  ;;  %v11463_v27 = vld [vmem:[#allocation138_spill] sm:$0xff]  ;;  %v11465_v46 = vld [vmem:[#allocation140_spill] sm:$0xff] }
 0x2f5   :  { %1867 = vmatpush.msra.mxu3 %v11435_v26  ;;  %1772 = vmatpush.msrb.mxu2 %v11437_v25  ;;  %v11464_v26 = vld [vmem:[#allocation139_spill] sm:$0xff]  ;;  %v11466_v25 = vld [vmem:[#allocation141_spill] sm:$0xff] }
 0x2f6   :  { %1828 = vmatpush.msra.mxu1 %v11438_v9  ;;  %1733 = vmatpush.msrb.mxu0 %v11440_v4  ;;  %v11467_v9 = vld [vmem:[#allocation142_spill] sm:$0xff]  ;;  %v11469_v4 = vld [vmem:[#allocation144_spill] sm:$0xff] }
 0x2f7   :  { %1868 = vmatpush.msra.mxu3 %v11439_v15  ;;  %1773 = vmatpush.msrb.mxu2 %v11441_v1  ;;  %v11468_v15 = vld [vmem:[#allocation143_spill] sm:$0xff]  ;;  %v11470_v1 = vld [vmem:[#allocation145_spill] sm:$0xff] }
 0x2f8   :  { %1829 = vmatpush.msra.mxu1 %v11442_v47  ;;  %1798 = vmatpush.msra.mxu0 %v11444_v31  ;;  %v11471_v47 = vld [vmem:[#allocation146_spill] sm:$0xff]  ;;  %v11473_v31 = vld [vmem:[#allocation148_spill] sm:$0xff] }
 0x2f9   :  { %1869 = vmatpush.msra.mxu3 %v11443_v24  ;;  %1838 = vmatpush.msra.mxu2 %v11445_v50  ;;  %v11472_v24 = vld [vmem:[#allocation147_spill] sm:$0xff]  ;;  %v11474_v50 = vld [vmem:[#allocation149_spill] sm:$0xff] }
 0x2fa   :  { %1830 = vmatpush.msra.mxu1 %v11446_v49  ;;  %1799 = vmatpush.msra.mxu0 %v11448_v12  ;;  %v11475_v49 = vld [vmem:[#allocation150_spill] sm:$0xff]  ;;  %v11477_v12 = vld [vmem:[#allocation152_spill] sm:$0xff] }
 0x2fb   :  { %1870 = vmatpush.msra.mxu3 %v11447_v54  ;;  %1839 = vmatpush.msra.mxu2 %v11449_v51  ;;  %v11476_v54 = vld [vmem:[#allocation151_spill] sm:$0xff]  ;;  %v11478_v51 = vld [vmem:[#allocation153_spill] sm:$0xff] }
 0x2fc   :  { %1831 = vmatpush.msra.mxu1 %v11450_v23  ;;  %1800 = vmatpush.msra.mxu0 %v11452_v14  ;;  %v11479_v23 = vld [vmem:[#allocation154_spill] sm:$0xff]  ;;  %v11481_v14 = vld [vmem:[#allocation156_spill] sm:$0xff] }
 0x2fd   :  { %1871 = vmatpush.msra.mxu3 %v11451_v0  ;;  %1840 = vmatpush.msra.mxu2 %v11453_v22  ;;  %v11480_v0 = vld [vmem:[#allocation155_spill] sm:$0xff]  ;;  %v11482_v22 = vld [vmem:[#allocation157_spill] sm:$0xff] }
 0x2fe   :  { %1832 = vmatpush.msra.mxu1 %v11454_v8  ;;  %1801 = vmatpush.msra.mxu0 %v11456_v13  ;;  %v11483_v8 = vld [vmem:[#allocation158_spill] sm:$0xff] }
 0x2ff   :  { %1872 = vmatpush.msra.mxu3 %v11455_v39  ;;  %1841 = vmatpush.msra.mxu2 %v11457_v7  ;;  %v11484_v7 = vld [vmem:[#allocation16_spill] sm:$0xff] }
 0x300   :  { %1833 = vmatpush.msra.mxu1 %v11458_v29  ;;  %1802 = vmatpush.msra.mxu0 %v11460_v63 }
 0x301   :  { %1873 = vmatpush.msra.mxu3 %v11459_v10  ;;  %1842 = vmatpush.msra.mxu2 %v11461_v48 }
 0x302   :  { %1803 = vmatpush.msra.mxu0 %v11462_v20 }
 0x303   :  { %1843 = vmatpush.msra.mxu2 %v11463_v27 }
 0x304   :  { %1804 = vmatpush.msra.mxu0 %v11464_v26  ;;  %v11485_v26 = vld [vmem:[#allocation17_spill] sm:$0xff] }
 0x305   :  { %1844 = vmatpush.msra.mxu2 %v11465_v46 }
 0x306   :  { %1805 = vmatpush.msra.mxu0 %v11466_v25 }
 0x307   :  { %1845 = vmatpush.msra.mxu2 %v11467_v9  ;;  %v11486_v9 = vld [vmem:[#allocation109_spill] sm:$0xff] }
 0x308   :  { %1806 = vmatpush.msra.mxu0 %v11468_v15  ;;  %v11487_v15 = vld [vmem:[#allocation45_spill] sm:$0xff] }
 0x309   :  { %1846 = vmatpush.msra.mxu2 %v11469_v4  ;;  %v163_v4 = vadd.f32 %v11487_v15, %v11486_v9 }
 0x30a   :  { %1807 = vmatpush.msra.mxu0 %v11470_v1 }
 0x30b   :  { %1847 = vmatpush.msra.mxu2 %v11471_v47 }
 0x30c   :  { %1808 = vmatpush.msra.mxu0 %v11472_v24 }
 0x30d   :  { %1848 = vmatpush.msra.mxu2 %v11473_v31 }
 0x30e   :  { %1809 = vmatpush.msra.mxu0 %v11474_v50 }
 0x30f   :  { %1849 = vmatpush.msra.mxu2 %v11475_v49 }
 0x310   :  { %1810 = vmatpush.msra.mxu0 %v11476_v54 }
 0x311   :  { %1850 = vmatpush.msra.mxu2 %v11477_v12 }
 0x312   :  { %1811 = vmatpush.msra.mxu0 %v11478_v51  ;;  %v11488_v51 = vld [vmem:[#allocation20_spill] sm:$0xff] }
 0x313   :  { %1851 = vmatpush.msra.mxu2 %v11479_v23 }
 0x314   :  { %1812 = vmatpush.msra.mxu0 %v11480_v0 }
 0x315   :  { %1852 = vmatpush.msra.mxu2 %v11481_v14 }
 0x316   :  { %1813 = vmatpush.msra.mxu0 %v11482_v22 }
 0x317   :  { %1853 = vmatpush.msra.mxu2 %v11483_v8 }
 0x31a   :  { %v1385_v39 = vpop.f32.mrf.mxu1 }
 0x320   :  { %v1425_v10 = vpop.f32.mrf.mxu3 }
 0x322   :  { %v1465_v63 = vpop.f32.mrf.mxu1 }
 0x328   :  { %v1505_v24 = vpop.f32.mrf.mxu3 }
 0x332   :  { %v1365_v13 = vpop.f32.mrf.mxu0 }
 0x333   :  { %v1366_v29 = vadd.f32 %v1365_v13, %v11484_v7  ;;  %v11489_v13 = vld [vmem:[#allocation114_spill] sm:$0xff] }
 0x335   :  { %v1386_v48 = vadd.f32 %v1385_v39, %v1366_v29  ;;  %v11490_v29 = vld [vmem:[#allocation62_spill] sm:$0xff] }
 0x337   :  { %v3490_v20 = vmul.f32 -1.442695, %v1386_v48 }
 0x338   :  { %v1405_v27 = vpop.f32.mrf.mxu2 }
 0x339   :  { %3606 = vpow2.f32 %v3490_v20  ;;  %v1406_v46 = vadd.f32 %v1405_v27, %v11485_v26  ;;  %v11491_v27 = vld [vmem:[#allocation23_spill] sm:$0xff] }
 0x33b   :  { %v1426_v25 = vadd.f32 %v1425_v10, %v1406_v46  ;;  %v1445_v14 = vpop.f32.mrf.mxu0  ;;  %v245_v10 = vadd.f32 %v11490_v29, %v11489_v13 }
 0x33c   :  { %v1608_v1 = vpop.f32.mrf.mxu1  ;;  %v1446_v46 = vadd.f32 %v1445_v14, %v11491_v27 }
 0x33d   :  { %v3491_v47 = vmul.f32 -1.442695, %v1426_v25  ;;  %v1652_v31 = vadd.f32 %v1608_v1, %v163_v4 }
 0x33f   :  { %v3607_v50 = vpop.eup %3606  ;;  %3608 = vpow2.f32 %v3491_v47  ;;  %v3494_v12 = vmul.f32 -1.442695, %v1652_v31  ;;  %v1466_v47 = vadd.f32 %v1465_v63, %v1446_v46 }
 0x340   :  { %v1511_v49 = vadd.f32 1.0, %v3607_v50 }
 0x341   :  { %v1485_v54 = vpop.f32.mrf.mxu2 }
 0x342   :  { %3610 = vrcp.f32 %v1511_v49  ;;  %v1486_v23 = vadd.f32 %v1485_v54, %v11488_v51  ;;  %vm1517_vm15 = vweird.f32 %v1511_v49  ;;  %v1521_v14 = vand.u32 2147483647, %v1511_v49 }
 0x343   :  { %3612 = vpow2.f32 %v3494_v12  ;;  %v1648_v39 = vpop.f32.mrf.mxu3 }
 0x344   :  { %v1506_v22 = vadd.f32 %v1505_v24, %v1486_v23  ;;  %v1654_v15 = vadd.f32 %v1648_v39, %v245_v10  ;;  %v11492_v39 = vld [vmem:[#allocation108_spill] sm:$0xff]  ;;  %vm1522_vm3 = vcmp.eq.f32.partialorder %v1521_v14, 8.507059e+37 }
 0x345   :  { %v3609_v0 = vpop.eup %3608  ;;  %v11493_v10 = vld [vmem:[#allocation44_spill] sm:$0xff] }
 0x346   :  { %v1530_v8 = vadd.f32 1.0, %v3609_v0  ;;  %v3492_v48 = vmul.f32 -1.442695, %v1506_v22  ;;  %v3495_v50 = vmul.f32 -1.442695, %v1654_v15  ;;  %v1523_v22 = vand.u32 2147483648, %v1511_v49 }
 0x348   :  { %v3611_v20 = vpop.eup %3610  ;;  %3614 = vrcp.f32 %v1530_v8  ;;  %v1542_v63 = vand.u32 2147483648, %v1530_v8  ;;  %vm1536_vm2 = vweird.f32 %v1530_v8 }
 0x349   :  { %v1513_v25 = vmul.f32 %v3611_v20, %v1511_v49  ;;  %3616 = vpow2.f32 %v3492_v48  ;;  %v3613_v1 = vpop.eup %3612  ;;  %vm1518_vm14 = vweird.f32 %v3611_v20  ;;  %v122_v48 = vadd.f32 %v11493_v10, %v11492_v39 }
 0x34a   :  { %v7558_v0 = vadd.f32 1.0, %v3613_v1  ;;  %3618 = vtanh.f32 %v1466_v47  ;;  %vm7562_vm0 = vmor %vm1517_vm15, %vm1518_vm14  ;;  %v1524_v49 = vor.u32 1.1754944e-38, %v1523_v22 }
 0x34b   :  { %v1514_v4 = vsub.f32 1.0, %v1513_v25  ;;  %3620 = vpow2.f32 %v3495_v50  ;;  %v1540_v25 = vand.u32 2147483647, %v1530_v8 }
 0x34c   :  { %vm1683_vm11 = vweird.f32 %v7558_v0 }
 0x34d   :  { %v1515_v31 = vmul.f32 %v3611_v20, %v1514_v4  ;;  %vm1541_vm5 = vcmp.eq.f32.partialorder %v1540_v25, 8.507059e+37 }
 0x34e   :  { %v3615_v24 = vpop.eup %3614 }
 0x34f   :  { %v3617_v54 = vpop.eup %3616  ;;  %v1532_v12 = vmul.f32 %v3615_v24, %v1530_v8  ;;  %v1516_v23 = vadd.f32 %v3611_v20, %v1515_v31  ;;  %vm1537_vm1 = vweird.f32 %v3615_v24 }
 0x350   :  { %v1550_v29 = vadd.f32 1.0, %v3617_v54  ;;  %v3619_v50 = vpop.eup %3618  ;;  %vm1538_vm4 = vmor %vm1536_vm2, %vm1537_vm1  ;;  %v1543_v54 = vor.u32 1.1754944e-38, %v1542_v63 }
 0x351   :  { %v1533_v13 = vsub.f32 1.0, %v1532_v12  ;;  %v1520_v4 = vsel %vm7562_vm0, %v3611_v20, %v1516_v23  ;;  %v3621_v39 = vpop.eup %3620 }
 0x352   :  { %3622 = vrcp.f32 %v1550_v29  ;;  %v1525_v12 = vsel %vm1522_vm3, %v1524_v49, %v1520_v4  ;;  %v7576_v46 = vadd.f32 1.0, %v3621_v39  ;;  %v1562_v25 = vand.u32 2147483648, %v1550_v29 }
 0x353   :  { %v1534_v15 = vmul.f32 %v3615_v24, %v1533_v13  ;;  %3624 = vrcp.f32 %v7558_v0  ;;  %v1588_v1 = vpop.f32.mrf.mxu0  ;;  %v1567_v22 = vmul.f32 %v3619_v50, %v1525_v12  ;;  %vm1556_vm7 = vweird.f32 %v1550_v29  ;;  %v11496_v12 = vld [vmem:[#allocation61_spill] sm:$0xff] }
 0x354   :  { %v1651_v47 = vadd.f32 %v1588_v1, %v122_v48  ;;  %v1563_v1 = vor.u32 1.1754944e-38, %v1562_v25  ;;  %vm1703_vm3 = vweird.f32 %v7576_v46 }
 0x355   :  { %v1535_v31 = vadd.f32 %v3615_v24, %v1534_v15  ;;  %v1560_v15 = vand.u32 2147483647, %v1550_v29 }
 0x356   :  { %v3493_v10 = vmul.f32 -1.442695, %v1651_v47 }
 0x357   :  { %v1539_v27 = vsel %vm1538_vm4, %v3615_v24, %v1535_v31  ;;  %vm1561_vm9 = vcmp.eq.f32.partialorder %v1560_v15, 8.507059e+37  ;;  %v7615_v15 = vld [vmem:[%s10498_s2 + $0x1d8] sm:$0xff] }
 0x358   :  { %v3623_v13 = vpop.eup %3622  ;;  %v1544_v51 = vsel %vm1541_vm5, %v1543_v54, %v1539_v27  ;;  %3626 = vpow2.f32 %v3493_v10  ;;  %v204_v10 = vadd.f32 %v11496_v12, %v5693_v2 }
 0x359   :  { %v7569_v20 = vpop.eup %3624  ;;  %v1566_v23 = vmul.f32 %v1544_v51, %v7150_v52  ;;  %v1552_v48 = vmul.f32 %v3623_v13, %v1550_v29  ;;  %vm1557_vm6 = vweird.f32 %v3623_v13 }
 0x35a   :  { %v1679_v63 = vmul.f32 %v7569_v20, %v7558_v0  ;;  %vm1558_vm8 = vmor %vm1556_vm7, %vm1557_vm6  ;;  %v1628_v50 = vpop.f32.mrf.mxu2  ;;  %vm1684_vm10 = vweird.f32 %v7569_v20 }
 0x35b   :  { %v7572_v8 = vadd.f32 %v1567_v22, %v1566_v23  ;;  %v1553_v14 = vsub.f32 1.0, %v1552_v48  ;;  %v1653_v22 = vadd.f32 %v1628_v50, %v204_v10  ;;  %v7597_v48 = vld [vmem:[%s10498_s2 + $0x1f8] sm:$0xff]  ;;  %vm7620_vm12 = vmor %vm1683_vm11, %vm1684_vm10 }
 0x35c   :  { %v1680_v51 = vsub.f32 1.0, %v1679_v63 }
 0x35d   :  { %3628 = vtanh.f32 %v7572_v8  ;;  %v1554_v24 = vmul.f32 %v3623_v13, %v1553_v14 }
 0x35e   :  { %v3627_v27 = vpop.eup %3626  ;;  %3630 = vrcp.f32 %v7576_v46  ;;  %v1681_v31 = vmul.f32 %v7569_v20, %v1680_v51  ;;  %v1687_v51 = vand.u32 2147483647, %v7558_v0 }
 0x35f   :  { %v7579_v4 = vadd.f32 1.0, %v3627_v27  ;;  %v1555_v52 = vadd.f32 %v3623_v13, %v1554_v24  ;;  %v1689_v24 = vand.u32 2147483648, %v7558_v0  ;;  %v7609_v27 = vld [vmem:[%s10498_s2 + $0x1c8] sm:$0xff] }
 0x360   :  { %v1682_v63 = vadd.f32 %v7569_v20, %v1681_v31  ;;  %vm1688_vm15 = vcmp.eq.f32.partialorder %v1687_v51, 8.507059e+37 }
 0x361   :  { %3632 = vrcp.f32 %v7579_v4  ;;  %v1559_v39 = vsel %vm1558_vm8, %v3623_v13, %v1555_v52  ;;  %v7591_v13 = vld [vmem:[%s10498_s2 + $0x1e8] sm:$0xff]  ;;  %v1668_v31 = vand.u32 2147483647, %v7579_v4  ;;  %v1690_v12 = vor.u32 1.1754944e-38, %v1689_v24 }
 0x362   :  { %v1564_v47 = vsel %vm1561_vm9, %v1563_v1, %v1559_v39  ;;  %v1670_v39 = vand.u32 2147483648, %v7579_v4  ;;  %3634 = vtanh.f32 %v1653_v22  ;;  %v1686_v50 = vsel %vm7620_vm12, %v7569_v20, %v1682_v63  ;;  %v7644_v22 = vld [vmem:[%s10498_s2 + $0x188] sm:$0xff] }
 0x363   :  { %v3629_v49 = vpop.eup %3628  ;;  %vm1664_vm14 = vweird.f32 %v7579_v4  ;;  %v1691_v63 = vsel %vm1688_vm15, %v1690_v12, %v1686_v50  ;;  %v7657_v24 = vld [vmem:[%s10498_s2 + $0x168] sm:$0xff]  ;;  %vm1669_vm1 = vcmp.eq.f32.partialorder %v1668_v31, 8.507059e+37  ;;  %v7689_v12 = vld [vmem:[%s10498_s2 + $0x138] sm:$0xff] }
 0x364   :  { %v1570_v54 = vmul.f32 %v3629_v49, %v1564_v47  ;;  %v7586_v23 = vpop.eup %3630  ;;  %v7628_v49 = vld [vmem:[%s10498_s2 + $0x1a8] sm:$0xff]  ;;  %v7634_v47 = vld [vmem:[%s10498_s2 + $0x1b8] sm:$0xff]  ;;  %v1671_v20 = vor.u32 1.1754944e-38, %v1670_v39 }
 0x365   :  { %v1699_v25 = vmul.f32 %v7586_v23, %v7576_v46  ;;  %v7670_v39 = vld [vmem:[%s10498_s2 + $0x148] sm:$0xff]  ;;  %vm1704_vm2 = vweird.f32 %v7586_v23 }
 0x366   :  { %1754 = vmatmul.f32.vlgmr.msrb.gmra.mxu1 %v1570_v54  ;;  %1794 = vmatmul.f32.vlgmr.msrb.gmra.mxu3 %v1570_v54  ;;  %v7683_v50 = vld [vmem:[%s10498_s2 + $0x128] sm:$0xff]  ;;  %vm1705_vm4 = vmor %vm1703_vm3, %vm1704_vm2 }
 0x367   :  { %v3633_v29 = vpop.eup %3632  ;;  %1961 = vmatpush.msrb.mxu1 %v7591_v13  ;;  %2001 = vmatpush.msrb.mxu3 %v7597_v48  ;;  %v1700_v10 = vsub.f32 1.0, %v1699_v25  ;;  %v7663_v25 = vld [vmem:[%s10498_s2 + $0x178] sm:$0xff] }
 0x368   :  { %v1660_v14 = vmul.f32 %v3633_v29, %v7579_v4  ;;  %vm1665_vm13 = vweird.f32 %v3633_v29 }
 0x369   :  { %1962 = vmatpush.msrb.mxu1 %v7609_v27  ;;  %2002 = vmatpush.msrb.mxu3 %v7615_v15  ;;  %vm1666_vm0 = vmor %vm1664_vm14, %vm1665_vm13  ;;  %v1701_v51 = vmul.f32 %v7586_v23, %v1700_v10 }
 0x36a   :  { %v1661_v52 = vsub.f32 1.0, %v1660_v14  ;;  %v7650_v14 = vld [vmem:[%s10498_s2 + $0x198] sm:$0xff] }
 0x36b   :  { %1963 = vmatpush.msrb.mxu1 %v7628_v49  ;;  %2003 = vmatpush.msrb.mxu3 %v7634_v47 }
 0x36c   :  { %v1662_v0 = vmul.f32 %v3633_v29, %v1661_v52 }
 0x36d   :  { %1964 = vmatpush.msrb.mxu1 %v7644_v22  ;;  %2004 = vmatpush.msrb.mxu3 %v7650_v14 }
 0x36e   :  { %v1663_v52 = vadd.f32 %v3633_v29, %v1662_v0  ;;  %1834 = vmatmul.f32.vlgmr.msra.gmra.mxu1 %v1570_v54  ;;  %1874 = vmatmul.f32.vlgmr.msra.gmra.mxu3 %v1570_v54  ;;  %v3635_v54 = vpop.eup %3634  ;;  %v7676_v0 = vld [vmem:[%s10498_s2 + $0x158] sm:$0xff] }
 0x36f   :  { %1965 = vmatpush.msrb.mxu1 %v7657_v24  ;;  %2005 = vmatpush.msrb.mxu3 %v7663_v25 }
 0x370   :  { %v1667_v4 = vsel %vm1666_vm0, %v3633_v29, %v1663_v52  ;;  %v1713_v29 = vmul.f32 %v1691_v63, %v7193_v21  ;;  %v1702_v52 = vadd.f32 %v7586_v23, %v1701_v51  ;;  %v7699_v21 = vld [vmem:[%s10498_s2 + $0x108] sm:$0xff]  ;;  %v1709_v63 = vand.u32 2147483648, %v7576_v46  ;;  %v7721_v51 = vld [vmem:[%s10498_s2 + $0xf8] sm:$0xff] }
 0x371   :  { %v1672_v1 = vsel %vm1669_vm1, %v1671_v20, %v1667_v4  ;;  %1966 = vmatpush.msrb.mxu1 %v7670_v39  ;;  %2006 = vmatpush.msrb.mxu3 %v7676_v0  ;;  %v7705_v20 = vld [vmem:[%s10498_s2 + $0x118] sm:$0xff]  ;;  %v1707_v4 = vand.u32 2147483647, %v7576_v46  ;;  %11500 = vst [vmem:[#allocation42_spill] sm:$0xff] %v7721_v51  ;;  %v7728_v46 = vld [vmem:[%s10498_s2 + $0xc8] sm:$0xff] }
 0x372   :  { %v1714_v31 = vmul.f32 %v3635_v54, %v1672_v1  ;;  %v7715_v54 = vld [vmem:[%s10498_s2 + $0xe8] sm:$0xff]  ;;  %v1706_v1 = vsel %vm1705_vm4, %v7586_v23, %v1702_v52  ;;  %11501 = vst [vmem:[#allocation24_spill] sm:$0xff] %v7728_v46  ;;  %v7746_v52 = vld [vmem:[%s10498_s2 + $0xb8] sm:$0xff] }
 0x373   :  { %1967 = vmatpush.msrb.mxu1 %v7683_v50  ;;  %2007 = vmatpush.msrb.mxu3 %v7689_v12  ;;  %11499 = vst [vmem:[#allocation25_spill] sm:$0xff] %v7715_v54  ;;  %vm1708_vm5 = vcmp.eq.f32.partialorder %v1707_v4, 8.507059e+37  ;;  %v7740_v23 = vld [vmem:[%s10498_s2 + $0xa8] sm:$0xff]  ;;  %v7760_v4 = vld [vmem:[%s10498_s2 + $0x98] sm:$0xff] }
 0x374   :  { %v7692_v10 = vadd.f32 %v1714_v31, %v1713_v29  ;;  %v7734_v29 = vld [vmem:[%s10498_s2 + $0xd8] sm:$0xff]  ;;  %v1710_v31 = vor.u32 1.1754944e-38, %v1709_v63  ;;  %v7754_v63 = vld [vmem:[%s10498_s2 + $0x88] sm:$0xff] }
 0x375   :  { %1968 = vmatpush.msrb.mxu1 %v7699_v21  ;;  %2008 = vmatpush.msrb.mxu3 %v7705_v20 }
 0x376   :  { %3636 = vtanh.f32 %v7692_v10 }
 0x377   :  { %1969 = vmatpush.msrb.mxu1 %v7715_v54  ;;  %2009 = vmatpush.msrb.mxu3 %v7721_v51  ;;  %v1711_v51 = vsel %vm1708_vm5, %v1710_v31, %v1706_v1  ;;  %v7776_v1 = vld [vmem:[%s10498_s2 + $0x78] sm:$0xff]  ;;  %v8022_v31 = vld [vmem:[%s10499_s4 + $0x268] sm:$0xff] }
 0x378   :  { %11524 = vst [vmem:[#allocation18_spill] sm:$0xff] %v8022_v31 }
 0x379   :  { %1970 = vmatpush.msrb.mxu1 %v7728_v46  ;;  %2010 = vmatpush.msrb.mxu3 %v7734_v29 }
 0x37b   :  { %1971 = vmatpush.msrb.mxu1 %v7740_v23  ;;  %2011 = vmatpush.msrb.mxu3 %v7746_v52 }
 0x37c   :  { %v3637_v46 = vpop.eup %3636 }
 0x37d   :  { %v7749_v54 = vmul.f32 %v3637_v46, %v1711_v51  ;;  %1972 = vmatpush.msrb.mxu1 %v7754_v63  ;;  %2012 = vmatpush.msrb.mxu3 %v7760_v4  ;;  %v7770_v51 = vld [vmem:[%s10498_s2 + $0x68] sm:$0xff]  ;;  %v8016_v46 = vld [vmem:[%s10499_s4 + $0x1c0] sm:$0xff] }
 0x37e   :  { %11523 = vst [vmem:[#allocation76_spill] sm:$0xff] %v8016_v46 }
 0x37f   :  { %1734 = vmatmul.f32.vlgmr.msrb.gmra.mxu0 %v7749_v54  ;;  %1774 = vmatmul.f32.vlgmr.msrb.gmra.mxu2 %v7749_v54 }
 0x380   :  { %1941 = vmatpush.msrb.mxu0 %v7219_v32  ;;  %1981 = vmatpush.msrb.mxu2 %v7225_v60  ;;  %v7784_v32 = vld [vmem:[%s10498_s2 + $0x48] sm:$0xff]  ;;  %v7790_v60 = vld [vmem:[%s10498_s2 + $0x58] sm:$0xff] }
 0x381   :  { %1973 = vmatpush.msrb.mxu1 %v7770_v51  ;;  %2013 = vmatpush.msrb.mxu3 %v7776_v1 }
 0x382   :  { %1942 = vmatpush.msrb.mxu0 %v7233_v55  ;;  %1982 = vmatpush.msrb.mxu2 %v7239_v62  ;;  %v7798_v55 = vld [vmem:[%s10498_s2 + $0x28] sm:$0xff]  ;;  %v7804_v62 = vld [vmem:[%s10498_s2 + $0x38] sm:$0xff] }
 0x383   :  { %1974 = vmatpush.msrb.mxu1 %v7784_v32  ;;  %2014 = vmatpush.msrb.mxu3 %v7790_v60 }
 0x384   :  { %1943 = vmatpush.msrb.mxu0 %v7247_v59  ;;  %1983 = vmatpush.msrb.mxu2 %v7253_v33  ;;  %v7812_v59 = vld [vmem:[%s10498_s2 + $0x8] sm:$0xff]  ;;  %v7818_v33 = vld [vmem:[%s10498_s2 + $0x18] sm:$0xff] }
 0x385   :  { %1975 = vmatpush.msrb.mxu1 %v7798_v55  ;;  %2015 = vmatpush.msrb.mxu3 %v7804_v62 }
 0x386   :  { %1944 = vmatpush.msrb.mxu0 %v7261_v35  ;;  %1984 = vmatpush.msrb.mxu2 %v7267_v42  ;;  %v7831_v35 = vld [vmem:[%s10499_s4 + $0x3e0] sm:$0xff]  ;;  %v7838_v42 = vld [vmem:[%s10499_s4 + $0x3e8] sm:$0xff] }
 0x387   :  { %1976 = vmatpush.msrb.mxu1 %v7812_v59  ;;  %2016 = vmatpush.msrb.mxu3 %v7818_v33 }
 0x388   :  { %1814 = vmatmul.f32.vlgmr.msra.gmra.mxu0 %v7749_v54  ;;  %1854 = vmatmul.f32.vlgmr.msra.gmra.mxu2 %v7749_v54 }
 0x389   :  { %1945 = vmatpush.msrb.mxu0 %v7277_v61  ;;  %1977 = vmatmul.f32.vlgmr.msrb.gmra.mxu1 %v7749_v54  ;;  %v7845_v61 = vld [vmem:[%s10499_s4 + $0x3c0] sm:$0xff] }
 0x38a   :  { %1985 = vmatpush.msrb.mxu2 %v7284_v19  ;;  %2017 = vmatmul.f32.vlgmr.msrb.gmra.mxu3 %v7749_v54  ;;  %v7852_v19 = vld [vmem:[%s10499_s4 + $0x3c8] sm:$0xff] }
 0x38b   :  { %1946 = vmatpush.msrb.mxu0 %v7291_v3  ;;  %2108 = vmatpush.msra.mxu1 %v7831_v35  ;;  %v7859_v3 = vld [vmem:[%s10499_s4 + $0x3a0] sm:$0xff] }
 0x38c   :  { %1986 = vmatpush.msrb.mxu2 %v7298_v38  ;;  %2148 = vmatpush.msra.mxu3 %v7838_v42  ;;  %v7866_v38 = vld [vmem:[%s10499_s4 + $0x3a8] sm:$0xff] }
 0x38d   :  { %1947 = vmatpush.msrb.mxu0 %v7305_v17  ;;  %2109 = vmatpush.msra.mxu1 %v7845_v61  ;;  %v7873_v17 = vld [vmem:[%s10499_s4 + $0x380] sm:$0xff] }
 0x38e   :  { %1987 = vmatpush.msrb.mxu2 %v7312_v6  ;;  %2149 = vmatpush.msra.mxu3 %v7852_v19  ;;  %11502 = vst [vmem:[#allocation41_spill] sm:$0xff] %v7873_v17  ;;  %v7880_v6 = vld [vmem:[%s10499_s4 + $0x388] sm:$0xff] }
 0x38f   :  { %1948 = vmatpush.msrb.mxu0 %v7319_v57  ;;  %2110 = vmatpush.msra.mxu1 %v7859_v3  ;;  %11503 = vst [vmem:[#allocation28_spill] sm:$0xff] %v7880_v6  ;;  %v7887_v57 = vld [vmem:[%s10499_s4 + $0x360] sm:$0xff] }
 0x390   :  { %1988 = vmatpush.msrb.mxu2 %v7326_v18  ;;  %2150 = vmatpush.msra.mxu3 %v7866_v38  ;;  %11504 = vst [vmem:[#allocation29_spill] sm:$0xff] %v7887_v57  ;;  %v7894_v18 = vld [vmem:[%s10499_s4 + $0x368] sm:$0xff] }
 0x391   :  { %1949 = vmatpush.msrb.mxu0 %v7333_v44  ;;  %2111 = vmatpush.msra.mxu1 %v7873_v17  ;;  %11505 = vst [vmem:[#allocation32_spill] sm:$0xff] %v7894_v18  ;;  %v7901_v44 = vld [vmem:[%s10499_s4 + $0x340] sm:$0xff] }
 0x392   :  { %1989 = vmatpush.msrb.mxu2 %v7340_v37  ;;  %2151 = vmatpush.msra.mxu3 %v7880_v6  ;;  %11506 = vst [vmem:[#allocation33_spill] sm:$0xff] %v7901_v44  ;;  %v7908_v37 = vld [vmem:[%s10499_s4 + $0x348] sm:$0xff] }
 0x393   :  { %1950 = vmatpush.msrb.mxu0 %v7347_v36  ;;  %2112 = vmatpush.msra.mxu1 %v7887_v57  ;;  %11507 = vst [vmem:[#allocation36_spill] sm:$0xff] %v7908_v37  ;;  %v7915_v36 = vld [vmem:[%s10499_s4 + $0x320] sm:$0xff] }
 0x394   :  { %1990 = vmatpush.msrb.mxu2 %v7354_v40  ;;  %2152 = vmatpush.msra.mxu3 %v7894_v18  ;;  %11508 = vst [vmem:[#allocation37_spill] sm:$0xff] %v7915_v36  ;;  %v7922_v40 = vld [vmem:[%s10499_s4 + $0x328] sm:$0xff] }
 0x395   :  { %1951 = vmatpush.msrb.mxu0 %v7361_v43  ;;  %2113 = vmatpush.msra.mxu1 %v7901_v44  ;;  %11509 = vst [vmem:[#allocation40_spill] sm:$0xff] %v7922_v40  ;;  %v7929_v43 = vld [vmem:[%s10499_s4 + $0x300] sm:$0xff] }
 0x396   :  { %1991 = vmatpush.msrb.mxu2 %v7368_v34  ;;  %2153 = vmatpush.msra.mxu3 %v7908_v37  ;;  %11510 = vst [vmem:[#allocation43_spill] sm:$0xff] %v7929_v43  ;;  %v7936_v34 = vld [vmem:[%s10499_s4 + $0x308] sm:$0xff] }
 0x397   :  { %1952 = vmatpush.msrb.mxu0 %v7375_v41  ;;  %2114 = vmatpush.msra.mxu1 %v7915_v36  ;;  %11511 = vst [vmem:[#allocation48_spill] sm:$0xff] %v7936_v34  ;;  %v7943_v41 = vld [vmem:[%s10499_s4 + $0x2e0] sm:$0xff] }
 0x398   :  { %1992 = vmatpush.msrb.mxu2 %v7382_v45  ;;  %2154 = vmatpush.msra.mxu3 %v7922_v40  ;;  %11512 = vst [vmem:[#allocation49_spill] sm:$0xff] %v7943_v41  ;;  %v7950_v45 = vld [vmem:[%s10499_s4 + $0x2e8] sm:$0xff] }
 0x399   :  { %1953 = vmatpush.msrb.mxu0 %v7389_v56  ;;  %2115 = vmatpush.msra.mxu1 %v7929_v43  ;;  %11513 = vst [vmem:[#allocation52_spill] sm:$0xff] %v7950_v45  ;;  %v7957_v56 = vld [vmem:[%s10499_s4 + $0x2c0] sm:$0xff] }
 0x39a   :  { %1993 = vmatpush.msrb.mxu2 %v7396_v5  ;;  %2155 = vmatpush.msra.mxu3 %v7936_v34  ;;  %11514 = vst [vmem:[#allocation53_spill] sm:$0xff] %v7957_v56  ;;  %v7964_v5 = vld [vmem:[%s10499_s4 + $0x2c8] sm:$0xff] }
 0x39b   :  { %1954 = vmatpush.msrb.mxu0 %v7403_v11  ;;  %2116 = vmatpush.msra.mxu1 %v7943_v41  ;;  %11515 = vst [vmem:[#allocation56_spill] sm:$0xff] %v7964_v5  ;;  %v7971_v11 = vld [vmem:[%s10499_s4 + $0x2a0] sm:$0xff] }
 0x39c   :  { %1994 = vmatpush.msrb.mxu2 %v7410_v28  ;;  %2156 = vmatpush.msra.mxu3 %v7950_v45  ;;  %11516 = vst [vmem:[#allocation57_spill] sm:$0xff] %v7971_v11  ;;  %v7980_v28 = vld [vmem:[%s10499_s4 + $0x2a8] sm:$0xff]  ;;  %v11624_v45 = vld [vmem:[#allocation65_spill] sm:$0xff] }
 0x39d   :  { %1955 = vmatpush.msrb.mxu0 %v7417_v30  ;;  %2117 = vmatpush.msra.mxu1 %v7957_v56  ;;  %11517 = vst [vmem:[#allocation60_spill] sm:$0xff] %v7980_v28  ;;  %v7986_v30 = vld [vmem:[%s10499_s4 + $0x280] sm:$0xff]  ;;  %v166_v41 = vadd.f32 %v11624_v45, %v11486_v9 }
 0x39e   :  { %1995 = vmatpush.msrb.mxu2 %v7424_v58  ;;  %2157 = vmatpush.msra.mxu3 %v7964_v5  ;;  %11518 = vst [vmem:[#allocation63_spill] sm:$0xff] %v7986_v30  ;;  %v7992_v58 = vld [vmem:[%s10499_s4 + $0x1e0] sm:$0xff] }
 0x39f   :  { %1956 = vmatpush.msrb.mxu0 %v7431_v53  ;;  %2118 = vmatpush.msra.mxu1 %v7971_v11  ;;  %11519 = vst [vmem:[#allocation68_spill] sm:$0xff] %v7992_v58  ;;  %v7998_v53 = vld [vmem:[%s10499_s4 + $0x288] sm:$0xff]  ;;  %v11627_v45 = vld [vmem:[#allocation78_spill] sm:$0xff] }
 0x3a0   :  { %1996 = vmatpush.msrb.mxu2 %v7438_v16  ;;  %1957 = vmatmul.f32.vlgmr.msrb.gmra.mxu0 %v7749_v54  ;;  %11520 = vst [vmem:[#allocation69_spill] sm:$0xff] %v7998_v53  ;;  %v8004_v16 = vld [vmem:[%s10499_s4 + $0x1e8] sm:$0xff] }
 0x3a1   :  { %1997 = vmatmul.f32.vlgmr.msrb.gmra.mxu2 %v7749_v54  ;;  %2158 = vmatpush.msra.mxu3 %v7980_v28  ;;  %11521 = vst [vmem:[#allocation72_spill] sm:$0xff] %v8004_v16  ;;  %v8010_v54 = vld [vmem:[%s10499_s4 + $0x260] sm:$0xff] }
 0x3a2   :  { %2119 = vmatpush.msra.mxu1 %v7986_v30  ;;  %2088 = vmatpush.msra.mxu0 %v7992_v58  ;;  %11522 = vst [vmem:[#allocation73_spill] sm:$0xff] %v8010_v54 }
 0x3a3   :  { %2159 = vmatpush.msra.mxu3 %v7998_v53  ;;  %2128 = vmatpush.msra.mxu2 %v8004_v16  ;;  %v8028_v16 = vld [vmem:[%s10499_s4 + $0x1c8] sm:$0xff] }
 0x3a4   :  { %2120 = vmatpush.msra.mxu1 %v8010_v54  ;;  %2089 = vmatpush.msra.mxu0 %v8016_v46  ;;  %11525 = vst [vmem:[#allocation19_spill] sm:$0xff] %v8028_v16  ;;  %v8034_v54 = vld [vmem:[%s10499_s4 + $0x240] sm:$0xff] }
 0x3a5   :  { %2160 = vmatpush.msra.mxu3 %v8022_v31  ;;  %2129 = vmatpush.msra.mxu2 %v8028_v16  ;;  %11526 = vst [vmem:[#allocation77_spill] sm:$0xff] %v8034_v54  ;;  %v8040_v46 = vld [vmem:[%s10499_s4 + $0x1a0] sm:$0xff]  ;;  %v8046_v31 = vld [vmem:[%s10499_s4 + $0x248] sm:$0xff] }
 0x3a6   :  { %2121 = vmatpush.msra.mxu1 %v8034_v54  ;;  %11527 = vst [vmem:[#allocation26_spill] sm:$0xff] %v8040_v46  ;;  %2090 = vmatpush.msra.mxu0 %v8040_v46  ;;  %v8052_v16 = vld [vmem:[%s10499_s4 + $0x1a8] sm:$0xff]  ;;  %v8058_v54 = vld [vmem:[%s10499_s4 + $0x220] sm:$0xff] }
 0x3a7   :  { %11528 = vst [vmem:[#allocation81_spill] sm:$0xff] %v8046_v31  ;;  %2161 = vmatpush.msra.mxu3 %v8046_v31  ;;  %2130 = vmatpush.msra.mxu2 %v8052_v16  ;;  %v8064_v46 = vld [vmem:[%s10499_s4 + $0x180] sm:$0xff]  ;;  %v8070_v31 = vld [vmem:[%s10499_s4 + $0x228] sm:$0xff] }
 0x3a8   :  { %11529 = vst [vmem:[#allocation27_spill] sm:$0xff] %v8052_v16  ;;  %2122 = vmatpush.msra.mxu1 %v8058_v54  ;;  %2091 = vmatpush.msra.mxu0 %v8064_v46  ;;  %v8076_v16 = vld [vmem:[%s10499_s4 + $0x188] sm:$0xff] }
 0x3a9   :  { %11530 = vst [vmem:[#allocation84_spill] sm:$0xff] %v8058_v54  ;;  %2162 = vmatpush.msra.mxu3 %v8070_v31  ;;  %2131 = vmatpush.msra.mxu2 %v8076_v16  ;;  %v8082_v54 = vld [vmem:[%s10499_s4 + $0x200] sm:$0xff] }
 0x3aa   :  { %11531 = vst [vmem:[#allocation30_spill] sm:$0xff] %v8064_v46  ;;  %2123 = vmatpush.msra.mxu1 %v8082_v54  ;;  %v8088_v46 = vld [vmem:[%s10499_s4 + $0x160] sm:$0xff] }
 0x3ab   :  { %11532 = vst [vmem:[#allocation88_spill] sm:$0xff] %v8070_v31  ;;  %2092 = vmatpush.msra.mxu0 %v8088_v46  ;;  %v8094_v31 = vld [vmem:[%s10499_s4 + $0x208] sm:$0xff] }
 0x3ac   :  { %11533 = vst [vmem:[#allocation31_spill] sm:$0xff] %v8076_v16  ;;  %2163 = vmatpush.msra.mxu3 %v8094_v31  ;;  %v8100_v16 = vld [vmem:[%s10499_s4 + $0x168] sm:$0xff] }
 0x3ad   :  { %11534 = vst [vmem:[#allocation89_spill] sm:$0xff] %v8082_v54  ;;  %2132 = vmatpush.msra.mxu2 %v8100_v16  ;;  %v8106_v54 = vld [vmem:[%s10499_s4 + $0x3f0] sm:$0xff] }
 0x3ae   :  { %11535 = vst [vmem:[#allocation34_spill] sm:$0xff] %v8088_v46  ;;  %2188 = vmatpush.msrb.mxu1 %v8106_v54  ;;  %v8112_v46 = vld [vmem:[%s10499_s4 + $0x3f8] sm:$0xff] }
 0x3af   :  { %11536 = vst [vmem:[#allocation92_spill] sm:$0xff] %v8094_v31  ;;  %2228 = vmatpush.msrb.mxu3 %v8112_v46  ;;  %v8118_v31 = vld [vmem:[%s10499_s4 + $0x140] sm:$0xff] }
 0x3b0   :  { %11537 = vst [vmem:[#allocation35_spill] sm:$0xff] %v8100_v16  ;;  %2093 = vmatpush.msra.mxu0 %v8118_v31  ;;  %v8124_v16 = vld [vmem:[%s10499_s4 + $0x148] sm:$0xff] }
 0x3b1   :  { %11538 = vst [vmem:[#allocation93_spill] sm:$0xff] %v8106_v54  ;;  %2133 = vmatpush.msra.mxu2 %v8124_v16  ;;  %v8130_v54 = vld [vmem:[%s10499_s4 + $0x3d0] sm:$0xff] }
 0x3b2   :  { %11539 = vst [vmem:[#allocation38_spill] sm:$0xff] %v8112_v46  ;;  %2189 = vmatpush.msrb.mxu1 %v8130_v54  ;;  %v8136_v46 = vld [vmem:[%s10499_s4 + $0x3d8] sm:$0xff] }
 0x3b3   :  { %11540 = vst [vmem:[#allocation39_spill] sm:$0xff] %v8118_v31  ;;  %2229 = vmatpush.msrb.mxu3 %v8136_v46  ;;  %v8142_v31 = vld [vmem:[%s10499_s4 + $0x120] sm:$0xff] }
 0x3b4   :  { %11541 = vst [vmem:[#allocation46_spill] sm:$0xff] %v8124_v16  ;;  %2094 = vmatpush.msra.mxu0 %v8142_v31  ;;  %v8148_v16 = vld [vmem:[%s10499_s4 + $0x128] sm:$0xff] }
 0x3b5   :  { %11542 = vst [vmem:[#allocation47_spill] sm:$0xff] %v8130_v54  ;;  %2134 = vmatpush.msra.mxu2 %v8148_v16  ;;  %v8154_v54 = vld [vmem:[%s10499_s4 + $0x3b0] sm:$0xff] }
 0x3b6   :  { %11543 = vst [vmem:[#allocation50_spill] sm:$0xff] %v8136_v46  ;;  %2190 = vmatpush.msrb.mxu1 %v8154_v54  ;;  %v8160_v46 = vld [vmem:[%s10499_s4 + $0x3b8] sm:$0xff] }
 0x3b7   :  { %11544 = vst [vmem:[#allocation51_spill] sm:$0xff] %v8142_v31  ;;  %2230 = vmatpush.msrb.mxu3 %v8160_v46  ;;  %v8166_v31 = vld [vmem:[%s10499_s4 + $0x100] sm:$0xff] }
 0x3b8   :  { %11545 = vst [vmem:[#allocation54_spill] sm:$0xff] %v8148_v16  ;;  %2095 = vmatpush.msra.mxu0 %v8166_v31  ;;  %v8172_v16 = vld [vmem:[%s10499_s4 + $0x108] sm:$0xff] }
 0x3b9   :  { %11546 = vst [vmem:[#allocation55_spill] sm:$0xff] %v8154_v54  ;;  %2135 = vmatpush.msra.mxu2 %v8172_v16  ;;  %v8178_v54 = vld [vmem:[%s10499_s4 + $0x390] sm:$0xff] }
 0x3ba   :  { %11547 = vst [vmem:[#allocation58_spill] sm:$0xff] %v8160_v46  ;;  %2191 = vmatpush.msrb.mxu1 %v8178_v54  ;;  %v8184_v46 = vld [vmem:[%s10499_s4 + $0x398] sm:$0xff] }
 0x3bb   :  { %11548 = vst [vmem:[#allocation59_spill] sm:$0xff] %v8166_v31  ;;  %2231 = vmatpush.msrb.mxu3 %v8184_v46  ;;  %v8190_v31 = vld [vmem:[%s10499_s4 + $0xe0] sm:$0xff] }
 0x3bc   :  { %11549 = vst [vmem:[#allocation66_spill] sm:$0xff] %v8172_v16  ;;  %2096 = vmatpush.msra.mxu0 %v8190_v31  ;;  %v8196_v16 = vld [vmem:[%s10499_s4 + $0xe8] sm:$0xff] }
 0x3bd   :  { %11550 = vst [vmem:[#allocation67_spill] sm:$0xff] %v8178_v54  ;;  %2136 = vmatpush.msra.mxu2 %v8196_v16  ;;  %v8202_v54 = vld [vmem:[%s10499_s4 + $0x370] sm:$0xff] }
 0x3be   :  { %11551 = vst [vmem:[#allocation70_spill] sm:$0xff] %v8184_v46  ;;  %2192 = vmatpush.msrb.mxu1 %v8202_v54  ;;  %v8208_v46 = vld [vmem:[%s10499_s4 + $0x378] sm:$0xff] }
 0x3bf   :  { %11552 = vst [vmem:[#allocation71_spill] sm:$0xff] %v8190_v31  ;;  %2232 = vmatpush.msrb.mxu3 %v8208_v46  ;;  %v8214_v31 = vld [vmem:[%s10499_s4 + $0xc0] sm:$0xff] }
 0x3c0   :  { %11553 = vst [vmem:[#allocation74_spill] sm:$0xff] %v8196_v16  ;;  %2097 = vmatpush.msra.mxu0 %v8214_v31  ;;  %v8220_v16 = vld [vmem:[%s10499_s4 + $0xc8] sm:$0xff] }
 0x3c1   :  { %11554 = vst [vmem:[#allocation75_spill] sm:$0xff] %v8202_v54  ;;  %2137 = vmatpush.msra.mxu2 %v8220_v16  ;;  %v8226_v54 = vld [vmem:[%s10499_s4 + $0x350] sm:$0xff] }
 0x3c2   :  { %11555 = vst [vmem:[#allocation79_spill] sm:$0xff] %v8208_v46  ;;  %2193 = vmatpush.msrb.mxu1 %v8226_v54  ;;  %v8232_v46 = vld [vmem:[%s10499_s4 + $0x358] sm:$0xff] }
 0x3c3   :  { %11556 = vst [vmem:[#allocation80_spill] sm:$0xff] %v8214_v31  ;;  %2233 = vmatpush.msrb.mxu3 %v8232_v46  ;;  %v8238_v31 = vld [vmem:[%s10499_s4 + $0xa0] sm:$0xff] }
 0x3c4   :  { %11557 = vst [vmem:[#allocation86_spill] sm:$0xff] %v8220_v16  ;;  %2098 = vmatpush.msra.mxu0 %v8238_v31  ;;  %v8244_v16 = vld [vmem:[%s10499_s4 + $0xa8] sm:$0xff] }
 0x3c5   :  { %11558 = vst [vmem:[#allocation87_spill] sm:$0xff] %v8226_v54  ;;  %2138 = vmatpush.msra.mxu2 %v8244_v16  ;;  %v8250_v54 = vld [vmem:[%s10499_s4 + $0x330] sm:$0xff] }
 0x3c6   :  { %11559 = vst [vmem:[#allocation90_spill] sm:$0xff] %v8232_v46  ;;  %2194 = vmatpush.msrb.mxu1 %v8250_v54  ;;  %v8256_v46 = vld [vmem:[%s10499_s4 + $0x338] sm:$0xff] }
 0x3c7   :  { %11560 = vst [vmem:[#allocation91_spill] sm:$0xff] %v8238_v31  ;;  %2234 = vmatpush.msrb.mxu3 %v8256_v46  ;;  %v8262_v31 = vld [vmem:[%s10499_s4 + $0x80] sm:$0xff] }
 0x3c8   :  { %11561 = vst [vmem:[#allocation94_spill] sm:$0xff] %v8244_v16  ;;  %2099 = vmatpush.msra.mxu0 %v8262_v31  ;;  %v8268_v16 = vld [vmem:[%s10499_s4 + $0x88] sm:$0xff] }
 0x3c9   :  { %11562 = vst [vmem:[#allocation95_spill] sm:$0xff] %v8250_v54  ;;  %2139 = vmatpush.msra.mxu2 %v8268_v16  ;;  %v8274_v54 = vld [vmem:[%s10499_s4 + $0x310] sm:$0xff] }
 0x3ca   :  { %11563 = vst [vmem:[#allocation96_spill] sm:$0xff] %v8256_v46  ;;  %2195 = vmatpush.msrb.mxu1 %v8274_v54  ;;  %v8280_v46 = vld [vmem:[%s10499_s4 + $0x318] sm:$0xff] }
 0x3cb   :  { %11564 = vst [vmem:[#allocation101_spill] sm:$0xff] %v8262_v31  ;;  %2235 = vmatpush.msrb.mxu3 %v8280_v46  ;;  %v8286_v31 = vld [vmem:[%s10499_s4 + $0x60] sm:$0xff] }
 0x3cc   :  { %11565 = vst [vmem:[#allocation105_spill] sm:$0xff] %v8268_v16  ;;  %2100 = vmatpush.msra.mxu0 %v8286_v31  ;;  %v8292_v16 = vld [vmem:[%s10499_s4 + $0x68] sm:$0xff] }
 0x3cd   :  { %11566 = vst [vmem:[#allocation106_spill] sm:$0xff] %v8274_v54  ;;  %2140 = vmatpush.msra.mxu2 %v8292_v16  ;;  %v8298_v54 = vld [vmem:[%s10499_s4 + $0x2f0] sm:$0xff] }
 0x3ce   :  { %11567 = vst [vmem:[#allocation107_spill] sm:$0xff] %v8280_v46  ;;  %2196 = vmatpush.msrb.mxu1 %v8298_v54  ;;  %v8304_v46 = vld [vmem:[%s10499_s4 + $0x2f8] sm:$0xff] }
 0x3cf   :  { %11568 = vst [vmem:[#allocation110_spill] sm:$0xff] %v8286_v31  ;;  %2236 = vmatpush.msrb.mxu3 %v8304_v46  ;;  %v8310_v31 = vld [vmem:[%s10499_s4 + $0x40] sm:$0xff] }
 0x3d0   :  { %11569 = vst [vmem:[#allocation111_spill] sm:$0xff] %v8292_v16  ;;  %2101 = vmatpush.msra.mxu0 %v8310_v31  ;;  %v8316_v16 = vld [vmem:[%s10499_s4 + $0x48] sm:$0xff] }
 0x3d1   :  { %11570 = vst [vmem:[#allocation11_spill] sm:$0xff] %v8298_v54  ;;  %2141 = vmatpush.msra.mxu2 %v8316_v16  ;;  %v8322_v54 = vld [vmem:[%s10499_s4 + $0x2d0] sm:$0xff] }
 0x3d2   :  { %11571 = vst [vmem:[#allocation22_spill] sm:$0xff] %v8304_v46  ;;  %2197 = vmatpush.msrb.mxu1 %v8322_v54  ;;  %v8328_v46 = vld [vmem:[%s10499_s4 + $0x2d8] sm:$0xff] }
 0x3d3   :  { %11572 = vst [vmem:[#allocation10_spill] sm:$0xff] %v8310_v31  ;;  %2237 = vmatpush.msrb.mxu3 %v8328_v46  ;;  %v8334_v31 = vld [vmem:[%s10499_s4 + $0x20] sm:$0xff] }
 0x3d4   :  { %11573 = vst [vmem:[#allocation21_spill] sm:$0xff] %v8316_v16  ;;  %2102 = vmatpush.msra.mxu0 %v8334_v31  ;;  %v8340_v16 = vld [vmem:[%s10499_s4 + $0x28] sm:$0xff] }
 0x3d5   :  { %11574 = vst [vmem:[#allocation3_spill] sm:$0xff] %v8322_v54  ;;  %2142 = vmatpush.msra.mxu2 %v8340_v16  ;;  %v8346_v54 = vld [vmem:[%s10499_s4 + $0x2b0] sm:$0xff] }
 0x3d6   :  { %11575 = vst [vmem:[#allocation4_spill] sm:$0xff] %v8328_v46  ;;  %2198 = vmatpush.msrb.mxu1 %v8346_v54  ;;  %v8352_v46 = vld [vmem:[%s10499_s4 + $0x2b8] sm:$0xff] }
 0x3d7   :  { %11576 = vst [vmem:[#allocation5_spill] sm:$0xff] %v8334_v31  ;;  %2238 = vmatpush.msrb.mxu3 %v8352_v46  ;;  %v8358_v31 = vld [vmem:[%s10499_s4] sm:$0xff] }
 0x3d8   :  { %11577 = vst [vmem:[#allocation6_spill] sm:$0xff] %v8340_v16  ;;  %2103 = vmatpush.msra.mxu0 %v8358_v31  ;;  %v8364_v16 = vld [vmem:[%s10499_s4 + $0x8] sm:$0xff] }
 0x3d9   :  { %11578 = vst [vmem:[#allocation7_spill] sm:$0xff] %v8346_v54  ;;  %2143 = vmatpush.msra.mxu2 %v8364_v16  ;;  %v8370_v54 = vld [vmem:[%s10499_s4 + $0x290] sm:$0xff] }
 0x3da   :  { %11579 = vst [vmem:[#allocation8_spill] sm:$0xff] %v8352_v46  ;;  %2199 = vmatpush.msrb.mxu1 %v8370_v54  ;;  %v8376_v46 = vld [vmem:[%s10499_s4 + $0x298] sm:$0xff] }
 0x3db   :  { %11580 = vst [vmem:[#allocation9_spill] sm:$0xff] %v8358_v31  ;;  %2239 = vmatpush.msrb.mxu3 %v8376_v46  ;;  %v8382_v31 = vld [vmem:[%s10499_s4 + $0x1f0] sm:$0xff] }
 0x3dc   :  { %11581 = vst [vmem:[#allocation12_spill] sm:$0xff] %v8364_v16  ;;  %2168 = vmatpush.msrb.mxu0 %v8382_v31  ;;  %v8388_v16 = vld [vmem:[%s10499_s4 + $0x1f8] sm:$0xff] }
 0x3dd   :  { %11582 = vst [vmem:[#allocation13_spill] sm:$0xff] %v8370_v54  ;;  %2208 = vmatpush.msrb.mxu2 %v8388_v16  ;;  %v8394_v54 = vld [vmem:[%s10499_s4 + $0x270] sm:$0xff] }
 0x3de   :  { %11583 = vst [vmem:[#allocation14_spill] sm:$0xff] %v8376_v46  ;;  %2200 = vmatpush.msrb.mxu1 %v8394_v54  ;;  %v8400_v46 = vld [vmem:[%s10499_s4 + $0x278] sm:$0xff] }
 0x3df   :  { %11584 = vst [vmem:[#allocation15_spill] sm:$0xff] %v8382_v31  ;;  %2240 = vmatpush.msrb.mxu3 %v8400_v46  ;;  %v8406_v31 = vld [vmem:[%s10499_s4 + $0x1d0] sm:$0xff] }
 0x3e0   :  { %11585 = vst [vmem:[#allocation116_spill] sm:$0xff] %v8388_v16  ;;  %2169 = vmatpush.msrb.mxu0 %v8406_v31  ;;  %v8412_v16 = vld [vmem:[%s10499_s4 + $0x1d8] sm:$0xff] }
 0x3e1   :  { %11586 = vst [vmem:[#allocation117_spill] sm:$0xff] %v8394_v54  ;;  %2209 = vmatpush.msrb.mxu2 %v8412_v16  ;;  %v8418_v54 = vld [vmem:[%s10499_s4 + $0x250] sm:$0xff] }
 0x3e2   :  { %11587 = vst [vmem:[#allocation118_spill] sm:$0xff] %v8400_v46  ;;  %2201 = vmatpush.msrb.mxu1 %v8418_v54  ;;  %v8424_v46 = vld [vmem:[%s10499_s4 + $0x258] sm:$0xff] }
 0x3e3   :  { %11588 = vst [vmem:[#allocation119_spill] sm:$0xff] %v8406_v31  ;;  %2241 = vmatpush.msrb.mxu3 %v8424_v46  ;;  %v8430_v31 = vld [vmem:[%s10499_s4 + $0x1b0] sm:$0xff] }
 0x3e4   :  { %11589 = vst [vmem:[#allocation120_spill] sm:$0xff] %v8412_v16  ;;  %2170 = vmatpush.msrb.mxu0 %v8430_v31  ;;  %v8436_v16 = vld [vmem:[%s10499_s4 + $0x1b8] sm:$0xff] }
 0x3e5   :  { %11590 = vst [vmem:[#allocation121_spill] sm:$0xff] %v8418_v54  ;;  %2210 = vmatpush.msrb.mxu2 %v8436_v16  ;;  %v8442_v54 = vld [vmem:[%s10499_s4 + $0x230] sm:$0xff] }
 0x3e6   :  { %11591 = vst [vmem:[#allocation122_spill] sm:$0xff] %v8424_v46  ;;  %2202 = vmatpush.msrb.mxu1 %v8442_v54  ;;  %v8448_v46 = vld [vmem:[%s10499_s4 + $0x238] sm:$0xff] }
 0x3e7   :  { %11592 = vst [vmem:[#allocation123_spill] sm:$0xff] %v8430_v31  ;;  %2242 = vmatpush.msrb.mxu3 %v8448_v46  ;;  %v8454_v31 = vld [vmem:[%s10499_s4 + $0x190] sm:$0xff] }
 0x3e8   :  { %11593 = vst [vmem:[#allocation124_spill] sm:$0xff] %v8436_v16  ;;  %2171 = vmatpush.msrb.mxu0 %v8454_v31  ;;  %v8460_v16 = vld [vmem:[%s10499_s4 + $0x198] sm:$0xff] }
 0x3e9   :  { %11594 = vst [vmem:[#allocation125_spill] sm:$0xff] %v8442_v54  ;;  %2211 = vmatpush.msrb.mxu2 %v8460_v16  ;;  %v8466_v54 = vld [vmem:[%s10499_s4 + $0x210] sm:$0xff]  ;;  %v1795_v30 = vpop.f32.mrf.mxu3 }
 0x3ea   :  { %11595 = vst [vmem:[#allocation126_spill] sm:$0xff] %v8448_v46  ;;  %2203 = vmatpush.msrb.mxu1 %v8466_v54  ;;  %v8472_v46 = vld [vmem:[%s10499_s4 + $0x218] sm:$0xff] }
 0x3eb   :  { %11596 = vst [vmem:[#allocation127_spill] sm:$0xff] %v8454_v31  ;;  %2243 = vmatpush.msrb.mxu3 %v8472_v46  ;;  %v8478_v31 = vld [vmem:[%s10499_s4 + $0x170] sm:$0xff] }
 0x3ec   :  { %11597 = vst [vmem:[#allocation128_spill] sm:$0xff] %v8460_v16  ;;  %2172 = vmatpush.msrb.mxu0 %v8478_v31  ;;  %v8484_v16 = vld [vmem:[%s10499_s4 + $0x178] sm:$0xff] }
 0x3ed   :  { %11598 = vst [vmem:[#allocation129_spill] sm:$0xff] %v8466_v54  ;;  %2212 = vmatpush.msrb.mxu2 %v8484_v16  ;;  %v8490_v54 = vld [vmem:[%s10499_s4 + $0x150] sm:$0xff] }
 0x3ee   :  { %11599 = vst [vmem:[#allocation130_spill] sm:$0xff] %v8472_v46  ;;  %2173 = vmatpush.msrb.mxu0 %v8490_v54  ;;  %v8496_v46 = vld [vmem:[%s10499_s4 + $0x158] sm:$0xff] }
 0x3ef   :  { %11600 = vst [vmem:[#allocation131_spill] sm:$0xff] %v8478_v31  ;;  %2213 = vmatpush.msrb.mxu2 %v8496_v46  ;;  %v8502_v31 = vld [vmem:[%s10499_s4 + $0x130] sm:$0xff] }
 0x3f0   :  { %11601 = vst [vmem:[#allocation132_spill] sm:$0xff] %v8484_v16  ;;  %2174 = vmatpush.msrb.mxu0 %v8502_v31  ;;  %v8508_v16 = vld [vmem:[%s10499_s4 + $0x138] sm:$0xff] }
 0x3f1   :  { %11602 = vst [vmem:[#allocation133_spill] sm:$0xff] %v8490_v54  ;;  %2214 = vmatpush.msrb.mxu2 %v8508_v16  ;;  %v8514_v54 = vld [vmem:[%s10499_s4 + $0x110] sm:$0xff]  ;;  %v1875_v40 = vpop.f32.mrf.mxu3 }
 0x3f2   :  { %11603 = vst [vmem:[#allocation134_spill] sm:$0xff] %v8496_v46  ;;  %2175 = vmatpush.msrb.mxu0 %v8514_v54  ;;  %v8520_v46 = vld [vmem:[%s10499_s4 + $0x118] sm:$0xff] }
 0x3f3   :  { %11604 = vst [vmem:[#allocation135_spill] sm:$0xff] %v8502_v31  ;;  %2215 = vmatpush.msrb.mxu2 %v8520_v46  ;;  %v8526_v31 = vld [vmem:[%s10499_s4 + $0xf0] sm:$0xff] }
 0x3f4   :  { %11605 = vst [vmem:[#allocation136_spill] sm:$0xff] %v8508_v16  ;;  %2176 = vmatpush.msrb.mxu0 %v8526_v31  ;;  %v8532_v16 = vld [vmem:[%s10499_s4 + $0xf8] sm:$0xff] }
 0x3f5   :  { %11606 = vst [vmem:[#allocation137_spill] sm:$0xff] %v8514_v54  ;;  %2216 = vmatpush.msrb.mxu2 %v8532_v16  ;;  %v8538_v54 = vld [vmem:[%s10499_s4 + $0xd0] sm:$0xff] }
 0x3f6   :  { %11607 = vst [vmem:[#allocation138_spill] sm:$0xff] %v8520_v46  ;;  %2177 = vmatpush.msrb.mxu0 %v8538_v54  ;;  %v8544_v46 = vld [vmem:[%s10499_s4 + $0xd8] sm:$0xff] }
 0x3f7   :  { %11608 = vst [vmem:[#allocation139_spill] sm:$0xff] %v8526_v31  ;;  %2217 = vmatpush.msrb.mxu2 %v8544_v46  ;;  %v8550_v31 = vld [vmem:[%s10499_s4 + $0xb0] sm:$0xff] }
 0x3f8   :  { %11609 = vst [vmem:[#allocation140_spill] sm:$0xff] %v8532_v16  ;;  %2178 = vmatpush.msrb.mxu0 %v8550_v31  ;;  %v8556_v16 = vld [vmem:[%s10499_s4 + $0xb8] sm:$0xff] }
 0x3f9   :  { %11610 = vst [vmem:[#allocation141_spill] sm:$0xff] %v8538_v54  ;;  %2218 = vmatpush.msrb.mxu2 %v8556_v16  ;;  %v8562_v54 = vld [vmem:[%s10499_s4 + $0x90] sm:$0xff] }
 0x3fa   :  { %11611 = vst [vmem:[#allocation142_spill] sm:$0xff] %v8544_v46  ;;  %2179 = vmatpush.msrb.mxu0 %v8562_v54  ;;  %v8568_v46 = vld [vmem:[%s10499_s4 + $0x98] sm:$0xff] }
 0x3fb   :  { %11612 = vst [vmem:[#allocation143_spill] sm:$0xff] %v8550_v31  ;;  %2219 = vmatpush.msrb.mxu2 %v8568_v46  ;;  %v8574_v31 = vld [vmem:[%s10499_s4 + $0x70] sm:$0xff] }
 0x3fc   :  { %11613 = vst [vmem:[#allocation144_spill] sm:$0xff] %v8556_v16  ;;  %2180 = vmatpush.msrb.mxu0 %v8574_v31  ;;  %v8580_v16 = vld [vmem:[%s10499_s4 + $0x78] sm:$0xff]  ;;  %v1735_v53 = vpop.f32.mrf.mxu0 }
 0x3fd   :  { %11614 = vst [vmem:[#allocation145_spill] sm:$0xff] %v8562_v54  ;;  %2220 = vmatpush.msrb.mxu2 %v8580_v16  ;;  %v8586_v54 = vld [vmem:[%s10499_s4 + $0x50] sm:$0xff]  ;;  %v1736_v58 = vadd.f32 %v1735_v53, %v11484_v7 }
 0x3fe   :  { %11615 = vst [vmem:[#allocation146_spill] sm:$0xff] %v8568_v46  ;;  %2181 = vmatpush.msrb.mxu0 %v8586_v54  ;;  %v8592_v46 = vld [vmem:[%s10499_s4 + $0x58] sm:$0xff] }
 0x3ff   :  { %11616 = vst [vmem:[#allocation147_spill] sm:$0xff] %v8574_v31  ;;  %2221 = vmatpush.msrb.mxu2 %v8592_v46  ;;  %v8598_v31 = vld [vmem:[%s10499_s4 + $0x30] sm:$0xff] }
 0x400   :  { %11617 = vst [vmem:[#allocation148_spill] sm:$0xff] %v8580_v16  ;;  %2182 = vmatpush.msrb.mxu0 %v8598_v31  ;;  %v8604_v16 = vld [vmem:[%s10499_s4 + $0x38] sm:$0xff] }
 0x401   :  { %11618 = vst [vmem:[#allocation149_spill] sm:$0xff] %v8586_v54  ;;  %2222 = vmatpush.msrb.mxu2 %v8604_v16  ;;  %v8610_v54 = vld [vmem:[%s10499_s4 + $0x10] sm:$0xff] }
 0x402   :  { %11619 = vst [vmem:[#allocation150_spill] sm:$0xff] %v8592_v46  ;;  %2183 = vmatpush.msrb.mxu0 %v8610_v54  ;;  %v8616_v46 = vld [vmem:[%s10499_s4 + $0x18] sm:$0xff]  ;;  %v1775_v5 = vpop.f32.mrf.mxu2 }
 0x403   :  { %11620 = vst [vmem:[#allocation151_spill] sm:$0xff] %v8598_v31  ;;  %2223 = vmatpush.msrb.mxu2 %v8616_v46  ;;  %v1755_v31 = vpop.f32.mrf.mxu1  ;;  %v1776_v56 = vadd.f32 %v1775_v5, %v11485_v26 }
 0x404   :  { %11621 = vst [vmem:[#allocation152_spill] sm:$0xff] %v8604_v16  ;;  %v1756_v28 = vadd.f32 %v1755_v31, %v1736_v58  ;;  %v11625_v58 = vld [vmem:[#allocation20_spill] sm:$0xff] }
 0x405   :  { %11622 = vst [vmem:[#allocation153_spill] sm:$0xff] %v8610_v54  ;;  %v1796_v54 = vadd.f32 %v1795_v30, %v1776_v56  ;;  %v11626_v30 = vld [vmem:[#allocation114_spill] sm:$0xff] }
 0x406   :  { %11623 = vst [vmem:[#allocation154_spill] sm:$0xff] %v8616_v46  ;;  %v3496_v11 = vmul.f32 -1.442695, %v1756_v28  ;;  %v248_v9 = vadd.f32 %v11627_v45, %v11626_v30 }
 0x407   :  { %v3497_v43 = vmul.f32 -1.442695, %v1796_v54 }
 0x408   :  { %3638 = vpow2.f32 %v3496_v11  ;;  %v1815_v11 = vpop.f32.mrf.mxu0 }
 0x409   :  { %3640 = vpow2.f32 %v3497_v43 }
 0x40b   :  { %v1835_v16 = vpop.f32.mrf.mxu1  ;;  %v1855_v53 = vpop.f32.mrf.mxu2 }
 0x40c   :  { %v1856_v28 = vadd.f32 %v1855_v53, %v11625_v58 }
 0x40d   :  { %v2018_v56 = vpop.f32.mrf.mxu3 }
 0x40e   :  { %v3639_v36 = vpop.eup %3638  ;;  %v1876_v44 = vadd.f32 %v1875_v40, %v1856_v28 }
 0x40f   :  { %v1881_v37 = vadd.f32 1.0, %v3639_v36  ;;  %v3641_v31 = vpop.eup %3640 }
 0x410   :  { %v1900_v5 = vadd.f32 1.0, %v3641_v31  ;;  %v3498_v54 = vmul.f32 -1.442695, %v1876_v44 }
 0x411   :  { %3642 = vrcp.f32 %v1881_v37  ;;  %v1893_v44 = vand.u32 2147483648, %v1881_v37  ;;  %vm1887_vm7 = vweird.f32 %v1881_v37 }
 0x412   :  { %vm1906_vm10 = vweird.f32 %v1900_v5 }
 0x413   :  { %v1978_v34 = vpop.f32.mrf.mxu1 }
 0x414   :  { %v2022_v46 = vadd.f32 %v1978_v34, %v166_v41  ;;  %v11628_v34 = vld [vmem:[#allocation23_spill] sm:$0xff]  ;;  %v2024_v41 = vadd.f32 %v2018_v56, %v248_v9  ;;  %v11629_v9 = vld [vmem:[#allocation108_spill] sm:$0xff] }
 0x415   :  { %v1816_v43 = vadd.f32 %v1815_v11, %v11628_v34  ;;  %v1891_v11 = vand.u32 2147483647, %v1881_v37  ;;  %v11630_v56 = vld [vmem:[#allocation64_spill] sm:$0xff] }
 0x416   :  { %v3500_v7 = vmul.f32 -1.442695, %v2022_v46  ;;  %v3501_v57 = vmul.f32 -1.442695, %v2024_v41 }
 0x417   :  { %v3643_v26 = vpop.eup %3642  ;;  %v1836_v53 = vadd.f32 %v1835_v16, %v1816_v43  ;;  %v1912_v16 = vand.u32 2147483648, %v1900_v5  ;;  %vm1892_vm11 = vcmp.eq.f32.partialorder %v1891_v11, 8.507059e+37 }
 0x418   :  { %3644 = vpow2.f32 %v3500_v7  ;;  %v1883_v36 = vmul.f32 %v3643_v26, %v1881_v37  ;;  %vm1888_vm6 = vweird.f32 %v3643_v26  ;;  %v1894_v37 = vor.u32 1.1754944e-38, %v1893_v44 }
 0x419   :  { %3646 = vrcp.f32 %v1900_v5  ;;  %vm8631_vm8 = vmor %vm1887_vm7, %vm1888_vm6 }
 0x41a   :  { %3648 = vpow2.f32 %v3498_v54  ;;  %v1884_v46 = vsub.f32 1.0, %v1883_v36  ;;  %v125_v54 = vadd.f32 %v11630_v56, %v11629_v9  ;;  %v1910_v36 = vand.u32 2147483647, %v1900_v5 }
 0x41b   :  { %3650 = vtanh.f32 %v1836_v53 }
 0x41c   :  { %v1885_v58 = vmul.f32 %v3643_v26, %v1884_v46  ;;  %3652 = vpow2.f32 %v3501_v57  ;;  %vm1911_vm13 = vcmp.eq.f32.partialorder %v1910_v36, 8.507059e+37 }
 0x41d   :  { %v1958_v41 = vpop.f32.mrf.mxu0 }
 0x41e   :  { %v3645_v18 = vpop.eup %3644  ;;  %v1886_v31 = vadd.f32 %v3643_v26, %v1885_v58  ;;  %v2021_v57 = vadd.f32 %v1958_v41, %v125_v54 }
 0x41f   :  { %v3647_v40 = vpop.eup %3646  ;;  %v8627_v6 = vadd.f32 1.0, %v3645_v18 }
 0x420   :  { %v3649_v28 = vpop.eup %3648  ;;  %v1902_v7 = vmul.f32 %v3647_v40, %v1900_v5  ;;  %vm1907_vm9 = vweird.f32 %v3647_v40  ;;  %v1890_v18 = vsel %vm8631_vm8, %v3643_v26, %v1886_v31  ;;  %v3499_v56 = vmul.f32 -1.442695, %v2021_v57 }
 0x421   :  { %v1920_v45 = vadd.f32 1.0, %v3649_v28  ;;  %v3651_v53 = vpop.eup %3650  ;;  %vm1908_vm12 = vmor %vm1906_vm10, %vm1907_vm9  ;;  %v1913_v28 = vor.u32 1.1754944e-38, %v1912_v16  ;;  %vm2053_vm3 = vweird.f32 %v8627_v6 }
 0x422   :  { %v1903_v30 = vsub.f32 1.0, %v1902_v7  ;;  %v1895_v7 = vsel %vm1892_vm11, %v1894_v37, %v1890_v18  ;;  %v3653_v9 = vpop.eup %3652 }
 0x423   :  { %3654 = vrcp.f32 %v1920_v45  ;;  %v1937_v44 = vmul.f32 %v3651_v53, %v1895_v7  ;;  %v8645_v43 = vadd.f32 1.0, %v3653_v9  ;;  %v1932_v36 = vand.u32 2147483648, %v1920_v45  ;;  %v11633_v7 = vld [vmem:[#allocation85_spill] sm:$0xff] }
 0x424   :  { %v1904_v58 = vmul.f32 %v3647_v40, %v1903_v30  ;;  %3656 = vrcp.f32 %v8627_v6  ;;  %vm1926_vm15 = vweird.f32 %v1920_v45  ;;  %v1998_v53 = vpop.f32.mrf.mxu2 }
 0x425   :  { %3658 = vpow2.f32 %v3499_v56  ;;  %v207_v56 = vadd.f32 %v11633_v7, %v5693_v2  ;;  %vm2073_vm11 = vweird.f32 %v8645_v43  ;;  %v11642_v7 = vld [vmem:[#allocation32_spill] sm:$0xff] }
 0x426   :  { %v1905_v46 = vadd.f32 %v3647_v40, %v1904_v58  ;;  %v1930_v58 = vand.u32 2147483647, %v1920_v45 }
 0x428   :  { %v1909_v34 = vsel %vm1908_vm12, %v3647_v40, %v1905_v46  ;;  %vm1931_vm1 = vcmp.eq.f32.partialorder %v1930_v58, 8.507059e+37 }
 0x429   :  { %v3655_v30 = vpop.eup %3654  ;;  %v1914_v17 = vsel %vm1911_vm13, %v1913_v28, %v1909_v34 }
 0x42a   :  { %v8638_v26 = vpop.eup %3656  ;;  %v1936_v31 = vmul.f32 %v1914_v17, %v7572_v8  ;;  %v1922_v54 = vmul.f32 %v3655_v30, %v1920_v45  ;;  %vm1927_vm14 = vweird.f32 %v3655_v30  ;;  %v1933_v17 = vor.u32 1.1754944e-38, %v1932_v36 }
 0x42b   :  { %v2049_v16 = vmul.f32 %v8638_v26, %v8627_v6  ;;  %v3659_v34 = vpop.eup %3658  ;;  %vm1928_vm0 = vmor %vm1926_vm15, %vm1927_vm14  ;;  %v2023_v45 = vadd.f32 %v1998_v53, %v207_v56  ;;  %vm2054_vm2 = vweird.f32 %v8638_v26  ;;  %v11641_v53 = vld [vmem:[#allocation29_spill] sm:$0xff]  ;;  %v8852_v56 = vld [vmem:[%s10498_s2 + $0xa0] sm:$0xff] }
 0x42c   :  { %v8641_v5 = vadd.f32 %v1937_v44, %v1936_v31  ;;  %v1923_v11 = vsub.f32 1.0, %v1922_v54  ;;  %v2028_v18 = vadd.f32 1.0, %v3659_v34  ;;  %vm8665_vm4 = vmor %vm2053_vm3, %vm2054_vm2 }
 0x42d   :  { %v2050_v8 = vsub.f32 1.0, %v2049_v16 }
 0x42e   :  { %3660 = vtanh.f32 %v8641_v5  ;;  %v1924_v40 = vmul.f32 %v3655_v30, %v1923_v11  ;;  %v2059_v11 = vand.u32 2147483648, %v8627_v6  ;;  %v2040_v36 = vand.u32 2147483648, %v2028_v18 }
 0x42f   :  { %3662 = vrcp.f32 %v8645_v43  ;;  %v2051_v46 = vmul.f32 %v8638_v26, %v2050_v8  ;;  %vm2034_vm6 = vweird.f32 %v2028_v18 }
 0x430   :  { %v1925_v41 = vadd.f32 %v3655_v30, %v1924_v40  ;;  %3664 = vrcp.f32 %v2028_v18  ;;  %v2060_v58 = vor.u32 1.1754944e-38, %v2059_v11  ;;  %v8873_v11 = vld [vmem:[%s10498_s2 + $0x90] sm:$0xff] }
 0x431   :  { %v2052_v54 = vadd.f32 %v8638_v26, %v2051_v46  ;;  %3666 = vtanh.f32 %v2023_v45  ;;  %v11640_v46 = vld [vmem:[#allocation28_spill] sm:$0xff] }
 0x432   :  { %v1929_v37 = vsel %vm1928_vm0, %v3655_v30, %v1925_v41  ;;  %v11644_v45 = vld [vmem:[#allocation36_spill] sm:$0xff] }
 0x433   :  { %v1934_v57 = vsel %vm1931_vm1, %v1933_v17, %v1929_v37  ;;  %v11638_v37 = vld [vmem:[#allocation24_spill] sm:$0xff] }
 0x434   :  { %v3661_v9 = vpop.eup %3660 }
 0x435   :  { %v1940_v28 = vmul.f32 %v3661_v9, %v1934_v57  ;;  %v8652_v31 = vpop.eup %3662  ;;  %v11639_v57 = vld [vmem:[#allocation41_spill] sm:$0xff] }
 0x436   :  { %v3665_v44 = vpop.eup %3664  ;;  %v2069_v16 = vmul.f32 %v8652_v31, %v8645_v43  ;;  %vm2074_vm10 = vweird.f32 %v8652_v31 }
 0x437   :  { %2124 = vmatmul.f32.vlgmr.msra.gmra.mxu1 %v1940_v28  ;;  %2164 = vmatmul.f32.vlgmr.msra.gmra.mxu3 %v1940_v28  ;;  %v2030_v30 = vmul.f32 %v3665_v44, %v2028_v18  ;;  %vm2035_vm5 = vweird.f32 %v3665_v44  ;;  %vm2075_vm12 = vmor %vm2073_vm11, %vm2074_vm10 }
 0x438   :  { %2331 = vmatpush.msra.mxu1 %v7591_v13  ;;  %2371 = vmatpush.msra.mxu3 %v7597_v48  ;;  %v2057_v13 = vand.u32 2147483647, %v8627_v6  ;;  %v2070_v41 = vsub.f32 1.0, %v2069_v16  ;;  %vm2036_vm8 = vmor %vm2034_vm6, %vm2035_vm5  ;;  %v11646_v16 = vld [vmem:[#allocation40_spill] sm:$0xff] }
 0x439   :  { %v2031_v40 = vsub.f32 1.0, %v2030_v30  ;;  %v8866_v30 = vld [vmem:[%s10498_s2 + $0x80] sm:$0xff]  ;;  %v8887_v48 = vld [vmem:[%s10498_s2 + $0x70] sm:$0xff] }
 0x43a   :  { %2332 = vmatpush.msra.mxu1 %v7609_v27  ;;  %2372 = vmatpush.msra.mxu3 %v7615_v15  ;;  %v2038_v27 = vand.u32 2147483647, %v2028_v18  ;;  %v2056_v15 = vsel %vm8665_vm4, %v8638_v26, %v2052_v54  ;;  %vm2058_vm7 = vcmp.eq.f32.partialorder %v2057_v13, 8.507059e+37  ;;  %v3667_v26 = vpop.eup %3666  ;;  %v2071_v17 = vmul.f32 %v8652_v31, %v2070_v41  ;;  %v11645_v54 = vld [vmem:[#allocation37_spill] sm:$0xff]  ;;  %v11647_v13 = vld [vmem:[#allocation43_spill] sm:$0xff] }
 0x43b   :  { %v2032_v34 = vmul.f32 %v3665_v44, %v2031_v40  ;;  %v8880_v40 = vld [vmem:[%s10498_s2 + $0x60] sm:$0xff] }
 0x43c   :  { %2333 = vmatpush.msra.mxu1 %v7628_v49  ;;  %2373 = vmatpush.msra.mxu3 %v7634_v47  ;;  %v2041_v49 = vor.u32 1.1754944e-38, %v2040_v36  ;;  %v2061_v47 = vsel %vm2058_vm7, %v2060_v58, %v2056_v15  ;;  %vm2039_vm9 = vcmp.eq.f32.partialorder %v2038_v27, 8.507059e+37  ;;  %v11648_v36 = vld [vmem:[#allocation48_spill] sm:$0xff]  ;;  %v11649_v27 = vld [vmem:[#allocation49_spill] sm:$0xff]  ;;  %v8908_v41 = vld [vmem:[%s10498_s2 + $0x20] sm:$0xff] }
 0x43d   :  { %v2033_v6 = vadd.f32 %v3665_v44, %v2032_v34  ;;  %v8894_v34 = vld [vmem:[%s10498_s2 + $0x40] sm:$0xff]  ;;  %v8901_v15 = vld [vmem:[%s10498_s2 + $0x50] sm:$0xff] }
 0x43e   :  { %2334 = vmatpush.msra.mxu1 %v7644_v22  ;;  %2374 = vmatpush.msra.mxu3 %v7650_v14  ;;  %v2083_v14 = vmul.f32 %v2061_v47, %v7692_v10  ;;  %v11650_v58 = vld [vmem:[#allocation52_spill] sm:$0xff] }
 0x43f   :  { %2204 = vmatmul.f32.vlgmr.msrb.gmra.mxu1 %v1940_v28  ;;  %2244 = vmatmul.f32.vlgmr.msrb.gmra.mxu3 %v1940_v28  ;;  %v2037_v8 = vsel %vm2036_vm8, %v3665_v44, %v2033_v6  ;;  %v8845_v28 = vld [vmem:[%s10498_s2 + $0xd0] sm:$0xff] }
 0x440   :  { %2335 = vmatpush.msra.mxu1 %v7657_v24  ;;  %2375 = vmatpush.msra.mxu3 %v7663_v25  ;;  %v2042_v22 = vsel %vm2039_vm9, %v2041_v49, %v2037_v8  ;;  %v2072_v25 = vadd.f32 %v8652_v31, %v2071_v17  ;;  %v8859_v44 = vld [vmem:[%s10498_s2 + $0xb0] sm:$0xff]  ;;  %v8922_v8 = vld [vmem:[%s10498_s2] sm:$0xff] }
 0x441   :  { %v2084_v18 = vmul.f32 %v3667_v26, %v2042_v22  ;;  %v11651_v6 = vld [vmem:[#allocation53_spill] sm:$0xff]  ;;  %v11652_v47 = vld [vmem:[#allocation56_spill] sm:$0xff] }
 0x442   :  { %2336 = vmatpush.msra.mxu1 %v7670_v39  ;;  %2376 = vmatpush.msra.mxu3 %v7676_v0  ;;  %v2079_v39 = vand.u32 2147483648, %v8645_v43  ;;  %v2077_v0 = vand.u32 2147483647, %v8645_v43  ;;  %v2076_v10 = vsel %vm2075_vm12, %v8652_v31, %v2072_v25  ;;  %v11643_v31 = vld [vmem:[#allocation33_spill] sm:$0xff]  ;;  %v11654_v22 = vld [vmem:[#allocation60_spill] sm:$0xff] }
 0x443   :  { %v8684_v24 = vadd.f32 %v2084_v18, %v2083_v14  ;;  %v8915_v49 = vld [vmem:[%s10498_s2 + $0x30] sm:$0xff]  ;;  %v11655_v14 = vld [vmem:[#allocation63_spill] sm:$0xff] }
 0x444   :  { %2337 = vmatpush.msra.mxu1 %v7683_v50  ;;  %2377 = vmatpush.msra.mxu3 %v7689_v12  ;;  %v11636_v50 = vld [vmem:[#allocation25_spill] sm:$0xff]  ;;  %v11637_v12 = vld [vmem:[#allocation42_spill] sm:$0xff]  ;;  %vm2078_vm13 = vcmp.eq.f32.partialorder %v2077_v0, 8.507059e+37  ;;  %v11656_v18 = vld [vmem:[#allocation68_spill] sm:$0xff] }
 0x445   :  { %3668 = vtanh.f32 %v8684_v24  ;;  %v11653_v26 = vld [vmem:[#allocation57_spill] sm:$0xff] }
 0x446   :  { %2338 = vmatpush.msra.mxu1 %v7699_v21  ;;  %2378 = vmatpush.msra.mxu3 %v7705_v20  ;;  %v2080_v21 = vor.u32 1.1754944e-38, %v2079_v39  ;;  %v8929_v17 = vld [vmem:[%s10498_s2 + $0x10] sm:$0xff] }
 0x447   :  { %v11657_v25 = vld [vmem:[#allocation69_spill] sm:$0xff]  ;;  %v11658_v39 = vld [vmem:[#allocation72_spill] sm:$0xff] }
 0x448   :  { %2339 = vmatpush.msra.mxu1 %v11636_v50  ;;  %2379 = vmatpush.msra.mxu3 %v11637_v12  ;;  %v2081_v9 = vsel %vm2078_vm13, %v2080_v21, %v2076_v10  ;;  %v11659_v0 = vld [vmem:[#allocation73_spill] sm:$0xff]  ;;  %v11660_v50 = vld [vmem:[#allocation76_spill] sm:$0xff]  ;;  %v11661_v12 = vld [vmem:[#allocation18_spill] sm:$0xff] }
 0x449   :  { %v11662_v10 = vld [vmem:[#allocation19_spill] sm:$0xff]  ;;  %v11664_v21 = vld [vmem:[#allocation26_spill] sm:$0xff] }
 0x44a   :  { %2340 = vmatpush.msra.mxu1 %v11638_v37  ;;  %2380 = vmatpush.msra.mxu3 %v7734_v29  ;;  %v8710_v29 = vld [vmem:[%s10498_s2 + $0x1e0] sm:$0xff]  ;;  %v11663_v37 = vld [vmem:[#allocation77_spill] sm:$0xff] }
 0x44b   :  { %v3669_v20 = vpop.eup %3668 }
 0x44c   :  { %2341 = vmatpush.msra.mxu1 %v7740_v23  ;;  %2381 = vmatpush.msra.mxu3 %v7746_v52  ;;  %v8701_v43 = vmul.f32 %v3669_v20, %v2081_v9  ;;  %v8716_v23 = vld [vmem:[%s10498_s2 + $0x1f0] sm:$0xff]  ;;  %v8724_v52 = vld [vmem:[%s10498_s2 + $0x1c0] sm:$0xff] }
 0x44d   :  { %v11665_v20 = vld [vmem:[#allocation81_spill] sm:$0xff]  ;;  %v11666_v9 = vld [vmem:[#allocation27_spill] sm:$0xff] }
 0x44e   :  { %2342 = vmatpush.msra.mxu1 %v7754_v63  ;;  %2382 = vmatpush.msra.mxu3 %v7760_v4  ;;  %v8730_v63 = vld [vmem:[%s10498_s2 + $0x1d0] sm:$0xff]  ;;  %v8738_v4 = vld [vmem:[%s10498_s2 + $0x1a0] sm:$0xff] }
 0x44f   :  { %2104 = vmatmul.f32.vlgmr.msra.gmra.mxu0 %v8701_v43  ;;  %2144 = vmatmul.f32.vlgmr.msra.gmra.mxu2 %v8701_v43 }
 0x450   :  { %2311 = vmatpush.msra.mxu0 %v8710_v29  ;;  %2351 = vmatpush.msra.mxu2 %v8716_v23 }
 0x451   :  { %2343 = vmatpush.msra.mxu1 %v7770_v51  ;;  %2383 = vmatpush.msra.mxu3 %v7776_v1  ;;  %v8744_v51 = vld [vmem:[%s10498_s2 + $0x1b0] sm:$0xff]  ;;  %v8752_v1 = vld [vmem:[%s10498_s2 + $0x180] sm:$0xff] }
 0x452   :  { %2312 = vmatpush.msra.mxu0 %v8724_v52  ;;  %2352 = vmatpush.msra.mxu2 %v8730_v63 }
 0x453   :  { %2344 = vmatpush.msra.mxu1 %v7784_v32  ;;  %2384 = vmatpush.msra.mxu3 %v7790_v60  ;;  %v8758_v32 = vld [vmem:[%s10498_s2 + $0x190] sm:$0xff]  ;;  %v8768_v60 = vld [vmem:[%s10498_s2 + $0x160] sm:$0xff] }
 0x454   :  { %2313 = vmatpush.msra.mxu0 %v8738_v4  ;;  %2353 = vmatpush.msra.mxu2 %v8744_v51 }
 0x455   :  { %2345 = vmatpush.msra.mxu1 %v7798_v55  ;;  %2385 = vmatpush.msra.mxu3 %v7804_v62  ;;  %v8775_v55 = vld [vmem:[%s10498_s2 + $0x170] sm:$0xff]  ;;  %v8782_v62 = vld [vmem:[%s10498_s2 + $0x140] sm:$0xff] }
 0x456   :  { %2314 = vmatpush.msra.mxu0 %v8752_v1  ;;  %2354 = vmatpush.msra.mxu2 %v8758_v32 }
 0x457   :  { %2346 = vmatpush.msra.mxu1 %v7812_v59  ;;  %2386 = vmatpush.msra.mxu3 %v7818_v33  ;;  %v8789_v59 = vld [vmem:[%s10498_s2 + $0x150] sm:$0xff]  ;;  %v8796_v33 = vld [vmem:[%s10498_s2 + $0x120] sm:$0xff] }
 0x458   :  { %2184 = vmatmul.f32.vlgmr.msrb.gmra.mxu0 %v8701_v43  ;;  %2224 = vmatmul.f32.vlgmr.msrb.gmra.mxu2 %v8701_v43 }
 0x459   :  { %2315 = vmatpush.msra.mxu0 %v8768_v60  ;;  %2347 = vmatmul.f32.vlgmr.msra.gmra.mxu1 %v8701_v43 }
 0x45a   :  { %2355 = vmatpush.msra.mxu2 %v8775_v55  ;;  %2387 = vmatmul.f32.vlgmr.msra.gmra.mxu3 %v8701_v43 }
 0x45b   :  { %2316 = vmatpush.msra.mxu0 %v8782_v62  ;;  %2478 = vmatpush.msrb.mxu1 %v7831_v35  ;;  %v8803_v35 = vld [vmem:[%s10498_s2 + $0x130] sm:$0xff] }
 0x45c   :  { %2356 = vmatpush.msra.mxu2 %v8789_v59  ;;  %2518 = vmatpush.msrb.mxu3 %v7838_v42  ;;  %v8810_v42 = vld [vmem:[%s10498_s2 + $0x100] sm:$0xff] }
 0x45d   :  { %2317 = vmatpush.msra.mxu0 %v8796_v33  ;;  %2479 = vmatpush.msrb.mxu1 %v7845_v61  ;;  %v8817_v61 = vld [vmem:[%s10498_s2 + $0x110] sm:$0xff] }
 0x45e   :  { %2357 = vmatpush.msra.mxu2 %v8803_v35  ;;  %2519 = vmatpush.msrb.mxu3 %v7852_v19  ;;  %v8824_v19 = vld [vmem:[%s10498_s2 + $0xe0] sm:$0xff] }
 0x45f   :  { %2318 = vmatpush.msra.mxu0 %v8810_v42  ;;  %2480 = vmatpush.msrb.mxu1 %v7859_v3  ;;  %v8831_v3 = vld [vmem:[%s10498_s2 + $0xf0] sm:$0xff] }
 0x460   :  { %2358 = vmatpush.msra.mxu2 %v8817_v61  ;;  %2520 = vmatpush.msrb.mxu3 %v7866_v38  ;;  %v8838_v38 = vld [vmem:[%s10498_s2 + $0xc0] sm:$0xff] }
 0x461   :  { %2319 = vmatpush.msra.mxu0 %v8824_v19  ;;  %2481 = vmatpush.msrb.mxu1 %v11639_v57  ;;  %v11668_v57 = vld [vmem:[#allocation30_spill] sm:$0xff] }
 0x462   :  { %2359 = vmatpush.msra.mxu2 %v8831_v3  ;;  %2521 = vmatpush.msrb.mxu3 %v11640_v46  ;;  %v11669_v46 = vld [vmem:[#allocation88_spill] sm:$0xff] }
 0x463   :  { %2320 = vmatpush.msra.mxu0 %v8838_v38  ;;  %2482 = vmatpush.msrb.mxu1 %v11641_v53  ;;  %v11670_v53 = vld [vmem:[#allocation31_spill] sm:$0xff] }
 0x464   :  { %2360 = vmatpush.msra.mxu2 %v8845_v28  ;;  %2522 = vmatpush.msrb.mxu3 %v11642_v7  ;;  %v11671_v7 = vld [vmem:[#allocation89_spill] sm:$0xff] }
 0x465   :  { %2321 = vmatpush.msra.mxu0 %v8852_v56  ;;  %2483 = vmatpush.msrb.mxu1 %v11643_v31  ;;  %v11672_v31 = vld [vmem:[#allocation34_spill] sm:$0xff] }
 0x466   :  { %2361 = vmatpush.msra.mxu2 %v8859_v44  ;;  %2523 = vmatpush.msrb.mxu3 %v11644_v45  ;;  %v11673_v45 = vld [vmem:[#allocation92_spill] sm:$0xff] }
 0x467   :  { %2322 = vmatpush.msra.mxu0 %v8866_v30  ;;  %2484 = vmatpush.msrb.mxu1 %v11645_v54  ;;  %v11674_v54 = vld [vmem:[#allocation35_spill] sm:$0xff] }
 0x468   :  { %2362 = vmatpush.msra.mxu2 %v8873_v11  ;;  %2524 = vmatpush.msrb.mxu3 %v11646_v16  ;;  %v11675_v16 = vld [vmem:[#allocation93_spill] sm:$0xff] }
 0x469   :  { %2323 = vmatpush.msra.mxu0 %v8880_v40  ;;  %2485 = vmatpush.msrb.mxu1 %v11647_v13  ;;  %v11676_v13 = vld [vmem:[#allocation38_spill] sm:$0xff] }
 0x46a   :  { %2363 = vmatpush.msra.mxu2 %v8887_v48  ;;  %2525 = vmatpush.msrb.mxu3 %v11648_v36  ;;  %v11677_v36 = vld [vmem:[#allocation39_spill] sm:$0xff] }
 0x46b   :  { %2324 = vmatpush.msra.mxu0 %v8894_v34  ;;  %2486 = vmatpush.msrb.mxu1 %v11649_v27  ;;  %v11678_v27 = vld [vmem:[#allocation46_spill] sm:$0xff] }
 0x46c   :  { %2364 = vmatpush.msra.mxu2 %v8901_v15  ;;  %2526 = vmatpush.msrb.mxu3 %v11650_v58  ;;  %v11679_v58 = vld [vmem:[#allocation47_spill] sm:$0xff] }
 0x46d   :  { %2325 = vmatpush.msra.mxu0 %v8908_v41  ;;  %2487 = vmatpush.msrb.mxu1 %v11651_v6  ;;  %v11680_v6 = vld [vmem:[#allocation50_spill] sm:$0xff] }
 0x46e   :  { %2365 = vmatpush.msra.mxu2 %v8915_v49  ;;  %2527 = vmatpush.msrb.mxu3 %v11652_v47  ;;  %v11681_v47 = vld [vmem:[#allocation51_spill] sm:$0xff] }
 0x46f   :  { %2326 = vmatpush.msra.mxu0 %v8922_v8  ;;  %2488 = vmatpush.msrb.mxu1 %v11653_v26  ;;  %v11682_v26 = vld [vmem:[#allocation54_spill] sm:$0xff] }
 0x470   :  { %2366 = vmatpush.msra.mxu2 %v8929_v17  ;;  %2327 = vmatmul.f32.vlgmr.msra.gmra.mxu0 %v8701_v43 }
 0x471   :  { %2367 = vmatmul.f32.vlgmr.msra.gmra.mxu2 %v8701_v43  ;;  %2528 = vmatpush.msrb.mxu3 %v11654_v22  ;;  %v11667_v43 = vld [vmem:[#allocation84_spill] sm:$0xff]  ;;  %v11683_v22 = vld [vmem:[#allocation55_spill] sm:$0xff] }
 0x472   :  { %2489 = vmatpush.msrb.mxu1 %v11655_v14  ;;  %2458 = vmatpush.msrb.mxu0 %v11656_v18  ;;  %v11684_v14 = vld [vmem:[#allocation58_spill] sm:$0xff]  ;;  %v11685_v18 = vld [vmem:[#allocation59_spill] sm:$0xff] }
 0x473   :  { %2529 = vmatpush.msrb.mxu3 %v11657_v25  ;;  %2498 = vmatpush.msrb.mxu2 %v11658_v39  ;;  %v11686_v25 = vld [vmem:[#allocation66_spill] sm:$0xff]  ;;  %v11687_v39 = vld [vmem:[#allocation67_spill] sm:$0xff] }
 0x474   :  { %2490 = vmatpush.msrb.mxu1 %v11659_v0  ;;  %2459 = vmatpush.msrb.mxu0 %v11660_v50  ;;  %v11688_v0 = vld [vmem:[#allocation70_spill] sm:$0xff]  ;;  %v11689_v50 = vld [vmem:[#allocation71_spill] sm:$0xff] }
 0x475   :  { %2530 = vmatpush.msrb.mxu3 %v11661_v12  ;;  %2499 = vmatpush.msrb.mxu2 %v11662_v10  ;;  %v11690_v12 = vld [vmem:[#allocation74_spill] sm:$0xff]  ;;  %v11691_v10 = vld [vmem:[#allocation75_spill] sm:$0xff] }
 0x476   :  { %2491 = vmatpush.msrb.mxu1 %v11663_v37  ;;  %2460 = vmatpush.msrb.mxu0 %v11664_v21  ;;  %v11692_v37 = vld [vmem:[#allocation79_spill] sm:$0xff]  ;;  %v11693_v21 = vld [vmem:[#allocation80_spill] sm:$0xff] }
 0x477   :  { %2531 = vmatpush.msrb.mxu3 %v11665_v20  ;;  %2500 = vmatpush.msrb.mxu2 %v11666_v9  ;;  %v11694_v20 = vld [vmem:[#allocation86_spill] sm:$0xff]  ;;  %v11695_v9 = vld [vmem:[#allocation87_spill] sm:$0xff] }
 0x478   :  { %2492 = vmatpush.msrb.mxu1 %v11667_v43  ;;  %2461 = vmatpush.msrb.mxu0 %v11668_v57  ;;  %v11696_v43 = vld [vmem:[#allocation90_spill] sm:$0xff]  ;;  %v11697_v57 = vld [vmem:[#allocation91_spill] sm:$0xff] }
 0x479   :  { %2532 = vmatpush.msrb.mxu3 %v11669_v46  ;;  %2501 = vmatpush.msrb.mxu2 %v11670_v53  ;;  %v11698_v46 = vld [vmem:[#allocation94_spill] sm:$0xff]  ;;  %v11699_v53 = vld [vmem:[#allocation95_spill] sm:$0xff] }
 0x47a   :  { %2493 = vmatpush.msrb.mxu1 %v11671_v7  ;;  %2462 = vmatpush.msrb.mxu0 %v11672_v31  ;;  %v11700_v7 = vld [vmem:[#allocation96_spill] sm:$0xff]  ;;  %v11701_v31 = vld [vmem:[#allocation101_spill] sm:$0xff] }
 0x47b   :  { %2533 = vmatpush.msrb.mxu3 %v11673_v45  ;;  %2502 = vmatpush.msrb.mxu2 %v11674_v54  ;;  %v11702_v45 = vld [vmem:[#allocation105_spill] sm:$0xff]  ;;  %v11703_v54 = vld [vmem:[#allocation106_spill] sm:$0xff] }
 0x47c   :  { %2558 = vmatpush.msra.mxu1 %v11675_v16  ;;  %2463 = vmatpush.msrb.mxu0 %v11677_v36  ;;  %v11704_v16 = vld [vmem:[#allocation107_spill] sm:$0xff] }
 0x47d   :  { %2598 = vmatpush.msra.mxu3 %v11676_v13  ;;  %2503 = vmatpush.msrb.mxu2 %v11678_v27  ;;  %v11705_v13 = vld [vmem:[#allocation110_spill] sm:$0xff]  ;;  %v11706_v36 = vld [vmem:[#allocation111_spill] sm:$0xff] }
 0x47e   :  { %2559 = vmatpush.msra.mxu1 %v11679_v58  ;;  %2464 = vmatpush.msrb.mxu0 %v11681_v47  ;;  %v11707_v27 = vld [vmem:[#allocation11_spill] sm:$0xff]  ;;  %v11708_v58 = vld [vmem:[#allocation22_spill] sm:$0xff]  ;;  %v11710_v47 = vld [vmem:[#allocation21_spill] sm:$0xff] }
 0x47f   :  { %2599 = vmatpush.msra.mxu3 %v11680_v6  ;;  %2504 = vmatpush.msrb.mxu2 %v11682_v26  ;;  %v11709_v6 = vld [vmem:[#allocation10_spill] sm:$0xff]  ;;  %v11711_v26 = vld [vmem:[#allocation3_spill] sm:$0xff] }
 0x480   :  { %2560 = vmatpush.msra.mxu1 %v11683_v22  ;;  %2465 = vmatpush.msrb.mxu0 %v11685_v18  ;;  %v11712_v22 = vld [vmem:[#allocation4_spill] sm:$0xff]  ;;  %v11714_v18 = vld [vmem:[#allocation6_spill] sm:$0xff] }
 0x481   :  { %2600 = vmatpush.msra.mxu3 %v11684_v14  ;;  %2505 = vmatpush.msrb.mxu2 %v11686_v25  ;;  %v11713_v14 = vld [vmem:[#allocation5_spill] sm:$0xff]  ;;  %v11715_v25 = vld [vmem:[#allocation7_spill] sm:$0xff] }
 0x482   :  { %2561 = vmatpush.msra.mxu1 %v11687_v39  ;;  %2466 = vmatpush.msrb.mxu0 %v11689_v50  ;;  %v11716_v39 = vld [vmem:[#allocation8_spill] sm:$0xff] }
 0x483   :  { %2601 = vmatpush.msra.mxu3 %v11688_v0  ;;  %2506 = vmatpush.msrb.mxu2 %v11690_v12  ;;  %v11717_v0 = vld [vmem:[#allocation9_spill] sm:$0xff]  ;;  %v11718_v50 = vld [vmem:[#allocation12_spill] sm:$0xff] }
 0x484   :  { %2562 = vmatpush.msra.mxu1 %v11691_v10  ;;  %2467 = vmatpush.msrb.mxu0 %v11693_v21  ;;  %v11719_v12 = vld [vmem:[#allocation13_spill] sm:$0xff]  ;;  %v11720_v10 = vld [vmem:[#allocation14_spill] sm:$0xff]  ;;  %v11722_v21 = vld [vmem:[#allocation116_spill] sm:$0xff] }
 0x485   :  { %2602 = vmatpush.msra.mxu3 %v11692_v37  ;;  %2507 = vmatpush.msrb.mxu2 %v11694_v20  ;;  %v11721_v37 = vld [vmem:[#allocation15_spill] sm:$0xff]  ;;  %v11723_v20 = vld [vmem:[#allocation117_spill] sm:$0xff] }
 0x486   :  { %2563 = vmatpush.msra.mxu1 %v11695_v9  ;;  %2468 = vmatpush.msrb.mxu0 %v11697_v57  ;;  %v11724_v9 = vld [vmem:[#allocation118_spill] sm:$0xff]  ;;  %v11726_v57 = vld [vmem:[#allocation120_spill] sm:$0xff] }
 0x487   :  { %2603 = vmatpush.msra.mxu3 %v11696_v43  ;;  %2508 = vmatpush.msrb.mxu2 %v11698_v46  ;;  %v11725_v43 = vld [vmem:[#allocation119_spill] sm:$0xff]  ;;  %v11727_v46 = vld [vmem:[#allocation121_spill] sm:$0xff] }
 0x488   :  { %2564 = vmatpush.msra.mxu1 %v11699_v53  ;;  %2469 = vmatpush.msrb.mxu0 %v11701_v31  ;;  %v11728_v53 = vld [vmem:[#allocation122_spill] sm:$0xff]  ;;  %v11730_v31 = vld [vmem:[#allocation124_spill] sm:$0xff] }
 0x489   :  { %2604 = vmatpush.msra.mxu3 %v11700_v7  ;;  %2509 = vmatpush.msrb.mxu2 %v11702_v45  ;;  %v11729_v7 = vld [vmem:[#allocation123_spill] sm:$0xff]  ;;  %v11731_v45 = vld [vmem:[#allocation125_spill] sm:$0xff] }
 0x48a   :  { %2565 = vmatpush.msra.mxu1 %v11703_v54  ;;  %2470 = vmatpush.msrb.mxu0 %v11705_v13  ;;  %v11732_v54 = vld [vmem:[#allocation126_spill] sm:$0xff]  ;;  %v11734_v13 = vld [vmem:[#allocation128_spill] sm:$0xff] }
 0x48b   :  { %2605 = vmatpush.msra.mxu3 %v11704_v16  ;;  %2510 = vmatpush.msrb.mxu2 %v11706_v36  ;;  %v11733_v16 = vld [vmem:[#allocation127_spill] sm:$0xff]  ;;  %v11735_v36 = vld [vmem:[#allocation129_spill] sm:$0xff] }
 0x48c   :  { %2566 = vmatpush.msra.mxu1 %v11707_v27  ;;  %2471 = vmatpush.msrb.mxu0 %v11709_v6  ;;  %v11736_v27 = vld [vmem:[#allocation130_spill] sm:$0xff]  ;;  %v11738_v6 = vld [vmem:[#allocation132_spill] sm:$0xff] }
 0x48d   :  { %2606 = vmatpush.msra.mxu3 %v11708_v58  ;;  %2511 = vmatpush.msrb.mxu2 %v11710_v47  ;;  %v11737_v58 = vld [vmem:[#allocation131_spill] sm:$0xff]  ;;  %v11739_v47 = vld [vmem:[#allocation133_spill] sm:$0xff] }
 0x48e   :  { %2567 = vmatpush.msra.mxu1 %v11711_v26  ;;  %2472 = vmatpush.msrb.mxu0 %v11713_v14  ;;  %v11740_v26 = vld [vmem:[#allocation134_spill] sm:$0xff]  ;;  %v11742_v14 = vld [vmem:[#allocation136_spill] sm:$0xff] }
 0x48f   :  { %2607 = vmatpush.msra.mxu3 %v11712_v22  ;;  %2512 = vmatpush.msrb.mxu2 %v11714_v18  ;;  %v11741_v22 = vld [vmem:[#allocation135_spill] sm:$0xff]  ;;  %v11743_v18 = vld [vmem:[#allocation137_spill] sm:$0xff] }
 0x490   :  { %2568 = vmatpush.msra.mxu1 %v11715_v25  ;;  %2473 = vmatpush.msrb.mxu0 %v11717_v0  ;;  %v11744_v25 = vld [vmem:[#allocation138_spill] sm:$0xff]  ;;  %v11746_v0 = vld [vmem:[#allocation140_spill] sm:$0xff] }
 0x491   :  { %2608 = vmatpush.msra.mxu3 %v11716_v39  ;;  %2513 = vmatpush.msrb.mxu2 %v11718_v50  ;;  %v11745_v39 = vld [vmem:[#allocation139_spill] sm:$0xff]  ;;  %v11747_v50 = vld [vmem:[#allocation141_spill] sm:$0xff] }
 0x492   :  { %2569 = vmatpush.msra.mxu1 %v11719_v12  ;;  %2538 = vmatpush.msra.mxu0 %v11721_v37  ;;  %v11748_v12 = vld [vmem:[#allocation142_spill] sm:$0xff]  ;;  %v11750_v37 = vld [vmem:[#allocation144_spill] sm:$0xff] }
 0x493   :  { %2609 = vmatpush.msra.mxu3 %v11720_v10  ;;  %2578 = vmatpush.msra.mxu2 %v11722_v21  ;;  %v11749_v10 = vld [vmem:[#allocation143_spill] sm:$0xff]  ;;  %v11751_v21 = vld [vmem:[#allocation145_spill] sm:$0xff] }
 0x494   :  { %2570 = vmatpush.msra.mxu1 %v11723_v20  ;;  %2539 = vmatpush.msra.mxu0 %v11725_v43  ;;  %v11752_v20 = vld [vmem:[#allocation146_spill] sm:$0xff]  ;;  %v11754_v43 = vld [vmem:[#allocation148_spill] sm:$0xff] }
 0x495   :  { %2610 = vmatpush.msra.mxu3 %v11724_v9  ;;  %2579 = vmatpush.msra.mxu2 %v11726_v57  ;;  %v11753_v9 = vld [vmem:[#allocation147_spill] sm:$0xff]  ;;  %v11755_v57 = vld [vmem:[#allocation149_spill] sm:$0xff] }
 0x496   :  { %2571 = vmatpush.msra.mxu1 %v11727_v46  ;;  %2540 = vmatpush.msra.mxu0 %v11729_v7  ;;  %v11756_v46 = vld [vmem:[#allocation150_spill] sm:$0xff]  ;;  %v11758_v7 = vld [vmem:[#allocation152_spill] sm:$0xff] }
 0x497   :  { %2611 = vmatpush.msra.mxu3 %v11728_v53  ;;  %2580 = vmatpush.msra.mxu2 %v11730_v31  ;;  %v11757_v53 = vld [vmem:[#allocation151_spill] sm:$0xff]  ;;  %v11759_v31 = vld [vmem:[#allocation153_spill] sm:$0xff] }
 0x498   :  { %2572 = vmatpush.msra.mxu1 %v11731_v45  ;;  %2541 = vmatpush.msra.mxu0 %v11733_v16  ;;  %v11760_v45 = vld [vmem:[#allocation154_spill] sm:$0xff] }
 0x499   :  { %2612 = vmatpush.msra.mxu3 %v11732_v54  ;;  %2581 = vmatpush.msra.mxu2 %v11734_v13  ;;  %v11761_v13 = vld [vmem:[#allocation16_spill] sm:$0xff] }
 0x49a   :  { %2573 = vmatpush.msra.mxu1 %v11735_v36  ;;  %2542 = vmatpush.msra.mxu0 %v11737_v58 }
 0x49b   :  { %2613 = vmatpush.msra.mxu3 %v11736_v27  ;;  %2582 = vmatpush.msra.mxu2 %v11738_v6 }
 0x49c   :  { %2543 = vmatpush.msra.mxu0 %v11739_v47 }
 0x49d   :  { %2583 = vmatpush.msra.mxu2 %v11740_v26 }
 0x49e   :  { %2544 = vmatpush.msra.mxu0 %v11741_v22  ;;  %v11762_v22 = vld [vmem:[#allocation17_spill] sm:$0xff] }
 0x49f   :  { %2584 = vmatpush.msra.mxu2 %v11742_v14 }
 0x4a0   :  { %2545 = vmatpush.msra.mxu0 %v11743_v18 }
 0x4a1   :  { %2585 = vmatpush.msra.mxu2 %v11744_v25  ;;  %v11763_v25 = vld [vmem:[#allocation109_spill] sm:$0xff] }
 0x4a2   :  { %2546 = vmatpush.msra.mxu0 %v11745_v39  ;;  %v11764_v39 = vld [vmem:[#allocation83_spill] sm:$0xff] }
 0x4a3   :  { %2586 = vmatpush.msra.mxu2 %v11746_v0  ;;  %v169_v0 = vadd.f32 %v11764_v39, %v11763_v25 }
 0x4a4   :  { %2547 = vmatpush.msra.mxu0 %v11747_v50 }
 0x4a5   :  { %2587 = vmatpush.msra.mxu2 %v11748_v12 }
 0x4a6   :  { %2548 = vmatpush.msra.mxu0 %v11749_v10 }
 0x4a7   :  { %2588 = vmatpush.msra.mxu2 %v11750_v37 }
 0x4a8   :  { %2549 = vmatpush.msra.mxu0 %v11751_v21 }
 0x4a9   :  { %2589 = vmatpush.msra.mxu2 %v11752_v20 }
 0x4aa   :  { %2550 = vmatpush.msra.mxu0 %v11753_v9 }
 0x4ab   :  { %2590 = vmatpush.msra.mxu2 %v11754_v43 }
 0x4ac   :  { %2551 = vmatpush.msra.mxu0 %v11755_v57  ;;  %v11765_v57 = vld [vmem:[#allocation20_spill] sm:$0xff] }
 0x4ad   :  { %2591 = vmatpush.msra.mxu2 %v11756_v46 }
 0x4ae   :  { %2552 = vmatpush.msra.mxu0 %v11757_v53 }
 0x4af   :  { %2592 = vmatpush.msra.mxu2 %v11758_v7 }
 0x4b0   :  { %2553 = vmatpush.msra.mxu0 %v11759_v31 }
 0x4b1   :  { %2593 = vmatpush.msra.mxu2 %v11760_v45 }
 0x4b4   :  { %v2125_v54 = vpop.f32.mrf.mxu1 }
 0x4ba   :  { %v2165_v27 = vpop.f32.mrf.mxu3 }
 0x4bc   :  { %v2205_v58 = vpop.f32.mrf.mxu1 }
 0x4c2   :  { %v2245_v10 = vpop.f32.mrf.mxu3 }
 0x4cc   :  { %v2105_v16 = vpop.f32.mrf.mxu0 }
 0x4cd   :  { %v2106_v36 = vadd.f32 %v2105_v16, %v11761_v13  ;;  %v11766_v16 = vld [vmem:[#allocation114_spill] sm:$0xff] }
 0x4cf   :  { %v2126_v6 = vadd.f32 %v2125_v54, %v2106_v36  ;;  %v11767_v36 = vld [vmem:[#allocation97_spill] sm:$0xff] }
 0x4d1   :  { %v3502_v47 = vmul.f32 -1.442695, %v2126_v6 }
 0x4d2   :  { %v2145_v26 = vpop.f32.mrf.mxu2 }
 0x4d3   :  { %3670 = vpow2.f32 %v3502_v47  ;;  %v2146_v14 = vadd.f32 %v2145_v26, %v11762_v22  ;;  %v11768_v26 = vld [vmem:[#allocation23_spill] sm:$0xff] }
 0x4d5   :  { %v2166_v18 = vadd.f32 %v2165_v27, %v2146_v14  ;;  %v2185_v7 = vpop.f32.mrf.mxu0  ;;  %v251_v27 = vadd.f32 %v11767_v36, %v11766_v16 }
 0x4d6   :  { %v2348_v50 = vpop.f32.mrf.mxu1  ;;  %v2186_v14 = vadd.f32 %v2185_v7, %v11768_v26 }
 0x4d7   :  { %v3503_v12 = vmul.f32 -1.442695, %v2166_v18  ;;  %v2392_v37 = vadd.f32 %v2348_v50, %v169_v0 }
 0x4d9   :  { %v3671_v21 = vpop.eup %3670  ;;  %3672 = vpow2.f32 %v3503_v12  ;;  %v3506_v43 = vmul.f32 -1.442695, %v2392_v37  ;;  %v2206_v12 = vadd.f32 %v2205_v58, %v2186_v14 }
 0x4da   :  { %v2251_v20 = vadd.f32 1.0, %v3671_v21 }
 0x4db   :  { %v2225_v9 = vpop.f32.mrf.mxu2 }
 0x4dc   :  { %3674 = vrcp.f32 %v2251_v20  ;;  %v2226_v46 = vadd.f32 %v2225_v9, %v11765_v57  ;;  %vm2257_vm15 = vweird.f32 %v2251_v20  ;;  %v2261_v7 = vand.u32 2147483647, %v2251_v20 }
 0x4dd   :  { %3676 = vpow2.f32 %v3506_v43  ;;  %v2388_v54 = vpop.f32.mrf.mxu3 }
 0x4de   :  { %v2246_v31 = vadd.f32 %v2245_v10, %v2226_v46  ;;  %v2394_v39 = vadd.f32 %v2388_v54, %v251_v27  ;;  %v11769_v54 = vld [vmem:[#allocation108_spill] sm:$0xff]  ;;  %v11770_v27 = vld [vmem:[#allocation82_spill] sm:$0xff]  ;;  %vm2262_vm3 = vcmp.eq.f32.partialorder %v2261_v7, 8.507059e+37 }
 0x4df   :  { %v3673_v53 = vpop.eup %3672 }
 0x4e0   :  { %v2270_v45 = vadd.f32 1.0, %v3673_v53  ;;  %v3504_v6 = vmul.f32 -1.442695, %v2246_v31  ;;  %v3507_v21 = vmul.f32 -1.442695, %v2394_v39  ;;  %v2263_v31 = vand.u32 2147483648, %v2251_v20 }
 0x4e2   :  { %v3675_v47 = vpop.eup %3674  ;;  %3678 = vrcp.f32 %v2270_v45  ;;  %v2282_v58 = vand.u32 2147483648, %v2270_v45  ;;  %vm2276_vm2 = vweird.f32 %v2270_v45 }
 0x4e3   :  { %v2253_v18 = vmul.f32 %v3675_v47, %v2251_v20  ;;  %3680 = vpow2.f32 %v3504_v6  ;;  %v3677_v50 = vpop.eup %3676  ;;  %vm2258_vm14 = vweird.f32 %v3675_v47  ;;  %v128_v6 = vadd.f32 %v11770_v27, %v11769_v54 }
 0x4e4   :  { %v9049_v53 = vadd.f32 1.0, %v3677_v50  ;;  %3682 = vtanh.f32 %v2206_v12  ;;  %vm9053_vm0 = vmor %vm2257_vm15, %vm2258_vm14  ;;  %v2264_v20 = vor.u32 1.1754944e-38, %v2263_v31 }
 0x4e5   :  { %v2254_v0 = vsub.f32 1.0, %v2253_v18  ;;  %3684 = vpow2.f32 %v3507_v21  ;;  %v2280_v18 = vand.u32 2147483647, %v2270_v45 }
 0x4e6   :  { %vm2423_vm11 = vweird.f32 %v9049_v53 }
 0x4e7   :  { %v2255_v37 = vmul.f32 %v3675_v47, %v2254_v0  ;;  %vm2281_vm5 = vcmp.eq.f32.partialorder %v2280_v18, 8.507059e+37 }
 0x4e8   :  { %v3679_v10 = vpop.eup %3678 }
 0x4e9   :  { %v3681_v9 = vpop.eup %3680  ;;  %v2272_v43 = vmul.f32 %v3679_v10, %v2270_v45  ;;  %v2256_v46 = vadd.f32 %v3675_v47, %v2255_v37  ;;  %vm2277_vm1 = vweird.f32 %v3679_v10 }
 0x4ea   :  { %v2290_v36 = vadd.f32 1.0, %v3681_v9  ;;  %v3683_v21 = vpop.eup %3682  ;;  %vm2278_vm4 = vmor %vm2276_vm2, %vm2277_vm1  ;;  %v2283_v9 = vor.u32 1.1754944e-38, %v2282_v58 }
 0x4eb   :  { %v2273_v16 = vsub.f32 1.0, %v2272_v43  ;;  %v2260_v0 = vsel %vm9053_vm0, %v3675_v47, %v2256_v46  ;;  %v3685_v27 = vpop.eup %3684 }
 0x4ec   :  { %3686 = vrcp.f32 %v2290_v36  ;;  %v2265_v43 = vsel %vm2262_vm3, %v2264_v20, %v2260_v0  ;;  %v9067_v58 = vadd.f32 1.0, %v3685_v27  ;;  %v2302_v18 = vand.u32 2147483648, %v2290_v36 }
 0x4ed   :  { %v2274_v39 = vmul.f32 %v3679_v10, %v2273_v16  ;;  %3688 = vrcp.f32 %v9049_v53  ;;  %v2328_v50 = vpop.f32.mrf.mxu0  ;;  %v2307_v46 = vmul.f32 %v3683_v21, %v2265_v43  ;;  %vm2296_vm7 = vweird.f32 %v2290_v36 }
 0x4ee   :  { %v2391_v37 = vadd.f32 %v2328_v50, %v128_v6  ;;  %v2303_v20 = vor.u32 1.1754944e-38, %v2302_v18  ;;  %v9103_v18 = vld [vmem:[%s10498_s2 + $0x1d8] sm:$0xff]  ;;  %vm2443_vm3 = vweird.f32 %v9067_v58 }
 0x4ef   :  { %v2275_v12 = vadd.f32 %v3679_v10, %v2274_v39 }
 0x4f0   :  { %v3505_v16 = vmul.f32 -1.442695, %v2391_v37 }
 0x4f1   :  { %v2279_v54 = vsel %vm2278_vm4, %v3679_v10, %v2275_v12 }
 0x4f2   :  { %v3687_v26 = vpop.eup %3686  ;;  %v2284_v57 = vsel %vm2281_vm5, %v2283_v9, %v2279_v54  ;;  %3690 = vpow2.f32 %v3505_v16  ;;  %v2300_v54 = vand.u32 2147483647, %v2290_v36 }
 0x4f3   :  { %v9060_v14 = vpop.eup %3688  ;;  %v2306_v47 = vmul.f32 %v2284_v57, %v8641_v5  ;;  %v2292_v31 = vmul.f32 %v3687_v26, %v2290_v36  ;;  %vm2297_vm6 = vweird.f32 %v3687_v26  ;;  %v11773_v36 = vld [vmem:[#allocation100_spill] sm:$0xff] }
 0x4f4   :  { %v2419_v6 = vmul.f32 %v9060_v14, %v9049_v53  ;;  %vm2298_vm8 = vmor %vm2296_vm7, %vm2297_vm6  ;;  %vm2301_vm9 = vcmp.eq.f32.partialorder %v2300_v54, 8.507059e+37  ;;  %v2368_v43 = vpop.f32.mrf.mxu2  ;;  %v210_v27 = vadd.f32 %v11773_v36, %v5693_v2  ;;  %vm2424_vm10 = vweird.f32 %v9060_v14  ;;  %v9137_v36 = vld [vmem:[%s10498_s2 + $0x188] sm:$0xff] }
 0x4f5   :  { %v9063_v45 = vadd.f32 %v2307_v46, %v2306_v47  ;;  %v2293_v7 = vsub.f32 1.0, %v2292_v31  ;;  %v9088_v47 = vld [vmem:[%s10498_s2 + $0x1f8] sm:$0xff]  ;;  %v2429_v54 = vand.u32 2147483648, %v9049_v53  ;;  %vm9125_vm12 = vmor %vm2423_vm11, %vm2424_vm10 }
 0x4f6   :  { %v2420_v0 = vsub.f32 1.0, %v2419_v6  ;;  %v2393_v31 = vadd.f32 %v2368_v43, %v210_v27  ;;  %v9143_v27 = vld [vmem:[%s10498_s2 + $0x198] sm:$0xff] }
 0x4f7   :  { %3692 = vtanh.f32 %v9063_v45  ;;  %v2294_v10 = vmul.f32 %v3687_v26, %v2293_v7 }
 0x4f8   :  { %v3691_v39 = vpop.eup %3690  ;;  %3694 = vrcp.f32 %v9067_v58  ;;  %v2421_v9 = vmul.f32 %v9060_v14, %v2420_v0  ;;  %v2427_v0 = vand.u32 2147483647, %v9049_v53 }
 0x4f9   :  { %v2295_v5 = vadd.f32 %v3687_v26, %v2294_v10  ;;  %v9070_v57 = vadd.f32 1.0, %v3691_v39  ;;  %v9097_v10 = vld [vmem:[%s10498_s2 + $0x1c8] sm:$0xff] }
 0x4fa   :  { %v2422_v6 = vadd.f32 %v9060_v14, %v2421_v9  ;;  %vm2428_vm15 = vcmp.eq.f32.partialorder %v2427_v0, 8.507059e+37  ;;  %v9169_v0 = vld [vmem:[%s10498_s2 + $0x158] sm:$0xff] }
 0x4fb   :  { %v2299_v50 = vsel %vm2298_vm8, %v3687_v26, %v2295_v5  ;;  %3696 = vrcp.f32 %v9070_v57  ;;  %v9082_v26 = vld [vmem:[%s10498_s2 + $0x1e8] sm:$0xff]  ;;  %v2410_v53 = vand.u32 2147483648, %v9070_v57  ;;  %v2408_v9 = vand.u32 2147483647, %v9070_v57 }
 0x4fc   :  { %v2304_v37 = vsel %vm2301_vm9, %v2303_v20, %v2299_v50  ;;  %v9114_v50 = vld [vmem:[%s10498_s2 + $0x1a8] sm:$0xff]  ;;  %v9120_v20 = vld [vmem:[%s10498_s2 + $0x1b8] sm:$0xff]  ;;  %3698 = vtanh.f32 %v2393_v31  ;;  %v2426_v43 = vsel %vm9125_vm12, %v9060_v14, %v2422_v6  ;;  %v2430_v31 = vor.u32 1.1754944e-38, %v2429_v54 }
 0x4fd   :  { %v3693_v12 = vpop.eup %3692  ;;  %vm2404_vm14 = vweird.f32 %v9070_v57  ;;  %v9150_v14 = vld [vmem:[%s10498_s2 + $0x168] sm:$0xff]  ;;  %v9156_v6 = vld [vmem:[%s10498_s2 + $0x178] sm:$0xff]  ;;  %vm2409_vm1 = vcmp.eq.f32.partialorder %v2408_v9, 8.507059e+37 }
 0x4fe   :  { %v2310_v21 = vmul.f32 %v3693_v12, %v2304_v37  ;;  %v9077_v16 = vpop.eup %3694  ;;  %v2431_v54 = vsel %vm2428_vm15, %v2430_v31, %v2426_v43  ;;  %v9177_v43 = vld [vmem:[%s10498_s2 + $0x128] sm:$0xff]  ;;  %v9183_v31 = vld [vmem:[%s10498_s2 + $0x138] sm:$0xff] }
 0x4ff   :  { %v2439_v39 = vmul.f32 %v9077_v16, %v9067_v58  ;;  %vm2444_vm2 = vweird.f32 %v9077_v16 }
 0x500   :  { %2494 = vmatmul.f32.vlgmr.msrb.gmra.mxu1 %v2310_v21  ;;  %2534 = vmatmul.f32.vlgmr.msrb.gmra.mxu3 %v2310_v21  ;;  %vm2445_vm4 = vmor %vm2443_vm3, %vm2444_vm2 }
 0x501   :  { %2701 = vmatpush.msrb.mxu1 %v9082_v26  ;;  %2741 = vmatpush.msrb.mxu3 %v9088_v47  ;;  %v3697_v46 = vpop.eup %3696 }
 0x502   :  { %v2400_v7 = vmul.f32 %v3697_v46, %v9070_v57  ;;  %vm2405_vm13 = vweird.f32 %v3697_v46  ;;  %v3699_v12 = vpop.eup %3698 }
 0x503   :  { %2702 = vmatpush.msrb.mxu1 %v9097_v10  ;;  %2742 = vmatpush.msrb.mxu3 %v9103_v18  ;;  %vm2406_vm0 = vmor %vm2404_vm14, %vm2405_vm13 }
 0x504   :  { %v2401_v5 = vsub.f32 1.0, %v2400_v7  ;;  %v2440_v7 = vsub.f32 1.0, %v2439_v39  ;;  %v9163_v39 = vld [vmem:[%s10498_s2 + $0x148] sm:$0xff] }
 0x505   :  { %2703 = vmatpush.msrb.mxu1 %v9114_v50  ;;  %2743 = vmatpush.msrb.mxu3 %v9120_v20 }
 0x506   :  { %v2402_v37 = vmul.f32 %v3697_v46, %v2401_v5 }
 0x507   :  { %2704 = vmatpush.msrb.mxu1 %v9137_v36  ;;  %2744 = vmatpush.msrb.mxu3 %v9143_v27 }
 0x508   :  { %2574 = vmatmul.f32.vlgmr.msra.gmra.mxu1 %v2310_v21  ;;  %2614 = vmatmul.f32.vlgmr.msra.gmra.mxu3 %v2310_v21  ;;  %v2403_v5 = vadd.f32 %v3697_v46, %v2402_v37  ;;  %v2411_v21 = vor.u32 1.1754944e-38, %v2410_v53  ;;  %v2441_v53 = vmul.f32 %v9077_v16, %v2440_v7  ;;  %v9197_v7 = vld [vmem:[%s10498_s2 + $0x118] sm:$0xff] }
 0x509   :  { %2705 = vmatpush.msrb.mxu1 %v9150_v14  ;;  %2745 = vmatpush.msrb.mxu3 %v9156_v6 }
 0x50a   :  { %v2407_v57 = vsel %vm2406_vm0, %v3697_v46, %v2403_v5  ;;  %v2453_v46 = vmul.f32 %v2431_v54, %v8684_v24  ;;  %v9191_v24 = vld [vmem:[%s10498_s2 + $0x108] sm:$0xff]  ;;  %v2449_v54 = vand.u32 2147483648, %v9067_v58 }
 0x50b   :  { %2706 = vmatpush.msrb.mxu1 %v9163_v39  ;;  %2746 = vmatpush.msrb.mxu3 %v9169_v0  ;;  %v2412_v37 = vsel %vm2409_vm1, %v2411_v21, %v2407_v57  ;;  %v2442_v21 = vadd.f32 %v9077_v16, %v2441_v53  ;;  %v9207_v57 = vld [vmem:[%s10498_s2 + $0xe8] sm:$0xff]  ;;  %v2447_v53 = vand.u32 2147483647, %v9067_v58 }
 0x50c   :  { %v2454_v9 = vmul.f32 %v3699_v12, %v2412_v37  ;;  %11776 = vst [vmem:[#allocation155_spill] sm:$0xff] %v9207_v57  ;;  %v9213_v12 = vld [vmem:[%s10498_s2 + $0xf8] sm:$0xff]  ;;  %v9221_v37 = vld [vmem:[%s10498_s2 + $0xc8] sm:$0xff] }
 0x50d   :  { %2707 = vmatpush.msrb.mxu1 %v9177_v43  ;;  %2747 = vmatpush.msrb.mxu3 %v9183_v31  ;;  %11777 = vst [vmem:[#allocation156_spill] sm:$0xff] %v9213_v12  ;;  %v9234_v58 = vld [vmem:[%s10498_s2 + $0xa8] sm:$0xff]  ;;  %vm2448_vm5 = vcmp.eq.f32.partialorder %v2447_v53, 8.507059e+37  ;;  %v9266_v53 = vld [vmem:[%s10498_s2 + $0x78] sm:$0xff] }
 0x50e   :  { %v9186_v5 = vadd.f32 %v2454_v9, %v2453_v46  ;;  %11778 = vst [vmem:[#allocation157_spill] sm:$0xff] %v9221_v37  ;;  %v9227_v46 = vld [vmem:[%s10498_s2 + $0xd8] sm:$0xff]  ;;  %v2446_v9 = vsel %vm2445_vm4, %v9077_v16, %v2442_v21  ;;  %v9246_v16 = vld [vmem:[%s10498_s2 + $0x88] sm:$0xff] }
 0x50f   :  { %2708 = vmatpush.msrb.mxu1 %v9191_v24  ;;  %2748 = vmatpush.msrb.mxu3 %v9197_v7  ;;  %11779 = vst [vmem:[#allocation158_spill] sm:$0xff] %v9227_v46  ;;  %v9252_v21 = vld [vmem:[%s10498_s2 + $0x98] sm:$0xff] }
 0x510   :  { %3700 = vtanh.f32 %v9186_v5 }
 0x511   :  { %2709 = vmatpush.msrb.mxu1 %v9207_v57  ;;  %2749 = vmatpush.msrb.mxu3 %v9213_v12  ;;  %v2450_v12 = vor.u32 1.1754944e-38, %v2449_v54 }
 0x513   :  { %2710 = vmatpush.msrb.mxu1 %v9221_v37  ;;  %2750 = vmatpush.msrb.mxu3 %v9227_v46  ;;  %v9240_v37 = vld [vmem:[%s10498_s2 + $0xb8] sm:$0xff]  ;;  %v2451_v46 = vsel %vm2448_vm5, %v2450_v12, %v2446_v9  ;;  %v9260_v12 = vld [vmem:[%s10498_s2 + $0x68] sm:$0xff] }
 0x514   :  { %v9516_v9 = vld [vmem:[%s10499_s4 + $0x268] sm:$0xff] }
 0x515   :  { %2711 = vmatpush.msrb.mxu1 %v9234_v58  ;;  %2751 = vmatpush.msrb.mxu3 %v9240_v37  ;;  %11802 = vst [vmem:[#allocation52_spill] sm:$0xff] %v9516_v9 }
 0x516   :  { %v3701_v57 = vpop.eup %3700 }
 0x517   :  { %2712 = vmatpush.msrb.mxu1 %v9246_v16  ;;  %2752 = vmatpush.msrb.mxu3 %v9252_v21  ;;  %v9255_v54 = vmul.f32 %v3701_v57, %v2451_v46  ;;  %v9276_v57 = vld [vmem:[%s10498_s2 + $0x48] sm:$0xff]  ;;  %v9282_v46 = vld [vmem:[%s10498_s2 + $0x58] sm:$0xff] }
 0x519   :  { %2713 = vmatpush.msrb.mxu1 %v9260_v12  ;;  %2753 = vmatpush.msrb.mxu3 %v9266_v53 }
 0x51a   :  { %2474 = vmatmul.f32.vlgmr.msrb.gmra.mxu0 %v9255_v54  ;;  %2514 = vmatmul.f32.vlgmr.msrb.gmra.mxu2 %v9255_v54 }
 0x51b   :  { %2681 = vmatpush.msrb.mxu0 %v8710_v29  ;;  %2721 = vmatpush.msrb.mxu2 %v8716_v23  ;;  %v9290_v29 = vld [vmem:[%s10498_s2 + $0x28] sm:$0xff]  ;;  %v9296_v23 = vld [vmem:[%s10498_s2 + $0x38] sm:$0xff] }
 0x51c   :  { %2714 = vmatpush.msrb.mxu1 %v9276_v57  ;;  %2754 = vmatpush.msrb.mxu3 %v9282_v46 }
 0x51d   :  { %2682 = vmatpush.msrb.mxu0 %v8724_v52  ;;  %2722 = vmatpush.msrb.mxu2 %v8730_v63  ;;  %v9304_v52 = vld [vmem:[%s10498_s2 + $0x8] sm:$0xff]  ;;  %v9310_v63 = vld [vmem:[%s10498_s2 + $0x18] sm:$0xff] }
 0x51e   :  { %2715 = vmatpush.msrb.mxu1 %v9290_v29  ;;  %2755 = vmatpush.msrb.mxu3 %v9296_v23 }
 0x51f   :  { %2683 = vmatpush.msrb.mxu0 %v8738_v4  ;;  %2723 = vmatpush.msrb.mxu2 %v8744_v51  ;;  %v9325_v4 = vld [vmem:[%s10499_s4 + $0x3e0] sm:$0xff]  ;;  %v9332_v51 = vld [vmem:[%s10499_s4 + $0x3e8] sm:$0xff] }
 0x520   :  { %2716 = vmatpush.msrb.mxu1 %v9304_v52  ;;  %2756 = vmatpush.msrb.mxu3 %v9310_v63 }
 0x521   :  { %2684 = vmatpush.msrb.mxu0 %v8752_v1  ;;  %2724 = vmatpush.msrb.mxu2 %v8758_v32  ;;  %v9339_v1 = vld [vmem:[%s10499_s4 + $0x3c0] sm:$0xff]  ;;  %v9346_v32 = vld [vmem:[%s10499_s4 + $0x3c8] sm:$0xff] }
 0x522   :  { %2554 = vmatmul.f32.vlgmr.msra.gmra.mxu0 %v9255_v54  ;;  %2594 = vmatmul.f32.vlgmr.msra.gmra.mxu2 %v9255_v54 }
 0x523   :  { %2685 = vmatpush.msrb.mxu0 %v8768_v60  ;;  %2717 = vmatmul.f32.vlgmr.msrb.gmra.mxu1 %v9255_v54  ;;  %v9353_v60 = vld [vmem:[%s10499_s4 + $0x3a0] sm:$0xff] }
 0x524   :  { %2725 = vmatpush.msrb.mxu2 %v8775_v55  ;;  %2757 = vmatmul.f32.vlgmr.msrb.gmra.mxu3 %v9255_v54  ;;  %v9360_v55 = vld [vmem:[%s10499_s4 + $0x3a8] sm:$0xff] }
 0x525   :  { %2686 = vmatpush.msrb.mxu0 %v8782_v62  ;;  %2848 = vmatpush.msra.mxu1 %v9325_v4  ;;  %v9367_v62 = vld [vmem:[%s10499_s4 + $0x380] sm:$0xff] }
 0x526   :  { %2726 = vmatpush.msrb.mxu2 %v8789_v59  ;;  %2888 = vmatpush.msra.mxu3 %v9332_v51  ;;  %11780 = vst [vmem:[#allocation45_spill] sm:$0xff] %v9367_v62  ;;  %v9374_v59 = vld [vmem:[%s10499_s4 + $0x388] sm:$0xff] }
 0x527   :  { %2687 = vmatpush.msrb.mxu0 %v8796_v33  ;;  %2849 = vmatpush.msra.mxu1 %v9339_v1  ;;  %11781 = vst [vmem:[#allocation62_spill] sm:$0xff] %v9374_v59  ;;  %v9381_v33 = vld [vmem:[%s10499_s4 + $0x360] sm:$0xff] }
 0x528   :  { %2727 = vmatpush.msrb.mxu2 %v8803_v35  ;;  %2889 = vmatpush.msra.mxu3 %v9346_v32  ;;  %11782 = vst [vmem:[#allocation44_spill] sm:$0xff] %v9381_v33  ;;  %v9388_v35 = vld [vmem:[%s10499_s4 + $0x368] sm:$0xff] }
 0x529   :  { %2688 = vmatpush.msrb.mxu0 %v8810_v42  ;;  %2850 = vmatpush.msra.mxu1 %v9353_v60  ;;  %11783 = vst [vmem:[#allocation61_spill] sm:$0xff] %v9388_v35  ;;  %v9395_v42 = vld [vmem:[%s10499_s4 + $0x340] sm:$0xff] }
 0x52a   :  { %2728 = vmatpush.msrb.mxu2 %v8817_v61  ;;  %2890 = vmatpush.msra.mxu3 %v9360_v55  ;;  %11784 = vst [vmem:[#allocation65_spill] sm:$0xff] %v9395_v42  ;;  %v9402_v61 = vld [vmem:[%s10499_s4 + $0x348] sm:$0xff] }
 0x52b   :  { %2689 = vmatpush.msrb.mxu0 %v8824_v19  ;;  %2851 = vmatpush.msra.mxu1 %v9367_v62  ;;  %11785 = vst [vmem:[#allocation78_spill] sm:$0xff] %v9402_v61  ;;  %v9409_v19 = vld [vmem:[%s10499_s4 + $0x320] sm:$0xff] }
 0x52c   :  { %2729 = vmatpush.msrb.mxu2 %v8831_v3  ;;  %2891 = vmatpush.msra.mxu3 %v9374_v59  ;;  %11786 = vst [vmem:[#allocation64_spill] sm:$0xff] %v9409_v19  ;;  %v9416_v3 = vld [vmem:[%s10499_s4 + $0x328] sm:$0xff] }
 0x52d   :  { %2690 = vmatpush.msrb.mxu0 %v8838_v38  ;;  %2852 = vmatpush.msra.mxu1 %v9381_v33  ;;  %11787 = vst [vmem:[#allocation85_spill] sm:$0xff] %v9416_v3  ;;  %v9423_v38 = vld [vmem:[%s10499_s4 + $0x300] sm:$0xff] }
 0x52e   :  { %2730 = vmatpush.msrb.mxu2 %v8845_v28  ;;  %2892 = vmatpush.msra.mxu3 %v9388_v35  ;;  %11788 = vst [vmem:[#allocation25_spill] sm:$0xff] %v9423_v38  ;;  %v9430_v28 = vld [vmem:[%s10499_s4 + $0x308] sm:$0xff] }
 0x52f   :  { %2691 = vmatpush.msrb.mxu0 %v8852_v56  ;;  %2853 = vmatpush.msra.mxu1 %v9395_v42  ;;  %11789 = vst [vmem:[#allocation42_spill] sm:$0xff] %v9430_v28  ;;  %v9437_v56 = vld [vmem:[%s10499_s4 + $0x2e0] sm:$0xff] }
 0x530   :  { %2731 = vmatpush.msrb.mxu2 %v8859_v44  ;;  %2893 = vmatpush.msra.mxu3 %v9402_v61  ;;  %11790 = vst [vmem:[#allocation24_spill] sm:$0xff] %v9437_v56  ;;  %v9444_v44 = vld [vmem:[%s10499_s4 + $0x2e8] sm:$0xff] }
 0x531   :  { %2692 = vmatpush.msrb.mxu0 %v8866_v30  ;;  %2854 = vmatpush.msra.mxu1 %v9409_v19  ;;  %11791 = vst [vmem:[#allocation41_spill] sm:$0xff] %v9444_v44  ;;  %v9451_v30 = vld [vmem:[%s10499_s4 + $0x2c0] sm:$0xff] }
 0x532   :  { %2732 = vmatpush.msrb.mxu2 %v8873_v11  ;;  %2894 = vmatpush.msra.mxu3 %v9416_v3  ;;  %11792 = vst [vmem:[#allocation28_spill] sm:$0xff] %v9451_v30  ;;  %v9458_v11 = vld [vmem:[%s10499_s4 + $0x2c8] sm:$0xff] }
 0x533   :  { %2693 = vmatpush.msrb.mxu0 %v8880_v40  ;;  %2855 = vmatpush.msra.mxu1 %v9423_v38  ;;  %11793 = vst [vmem:[#allocation29_spill] sm:$0xff] %v9458_v11  ;;  %v9465_v40 = vld [vmem:[%s10499_s4 + $0x2a0] sm:$0xff] }
 0x534   :  { %2733 = vmatpush.msrb.mxu2 %v8887_v48  ;;  %2895 = vmatpush.msra.mxu3 %v9430_v28  ;;  %11794 = vst [vmem:[#allocation32_spill] sm:$0xff] %v9465_v40  ;;  %v9474_v48 = vld [vmem:[%s10499_s4 + $0x2a8] sm:$0xff] }
 0x535   :  { %2694 = vmatpush.msrb.mxu0 %v8894_v34  ;;  %2856 = vmatpush.msra.mxu1 %v9437_v56  ;;  %11795 = vst [vmem:[#allocation33_spill] sm:$0xff] %v9474_v48  ;;  %v9480_v34 = vld [vmem:[%s10499_s4 + $0x280] sm:$0xff] }
 0x536   :  { %2734 = vmatpush.msrb.mxu2 %v8901_v15  ;;  %2896 = vmatpush.msra.mxu3 %v9444_v44  ;;  %11796 = vst [vmem:[#allocation36_spill] sm:$0xff] %v9480_v34  ;;  %v9486_v15 = vld [vmem:[%s10499_s4 + $0x1e0] sm:$0xff] }
 0x537   :  { %2695 = vmatpush.msrb.mxu0 %v8908_v41  ;;  %2857 = vmatpush.msra.mxu1 %v9451_v30  ;;  %11797 = vst [vmem:[#allocation37_spill] sm:$0xff] %v9486_v15  ;;  %v9492_v41 = vld [vmem:[%s10499_s4 + $0x288] sm:$0xff] }
 0x538   :  { %2735 = vmatpush.msrb.mxu2 %v8915_v49  ;;  %2897 = vmatpush.msra.mxu3 %v9458_v11  ;;  %11798 = vst [vmem:[#allocation40_spill] sm:$0xff] %v9492_v41  ;;  %v9498_v49 = vld [vmem:[%s10499_s4 + $0x1e8] sm:$0xff] }
 0x539   :  { %2696 = vmatpush.msrb.mxu0 %v8922_v8  ;;  %2858 = vmatpush.msra.mxu1 %v9465_v40  ;;  %11799 = vst [vmem:[#allocation43_spill] sm:$0xff] %v9498_v49  ;;  %v9504_v8 = vld [vmem:[%s10499_s4 + $0x260] sm:$0xff] }
 0x53a   :  { %2736 = vmatpush.msrb.mxu2 %v8929_v17  ;;  %2697 = vmatmul.f32.vlgmr.msrb.gmra.mxu0 %v9255_v54  ;;  %11800 = vst [vmem:[#allocation48_spill] sm:$0xff] %v9504_v8  ;;  %v9510_v17 = vld [vmem:[%s10499_s4 + $0x1c0] sm:$0xff] }
 0x53b   :  { %2737 = vmatmul.f32.vlgmr.msrb.gmra.mxu2 %v9255_v54  ;;  %2898 = vmatpush.msra.mxu3 %v9474_v48  ;;  %11801 = vst [vmem:[#allocation49_spill] sm:$0xff] %v9510_v17  ;;  %v9522_v54 = vld [vmem:[%s10499_s4 + $0x1c8] sm:$0xff] }
 0x53c   :  { %2859 = vmatpush.msra.mxu1 %v9480_v34  ;;  %2828 = vmatpush.msra.mxu0 %v9486_v15  ;;  %11803 = vst [vmem:[#allocation53_spill] sm:$0xff] %v9522_v54  ;;  %v11902_v44 = vld [vmem:[#allocation99_spill] sm:$0xff] }
 0x53d   :  { %2899 = vmatpush.msra.mxu3 %v9492_v41  ;;  %2868 = vmatpush.msra.mxu2 %v9498_v49  ;;  %v172_v56 = vadd.f32 %v11902_v44, %v11763_v25 }
 0x53e   :  { %2860 = vmatpush.msra.mxu1 %v9504_v8  ;;  %2829 = vmatpush.msra.mxu0 %v9510_v17  ;;  %v9528_v8 = vld [vmem:[%s10499_s4 + $0x240] sm:$0xff] }
 0x53f   :  { %2900 = vmatpush.msra.mxu3 %v9516_v9  ;;  %2869 = vmatpush.msra.mxu2 %v9522_v54  ;;  %11804 = vst [vmem:[#allocation56_spill] sm:$0xff] %v9528_v8  ;;  %v9534_v17 = vld [vmem:[%s10499_s4 + $0x1a0] sm:$0xff]  ;;  %v9540_v9 = vld [vmem:[%s10499_s4 + $0x248] sm:$0xff] }
 0x540   :  { %2861 = vmatpush.msra.mxu1 %v9528_v8  ;;  %11805 = vst [vmem:[#allocation57_spill] sm:$0xff] %v9534_v17  ;;  %2830 = vmatpush.msra.mxu0 %v9534_v17  ;;  %v9546_v54 = vld [vmem:[%s10499_s4 + $0x1a8] sm:$0xff]  ;;  %v9552_v8 = vld [vmem:[%s10499_s4 + $0x220] sm:$0xff] }
 0x541   :  { %11806 = vst [vmem:[#allocation60_spill] sm:$0xff] %v9540_v9  ;;  %2901 = vmatpush.msra.mxu3 %v9540_v9  ;;  %2870 = vmatpush.msra.mxu2 %v9546_v54  ;;  %v9558_v17 = vld [vmem:[%s10499_s4 + $0x180] sm:$0xff]  ;;  %v9564_v9 = vld [vmem:[%s10499_s4 + $0x228] sm:$0xff] }
 0x542   :  { %11807 = vst [vmem:[#allocation63_spill] sm:$0xff] %v9546_v54  ;;  %2862 = vmatpush.msra.mxu1 %v9552_v8  ;;  %2831 = vmatpush.msra.mxu0 %v9558_v17  ;;  %v9570_v54 = vld [vmem:[%s10499_s4 + $0x188] sm:$0xff] }
 0x543   :  { %11808 = vst [vmem:[#allocation68_spill] sm:$0xff] %v9552_v8  ;;  %2902 = vmatpush.msra.mxu3 %v9564_v9  ;;  %2871 = vmatpush.msra.mxu2 %v9570_v54  ;;  %v9576_v8 = vld [vmem:[%s10499_s4 + $0x200] sm:$0xff] }
 0x544   :  { %11809 = vst [vmem:[#allocation69_spill] sm:$0xff] %v9558_v17  ;;  %2863 = vmatpush.msra.mxu1 %v9576_v8  ;;  %v9582_v17 = vld [vmem:[%s10499_s4 + $0x160] sm:$0xff] }
 0x545   :  { %11810 = vst [vmem:[#allocation72_spill] sm:$0xff] %v9564_v9  ;;  %2832 = vmatpush.msra.mxu0 %v9582_v17  ;;  %v9588_v9 = vld [vmem:[%s10499_s4 + $0x208] sm:$0xff] }
 0x546   :  { %11811 = vst [vmem:[#allocation73_spill] sm:$0xff] %v9570_v54  ;;  %2903 = vmatpush.msra.mxu3 %v9588_v9  ;;  %v9594_v54 = vld [vmem:[%s10499_s4 + $0x168] sm:$0xff] }
 0x547   :  { %11812 = vst [vmem:[#allocation76_spill] sm:$0xff] %v9576_v8  ;;  %2872 = vmatpush.msra.mxu2 %v9594_v54  ;;  %v9600_v8 = vld [vmem:[%s10499_s4 + $0x3f0] sm:$0xff] }
 0x548   :  { %11813 = vst [vmem:[#allocation18_spill] sm:$0xff] %v9582_v17  ;;  %2928 = vmatpush.msrb.mxu1 %v9600_v8  ;;  %v9606_v17 = vld [vmem:[%s10499_s4 + $0x3f8] sm:$0xff] }
 0x549   :  { %11814 = vst [vmem:[#allocation19_spill] sm:$0xff] %v9588_v9  ;;  %2968 = vmatpush.msrb.mxu3 %v9606_v17  ;;  %v9612_v9 = vld [vmem:[%s10499_s4 + $0x140] sm:$0xff] }
 0x54a   :  { %11815 = vst [vmem:[#allocation77_spill] sm:$0xff] %v9594_v54  ;;  %2833 = vmatpush.msra.mxu0 %v9612_v9  ;;  %v9618_v54 = vld [vmem:[%s10499_s4 + $0x148] sm:$0xff] }
 0x54b   :  { %11816 = vst [vmem:[#allocation26_spill] sm:$0xff] %v9600_v8  ;;  %2873 = vmatpush.msra.mxu2 %v9618_v54  ;;  %v9624_v8 = vld [vmem:[%s10499_s4 + $0x3d0] sm:$0xff] }
 0x54c   :  { %11817 = vst [vmem:[#allocation81_spill] sm:$0xff] %v9606_v17  ;;  %2929 = vmatpush.msrb.mxu1 %v9624_v8  ;;  %v9630_v17 = vld [vmem:[%s10499_s4 + $0x3d8] sm:$0xff] }
 0x54d   :  { %11818 = vst [vmem:[#allocation27_spill] sm:$0xff] %v9612_v9  ;;  %2969 = vmatpush.msrb.mxu3 %v9630_v17  ;;  %v9636_v9 = vld [vmem:[%s10499_s4 + $0x120] sm:$0xff] }
 0x54e   :  { %11819 = vst [vmem:[#allocation84_spill] sm:$0xff] %v9618_v54  ;;  %2834 = vmatpush.msra.mxu0 %v9636_v9  ;;  %v9642_v54 = vld [vmem:[%s10499_s4 + $0x128] sm:$0xff] }
 0x54f   :  { %11820 = vst [vmem:[#allocation30_spill] sm:$0xff] %v9624_v8  ;;  %2874 = vmatpush.msra.mxu2 %v9642_v54  ;;  %v9648_v8 = vld [vmem:[%s10499_s4 + $0x3b0] sm:$0xff] }
 0x550   :  { %11821 = vst [vmem:[#allocation88_spill] sm:$0xff] %v9630_v17  ;;  %2930 = vmatpush.msrb.mxu1 %v9648_v8  ;;  %v9654_v17 = vld [vmem:[%s10499_s4 + $0x3b8] sm:$0xff] }
 0x551   :  { %11822 = vst [vmem:[#allocation31_spill] sm:$0xff] %v9636_v9  ;;  %2970 = vmatpush.msrb.mxu3 %v9654_v17  ;;  %v9660_v9 = vld [vmem:[%s10499_s4 + $0x100] sm:$0xff] }
 0x552   :  { %11823 = vst [vmem:[#allocation89_spill] sm:$0xff] %v9642_v54  ;;  %2835 = vmatpush.msra.mxu0 %v9660_v9  ;;  %v9666_v54 = vld [vmem:[%s10499_s4 + $0x108] sm:$0xff] }
 0x553   :  { %11824 = vst [vmem:[#allocation34_spill] sm:$0xff] %v9648_v8  ;;  %2875 = vmatpush.msra.mxu2 %v9666_v54  ;;  %v9672_v8 = vld [vmem:[%s10499_s4 + $0x390] sm:$0xff] }
 0x554   :  { %11825 = vst [vmem:[#allocation92_spill] sm:$0xff] %v9654_v17  ;;  %2931 = vmatpush.msrb.mxu1 %v9672_v8  ;;  %v9678_v17 = vld [vmem:[%s10499_s4 + $0x398] sm:$0xff] }
 0x555   :  { %11826 = vst [vmem:[#allocation35_spill] sm:$0xff] %v9660_v9  ;;  %2971 = vmatpush.msrb.mxu3 %v9678_v17  ;;  %v9684_v9 = vld [vmem:[%s10499_s4 + $0xe0] sm:$0xff] }
 0x556   :  { %11827 = vst [vmem:[#allocation93_spill] sm:$0xff] %v9666_v54  ;;  %2836 = vmatpush.msra.mxu0 %v9684_v9  ;;  %v9690_v54 = vld [vmem:[%s10499_s4 + $0xe8] sm:$0xff] }
 0x557   :  { %11828 = vst [vmem:[#allocation38_spill] sm:$0xff] %v9672_v8  ;;  %2876 = vmatpush.msra.mxu2 %v9690_v54  ;;  %v9696_v8 = vld [vmem:[%s10499_s4 + $0x370] sm:$0xff] }
 0x558   :  { %11829 = vst [vmem:[#allocation39_spill] sm:$0xff] %v9678_v17  ;;  %2932 = vmatpush.msrb.mxu1 %v9696_v8  ;;  %v9702_v17 = vld [vmem:[%s10499_s4 + $0x378] sm:$0xff] }
 0x559   :  { %11830 = vst [vmem:[#allocation46_spill] sm:$0xff] %v9684_v9  ;;  %2972 = vmatpush.msrb.mxu3 %v9702_v17  ;;  %v9708_v9 = vld [vmem:[%s10499_s4 + $0xc0] sm:$0xff] }
 0x55a   :  { %11831 = vst [vmem:[#allocation47_spill] sm:$0xff] %v9690_v54  ;;  %2837 = vmatpush.msra.mxu0 %v9708_v9  ;;  %v9714_v54 = vld [vmem:[%s10499_s4 + $0xc8] sm:$0xff] }
 0x55b   :  { %11832 = vst [vmem:[#allocation50_spill] sm:$0xff] %v9696_v8  ;;  %2877 = vmatpush.msra.mxu2 %v9714_v54  ;;  %v9720_v8 = vld [vmem:[%s10499_s4 + $0x350] sm:$0xff] }
 0x55c   :  { %11833 = vst [vmem:[#allocation51_spill] sm:$0xff] %v9702_v17  ;;  %2933 = vmatpush.msrb.mxu1 %v9720_v8  ;;  %v9726_v17 = vld [vmem:[%s10499_s4 + $0x358] sm:$0xff] }
 0x55d   :  { %11834 = vst [vmem:[#allocation54_spill] sm:$0xff] %v9708_v9  ;;  %2973 = vmatpush.msrb.mxu3 %v9726_v17  ;;  %v9732_v9 = vld [vmem:[%s10499_s4 + $0xa0] sm:$0xff] }
 0x55e   :  { %11835 = vst [vmem:[#allocation55_spill] sm:$0xff] %v9714_v54  ;;  %2838 = vmatpush.msra.mxu0 %v9732_v9  ;;  %v9738_v54 = vld [vmem:[%s10499_s4 + $0xa8] sm:$0xff] }
 0x55f   :  { %11836 = vst [vmem:[#allocation58_spill] sm:$0xff] %v9720_v8  ;;  %2878 = vmatpush.msra.mxu2 %v9738_v54  ;;  %v9744_v8 = vld [vmem:[%s10499_s4 + $0x330] sm:$0xff] }
 0x560   :  { %11837 = vst [vmem:[#allocation59_spill] sm:$0xff] %v9726_v17  ;;  %2934 = vmatpush.msrb.mxu1 %v9744_v8  ;;  %v9750_v17 = vld [vmem:[%s10499_s4 + $0x338] sm:$0xff] }
 0x561   :  { %11838 = vst [vmem:[#allocation66_spill] sm:$0xff] %v9732_v9  ;;  %2974 = vmatpush.msrb.mxu3 %v9750_v17  ;;  %v9756_v9 = vld [vmem:[%s10499_s4 + $0x80] sm:$0xff] }
 0x562   :  { %11839 = vst [vmem:[#allocation67_spill] sm:$0xff] %v9738_v54  ;;  %2839 = vmatpush.msra.mxu0 %v9756_v9  ;;  %v9762_v54 = vld [vmem:[%s10499_s4 + $0x88] sm:$0xff] }
 0x563   :  { %11840 = vst [vmem:[#allocation70_spill] sm:$0xff] %v9744_v8  ;;  %2879 = vmatpush.msra.mxu2 %v9762_v54  ;;  %v9768_v8 = vld [vmem:[%s10499_s4 + $0x310] sm:$0xff] }
 0x564   :  { %11841 = vst [vmem:[#allocation71_spill] sm:$0xff] %v9750_v17  ;;  %2935 = vmatpush.msrb.mxu1 %v9768_v8  ;;  %v9774_v17 = vld [vmem:[%s10499_s4 + $0x318] sm:$0xff] }
 0x565   :  { %11842 = vst [vmem:[#allocation74_spill] sm:$0xff] %v9756_v9  ;;  %2975 = vmatpush.msrb.mxu3 %v9774_v17  ;;  %v9780_v9 = vld [vmem:[%s10499_s4 + $0x60] sm:$0xff] }
 0x566   :  { %11843 = vst [vmem:[#allocation75_spill] sm:$0xff] %v9762_v54  ;;  %2840 = vmatpush.msra.mxu0 %v9780_v9  ;;  %v9786_v54 = vld [vmem:[%s10499_s4 + $0x68] sm:$0xff] }
 0x567   :  { %11844 = vst [vmem:[#allocation79_spill] sm:$0xff] %v9768_v8  ;;  %2880 = vmatpush.msra.mxu2 %v9786_v54  ;;  %v9792_v8 = vld [vmem:[%s10499_s4 + $0x2f0] sm:$0xff] }
 0x568   :  { %11845 = vst [vmem:[#allocation80_spill] sm:$0xff] %v9774_v17  ;;  %2936 = vmatpush.msrb.mxu1 %v9792_v8  ;;  %v9798_v17 = vld [vmem:[%s10499_s4 + $0x2f8] sm:$0xff] }
 0x569   :  { %11846 = vst [vmem:[#allocation86_spill] sm:$0xff] %v9780_v9  ;;  %2976 = vmatpush.msrb.mxu3 %v9798_v17  ;;  %v9804_v9 = vld [vmem:[%s10499_s4 + $0x40] sm:$0xff] }
 0x56a   :  { %11847 = vst [vmem:[#allocation87_spill] sm:$0xff] %v9786_v54  ;;  %2841 = vmatpush.msra.mxu0 %v9804_v9  ;;  %v9810_v54 = vld [vmem:[%s10499_s4 + $0x48] sm:$0xff] }
 0x56b   :  { %11848 = vst [vmem:[#allocation90_spill] sm:$0xff] %v9792_v8  ;;  %2881 = vmatpush.msra.mxu2 %v9810_v54  ;;  %v9816_v8 = vld [vmem:[%s10499_s4 + $0x2d0] sm:$0xff] }
 0x56c   :  { %11849 = vst [vmem:[#allocation91_spill] sm:$0xff] %v9798_v17  ;;  %2937 = vmatpush.msrb.mxu1 %v9816_v8  ;;  %v9822_v17 = vld [vmem:[%s10499_s4 + $0x2d8] sm:$0xff] }
 0x56d   :  { %11850 = vst [vmem:[#allocation94_spill] sm:$0xff] %v9804_v9  ;;  %2977 = vmatpush.msrb.mxu3 %v9822_v17  ;;  %v9828_v9 = vld [vmem:[%s10499_s4 + $0x20] sm:$0xff] }
 0x56e   :  { %11851 = vst [vmem:[#allocation95_spill] sm:$0xff] %v9810_v54  ;;  %2842 = vmatpush.msra.mxu0 %v9828_v9  ;;  %v9834_v54 = vld [vmem:[%s10499_s4 + $0x28] sm:$0xff] }
 0x56f   :  { %11852 = vst [vmem:[#allocation96_spill] sm:$0xff] %v9816_v8  ;;  %2882 = vmatpush.msra.mxu2 %v9834_v54  ;;  %v9840_v8 = vld [vmem:[%s10499_s4 + $0x2b0] sm:$0xff] }
 0x570   :  { %11853 = vst [vmem:[#allocation101_spill] sm:$0xff] %v9822_v17  ;;  %2938 = vmatpush.msrb.mxu1 %v9840_v8  ;;  %v9846_v17 = vld [vmem:[%s10499_s4 + $0x2b8] sm:$0xff] }
 0x571   :  { %11854 = vst [vmem:[#allocation105_spill] sm:$0xff] %v9828_v9  ;;  %2978 = vmatpush.msrb.mxu3 %v9846_v17  ;;  %v9852_v9 = vld [vmem:[%s10499_s4] sm:$0xff] }
 0x572   :  { %11855 = vst [vmem:[#allocation106_spill] sm:$0xff] %v9834_v54  ;;  %2843 = vmatpush.msra.mxu0 %v9852_v9  ;;  %v9858_v54 = vld [vmem:[%s10499_s4 + $0x8] sm:$0xff] }
 0x573   :  { %11856 = vst [vmem:[#allocation107_spill] sm:$0xff] %v9840_v8  ;;  %2883 = vmatpush.msra.mxu2 %v9858_v54  ;;  %v9864_v8 = vld [vmem:[%s10499_s4 + $0x290] sm:$0xff] }
 0x574   :  { %11857 = vst [vmem:[#allocation110_spill] sm:$0xff] %v9846_v17  ;;  %2939 = vmatpush.msrb.mxu1 %v9864_v8  ;;  %v9870_v17 = vld [vmem:[%s10499_s4 + $0x298] sm:$0xff] }
 0x575   :  { %11858 = vst [vmem:[#allocation111_spill] sm:$0xff] %v9852_v9  ;;  %2979 = vmatpush.msrb.mxu3 %v9870_v17  ;;  %v9876_v9 = vld [vmem:[%s10499_s4 + $0x1f0] sm:$0xff] }
 0x576   :  { %11859 = vst [vmem:[#allocation11_spill] sm:$0xff] %v9858_v54  ;;  %2908 = vmatpush.msrb.mxu0 %v9876_v9  ;;  %v9882_v54 = vld [vmem:[%s10499_s4 + $0x1f8] sm:$0xff] }
 0x577   :  { %11860 = vst [vmem:[#allocation22_spill] sm:$0xff] %v9864_v8  ;;  %2948 = vmatpush.msrb.mxu2 %v9882_v54  ;;  %v9888_v8 = vld [vmem:[%s10499_s4 + $0x270] sm:$0xff] }
 0x578   :  { %11861 = vst [vmem:[#allocation10_spill] sm:$0xff] %v9870_v17  ;;  %2940 = vmatpush.msrb.mxu1 %v9888_v8  ;;  %v9894_v17 = vld [vmem:[%s10499_s4 + $0x278] sm:$0xff] }
 0x579   :  { %11862 = vst [vmem:[#allocation21_spill] sm:$0xff] %v9876_v9  ;;  %2980 = vmatpush.msrb.mxu3 %v9894_v17  ;;  %v9900_v9 = vld [vmem:[%s10499_s4 + $0x1d0] sm:$0xff] }
 0x57a   :  { %11863 = vst [vmem:[#allocation3_spill] sm:$0xff] %v9882_v54  ;;  %2909 = vmatpush.msrb.mxu0 %v9900_v9  ;;  %v9906_v54 = vld [vmem:[%s10499_s4 + $0x1d8] sm:$0xff] }
 0x57b   :  { %11864 = vst [vmem:[#allocation4_spill] sm:$0xff] %v9888_v8  ;;  %2949 = vmatpush.msrb.mxu2 %v9906_v54  ;;  %v9912_v8 = vld [vmem:[%s10499_s4 + $0x250] sm:$0xff] }
 0x57c   :  { %11865 = vst [vmem:[#allocation5_spill] sm:$0xff] %v9894_v17  ;;  %2941 = vmatpush.msrb.mxu1 %v9912_v8  ;;  %v9918_v17 = vld [vmem:[%s10499_s4 + $0x258] sm:$0xff] }
 0x57d   :  { %11866 = vst [vmem:[#allocation6_spill] sm:$0xff] %v9900_v9  ;;  %2981 = vmatpush.msrb.mxu3 %v9918_v17  ;;  %v9924_v9 = vld [vmem:[%s10499_s4 + $0x1b0] sm:$0xff] }
 0x57e   :  { %11867 = vst [vmem:[#allocation7_spill] sm:$0xff] %v9906_v54  ;;  %2910 = vmatpush.msrb.mxu0 %v9924_v9  ;;  %v9930_v54 = vld [vmem:[%s10499_s4 + $0x1b8] sm:$0xff] }
 0x57f   :  { %11868 = vst [vmem:[#allocation8_spill] sm:$0xff] %v9912_v8  ;;  %2950 = vmatpush.msrb.mxu2 %v9930_v54  ;;  %v9936_v8 = vld [vmem:[%s10499_s4 + $0x230] sm:$0xff] }
 0x580   :  { %11869 = vst [vmem:[#allocation9_spill] sm:$0xff] %v9918_v17  ;;  %2942 = vmatpush.msrb.mxu1 %v9936_v8  ;;  %v9942_v17 = vld [vmem:[%s10499_s4 + $0x238] sm:$0xff] }
 0x581   :  { %11870 = vst [vmem:[#allocation12_spill] sm:$0xff] %v9924_v9  ;;  %2982 = vmatpush.msrb.mxu3 %v9942_v17  ;;  %v9948_v9 = vld [vmem:[%s10499_s4 + $0x190] sm:$0xff] }
 0x582   :  { %11871 = vst [vmem:[#allocation13_spill] sm:$0xff] %v9930_v54  ;;  %2911 = vmatpush.msrb.mxu0 %v9948_v9  ;;  %v9954_v54 = vld [vmem:[%s10499_s4 + $0x198] sm:$0xff] }
 0x583   :  { %11872 = vst [vmem:[#allocation14_spill] sm:$0xff] %v9936_v8  ;;  %2951 = vmatpush.msrb.mxu2 %v9954_v54  ;;  %v9960_v8 = vld [vmem:[%s10499_s4 + $0x210] sm:$0xff] }
 0x584   :  { %11873 = vst [vmem:[#allocation15_spill] sm:$0xff] %v9942_v17  ;;  %2943 = vmatpush.msrb.mxu1 %v9960_v8  ;;  %v9966_v17 = vld [vmem:[%s10499_s4 + $0x218] sm:$0xff] }
 0x585   :  { %11874 = vst [vmem:[#allocation116_spill] sm:$0xff] %v9948_v9  ;;  %2983 = vmatpush.msrb.mxu3 %v9966_v17  ;;  %v9972_v9 = vld [vmem:[%s10499_s4 + $0x170] sm:$0xff] }
 0x586   :  { %11875 = vst [vmem:[#allocation117_spill] sm:$0xff] %v9954_v54  ;;  %2912 = vmatpush.msrb.mxu0 %v9972_v9  ;;  %v9978_v54 = vld [vmem:[%s10499_s4 + $0x178] sm:$0xff] }
 0x587   :  { %11876 = vst [vmem:[#allocation118_spill] sm:$0xff] %v9960_v8  ;;  %2952 = vmatpush.msrb.mxu2 %v9978_v54  ;;  %v9984_v8 = vld [vmem:[%s10499_s4 + $0x150] sm:$0xff] }
 0x588   :  { %11877 = vst [vmem:[#allocation119_spill] sm:$0xff] %v9966_v17  ;;  %2913 = vmatpush.msrb.mxu0 %v9984_v8  ;;  %v9990_v17 = vld [vmem:[%s10499_s4 + $0x158] sm:$0xff] }
 0x589   :  { %11878 = vst [vmem:[#allocation120_spill] sm:$0xff] %v9972_v9  ;;  %2953 = vmatpush.msrb.mxu2 %v9990_v17  ;;  %v9996_v9 = vld [vmem:[%s10499_s4 + $0x130] sm:$0xff] }
 0x58a   :  { %11879 = vst [vmem:[#allocation121_spill] sm:$0xff] %v9978_v54  ;;  %2914 = vmatpush.msrb.mxu0 %v9996_v9  ;;  %v10002_v54 = vld [vmem:[%s10499_s4 + $0x138] sm:$0xff] }
 0x58b   :  { %11880 = vst [vmem:[#allocation122_spill] sm:$0xff] %v9984_v8  ;;  %2954 = vmatpush.msrb.mxu2 %v10002_v54  ;;  %v10008_v8 = vld [vmem:[%s10499_s4 + $0x110] sm:$0xff] }
 0x58c   :  { %11881 = vst [vmem:[#allocation123_spill] sm:$0xff] %v9990_v17  ;;  %2915 = vmatpush.msrb.mxu0 %v10008_v8  ;;  %v10014_v17 = vld [vmem:[%s10499_s4 + $0x118] sm:$0xff] }
 0x58d   :  { %11882 = vst [vmem:[#allocation124_spill] sm:$0xff] %v9996_v9  ;;  %2955 = vmatpush.msrb.mxu2 %v10014_v17  ;;  %v10020_v9 = vld [vmem:[%s10499_s4 + $0xf0] sm:$0xff] }
 0x58e   :  { %11883 = vst [vmem:[#allocation125_spill] sm:$0xff] %v10002_v54  ;;  %2916 = vmatpush.msrb.mxu0 %v10020_v9  ;;  %v10026_v54 = vld [vmem:[%s10499_s4 + $0xf8] sm:$0xff] }
 0x58f   :  { %11884 = vst [vmem:[#allocation126_spill] sm:$0xff] %v10008_v8  ;;  %2956 = vmatpush.msrb.mxu2 %v10026_v54  ;;  %v10032_v8 = vld [vmem:[%s10499_s4 + $0xd0] sm:$0xff] }
 0x590   :  { %11885 = vst [vmem:[#allocation127_spill] sm:$0xff] %v10014_v17  ;;  %2917 = vmatpush.msrb.mxu0 %v10032_v8  ;;  %v10038_v17 = vld [vmem:[%s10499_s4 + $0xd8] sm:$0xff] }
 0x591   :  { %11886 = vst [vmem:[#allocation128_spill] sm:$0xff] %v10020_v9  ;;  %2957 = vmatpush.msrb.mxu2 %v10038_v17  ;;  %v10044_v9 = vld [vmem:[%s10499_s4 + $0xb0] sm:$0xff] }
 0x592   :  { %11887 = vst [vmem:[#allocation129_spill] sm:$0xff] %v10026_v54  ;;  %2918 = vmatpush.msrb.mxu0 %v10044_v9  ;;  %v10050_v54 = vld [vmem:[%s10499_s4 + $0xb8] sm:$0xff] }
 0x593   :  { %11888 = vst [vmem:[#allocation130_spill] sm:$0xff] %v10032_v8  ;;  %2958 = vmatpush.msrb.mxu2 %v10050_v54  ;;  %v10056_v8 = vld [vmem:[%s10499_s4 + $0x90] sm:$0xff] }
 0x594   :  { %11889 = vst [vmem:[#allocation131_spill] sm:$0xff] %v10038_v17  ;;  %2919 = vmatpush.msrb.mxu0 %v10056_v8  ;;  %v10062_v17 = vld [vmem:[%s10499_s4 + $0x98] sm:$0xff] }
 0x595   :  { %11890 = vst [vmem:[#allocation132_spill] sm:$0xff] %v10044_v9  ;;  %2959 = vmatpush.msrb.mxu2 %v10062_v17  ;;  %v10068_v9 = vld [vmem:[%s10499_s4 + $0x70] sm:$0xff] }
 0x596   :  { %11891 = vst [vmem:[#allocation133_spill] sm:$0xff] %v10050_v54  ;;  %2920 = vmatpush.msrb.mxu0 %v10068_v9  ;;  %v10074_v54 = vld [vmem:[%s10499_s4 + $0x78] sm:$0xff] }
 0x597   :  { %11892 = vst [vmem:[#allocation134_spill] sm:$0xff] %v10056_v8  ;;  %2960 = vmatpush.msrb.mxu2 %v10074_v54  ;;  %v10080_v8 = vld [vmem:[%s10499_s4 + $0x50] sm:$0xff]  ;;  %v2475_v49 = vpop.f32.mrf.mxu0 }
 0x598   :  { %11893 = vst [vmem:[#allocation135_spill] sm:$0xff] %v10062_v17  ;;  %2921 = vmatpush.msrb.mxu0 %v10080_v8  ;;  %v10086_v17 = vld [vmem:[%s10499_s4 + $0x58] sm:$0xff]  ;;  %v2476_v15 = vadd.f32 %v2475_v49, %v11761_v13  ;;  %v11903_v49 = vld [vmem:[#allocation20_spill] sm:$0xff] }
 0x599   :  { %11894 = vst [vmem:[#allocation136_spill] sm:$0xff] %v10068_v9  ;;  %2961 = vmatpush.msrb.mxu2 %v10086_v17  ;;  %v10092_v9 = vld [vmem:[%s10499_s4 + $0x30] sm:$0xff] }
 0x59a   :  { %11895 = vst [vmem:[#allocation137_spill] sm:$0xff] %v10074_v54  ;;  %2922 = vmatpush.msrb.mxu0 %v10092_v9  ;;  %v10098_v54 = vld [vmem:[%s10499_s4 + $0x38] sm:$0xff] }
 0x59b   :  { %11896 = vst [vmem:[#allocation138_spill] sm:$0xff] %v10080_v8  ;;  %2962 = vmatpush.msrb.mxu2 %v10098_v54  ;;  %v10104_v8 = vld [vmem:[%s10499_s4 + $0x10] sm:$0xff] }
 0x59c   :  { %11897 = vst [vmem:[#allocation139_spill] sm:$0xff] %v10086_v17  ;;  %2923 = vmatpush.msrb.mxu0 %v10104_v8  ;;  %v10110_v17 = vld [vmem:[%s10499_s4 + $0x18] sm:$0xff] }
 0x59d   :  { %11898 = vst [vmem:[#allocation140_spill] sm:$0xff] %v10092_v9  ;;  %2963 = vmatpush.msrb.mxu2 %v10110_v17  ;;  %v2495_v9 = vpop.f32.mrf.mxu1  ;;  %v2515_v40 = vpop.f32.mrf.mxu2 }
 0x59e   :  { %11899 = vst [vmem:[#allocation141_spill] sm:$0xff] %v10098_v54  ;;  %v2535_v54 = vpop.f32.mrf.mxu3  ;;  %v2496_v34 = vadd.f32 %v2495_v9, %v2476_v15  ;;  %v2516_v11 = vadd.f32 %v2515_v40, %v11762_v22 }
 0x59f   :  { %11900 = vst [vmem:[#allocation142_spill] sm:$0xff] %v10104_v8 }
 0x5a0   :  { %11901 = vst [vmem:[#allocation143_spill] sm:$0xff] %v10110_v17  ;;  %v3508_v48 = vmul.f32 -1.442695, %v2496_v34  ;;  %v2536_v8 = vadd.f32 %v2535_v54, %v2516_v11  ;;  %v2555_v11 = vpop.f32.mrf.mxu0 }
 0x5a2   :  { %3702 = vpow2.f32 %v3508_v48  ;;  %v3509_v28 = vmul.f32 -1.442695, %v2536_v8  ;;  %v11904_v8 = vld [vmem:[#allocation114_spill] sm:$0xff] }
 0x5a4   :  { %3704 = vpow2.f32 %v3509_v28 }
 0x5a5   :  { %v2575_v41 = vpop.f32.mrf.mxu1  ;;  %v2595_v61 = vpop.f32.mrf.mxu2 }
 0x5a6   :  { %v2615_v3 = vpop.f32.mrf.mxu3  ;;  %v2596_v13 = vadd.f32 %v2595_v61, %v11903_v49 }
 0x5a8   :  { %v3703_v17 = vpop.eup %3702  ;;  %v2616_v15 = vadd.f32 %v2615_v3, %v2596_v13 }
 0x5a9   :  { %v2621_v19 = vadd.f32 1.0, %v3703_v17  ;;  %v11906_v17 = vld [vmem:[#allocation23_spill] sm:$0xff] }
 0x5aa   :  { %v3705_v48 = vpop.eup %3704  ;;  %v3510_v9 = vmul.f32 -1.442695, %v2616_v15  ;;  %v2556_v25 = vadd.f32 %v2555_v11, %v11906_v17  ;;  %v11907_v11 = vld [vmem:[#allocation108_spill] sm:$0xff] }
 0x5ab   :  { %3706 = vrcp.f32 %v2621_v19  ;;  %v2640_v40 = vadd.f32 1.0, %v3705_v48  ;;  %v2633_v33 = vand.u32 2147483648, %v2621_v19  ;;  %vm2627_vm7 = vweird.f32 %v2621_v19 }
 0x5ac   :  { %v2576_v13 = vadd.f32 %v2575_v41, %v2556_v25 }
 0x5ad   :  { %v2718_v30 = vpop.f32.mrf.mxu1  ;;  %vm2646_vm10 = vweird.f32 %v2640_v40 }
 0x5ae   :  { %v2762_v38 = vadd.f32 %v2718_v30, %v172_v56  ;;  %v2758_v54 = vpop.f32.mrf.mxu3  ;;  %v11905_v56 = vld [vmem:[#allocation102_spill] sm:$0xff] }
 0x5af   :  { %v254_v30 = vadd.f32 %v11905_v56, %v11904_v8  ;;  %v2631_v8 = vand.u32 2147483647, %v2621_v19 }
 0x5b0   :  { %v3512_v34 = vmul.f32 -1.442695, %v2762_v38 }
 0x5b1   :  { %v3707_v44 = vpop.eup %3706  ;;  %v2764_v22 = vadd.f32 %v2758_v54, %v254_v30  ;;  %v11908_v54 = vld [vmem:[#allocation98_spill] sm:$0xff]  ;;  %vm2632_vm11 = vcmp.eq.f32.partialorder %v2631_v8, 8.507059e+37 }
 0x5b2   :  { %3708 = vpow2.f32 %v3512_v34  ;;  %v2623_v28 = vmul.f32 %v3707_v44, %v2621_v19  ;;  %vm2628_vm6 = vweird.f32 %v3707_v44  ;;  %v131_v30 = vadd.f32 %v11908_v54, %v11907_v11 }
 0x5b3   :  { %3710 = vpow2.f32 %v3510_v9  ;;  %v3513_v42 = vmul.f32 -1.442695, %v2764_v22  ;;  %vm10125_vm8 = vmor %vm2627_vm7, %vm2628_vm6  ;;  %v2650_v22 = vand.u32 2147483647, %v2640_v40  ;;  %v2634_v19 = vor.u32 1.1754944e-38, %v2633_v33 }
 0x5b4   :  { %3712 = vrcp.f32 %v2640_v40  ;;  %v2624_v61 = vsub.f32 1.0, %v2623_v28  ;;  %v2652_v28 = vand.u32 2147483648, %v2640_v40 }
 0x5b5   :  { %vm2651_vm13 = vcmp.eq.f32.partialorder %v2650_v22, 8.507059e+37 }
 0x5b6   :  { %v2625_v3 = vmul.f32 %v3707_v44, %v2624_v61 }
 0x5b7   :  { %v2698_v41 = vpop.f32.mrf.mxu0 }
 0x5b8   :  { %v3709_v49 = vpop.eup %3708  ;;  %v2626_v9 = vadd.f32 %v3707_v44, %v2625_v3 }
 0x5b9   :  { %v3711_v38 = vpop.eup %3710  ;;  %v10121_v35 = vadd.f32 1.0, %v3709_v49 }
 0x5ba   :  { %v3713_v15 = vpop.eup %3712  ;;  %v2660_v48 = vadd.f32 1.0, %v3711_v38  ;;  %v2630_v49 = vsel %vm10125_vm8, %v3707_v44, %v2626_v9  ;;  %v2761_v38 = vadd.f32 %v2698_v41, %v131_v30 }
 0x5bb   :  { %v2642_v34 = vmul.f32 %v3713_v15, %v2640_v40  ;;  %vm2647_vm9 = vweird.f32 %v3713_v15  ;;  %v2635_v54 = vsel %vm2632_vm11, %v2634_v19, %v2630_v49  ;;  %vm2793_vm3 = vweird.f32 %v10121_v35 }
 0x5bc   :  { %3714 = vrcp.f32 %v2660_v48  ;;  %vm2648_vm12 = vmor %vm2646_vm10, %vm2647_vm9  ;;  %v3511_v11 = vmul.f32 -1.442695, %v2761_v38  ;;  %vm2666_vm15 = vweird.f32 %v2660_v48  ;;  %v2670_v41 = vand.u32 2147483647, %v2660_v48 }
 0x5bd   :  { %v2643_v56 = vsub.f32 1.0, %v2642_v34  ;;  %3716 = vtanh.f32 %v2576_v13  ;;  %v2653_v34 = vor.u32 1.1754944e-38, %v2652_v28 }
 0x5be   :  { %3718 = vpow2.f32 %v3513_v42  ;;  %vm2671_vm1 = vcmp.eq.f32.partialorder %v2670_v41, 8.507059e+37  ;;  %v2738_v38 = vpop.f32.mrf.mxu2 }
 0x5bf   :  { %v2644_v61 = vmul.f32 %v3713_v15, %v2643_v56  ;;  %3720 = vrcp.f32 %v10121_v35 }
 0x5c0   :  { %3722 = vpow2.f32 %v3511_v11 }
 0x5c1   :  { %v2645_v13 = vadd.f32 %v3713_v15, %v2644_v61 }
 0x5c2   :  { %v3715_v3 = vpop.eup %3714 }
 0x5c3   :  { %v3717_v17 = vpop.eup %3716  ;;  %v2649_v42 = vsel %vm2648_vm12, %v3713_v15, %v2645_v13  ;;  %v2662_v56 = vmul.f32 %v3715_v3, %v2660_v48  ;;  %vm2667_vm14 = vweird.f32 %v3715_v3  ;;  %v2672_v15 = vand.u32 2147483648, %v2660_v48 }
 0x5c4   :  { %v3719_v59 = vpop.eup %3718  ;;  %v2654_v62 = vsel %vm2651_vm13, %v2653_v34, %v2649_v42  ;;  %v2677_v9 = vmul.f32 %v3717_v17, %v2635_v54  ;;  %vm2668_vm0 = vmor %vm2666_vm15, %vm2667_vm14  ;;  %v11911_v34 = vld [vmem:[#allocation112_spill] sm:$0xff] }
 0x5c5   :  { %v10132_v44 = vpop.eup %3720  ;;  %v2676_v33 = vmul.f32 %v2654_v62, %v9063_v45  ;;  %v2663_v40 = vsub.f32 1.0, %v2662_v56  ;;  %v10139_v25 = vadd.f32 1.0, %v3719_v59  ;;  %v2673_v17 = vor.u32 1.1754944e-38, %v2672_v15 }
 0x5c6   :  { %v2789_v28 = vmul.f32 %v10132_v44, %v10121_v35  ;;  %v3723_v11 = vpop.eup %3722  ;;  %v213_v54 = vadd.f32 %v11911_v34, %v5693_v2  ;;  %vm2794_vm2 = vweird.f32 %v10132_v44  ;;  %v4377_v34 = vld [vmem:[%s10498_s2 + $0xd0] sm:$0xff] }
 0x5c7   :  { %v10135_v8 = vadd.f32 %v2677_v9, %v2676_v33  ;;  %v2664_v30 = vmul.f32 %v3715_v3, %v2663_v40  ;;  %v2768_v61 = vadd.f32 1.0, %v3723_v11  ;;  %v2799_v9 = vand.u32 2147483648, %v10121_v35  ;;  %vm10159_vm4 = vmor %vm2793_vm3, %vm2794_vm2 }
 0x5c8   :  { %v2790_v45 = vsub.f32 1.0, %v2789_v28  ;;  %v2763_v56 = vadd.f32 %v2738_v38, %v213_v54  ;;  %vm2813_vm11 = vweird.f32 %v10139_v25  ;;  %v4375_v38 = vld [vmem:[%s10498_s2 + $0xf0] sm:$0xff] }
 0x5c9   :  { %3724 = vtanh.f32 %v10135_v8  ;;  %v2665_v22 = vadd.f32 %v3715_v3, %v2664_v30  ;;  %v2780_v28 = vand.u32 2147483648, %v2768_v61  ;;  %vm2774_vm6 = vweird.f32 %v2768_v61  ;;  %v11921_v54 = vld [vmem:[#allocation61_spill] sm:$0xff] }
 0x5ca   :  { %3726 = vrcp.f32 %v10139_v25  ;;  %v2791_v19 = vmul.f32 %v10132_v44, %v2790_v45 }
 0x5cb   :  { %v2669_v62 = vsel %vm2668_vm0, %v3715_v3, %v2665_v22  ;;  %3728 = vrcp.f32 %v2768_v61  ;;  %v2800_v22 = vor.u32 1.1754944e-38, %v2799_v9  ;;  %v11924_v9 = vld [vmem:[#allocation64_spill] sm:$0xff] }
 0x5cc   :  { %v2674_v59 = vsel %vm2671_vm1, %v2673_v17, %v2669_v62  ;;  %v2792_v33 = vadd.f32 %v10132_v44, %v2791_v19  ;;  %3730 = vtanh.f32 %v2763_v56  ;;  %v11916_v62 = vld [vmem:[#allocation157_spill] sm:$0xff] }
 0x5cd   :  { %v4371_v19 = vld [vmem:[%s10498_s2 + $0x130] sm:$0xff] }
 0x5ce   :  { %v4379_v56 = vld [vmem:[%s10498_s2 + $0xb0] sm:$0xff] }
 0x5cf   :  { %v3725_v49 = vpop.eup %3724 }
 0x5d0   :  { %v2680_v13 = vmul.f32 %v3725_v49, %v2674_v59  ;;  %v10146_v42 = vpop.eup %3726  ;;  %v4358_v59 = vld [vmem:[%s10498_s2 + $0x1e0] sm:$0xff] }
 0x5d1   :  { %v3729_v48 = vpop.eup %3728  ;;  %v2809_v40 = vmul.f32 %v10146_v42, %v10139_v25  ;;  %vm2814_vm10 = vweird.f32 %v10146_v42 }
 0x5d2   :  { %2864 = vmatmul.f32.vlgmr.msra.gmra.mxu1 %v2680_v13  ;;  %2904 = vmatmul.f32.vlgmr.msra.gmra.mxu3 %v2680_v13  ;;  %v2770_v3 = vmul.f32 %v3729_v48, %v2768_v61  ;;  %vm2775_vm5 = vweird.f32 %v3729_v48  ;;  %vm2815_vm12 = vmor %vm2813_vm11, %vm2814_vm10 }
 0x5d3   :  { %3071 = vmatpush.msra.mxu1 %v9082_v26  ;;  %3111 = vmatpush.msra.mxu3 %v9088_v47  ;;  %v2797_v26 = vand.u32 2147483647, %v10121_v35  ;;  %v2810_v11 = vsub.f32 1.0, %v2809_v40  ;;  %vm2776_vm8 = vmor %vm2774_vm6, %vm2775_vm5  ;;  %v4381_v40 = vld [vmem:[%s10498_s2 + $0x90] sm:$0xff] }
 0x5d4   :  { %v2771_v30 = vsub.f32 1.0, %v2770_v3  ;;  %v11923_v3 = vld [vmem:[#allocation78_spill] sm:$0xff]  ;;  %v11926_v47 = vld [vmem:[#allocation25_spill] sm:$0xff] }
 0x5d5   :  { %3072 = vmatpush.msra.mxu1 %v9097_v10  ;;  %3112 = vmatpush.msra.mxu3 %v9103_v18  ;;  %v2778_v10 = vand.u32 2147483647, %v2768_v61  ;;  %v2796_v18 = vsel %vm10159_vm4, %v10132_v44, %v2792_v33  ;;  %vm2798_vm7 = vcmp.eq.f32.partialorder %v2797_v26, 8.507059e+37  ;;  %v3731_v44 = vpop.eup %3730  ;;  %v2811_v45 = vmul.f32 %v10146_v42, %v2810_v11  ;;  %v4380_v33 = vld [vmem:[%s10498_s2 + $0x80] sm:$0xff]  ;;  %v11929_v11 = vld [vmem:[#allocation41_spill] sm:$0xff] }
 0x5d6   :  { %v2772_v15 = vmul.f32 %v3729_v48, %v2771_v30  ;;  %v11925_v30 = vld [vmem:[#allocation85_spill] sm:$0xff]  ;;  %v4382_v26 = vld [vmem:[%s10498_s2 + $0x60] sm:$0xff] }
 0x5d7   :  { %3073 = vmatpush.msra.mxu1 %v9114_v50  ;;  %3113 = vmatpush.msra.mxu3 %v9120_v20  ;;  %v2781_v50 = vor.u32 1.1754944e-38, %v2780_v28  ;;  %v2801_v20 = vsel %vm2798_vm7, %v2800_v22, %v2796_v18  ;;  %vm2779_vm9 = vcmp.eq.f32.partialorder %v2778_v10, 8.507059e+37  ;;  %v4383_v28 = vld [vmem:[%s10498_s2 + $0x70] sm:$0xff]  ;;  %v4384_v10 = vld [vmem:[%s10498_s2 + $0x40] sm:$0xff] }
 0x5d8   :  { %v2773_v35 = vadd.f32 %v3729_v48, %v2772_v15  ;;  %v11927_v15 = vld [vmem:[#allocation42_spill] sm:$0xff]  ;;  %v11928_v18 = vld [vmem:[#allocation24_spill] sm:$0xff] }
 0x5d9   :  { %3074 = vmatpush.msra.mxu1 %v9137_v36  ;;  %3114 = vmatpush.msra.mxu3 %v9143_v27  ;;  %v2823_v27 = vmul.f32 %v2801_v20, %v9186_v5  ;;  %v4385_v22 = vld [vmem:[%s10498_s2 + $0x50] sm:$0xff] }
 0x5da   :  { %2944 = vmatmul.f32.vlgmr.msrb.gmra.mxu1 %v2680_v13  ;;  %2984 = vmatmul.f32.vlgmr.msrb.gmra.mxu3 %v2680_v13  ;;  %v2777_v41 = vsel %vm2776_vm8, %v3729_v48, %v2773_v35  ;;  %v4376_v13 = vld [vmem:[%s10498_s2 + $0xc0] sm:$0xff]  ;;  %v11922_v48 = vld [vmem:[#allocation65_spill] sm:$0xff] }
 0x5db   :  { %3075 = vmatpush.msra.mxu1 %v9150_v14  ;;  %3115 = vmatpush.msra.mxu3 %v9156_v6  ;;  %v2782_v36 = vsel %vm2779_vm9, %v2781_v50, %v2777_v41  ;;  %v2812_v6 = vadd.f32 %v10146_v42, %v2811_v45  ;;  %v4386_v35 = vld [vmem:[%s10498_s2 + $0x20] sm:$0xff]  ;;  %v11930_v50 = vld [vmem:[#allocation28_spill] sm:$0xff]  ;;  %v11931_v41 = vld [vmem:[#allocation29_spill] sm:$0xff] }
 0x5dc   :  { %v2824_v61 = vmul.f32 %v3731_v44, %v2782_v36  ;;  %v4387_v20 = vld [vmem:[%s10498_s2 + $0x30] sm:$0xff]  ;;  %v4388_v44 = vld [vmem:[%s10498_s2] sm:$0xff] }
 0x5dd   :  { %3076 = vmatpush.msra.mxu1 %v9163_v39  ;;  %3116 = vmatpush.msra.mxu3 %v9169_v0  ;;  %v2819_v39 = vand.u32 2147483648, %v10139_v25  ;;  %v2817_v0 = vand.u32 2147483647, %v10139_v25  ;;  %v2816_v5 = vsel %vm2815_vm12, %v10146_v42, %v2812_v6  ;;  %v4378_v42 = vld [vmem:[%s10498_s2 + $0xa0] sm:$0xff]  ;;  %v11932_v45 = vld [vmem:[#allocation32_spill] sm:$0xff]  ;;  %v11935_v6 = vld [vmem:[#allocation37_spill] sm:$0xff] }
 0x5de   :  { %v10178_v14 = vadd.f32 %v2824_v61, %v2823_v27  ;;  %v4389_v36 = vld [vmem:[%s10498_s2 + $0x10] sm:$0xff] }
 0x5df   :  { %3077 = vmatpush.msra.mxu1 %v9177_v43  ;;  %3117 = vmatpush.msra.mxu3 %v9183_v31  ;;  %v11914_v43 = vld [vmem:[#allocation155_spill] sm:$0xff]  ;;  %v11915_v31 = vld [vmem:[#allocation156_spill] sm:$0xff]  ;;  %vm2818_vm13 = vcmp.eq.f32.partialorder %v2817_v0, 8.507059e+37  ;;  %v11933_v27 = vld [vmem:[#allocation33_spill] sm:$0xff] }
 0x5e0   :  { %3732 = vtanh.f32 %v10178_v14  ;;  %v11934_v61 = vld [vmem:[#allocation36_spill] sm:$0xff]  ;;  %v11937_v0 = vld [vmem:[#allocation43_spill] sm:$0xff] }
 0x5e1   :  { %3078 = vmatpush.msra.mxu1 %v9191_v24  ;;  %3118 = vmatpush.msra.mxu3 %v9197_v7  ;;  %v11917_v24 = vld [vmem:[#allocation158_spill] sm:$0xff]  ;;  %v2820_v7 = vor.u32 1.1754944e-38, %v2819_v39  ;;  %v11936_v39 = vld [vmem:[#allocation40_spill] sm:$0xff] }
 0x5e3   :  { %3079 = vmatpush.msra.mxu1 %v11914_v43  ;;  %3119 = vmatpush.msra.mxu3 %v11915_v31  ;;  %v2821_v49 = vsel %vm2818_vm13, %v2820_v7, %v2816_v5  ;;  %v11938_v43 = vld [vmem:[#allocation48_spill] sm:$0xff]  ;;  %v11939_v31 = vld [vmem:[#allocation49_spill] sm:$0xff] }
 0x5e4   :  { %v11940_v5 = vld [vmem:[#allocation52_spill] sm:$0xff]  ;;  %v11943_v7 = vld [vmem:[#allocation57_spill] sm:$0xff] }
 0x5e5   :  { %3080 = vmatpush.msra.mxu1 %v11916_v62  ;;  %3120 = vmatpush.msra.mxu3 %v11917_v24  ;;  %v11941_v62 = vld [vmem:[#allocation53_spill] sm:$0xff]  ;;  %v11942_v24 = vld [vmem:[#allocation56_spill] sm:$0xff] }
 0x5e6   :  { %v3733_v17 = vpop.eup %3732 }
 0x5e7   :  { %3081 = vmatpush.msra.mxu1 %v9234_v58  ;;  %3121 = vmatpush.msra.mxu3 %v9240_v37  ;;  %v10195_v25 = vmul.f32 %v3733_v17, %v2821_v49  ;;  %v4359_v37 = vld [vmem:[%s10498_s2 + $0x1f0] sm:$0xff]  ;;  %v4360_v58 = vld [vmem:[%s10498_s2 + $0x1c0] sm:$0xff] }
 0x5e8   :  { %v11944_v17 = vld [vmem:[#allocation60_spill] sm:$0xff]  ;;  %v11945_v49 = vld [vmem:[#allocation63_spill] sm:$0xff] }
 0x5e9   :  { %3082 = vmatpush.msra.mxu1 %v9246_v16  ;;  %3122 = vmatpush.msra.mxu3 %v9252_v21  ;;  %v4361_v16 = vld [vmem:[%s10498_s2 + $0x1d0] sm:$0xff]  ;;  %v4362_v21 = vld [vmem:[%s10498_s2 + $0x1a0] sm:$0xff] }
 0x5ea   :  { %2844 = vmatmul.f32.vlgmr.msra.gmra.mxu0 %v10195_v25  ;;  %2884 = vmatmul.f32.vlgmr.msra.gmra.mxu2 %v10195_v25 }
 0x5eb   :  { %3051 = vmatpush.msra.mxu0 %v4358_v59  ;;  %3091 = vmatpush.msra.mxu2 %v4359_v37  ;;  %v11947_v59 = vld [vmem:[#allocation69_spill] sm:$0xff]  ;;  %v11948_v37 = vld [vmem:[#allocation72_spill] sm:$0xff] }
 0x5ec   :  { %3083 = vmatpush.msra.mxu1 %v9260_v12  ;;  %3123 = vmatpush.msra.mxu3 %v9266_v53  ;;  %v4363_v12 = vld [vmem:[%s10498_s2 + $0x1b0] sm:$0xff]  ;;  %v4364_v53 = vld [vmem:[%s10498_s2 + $0x180] sm:$0xff] }
 0x5ed   :  { %3052 = vmatpush.msra.mxu0 %v4360_v58  ;;  %3092 = vmatpush.msra.mxu2 %v4361_v16  ;;  %v11949_v58 = vld [vmem:[#allocation73_spill] sm:$0xff]  ;;  %v11950_v16 = vld [vmem:[#allocation76_spill] sm:$0xff] }
 0x5ee   :  { %3084 = vmatpush.msra.mxu1 %v9276_v57  ;;  %3124 = vmatpush.msra.mxu3 %v9282_v46  ;;  %v4365_v57 = vld [vmem:[%s10498_s2 + $0x190] sm:$0xff]  ;;  %v4366_v46 = vld [vmem:[%s10498_s2 + $0x160] sm:$0xff] }
 0x5ef   :  { %3053 = vmatpush.msra.mxu0 %v4362_v21  ;;  %3093 = vmatpush.msra.mxu2 %v4363_v12  ;;  %v11951_v21 = vld [vmem:[#allocation18_spill] sm:$0xff]  ;;  %v11952_v12 = vld [vmem:[#allocation19_spill] sm:$0xff] }
 0x5f0   :  { %3085 = vmatpush.msra.mxu1 %v9290_v29  ;;  %3125 = vmatpush.msra.mxu3 %v9296_v23  ;;  %v4367_v29 = vld [vmem:[%s10498_s2 + $0x170] sm:$0xff]  ;;  %v4368_v23 = vld [vmem:[%s10498_s2 + $0x140] sm:$0xff] }
 0x5f1   :  { %3054 = vmatpush.msra.mxu0 %v4364_v53  ;;  %3094 = vmatpush.msra.mxu2 %v4365_v57  ;;  %v11953_v53 = vld [vmem:[#allocation77_spill] sm:$0xff]  ;;  %v11954_v57 = vld [vmem:[#allocation26_spill] sm:$0xff] }
 0x5f2   :  { %3086 = vmatpush.msra.mxu1 %v9304_v52  ;;  %3126 = vmatpush.msra.mxu3 %v9310_v63  ;;  %v4369_v52 = vld [vmem:[%s10498_s2 + $0x150] sm:$0xff]  ;;  %v4370_v63 = vld [vmem:[%s10498_s2 + $0x120] sm:$0xff] }
 0x5f3   :  { %2924 = vmatmul.f32.vlgmr.msrb.gmra.mxu0 %v10195_v25  ;;  %2964 = vmatmul.f32.vlgmr.msrb.gmra.mxu2 %v10195_v25 }
 0x5f4   :  { %3055 = vmatpush.msra.mxu0 %v4366_v46  ;;  %3087 = vmatmul.f32.vlgmr.msra.gmra.mxu1 %v10195_v25  ;;  %v11955_v46 = vld [vmem:[#allocation81_spill] sm:$0xff] }
 0x5f5   :  { %3095 = vmatpush.msra.mxu2 %v4367_v29  ;;  %3127 = vmatmul.f32.vlgmr.msra.gmra.mxu3 %v10195_v25  ;;  %v11956_v29 = vld [vmem:[#allocation27_spill] sm:$0xff] }
 0x5f6   :  { %3056 = vmatpush.msra.mxu0 %v4368_v23  ;;  %3218 = vmatpush.msrb.mxu1 %v9325_v4  ;;  %v4372_v4 = vld [vmem:[%s10498_s2 + $0x100] sm:$0xff]  ;;  %v11957_v23 = vld [vmem:[#allocation84_spill] sm:$0xff] }
 0x5f7   :  { %3096 = vmatpush.msra.mxu2 %v4369_v52  ;;  %3258 = vmatpush.msrb.mxu3 %v9332_v51  ;;  %v4373_v51 = vld [vmem:[%s10498_s2 + $0x110] sm:$0xff]  ;;  %v11958_v52 = vld [vmem:[#allocation30_spill] sm:$0xff] }
 0x5f8   :  { %3057 = vmatpush.msra.mxu0 %v4370_v63  ;;  %3219 = vmatpush.msrb.mxu1 %v9339_v1  ;;  %v4374_v1 = vld [vmem:[%s10498_s2 + $0xe0] sm:$0xff]  ;;  %v11959_v63 = vld [vmem:[#allocation88_spill] sm:$0xff] }
 0x5f9   :  { %3097 = vmatpush.msra.mxu2 %v4371_v19  ;;  %3259 = vmatpush.msrb.mxu3 %v9346_v32  ;;  %v11918_v32 = vld [vmem:[#allocation45_spill] sm:$0xff]  ;;  %v11960_v19 = vld [vmem:[#allocation31_spill] sm:$0xff] }
 0x5fa   :  { %3058 = vmatpush.msra.mxu0 %v4372_v4  ;;  %3220 = vmatpush.msrb.mxu1 %v9353_v60  ;;  %v11919_v60 = vld [vmem:[#allocation62_spill] sm:$0xff]  ;;  %v11961_v4 = vld [vmem:[#allocation89_spill] sm:$0xff] }
 0x5fb   :  { %3098 = vmatpush.msra.mxu2 %v4373_v51  ;;  %3260 = vmatpush.msrb.mxu3 %v9360_v55  ;;  %v11920_v55 = vld [vmem:[#allocation44_spill] sm:$0xff]  ;;  %v11962_v51 = vld [vmem:[#allocation34_spill] sm:$0xff] }
 0x5fc   :  { %3059 = vmatpush.msra.mxu0 %v4374_v1  ;;  %3221 = vmatpush.msrb.mxu1 %v11918_v32  ;;  %v11963_v1 = vld [vmem:[#allocation92_spill] sm:$0xff]  ;;  %v11964_v32 = vld [vmem:[#allocation35_spill] sm:$0xff] }
 0x5fd   :  { %3099 = vmatpush.msra.mxu2 %v4375_v38  ;;  %3261 = vmatpush.msrb.mxu3 %v11919_v60  ;;  %v11965_v38 = vld [vmem:[#allocation93_spill] sm:$0xff]  ;;  %v11966_v60 = vld [vmem:[#allocation38_spill] sm:$0xff] }
 0x5fe   :  { %3060 = vmatpush.msra.mxu0 %v4376_v13  ;;  %3222 = vmatpush.msrb.mxu1 %v11920_v55  ;;  %v11967_v13 = vld [vmem:[#allocation39_spill] sm:$0xff]  ;;  %v11968_v55 = vld [vmem:[#allocation46_spill] sm:$0xff] }
 0x5ff   :  { %3100 = vmatpush.msra.mxu2 %v4377_v34  ;;  %3262 = vmatpush.msrb.mxu3 %v11921_v54  ;;  %v11969_v34 = vld [vmem:[#allocation47_spill] sm:$0xff]  ;;  %v11970_v54 = vld [vmem:[#allocation50_spill] sm:$0xff] }
 0x600   :  { %3061 = vmatpush.msra.mxu0 %v4378_v42  ;;  %3223 = vmatpush.msrb.mxu1 %v11922_v48  ;;  %v11971_v42 = vld [vmem:[#allocation51_spill] sm:$0xff]  ;;  %v11972_v48 = vld [vmem:[#allocation54_spill] sm:$0xff] }
 0x601   :  { %3101 = vmatpush.msra.mxu2 %v4379_v56  ;;  %3263 = vmatpush.msrb.mxu3 %v11923_v3  ;;  %v11973_v56 = vld [vmem:[#allocation55_spill] sm:$0xff]  ;;  %v11974_v3 = vld [vmem:[#allocation58_spill] sm:$0xff] }
 0x602   :  { %3062 = vmatpush.msra.mxu0 %v4380_v33  ;;  %3224 = vmatpush.msrb.mxu1 %v11924_v9  ;;  %v11975_v33 = vld [vmem:[#allocation59_spill] sm:$0xff]  ;;  %v11976_v9 = vld [vmem:[#allocation66_spill] sm:$0xff] }
 0x603   :  { %3102 = vmatpush.msra.mxu2 %v4381_v40  ;;  %3264 = vmatpush.msrb.mxu3 %v11925_v30  ;;  %v11977_v40 = vld [vmem:[#allocation67_spill] sm:$0xff]  ;;  %v11978_v30 = vld [vmem:[#allocation70_spill] sm:$0xff] }
 0x604   :  { %3063 = vmatpush.msra.mxu0 %v4382_v26  ;;  %3225 = vmatpush.msrb.mxu1 %v11926_v47  ;;  %v11979_v26 = vld [vmem:[#allocation71_spill] sm:$0xff]  ;;  %v11980_v47 = vld [vmem:[#allocation74_spill] sm:$0xff] }
 0x605   :  { %3103 = vmatpush.msra.mxu2 %v4383_v28  ;;  %3265 = vmatpush.msrb.mxu3 %v11927_v15  ;;  %v11981_v28 = vld [vmem:[#allocation75_spill] sm:$0xff] }
 0x606   :  { %3064 = vmatpush.msra.mxu0 %v4384_v10  ;;  %3226 = vmatpush.msrb.mxu1 %v11928_v18  ;;  %v11982_v15 = vld [vmem:[#allocation79_spill] sm:$0xff]  ;;  %v11983_v10 = vld [vmem:[#allocation80_spill] sm:$0xff]  ;;  %v11984_v18 = vld [vmem:[#allocation86_spill] sm:$0xff] }
 0x607   :  { %3104 = vmatpush.msra.mxu2 %v4385_v22  ;;  %3266 = vmatpush.msrb.mxu3 %v11929_v11  ;;  %v11985_v22 = vld [vmem:[#allocation87_spill] sm:$0xff]  ;;  %v11986_v11 = vld [vmem:[#allocation90_spill] sm:$0xff] }
 0x608   :  { %3065 = vmatpush.msra.mxu0 %v4386_v35  ;;  %3227 = vmatpush.msrb.mxu1 %v11930_v50  ;;  %v11987_v35 = vld [vmem:[#allocation91_spill] sm:$0xff]  ;;  %v11988_v50 = vld [vmem:[#allocation94_spill] sm:$0xff] }
 0x609   :  { %3105 = vmatpush.msra.mxu2 %v4387_v20  ;;  %3267 = vmatpush.msrb.mxu3 %v11931_v41  ;;  %v11989_v20 = vld [vmem:[#allocation95_spill] sm:$0xff]  ;;  %v11990_v41 = vld [vmem:[#allocation96_spill] sm:$0xff] }
 0x60a   :  { %3066 = vmatpush.msra.mxu0 %v4388_v44  ;;  %3228 = vmatpush.msrb.mxu1 %v11932_v45  ;;  %v11991_v44 = vld [vmem:[#allocation101_spill] sm:$0xff] }
 0x60b   :  { %3106 = vmatpush.msra.mxu2 %v4389_v36  ;;  %3067 = vmatmul.f32.vlgmr.msra.gmra.mxu0 %v10195_v25  ;;  %v11992_v45 = vld [vmem:[#allocation105_spill] sm:$0xff]  ;;  %v11993_v36 = vld [vmem:[#allocation106_spill] sm:$0xff] }
 0x60c   :  { %3107 = vmatmul.f32.vlgmr.msra.gmra.mxu2 %v10195_v25  ;;  %3268 = vmatpush.msrb.mxu3 %v11933_v27  ;;  %v11946_v25 = vld [vmem:[#allocation68_spill] sm:$0xff]  ;;  %v11994_v27 = vld [vmem:[#allocation107_spill] sm:$0xff] }
 0x60d   :  { %3229 = vmatpush.msrb.mxu1 %v11934_v61  ;;  %3198 = vmatpush.msrb.mxu0 %v11935_v6  ;;  %v11995_v61 = vld [vmem:[#allocation110_spill] sm:$0xff]  ;;  %v11996_v6 = vld [vmem:[#allocation111_spill] sm:$0xff] }
 0x60e   :  { %3269 = vmatpush.msrb.mxu3 %v11936_v39  ;;  %3238 = vmatpush.msrb.mxu2 %v11937_v0  ;;  %v11997_v39 = vld [vmem:[#allocation11_spill] sm:$0xff]  ;;  %v11998_v0 = vld [vmem:[#allocation22_spill] sm:$0xff] }
 0x60f   :  { %3230 = vmatpush.msrb.mxu1 %v11938_v43  ;;  %3199 = vmatpush.msrb.mxu0 %v11939_v31  ;;  %v11999_v43 = vld [vmem:[#allocation10_spill] sm:$0xff]  ;;  %v12000_v31 = vld [vmem:[#allocation21_spill] sm:$0xff] }
 0x610   :  { %3270 = vmatpush.msrb.mxu3 %v11940_v5  ;;  %3239 = vmatpush.msrb.mxu2 %v11941_v62  ;;  %v12001_v5 = vld [vmem:[#allocation3_spill] sm:$0xff]  ;;  %v12002_v62 = vld [vmem:[#allocation4_spill] sm:$0xff] }
 0x611   :  { %3231 = vmatpush.msrb.mxu1 %v11942_v24  ;;  %3200 = vmatpush.msrb.mxu0 %v11943_v7  ;;  %v12003_v24 = vld [vmem:[#allocation5_spill] sm:$0xff]  ;;  %v12004_v7 = vld [vmem:[#allocation6_spill] sm:$0xff] }
 0x612   :  { %3271 = vmatpush.msrb.mxu3 %v11944_v17  ;;  %3240 = vmatpush.msrb.mxu2 %v11945_v49  ;;  %v12005_v17 = vld [vmem:[#allocation7_spill] sm:$0xff]  ;;  %v12006_v49 = vld [vmem:[#allocation8_spill] sm:$0xff] }
 0x613   :  { %3232 = vmatpush.msrb.mxu1 %v11946_v25  ;;  %3201 = vmatpush.msrb.mxu0 %v11947_v59  ;;  %v12007_v25 = vld [vmem:[#allocation9_spill] sm:$0xff]  ;;  %v12008_v59 = vld [vmem:[#allocation12_spill] sm:$0xff] }
 0x614   :  { %3272 = vmatpush.msrb.mxu3 %v11948_v37  ;;  %3241 = vmatpush.msrb.mxu2 %v11949_v58  ;;  %v12009_v37 = vld [vmem:[#allocation13_spill] sm:$0xff]  ;;  %v12010_v58 = vld [vmem:[#allocation14_spill] sm:$0xff] }
 0x615   :  { %3233 = vmatpush.msrb.mxu1 %v11950_v16  ;;  %3202 = vmatpush.msrb.mxu0 %v11951_v21  ;;  %v12011_v16 = vld [vmem:[#allocation15_spill] sm:$0xff]  ;;  %v12012_v21 = vld [vmem:[#allocation116_spill] sm:$0xff] }
 0x616   :  { %3273 = vmatpush.msrb.mxu3 %v11952_v12  ;;  %3242 = vmatpush.msrb.mxu2 %v11953_v53  ;;  %v12013_v12 = vld [vmem:[#allocation117_spill] sm:$0xff]  ;;  %v12014_v53 = vld [vmem:[#allocation118_spill] sm:$0xff] }
 0x617   :  { %3298 = vmatpush.msra.mxu1 %v11954_v57  ;;  %3203 = vmatpush.msrb.mxu0 %v11956_v29  ;;  %v12015_v57 = vld [vmem:[#allocation119_spill] sm:$0xff]  ;;  %v12017_v29 = vld [vmem:[#allocation121_spill] sm:$0xff] }
 0x618   :  { %3338 = vmatpush.msra.mxu3 %v11955_v46  ;;  %3243 = vmatpush.msrb.mxu2 %v11957_v23  ;;  %v12016_v46 = vld [vmem:[#allocation120_spill] sm:$0xff]  ;;  %v12018_v23 = vld [vmem:[#allocation122_spill] sm:$0xff] }
 0x619   :  { %3299 = vmatpush.msra.mxu1 %v11958_v52  ;;  %3204 = vmatpush.msrb.mxu0 %v11960_v19  ;;  %v12019_v52 = vld [vmem:[#allocation123_spill] sm:$0xff]  ;;  %v12021_v19 = vld [vmem:[#allocation125_spill] sm:$0xff] }
 0x61a   :  { %3339 = vmatpush.msra.mxu3 %v11959_v63  ;;  %3244 = vmatpush.msrb.mxu2 %v11961_v4  ;;  %v12020_v63 = vld [vmem:[#allocation124_spill] sm:$0xff]  ;;  %v12022_v4 = vld [vmem:[#allocation126_spill] sm:$0xff] }
 0x61b   :  { %3300 = vmatpush.msra.mxu1 %v11962_v51  ;;  %3205 = vmatpush.msrb.mxu0 %v11964_v32  ;;  %v12023_v51 = vld [vmem:[#allocation127_spill] sm:$0xff]  ;;  %v12025_v32 = vld [vmem:[#allocation129_spill] sm:$0xff] }
 0x61c   :  { %3340 = vmatpush.msra.mxu3 %v11963_v1  ;;  %3245 = vmatpush.msrb.mxu2 %v11965_v38  ;;  %v12024_v1 = vld [vmem:[#allocation128_spill] sm:$0xff]  ;;  %v12026_v38 = vld [vmem:[#allocation130_spill] sm:$0xff] }
 0x61d   :  { %3301 = vmatpush.msra.mxu1 %v11966_v60  ;;  %3206 = vmatpush.msrb.mxu0 %v11968_v55  ;;  %v12027_v60 = vld [vmem:[#allocation131_spill] sm:$0xff]  ;;  %v12029_v55 = vld [vmem:[#allocation133_spill] sm:$0xff] }
 0x61e   :  { %3341 = vmatpush.msra.mxu3 %v11967_v13  ;;  %3246 = vmatpush.msrb.mxu2 %v11969_v34  ;;  %v12028_v13 = vld [vmem:[#allocation132_spill] sm:$0xff]  ;;  %v12030_v34 = vld [vmem:[#allocation134_spill] sm:$0xff] }
 0x61f   :  { %3302 = vmatpush.msra.mxu1 %v11970_v54  ;;  %3207 = vmatpush.msrb.mxu0 %v11972_v48  ;;  %v12031_v54 = vld [vmem:[#allocation135_spill] sm:$0xff]  ;;  %v12033_v48 = vld [vmem:[#allocation137_spill] sm:$0xff] }
 0x620   :  { %3342 = vmatpush.msra.mxu3 %v11971_v42  ;;  %3247 = vmatpush.msrb.mxu2 %v11973_v56  ;;  %v12032_v42 = vld [vmem:[#allocation136_spill] sm:$0xff]  ;;  %v12034_v56 = vld [vmem:[#allocation138_spill] sm:$0xff] }
 0x621   :  { %3303 = vmatpush.msra.mxu1 %v11974_v3  ;;  %3208 = vmatpush.msrb.mxu0 %v11976_v9  ;;  %v12035_v3 = vld [vmem:[#allocation139_spill] sm:$0xff]  ;;  %v12037_v9 = vld [vmem:[#allocation141_spill] sm:$0xff] }
 0x622   :  { %3343 = vmatpush.msra.mxu3 %v11975_v33  ;;  %3248 = vmatpush.msrb.mxu2 %v11977_v40  ;;  %v12036_v33 = vld [vmem:[#allocation140_spill] sm:$0xff]  ;;  %v12038_v40 = vld [vmem:[#allocation142_spill] sm:$0xff] }
 0x623   :  { %3304 = vmatpush.msra.mxu1 %v11978_v30  ;;  %3209 = vmatpush.msrb.mxu0 %v11980_v47  ;;  %v12039_v30 = vld [vmem:[#allocation143_spill] sm:$0xff] }
 0x624   :  { %3344 = vmatpush.msra.mxu3 %v11979_v26  ;;  %3249 = vmatpush.msrb.mxu2 %v11981_v28  ;;  %v12040_v28 = vld [vmem:[#allocation16_spill] sm:$0xff] }
 0x625   :  { %3305 = vmatpush.msra.mxu1 %v11982_v15  ;;  %3210 = vmatpush.msrb.mxu0 %v11984_v18 }
 0x626   :  { %3345 = vmatpush.msra.mxu3 %v11983_v10  ;;  %3250 = vmatpush.msrb.mxu2 %v11985_v22 }
 0x627   :  { %3306 = vmatpush.msra.mxu1 %v11986_v11  ;;  %3211 = vmatpush.msrb.mxu0 %v11988_v50  ;;  %v12041_v50 = vld [vmem:[#allocation17_spill] sm:$0xff] }
 0x628   :  { %3346 = vmatpush.msra.mxu3 %v11987_v35  ;;  %3251 = vmatpush.msrb.mxu2 %v11989_v20 }
 0x629   :  { %3307 = vmatpush.msra.mxu1 %v11990_v41  ;;  %3212 = vmatpush.msrb.mxu0 %v11992_v45  ;;  %v12043_v45 = vld [vmem:[#allocation104_spill] sm:$0xff] }
 0x62a   :  { %3347 = vmatpush.msra.mxu3 %v11991_v44  ;;  %3252 = vmatpush.msrb.mxu2 %v11993_v36  ;;  %v12042_v44 = vld [vmem:[#allocation109_spill] sm:$0xff] }
 0x62b   :  { %3308 = vmatpush.msra.mxu1 %v11994_v27  ;;  %3213 = vmatpush.msrb.mxu0 %v11996_v6  ;;  %v175_v36 = vadd.f32 %v12043_v45, %v12042_v44 }
 0x62c   :  { %3348 = vmatpush.msra.mxu3 %v11995_v61  ;;  %3253 = vmatpush.msrb.mxu2 %v11997_v39 }
 0x62d   :  { %3309 = vmatpush.msra.mxu1 %v11998_v0  ;;  %3278 = vmatpush.msra.mxu0 %v12000_v31 }
 0x62e   :  { %3349 = vmatpush.msra.mxu3 %v11999_v43  ;;  %3318 = vmatpush.msra.mxu2 %v12001_v5 }
 0x62f   :  { %3310 = vmatpush.msra.mxu1 %v12002_v62  ;;  %3279 = vmatpush.msra.mxu0 %v12004_v7  ;;  %v12044_v62 = vld [vmem:[#allocation20_spill] sm:$0xff] }
 0x630   :  { %3350 = vmatpush.msra.mxu3 %v12003_v24  ;;  %3319 = vmatpush.msra.mxu2 %v12005_v17 }
 0x631   :  { %3311 = vmatpush.msra.mxu1 %v12006_v49  ;;  %3280 = vmatpush.msra.mxu0 %v12008_v59 }
 0x632   :  { %3351 = vmatpush.msra.mxu3 %v12007_v25  ;;  %3320 = vmatpush.msra.mxu2 %v12009_v37  ;;  %v12045_v37 = vld [vmem:[#allocation114_spill] sm:$0xff] }
 0x633   :  { %3312 = vmatpush.msra.mxu1 %v12010_v58  ;;  %3281 = vmatpush.msra.mxu0 %v12012_v21  ;;  %v12046_v58 = vld [vmem:[#allocation113_spill] sm:$0xff] }
 0x634   :  { %3352 = vmatpush.msra.mxu3 %v12011_v16  ;;  %3321 = vmatpush.msra.mxu2 %v12013_v12  ;;  %v257_v16 = vadd.f32 %v12046_v58, %v12045_v37 }
 0x635   :  { %3313 = vmatpush.msra.mxu1 %v12014_v53  ;;  %3282 = vmatpush.msra.mxu0 %v12016_v46  ;;  %v12047_v53 = vld [vmem:[#allocation23_spill] sm:$0xff] }
 0x636   :  { %3353 = vmatpush.msra.mxu3 %v12015_v57  ;;  %3322 = vmatpush.msra.mxu2 %v12017_v29 }
 0x637   :  { %3283 = vmatpush.msra.mxu0 %v12018_v23 }
 0x638   :  { %3323 = vmatpush.msra.mxu2 %v12019_v52 }
 0x639   :  { %3284 = vmatpush.msra.mxu0 %v12020_v63 }
 0x63a   :  { %3324 = vmatpush.msra.mxu2 %v12021_v19 }
 0x63b   :  { %3285 = vmatpush.msra.mxu0 %v12022_v4 }
 0x63c   :  { %3325 = vmatpush.msra.mxu2 %v12023_v51 }
 0x63d   :  { %3286 = vmatpush.msra.mxu0 %v12024_v1 }
 0x63e   :  { %3326 = vmatpush.msra.mxu2 %v12025_v32 }
 0x63f   :  { %3287 = vmatpush.msra.mxu0 %v12026_v38 }
 0x640   :  { %3327 = vmatpush.msra.mxu2 %v12027_v60 }
 0x641   :  { %3288 = vmatpush.msra.mxu0 %v12028_v13 }
 0x642   :  { %3328 = vmatpush.msra.mxu2 %v12029_v55 }
 0x643   :  { %3289 = vmatpush.msra.mxu0 %v12030_v34 }
 0x644   :  { %3329 = vmatpush.msra.mxu2 %v12031_v54 }
 0x645   :  { %3290 = vmatpush.msra.mxu0 %v12032_v42  ;;  %v12048_v42 = vld [vmem:[#allocation108_spill] sm:$0xff] }
 0x646   :  { %3330 = vmatpush.msra.mxu2 %v12033_v48  ;;  %v12049_v48 = vld [vmem:[#allocation103_spill] sm:$0xff] }
 0x647   :  { %3291 = vmatpush.msra.mxu0 %v12034_v56  ;;  %v134_v56 = vadd.f32 %v12049_v48, %v12048_v42 }
 0x648   :  { %3331 = vmatpush.msra.mxu2 %v12035_v3 }
 0x649   :  { %3292 = vmatpush.msra.mxu0 %v12036_v33 }
 0x64a   :  { %3332 = vmatpush.msra.mxu2 %v12037_v9 }
 0x64b   :  { %3293 = vmatpush.msra.mxu0 %v12038_v40 }
 0x64c   :  { %3333 = vmatpush.msra.mxu2 %v12039_v30 }
 0x64f   :  { %v2865_v26 = vpop.f32.mrf.mxu1 }
 0x655   :  { %v2905_v10 = vpop.f32.mrf.mxu3 }
 0x657   :  { %v2945_v18 = vpop.f32.mrf.mxu1 }
 0x65d   :  { %v2985_v6 = vpop.f32.mrf.mxu3 }
 0x667   :  { %v2845_v47 = vpop.f32.mrf.mxu0 }
 0x668   :  { %v2846_v15 = vadd.f32 %v2845_v47, %v12040_v28 }
 0x66a   :  { %v2866_v22 = vadd.f32 %v2865_v26, %v2846_v15 }
 0x66c   :  { %v3514_v11 = vmul.f32 -1.442695, %v2866_v22 }
 0x66d   :  { %v2885_v35 = vpop.f32.mrf.mxu2 }
 0x66e   :  { %3734 = vpow2.f32 %v3514_v11  ;;  %v2886_v20 = vadd.f32 %v2885_v35, %v12041_v50 }
 0x670   :  { %v2906_v41 = vadd.f32 %v2905_v10, %v2886_v20  ;;  %v2925_v17 = vpop.f32.mrf.mxu0 }
 0x671   :  { %v3088_v27 = vpop.f32.mrf.mxu1  ;;  %v2926_v57 = vadd.f32 %v2925_v17, %v12047_v53 }
 0x672   :  { %v3515_v61 = vmul.f32 -1.442695, %v2906_v41  ;;  %v3132_v39 = vadd.f32 %v3088_v27, %v175_v36 }
 0x673   :  { %v2946_v63 = vadd.f32 %v2945_v18, %v2926_v57 }
 0x674   :  { %v3735_v0 = vpop.eup %3734  ;;  %3736 = vpow2.f32 %v3515_v61  ;;  %v3518_v5 = vmul.f32 -1.442695, %v3132_v39 }
 0x675   :  { %v2991_v43 = vadd.f32 1.0, %v3735_v0 }
 0x676   :  { %v2965_v31 = vpop.f32.mrf.mxu2 }
 0x677   :  { %3738 = vrcp.f32 %v2991_v43  ;;  %v2966_v24 = vadd.f32 %v2965_v31, %v12044_v62  ;;  %v3003_v13 = vand.u32 2147483648, %v2991_v43  ;;  %vm2997_vm15 = vweird.f32 %v2991_v43 }
 0x678   :  { %3740 = vpow2.f32 %v3518_v5  ;;  %v3128_v59 = vpop.f32.mrf.mxu3  ;;  %v3001_v54 = vand.u32 2147483647, %v2991_v43 }
 0x679   :  { %v2986_v49 = vadd.f32 %v2985_v6, %v2966_v24  ;;  %v3134_v29 = vadd.f32 %v3128_v59, %v257_v16  ;;  %v3004_v47 = vor.u32 1.1754944e-38, %v3003_v13 }
 0x67a   :  { %v3737_v7 = vpop.eup %3736  ;;  %vm3002_vm3 = vcmp.eq.f32.partialorder %v3001_v54, 8.507059e+37 }
 0x67b   :  { %v3010_v25 = vadd.f32 1.0, %v3737_v7  ;;  %v3516_v21 = vmul.f32 -1.442695, %v2986_v49  ;;  %v3519_v4 = vmul.f32 -1.442695, %v3134_v29 }
 0x67d   :  { %v3739_v12 = vpop.eup %3738  ;;  %3742 = vrcp.f32 %v3010_v25  ;;  %v3022_v3 = vand.u32 2147483648, %v3010_v25  ;;  %v3020_v9 = vand.u32 2147483647, %v3010_v25  ;;  %vm3016_vm2 = vweird.f32 %v3010_v25 }
 0x67e   :  { %v2993_v46 = vmul.f32 %v3739_v12, %v2991_v43  ;;  %3744 = vpow2.f32 %v3516_v21  ;;  %v3741_v52 = vpop.eup %3740  ;;  %vm2998_vm14 = vweird.f32 %v3739_v12 }
 0x67f   :  { %v10447_v60 = vadd.f32 1.0, %v3741_v52  ;;  %3746 = vtanh.f32 %v2946_v63  ;;  %vm10451_vm0 = vmor %vm2997_vm15, %vm2998_vm14  ;;  %v3023_v22 = vor.u32 1.1754944e-38, %v3022_v3  ;;  %vm3021_vm5 = vcmp.eq.f32.partialorder %v3020_v9, 8.507059e+37 }
 0x680   :  { %v2994_v23 = vsub.f32 1.0, %v2993_v46  ;;  %3748 = vpow2.f32 %v3519_v4  ;;  %v12052_v46 = vld [vmem:[#allocation115_spill] sm:$0xff] }
 0x681   :  { %v216_v29 = vadd.f32 %v12052_v46, %v5693_v2  ;;  %vm3163_vm11 = vweird.f32 %v10447_v60 }
 0x682   :  { %v2995_v19 = vmul.f32 %v3739_v12, %v2994_v23 }
 0x683   :  { %v3743_v51 = vpop.eup %3742 }
 0x684   :  { %v3745_v1 = vpop.eup %3744  ;;  %v3012_v32 = vmul.f32 %v3743_v51, %v3010_v25  ;;  %v2996_v38 = vadd.f32 %v3739_v12, %v2995_v19  ;;  %vm3017_vm1 = vweird.f32 %v3743_v51 }
 0x685   :  { %v3030_v55 = vadd.f32 1.0, %v3745_v1  ;;  %v3747_v18 = vpop.eup %3746  ;;  %vm3018_vm4 = vmor %vm3016_vm2, %vm3017_vm1 }
 0x686   :  { %v3013_v34 = vsub.f32 1.0, %v3012_v32  ;;  %v3000_v30 = vsel %vm10451_vm0, %v3739_v12, %v2996_v38  ;;  %v3749_v35 = vpop.eup %3748  ;;  %v3167_v38 = vand.u32 2147483647, %v10447_v60 }
 0x687   :  { %3750 = vrcp.f32 %v3030_v55  ;;  %v3005_v11 = vsel %vm3002_vm3, %v3004_v47, %v3000_v30  ;;  %v10462_v31 = vadd.f32 1.0, %v3749_v35  ;;  %v3042_v24 = vand.u32 2147483648, %v3030_v55 }
 0x688   :  { %v3014_v40 = vmul.f32 %v3743_v51, %v3013_v34  ;;  %3752 = vrcp.f32 %v10447_v60  ;;  %v3068_v26 = vpop.f32.mrf.mxu0  ;;  %v3047_v61 = vmul.f32 %v3747_v18, %v3005_v11  ;;  %v3040_v7 = vand.u32 2147483647, %v3030_v55 }
 0x689   :  { %v3131_v10 = vadd.f32 %v3068_v26, %v134_v56  ;;  %vm3036_vm7 = vweird.f32 %v3030_v55  ;;  %v3043_v37 = vor.u32 1.1754944e-38, %v3042_v24  ;;  %vm3168_vm15 = vcmp.eq.f32.partialorder %v3167_v38, 8.507059e+37 }
 0x68a   :  { %v3015_v15 = vadd.f32 %v3743_v51, %v3014_v40  ;;  %vm3041_vm9 = vcmp.eq.f32.partialorder %v3040_v7, 8.507059e+37  ;;  %v3189_v18 = vand.u32 2147483648, %v10462_v31  ;;  %vm3183_vm3 = vweird.f32 %v10462_v31 }
 0x68b   :  { %v3517_v41 = vmul.f32 -1.442695, %v3131_v10 }
 0x68c   :  { %v3019_v20 = vsel %vm3018_vm4, %v3743_v51, %v3015_v15  ;;  %v3169_v51 = vand.u32 2147483648, %v10447_v60  ;;  %v3190_v35 = vor.u32 1.1754944e-38, %v3189_v18 }
 0x68d   :  { %v3751_v44 = vpop.eup %3750  ;;  %v3024_v45 = vsel %vm3021_vm5, %v3023_v22, %v3019_v20  ;;  %3754 = vpow2.f32 %v3517_v41  ;;  %v3187_v22 = vand.u32 2147483647, %v10462_v31 }
 0x68e   :  { %v3753_v36 = vpop.eup %3752  ;;  %v3046_v27 = vmul.f32 %v3024_v45, %v10135_v8  ;;  %v3032_v6 = vmul.f32 %v3751_v44, %v3030_v55  ;;  %vm3037_vm6 = vweird.f32 %v3751_v44  ;;  %v3170_v42 = vor.u32 1.1754944e-38, %v3169_v51 }
 0x68f   :  { %v3159_v43 = vmul.f32 %v3753_v36, %v10447_v60  ;;  %vm3038_vm8 = vmor %vm3036_vm7, %vm3037_vm6  ;;  %v3108_v57 = vpop.f32.mrf.mxu2  ;;  %vm3164_vm10 = vweird.f32 %v3753_v36  ;;  %vm3188_vm5 = vcmp.eq.f32.partialorder %v3187_v22, 8.507059e+37 }
 0x690   :  { %v10459_v39 = vadd.f32 %v3047_v61, %v3046_v27  ;;  %v3033_v0 = vsub.f32 1.0, %v3032_v6  ;;  %v3133_v63 = vadd.f32 %v3108_v57, %v216_v29  ;;  %vm10472_vm12 = vmor %vm3163_vm11, %vm3164_vm10 }
 0x691   :  { %v3160_v25 = vsub.f32 1.0, %v3159_v43 }
 0x692   :  { %3756 = vtanh.f32 %v10459_v39  ;;  %v3034_v5 = vmul.f32 %v3751_v44, %v3033_v0 }
 0x693   :  { %v3755_v17 = vpop.eup %3754  ;;  %3758 = vrcp.f32 %v10462_v31  ;;  %v3161_v12 = vmul.f32 %v3753_v36, %v3160_v25 }
 0x694   :  { %v3035_v49 = vadd.f32 %v3751_v44, %v3034_v5  ;;  %v3138_v8 = vadd.f32 1.0, %v3755_v17 }
 0x695   :  { %v3162_v4 = vadd.f32 %v3753_v36, %v3161_v12 }
 0x696   :  { %v3039_v59 = vsel %vm3038_vm8, %v3751_v44, %v3035_v49  ;;  %3760 = vrcp.f32 %v3138_v8  ;;  %v3150_v2 = vand.u32 2147483648, %v3138_v8  ;;  %v3148_v34 = vand.u32 2147483647, %v3138_v8 }
 0x697   :  { %v3044_v16 = vsel %vm3041_vm9, %v3043_v37, %v3039_v59  ;;  %3762 = vtanh.f32 %v3133_v63  ;;  %v3166_v54 = vsel %vm10472_vm12, %v3753_v36, %v3162_v4  ;;  %vm3144_vm14 = vweird.f32 %v3138_v8 }
 0x698   :  { %v3757_v58 = vpop.eup %3756  ;;  %v3151_v60 = vor.u32 1.1754944e-38, %v3150_v2  ;;  %v3171_v3 = vsel %vm3168_vm15, %v3170_v42, %v3166_v54  ;;  %vm3149_vm1 = vcmp.eq.f32.partialorder %v3148_v34, 8.507059e+37 }
 0x699   :  { %v3050_v21 = vmul.f32 %v3757_v58, %v3044_v16  ;;  %v3759_v23 = vpop.eup %3758  ;;  %v3193_v26 = vmul.f32 %v3171_v3, %v10178_v14 }
 0x69a   :  { %v3179_v1 = vmul.f32 %v3759_v23, %v10462_v31  ;;  %vm3184_vm2 = vweird.f32 %v3759_v23 }
 0x69b   :  { %3234 = vmatmul.f32.vlgmr.msrb.gmra.mxu1 %v3050_v21  ;;  %3274 = vmatmul.f32.vlgmr.msrb.gmra.mxu3 %v3050_v21  ;;  %vm3185_vm4 = vmor %vm3183_vm3, %vm3184_vm2  ;;  %vm3433_vm2 = vcmask 7168  }
 0x69c   :  { %v3761_v52 = vpop.eup %3760  ;;  %v3180_v48 = vsub.f32 1.0, %v3179_v1 }
 0x69d   :  { %v3140_v19 = vmul.f32 %v3761_v52, %v3138_v8  ;;  %vm3145_vm13 = vweird.f32 %v3761_v52  ;;  %v3763_v9 = vpop.eup %3762 }
 0x69e   :  { %vm3146_vm0 = vmor %vm3144_vm14, %vm3145_vm13  ;;  %v3181_v40 = vmul.f32 %v3759_v23, %v3180_v48 }
 0x69f   :  { %v3141_v32 = vsub.f32 1.0, %v3140_v19 }
 0x6a0   :  { %v3182_v10 = vadd.f32 %v3759_v23, %v3181_v40 }
 0x6a1   :  { %v3142_v55 = vmul.f32 %v3761_v52, %v3141_v32 }
 0x6a2   :  { %v3186_v11 = vsel %vm3185_vm4, %v3759_v23, %v3182_v10 }
 0x6a3   :  { %3314 = vmatmul.f32.vlgmr.msra.gmra.mxu1 %v3050_v21  ;;  %3354 = vmatmul.f32.vlgmr.msra.gmra.mxu3 %v3050_v21  ;;  %v3143_v56 = vadd.f32 %v3761_v52, %v3142_v55  ;;  %v3191_v41 = vsel %vm3188_vm5, %v3190_v35, %v3186_v11  ;;  %v3524_v35 = vld [vmem:[%s10502_s6] ss:$0 sm:$0xff] }
 0x6a5   :  { %v3147_v33 = vsel %vm3146_vm0, %v3761_v52, %v3143_v56 }
 0x6a6   :  { %v3152_v30 = vsel %vm3149_vm1, %v3151_v60, %v3147_v33 }
 0x6a7   :  { %v3194_v47 = vmul.f32 %v3763_v9, %v3152_v30 }
 0x6a9   :  { %v3195_v15 = vadd.f32 %v3194_v47, %v3193_v26 }
 0x6ab   :  { %3764 = vtanh.f32 %v3195_v15 }
 0x6b1   :  { %v3765_v20 = vpop.eup %3764 }
 0x6b2   :  { %v3197_v44 = vmul.f32 %v3765_v20, %v3191_v41 }
 0x6b4   :  { %3214 = vmatmul.f32.vlgmr.msrb.gmra.mxu0 %v3197_v44  ;;  %3254 = vmatmul.f32.vlgmr.msrb.gmra.mxu2 %v3197_v44 }
 0x6bc   :  { %3294 = vmatmul.f32.vlgmr.msra.gmra.mxu0 %v3197_v44  ;;  %3334 = vmatmul.f32.vlgmr.msra.gmra.mxu2 %v3197_v44 }
 0x718   :  { %v3235_v36 = vpop.f32.mrf.mxu1 }
 0x71e   :  { %v3275_v6 = vpop.f32.mrf.mxu3 }
 0x720   :  { %v3315_v46 = vpop.f32.mrf.mxu1 }
 0x726   :  { %v3355_v8 = vpop.f32.mrf.mxu3 }
 0x731   :  { %v3215_v14 = vpop.f32.mrf.mxu0 }
 0x732   :  { %v3216_v45 = vadd.f32 %v3215_v14, %v12040_v28 }
 0x734   :  { %v3236_v27 = vadd.f32 %v3235_v36, %v3216_v45 }
 0x736   :  { %v3520_v61 = vmul.f32 -1.442695, %v3236_v27 }
 0x737   :  { %v3255_v0 = vpop.f32.mrf.mxu2 }
 0x738   :  { %3766 = vpow2.f32 %v3520_v61  ;;  %v3256_v43 = vadd.f32 %v3255_v0, %v12041_v50  ;;  %v13_v50 = vstv %s10503_s7 }
 0x739   :  { %v3295_v58 = vpop.f32.mrf.mxu0  ;;  %14 = vst [vmem:[#allocation2] sm:$0x1] %v13_v50 }
 0x73a   :  { %v3276_v31 = vadd.f32 %v3275_v6, %v3256_v43  ;;  %v3296_v12 = vadd.f32 %v3295_v58, %v12047_v53 }
 0x73c   :  { %v3521_v5 = vmul.f32 -1.442695, %v3276_v31  ;;  %v3316_v52 = vadd.f32 %v3315_v46, %v3296_v12 }
 0x73e   :  { %v3767_v24 = vpop.eup %3766  ;;  %3768 = vpow2.f32 %v3521_v5 }
 0x73f   :  { %v3361_v7 = vadd.f32 1.0, %v3767_v24  ;;  %v3335_v17 = vpop.f32.mrf.mxu2 }
 0x740   :  { %v3336_v49 = vadd.f32 %v3335_v17, %v12044_v62  ;;  %v3525_v14 = vld [vmem:[#allocation2] ss:$0 sm:$0xff] }
 0x741   :  { %3770 = vrcp.f32 %v3361_v7  ;;  %v3373_v51 = vand.u32 2147483648, %v3361_v7  ;;  %vm3367_vm7 = vweird.f32 %v3361_v7  ;;  %v3371_v32 = vand.u32 2147483647, %v3361_v7 }
 0x742   :  { %v3356_v25 = vadd.f32 %v3355_v8, %v3336_v49 }
 0x743   :  { %v3374_v55 = vor.u32 1.1754944e-38, %v3373_v51  ;;  %vm3372_vm11 = vcmp.eq.f32.partialorder %v3371_v32, 8.507059e+37 }
 0x744   :  { %v3769_v28 = vpop.eup %3768  ;;  %v3522_v59 = vmul.f32 -1.442695, %v3356_v25 }
 0x745   :  { %v3380_v37 = vadd.f32 1.0, %v3769_v28 }
 0x746   :  { %3772 = vpow2.f32 %v3522_v59 }
 0x747   :  { %v3771_v16 = vpop.eup %3770  ;;  %3774 = vrcp.f32 %v3380_v37  ;;  %v3392_v38 = vand.u32 2147483648, %v3380_v37  ;;  %v3390_v2 = vand.u32 2147483647, %v3380_v37  ;;  %vm3386_vm10 = vweird.f32 %v3380_v37 }
 0x748   :  { %v3363_v21 = vmul.f32 %v3771_v16, %v3361_v7  ;;  %vm3368_vm6 = vweird.f32 %v3771_v16 }
 0x749   :  { %vm3369_vm8 = vmor %vm3367_vm7, %vm3368_vm6  ;;  %v3393_v48 = vor.u32 1.1754944e-38, %v3392_v38  ;;  %vm3391_vm13 = vcmp.eq.f32.partialorder %v3390_v2, 8.507059e+37 }
 0x74a   :  { %v3364_v57 = vsub.f32 1.0, %v3363_v21 }
 0x74c   :  { %v3773_v62 = vpop.eup %3772  ;;  %v3365_v29 = vmul.f32 %v3771_v16, %v3364_v57 }
 0x74d   :  { %v3775_v23 = vpop.eup %3774  ;;  %v3400_v63 = vadd.f32 1.0, %v3773_v62 }
 0x74e   :  { %v3382_v19 = vmul.f32 %v3775_v23, %v3380_v37  ;;  %v3366_v4 = vadd.f32 %v3771_v16, %v3365_v29  ;;  %vm3387_vm9 = vweird.f32 %v3775_v23 }
 0x74f   :  { %3776 = vrcp.f32 %v3400_v63  ;;  %vm3388_vm12 = vmor %vm3386_vm10, %vm3387_vm9  ;;  %v3412_v10 = vand.u32 2147483648, %v3400_v63  ;;  %vm3406_vm15 = vweird.f32 %v3400_v63  ;;  %v3410_v18 = vand.u32 2147483647, %v3400_v63 }
 0x750   :  { %v3383_v1 = vsub.f32 1.0, %v3382_v19  ;;  %3778 = vtanh.f32 %v3316_v52  ;;  %v3370_v13 = vsel %vm3369_vm8, %v3771_v16, %v3366_v4 }
 0x751   :  { %v3375_v42 = vsel %vm3372_vm11, %v3374_v55, %v3370_v13  ;;  %v3413_v11 = vor.u32 1.1754944e-38, %v3412_v10  ;;  %vm3411_vm1 = vcmp.eq.f32.partialorder %v3410_v18, 8.507059e+37 }
 0x752   :  { %v3384_v53 = vmul.f32 %v3775_v23, %v3383_v1 }
 0x754   :  { %v3385_v34 = vadd.f32 %v3775_v23, %v3384_v53 }
 0x755   :  { %v3777_v54 = vpop.eup %3776 }
 0x756   :  { %v3389_v56 = vsel %vm3388_vm12, %v3775_v23, %v3385_v34  ;;  %v3402_v60 = vmul.f32 %v3777_v54, %v3400_v63  ;;  %v3779_v3 = vpop.eup %3778  ;;  %vm3407_vm14 = vweird.f32 %v3777_v54 }
 0x757   :  { %v3394_v33 = vsel %vm3391_vm13, %v3393_v48, %v3389_v56  ;;  %v3417_v9 = vmul.f32 %v3779_v3, %v3375_v42  ;;  %vm3408_vm0 = vmor %vm3406_vm15, %vm3407_vm14 }
 0x758   :  { %v3403_v40 = vsub.f32 1.0, %v3402_v60  ;;  %v3416_v30 = vmul.f32 %v3394_v33, %v10459_v39 }
 0x75a   :  { %v3404_v26 = vmul.f32 %v3777_v54, %v3403_v40  ;;  %v3418_v47 = vadd.f32 %v3417_v9, %v3416_v30 }
 0x75c   :  { %v3405_v15 = vadd.f32 %v3777_v54, %v3404_v26  ;;  %3780 = vtanh.f32 %v3418_v47 }
 0x75e   :  { %v3409_v22 = vsel %vm3408_vm0, %v3777_v54, %v3405_v15 }
 0x75f   :  { %v3414_v41 = vsel %vm3411_vm1, %v3413_v11, %v3409_v22 }
 0x762   :  { %v3781_v20 = vpop.eup %3780 }
 0x763   :  { %v3420_v44 = vmul.f32 %v3781_v20, %v3414_v41 }
 0x765   :  { %v3425_v39 = vmul.f32 %v3524_v35, %v3420_v44 }
 0x767   :  { %3426 = vadd.xlane.f32.xlu0 %v3425_v39 }
 0x7da   :  { %v3427_v45 = vpop.xlane.xlu0 %3426 }
 0x7db   :  { %v3432_v36 = vadd.f32 %v3525_v14, %v3427_v45 }
 0x7dd   :  { %3434 = vst.msk [vmem:[%s10504_s8] sm:$0xff] %vm3433_vm2, %v3432_v36 }

</bundles_post_ra>
